<compile_context>
chip_gen: v7x
topology: tpu7x:2x2x1
jax: 0.10.0
libtpu: 0.0.40
codegen_flags: <defaults>
</compile_context>

<pallas_src>
import jax
import jax.numpy as jnp
from jax import lax
from jax.experimental import pallas as pl
from jax.experimental.pallas import tpu as pltpu

D_MODEL = 64
NHEAD = 4
HEAD_DIM = D_MODEL // NHEAD
DFF = 2048          # PyTorch TransformerEncoderLayer default dim_feedforward
NUM_LAYERS = 2
LN_EPS = 1e-5
FF_CHUNK = 512      # DFF chunk size (bounds live ranges of the hidden activation)


def _layer_norm(x, w, b):
    mu = jnp.mean(x, axis=-1, keepdims=True)
    var = jnp.mean(jnp.square(x - mu), axis=-1, keepdims=True)
    return (x - mu) * lax.rsqrt(var + LN_EPS) * w + b


# --------------------------- Fused forward kernel (grid over layers) ---------------------------
def _make_fused_kernel(S, B, input_size):
    def kernel(src_ref, emb_w_ref, emb_b_ref,
               w_qkv_ref, w_out_ref, vecs_ref,
               w_ff1_ref, b_ff1_ref, w_ff2_ref,
               fc_w_ref, fc_b_ref, o_ref, x_scr):
        l = pl.program_id(0)

        # ---- embedding (first grid step only); K == 1 -> VPU broadcast mul-add ----
        @pl.when(l == 0)
        def _():
            src = src_ref[...]                                   # (S, B, I) f32
            if input_size == 1:
                x0 = src * emb_w_ref[...] + emb_b_ref[...]       # (S,B,1)*(1,D)+(1,D)
            else:
                x0 = (jnp.einsum("sbi,id->sbd", src, emb_w_ref[...],
                                 preferred_element_type=jnp.float32)
                      + emb_b_ref[...])
            x_scr[...] = x0

        x = x_scr[...]                                           # (S, B, D) f32

        vecs = vecs_ref[0]                                       # (9, D) f32
        bq, bk, bv = vecs[0:1], vecs[1:2], vecs[2:3]
        out_b = vecs[3:4]
        ln1_w, ln1_b = vecs[4:5], vecs[5:6]
        ff2_b = vecs[6:7]
        ln2_w, ln2_b = vecs[7:8], vecs[8:9]

        # ---- multi-head self-attention (post-norm, dropout = identity) ----
        # Single lane-dense QKV projection (q columns pre-scaled by 1/sqrt(head_dim)).
        x_bf = x.astype(jnp.bfloat16)
        qkv = jnp.einsum("sbd,de->sbe", x_bf, w_qkv_ref[0],
                         preferred_element_type=jnp.float32)     # (S, B, 3D) f32
        q = qkv[..., 0:D_MODEL] + bq
        k = qkv[..., D_MODEL:2 * D_MODEL] + bk
        v = qkv[..., 2 * D_MODEL:3 * D_MODEL] + bv

        ctx_heads = []
        for n in range(NHEAD):                                   # static unroll
            h0 = n * HEAD_DIM
            qh = q[..., h0:h0 + HEAD_DIM]                        # (S,B,HD) static slices
            kh = k[..., h0:h0 + HEAD_DIM]
            vh = v[..., h0:h0 + HEAD_DIM]
            s = jnp.einsum("sbh,tbh->bst", qh, kh,
                           preferred_element_type=jnp.float32)   # (B,S,S) f32
            s = s - jnp.max(s, axis=-1, keepdims=True)
            p = jnp.exp(s)
            p = p * pl.reciprocal(jnp.sum(p, axis=-1, keepdims=True), approx=True)
            ctx_heads.append(jnp.einsum("bst,tbh->sbh", p, vh,
                                        preferred_element_type=jnp.float32))
        ctx = jnp.concatenate(ctx_heads, axis=-1)                # (S, B, D)

        attn = (jnp.einsum("sbd,de->sbe", ctx.astype(jnp.bfloat16), w_out_ref[0],
                           preferred_element_type=jnp.float32)
                + out_b)

        x1 = _layer_norm(x + attn, ln1_w, ln1_b)                 # (S, B, D) f32

        # ---- feed-forward (chunked over DFF), relu in f32, matmul operands bf16 ----
        def ff(xin):
            xin_bf = xin.astype(jnp.bfloat16)
            acc = jnp.zeros(xin.shape, jnp.float32)
            for c in range(DFF // FF_CHUNK):                     # static unroll
                c0 = c * FF_CHUNK
                w1c = w_ff1_ref[0, :, c0:c0 + FF_CHUNK]          # (D, C) bf16
                b1c = b_ff1_ref[0, :, c0:c0 + FF_CHUNK]          # (1, C) f32
                w2c = w_ff2_ref[0, c0:c0 + FF_CHUNK, :]          # (C, D) bf16
                h = (jnp.einsum("sbd,dc->sbc", xin_bf, w1c,
                                preferred_element_type=jnp.float32) + b1c)
                h = jnp.maximum(h, 0.0).astype(jnp.bfloat16)
                acc = acc + jnp.einsum("sbc,cd->sbd", h, w2c,
                                       preferred_element_type=jnp.float32)
            return acc + ff2_b

        @pl.when(l < NUM_LAYERS - 1)
        def _():
            x_scr[...] = _layer_norm(x1 + ff(x1), ln2_w, ln2_b)

        @pl.when(l == NUM_LAYERS - 1)
        def _():
            # Only output[-1] feeds fc_out -> final layer's FF/LN2 on the last step only.
            last = x1[S - 1:S]                                   # (1, B, D)
            y = _layer_norm(last + ff(last), ln2_w, ln2_b)       # (1, B, D)
            o_ref[...] = (jnp.dot(y[0], fc_w_ref[...],
                                  preferred_element_type=jnp.float32)
                          + fc_b_ref[...])                       # (B, 1)
    return kernel


# --------------------------- Host-side weight packing ---------------------------
def pack_params(params):
    """Pre-transpose / merge / stack all weights once on the host (bf16 matmul weights)."""
    d = D_MODEL
    scale = 1.0 / (HEAD_DIM ** 0.5)

    w_qkv, w_out, vecs, w_ff1, b_ff1, w_ff2 = [], [], [], [], [], []
    for p in params["layers"]:
        in_wT = p["in_w"].T                         # (D, 3D), columns = q | k | v
        in_b = p["in_b"]
        wq = in_wT[:, :d] * scale                   # fold 1/sqrt(head_dim) into q
        w_qkv.append(jnp.concatenate([wq, in_wT[:, d:]], axis=1))        # (D, 3D)
        bq = in_b[:d] * scale
        bk = in_b[d:2 * d]
        bv = in_b[2 * d:]
        vecs.append(jnp.stack([bq, bk, bv, p["out_b"], p["ln1_w"], p["ln1_b"],
                               p["ff2_b"], p["ln2_w"], p["ln2_b"]]))      # (9, D)
        w_out.append(p["out_w"].T)                  # (D, D)
        w_ff1.append(p["ff1_w"].T)                  # (D, DFF)
        b_ff1.append(p["ff1_b"].reshape(1, DFF))
        w_ff2.append(p["ff2_w"].T)                  # (DFF, D)

    return dict(
        w_qkv=jnp.stack(w_qkv).astype(jnp.bfloat16),    # (L, D, 3D)    bf16
        w_out=jnp.stack(w_out).astype(jnp.bfloat16),    # (L, D, D)     bf16
        vecs=jnp.stack(vecs).astype(jnp.float32),       # (L, 9, D)     f32
        w_ff1=jnp.stack(w_ff1).astype(jnp.bfloat16),    # (L, D, DFF)   bf16
        b_ff1=jnp.stack(b_ff1).astype(jnp.float32),     # (L, 1, DFF)   f32
        w_ff2=jnp.stack(w_ff2).astype(jnp.bfloat16),    # (L, DFF, D)   bf16
        emb_w=params["emb_w"].T,                        # (I, D)        f32
        emb_b=params["emb_b"].reshape(1, -1),           # (1, D)        f32
        fc_w=params["fc_w"].T,                          # (D, 1)        f32
        fc_b=params["fc_b"].reshape(1, -1),             # (1, 1)        f32
    )


# --------------------------- Full forward pass (one pallas_call, grid over layers) ---------------------------
def transformer_forward(src, packed):
    S, B, I = src.shape
    in_specs = [
        pl.BlockSpec((S, B, I), lambda l: (0, 0, 0)),                      # src
        pl.BlockSpec((I, D_MODEL), lambda l: (0, 0)),                      # emb_w
        pl.BlockSpec((1, D_MODEL), lambda l: (0, 0)),                      # emb_b
        pl.BlockSpec((1, D_MODEL, 3 * D_MODEL), lambda l: (l, 0, 0)),      # w_qkv (per layer)
        pl.BlockSpec((1, D_MODEL, D_MODEL), lambda l: (l, 0, 0)),          # w_out
        pl.BlockSpec((1, 9, D_MODEL), lambda l: (l, 0, 0)),                # vecs
        pl.BlockSpec((1, D_MODEL, DFF), lambda l: (l, 0, 0)),              # w_ff1
        pl.BlockSpec((1, 1, DFF), lambda l: (l, 0, 0)),                    # b_ff1
        pl.BlockSpec((1, DFF, D_MODEL), lambda l: (l, 0, 0)),              # w_ff2
        pl.BlockSpec((D_MODEL, 1), lambda l: (0, 0)),                      # fc_w
        pl.BlockSpec((1, 1), lambda l: (0, 0)),                            # fc_b
    ]
    args = (src, packed["emb_w"], packed["emb_b"],
            packed["w_qkv"], packed["w_out"], packed["vecs"],
            packed["w_ff1"], packed["b_ff1"], packed["w_ff2"],
            packed["fc_w"], packed["fc_b"])
    return pl.pallas_call(
        _make_fused_kernel(S, B, I),
        out_shape=jax.ShapeDtypeStruct((B, 1), jnp.float32),
        grid=(NUM_LAYERS,),
        in_specs=in_specs,
        out_specs=pl.BlockSpec((B, 1), lambda l: (0, 0)),
        scratch_shapes=[pltpu.VMEM((S, B, D_MODEL), jnp.float32)],         # x carried across layers
        compiler_params=pltpu.CompilerParams(dimension_semantics=("arbitrary",)),
    )(*args)


# --------------------------- Deterministic parameter init (PyTorch layout) ---------------------------
def init_params(key, input_size=1):
    keys = jax.random.split(key, 4 + NUM_LAYERS)

    def dense(k, shape, scale=0.05):
        return jax.random.normal(k, shape, jnp.float32) * scale

    params = {
        "emb_w": dense(keys[0], (D_MODEL, input_size)),
        "emb_b": dense(keys[1], (D_MODEL,)),
        "fc_w": dense(keys[2], (1, D_MODEL)),
        "fc_b": dense(keys[3], (1,)),
        "layers": [],
    }
    for i in range(NUM_LAYERS):
        lk = jax.random.split(keys[4 + i], 8)
        params["layers"].append({
            "in_w": dense(lk[0], (3 * D_MODEL, D_MODEL)),
            "in_b": dense(lk[1], (3 * D_MODEL,)),
            "out_w": dense(lk[2], (D_MODEL, D_MODEL)),
            "out_b": dense(lk[3], (D_MODEL,)),
            "ln1_w": jnp.ones((D_MODEL,), jnp.float32),
            "ln1_b": jnp.zeros((D_MODEL,), jnp.float32),
            "ff1_w": dense(lk[4], (DFF, D_MODEL)),
            "ff1_b": dense(lk[5], (DFF,)),
            "ff2_w": dense(lk[6], (D_MODEL, DFF)),
            "ff2_b": dense(lk[7], (D_MODEL,)),
            "ln2_w": jnp.ones((D_MODEL,), jnp.float32),
            "ln2_b": jnp.zeros((D_MODEL,), jnp.float32),
        })
    return params


# --------------------------- Pure-JAX f32 reference (PyTorch semantics) ---------------------------
def _ln_ref(x, w, b):
    mu = jnp.mean(x, axis=-1, keepdims=True)
    var = jnp.mean(jnp.square(x - mu), axis=-1, keepdims=True)
    return (x - mu) * lax.rsqrt(var + LN_EPS) * w + b


def reference_forward(src, params):
    def linear(x, w, b):
        return x @ w.T + b

    S, B, _ = src.shape
    x = linear(src, params["emb_w"], params["emb_b"])
    for p in params["layers"]:
        qkv = linear(x, p["in_w"], p["in_b"])
        q, k, v = jnp.split(qkv, 3, axis=-1)
        q = q * (1.0 / jnp.sqrt(jnp.float32(HEAD_DIM)))
        qh = q.reshape(S, B, NHEAD, HEAD_DIM)
        kh = k.reshape(S, B, NHEAD, HEAD_DIM)
        vh = v.reshape(S, B, NHEAD, HEAD_DIM)
        scores = jnp.einsum("sbnh,tbnh->bnst", qh, kh)
        pattn = jax.nn.softmax(scores, axis=-1)
        ctx = jnp.einsum("bnst,tbnh->sbnh", pattn, vh).reshape(S, B, D_MODEL)
        attn = linear(ctx, p["out_w"], p["out_b"])
        x = _ln_ref(x + attn, p["ln1_w"], p["ln1_b"])
        h = jnp.maximum(linear(x, p["ff1_w"], p["ff1_b"]), 0.0)
        x = _ln_ref(x + linear(h, p["ff2_w"], p["ff2_b"]), p["ln2_w"], p["ln2_b"])
    return linear(x[-1], params["fc_w"], params["fc_b"])


if __name__ == "__main__":
    key = jax.random.PRNGKey(0)
    pkey, xkey = jax.random.split(key)
    params = init_params(pkey, input_size=1)

    S, B, I = 8, 2, 1
    src = jax.random.normal(xkey, (S, B, I), jnp.float32)

    packed = pack_params(params)                 # one-time host-side weight prep (bf16 matmul weights)
    fwd = jax.jit(transformer_forward)

    out = jax.block_until_ready(fwd(src, packed))
    ref = jax.block_until_ready(reference_forward(src, params))

    assert out.shape == (B, 1), out.shape
    # bf16 weight storage on the FF/attention matmul path -> tolerance loosened vs f32 reference.
    if not bool(jnp.allclose(out, ref, atol=5e-2, rtol=5e-2)):
        diff = jnp.max(jnp.abs(out - ref))
        raise AssertionError(f"mismatch: max|diff|={diff} pallas={out} ref={ref}")
    print("KERNEL_OK")
</pallas_src>

<mosaic_0001>
module attributes {stable_mosaic.version = 11 : i64} {
  func.func @kernel(%arg0: i32, %arg1: memref<8x2x1xf32, #tpu.memory_space<vmem>>, %arg2: memref<1x64xf32, #tpu.memory_space<vmem>>, %arg3: memref<1x64xf32, #tpu.memory_space<vmem>>, %arg4: memref<1x64x192xbf16, #tpu.memory_space<vmem>>, %arg5: memref<1x64x64xbf16, #tpu.memory_space<vmem>>, %arg6: memref<1x9x64xf32, #tpu.memory_space<vmem>>, %arg7: memref<1x64x2048xbf16, #tpu.memory_space<vmem>>, %arg8: memref<1x1x2048xf32, #tpu.memory_space<vmem>>, %arg9: memref<1x2048x64xbf16, #tpu.memory_space<vmem>>, %arg10: memref<64x1xf32, #tpu.memory_space<vmem>>, %arg11: memref<1x1xf32, #tpu.memory_space<vmem>>, %arg12: memref<2x1xf32, #tpu.memory_space<vmem>>, %arg13: memref<8x2x64xf32, #tpu.memory_space<vmem>>) attributes {dimension_semantics = [#tpu.dimension_semantics<arbitrary>], iteration_bounds = array<i64: 2>, scalar_prefetch = 0 : i64, scratch_operands = 1 : i64, tpu.core_type = #tpu.core_type<tc>, window_params = [{pipeline_mode = #tpu.pipeline_mode<synchronous>, transform_indices = @transform_0, window_bounds = array<i64: 8, 2, 1>}, {pipeline_mode = #tpu.pipeline_mode<synchronous>, transform_indices = @transform_1, window_bounds = array<i64: 1, 64>}, {pipeline_mode = #tpu.pipeline_mode<synchronous>, transform_indices = @transform_2, window_bounds = array<i64: 1, 64>}, {transform_indices = @transform_3, window_bounds = array<i64: 1, 64, 192>}, {transform_indices = @transform_4, window_bounds = array<i64: 1, 64, 64>}, {transform_indices = @transform_5, window_bounds = array<i64: 1, 9, 64>}, {transform_indices = @transform_6, window_bounds = array<i64: 1, 64, 2048>}, {transform_indices = @transform_7, window_bounds = array<i64: 1, 1, 2048>}, {transform_indices = @transform_8, window_bounds = array<i64: 1, 2048, 64>}, {pipeline_mode = #tpu.pipeline_mode<synchronous>, transform_indices = @transform_9, window_bounds = array<i64: 64, 1>}, {pipeline_mode = #tpu.pipeline_mode<synchronous>, transform_indices = @transform_10, window_bounds = array<i64: 1, 1>}, {pipeline_mode = #tpu.pipeline_mode<synchronous>, transform_indices = @transform_11, window_bounds = array<i64: 2, 1>}]} {
    %c0_i32 = arith.constant 0 : i32
    %0 = arith.cmpi eq, %arg0, %c0_i32 : i32
    %1 = arith.extui %0 : i1 to i32
    %c0_i32_0 = arith.constant 0 : i32
    %2 = arith.cmpi ne, %1, %c0_i32_0 : i32
    scf.if %2 {
      %c0_37 = arith.constant 0 : index
      %c0_38 = arith.constant 0 : index
      %c0_39 = arith.constant 0 : index
      %134 = vector.load %arg1[%c0_37, %c0_38, %c0_39] : memref<8x2x1xf32, #tpu.memory_space<vmem>>, vector<8x2x1xf32>
      %c0_40 = arith.constant 0 : index
      %c0_41 = arith.constant 0 : index
      %135 = vector.load %arg2[%c0_40, %c0_41] : memref<1x64xf32, #tpu.memory_space<vmem>>, vector<1x64xf32>
      %136 = vector.shape_cast %135 : vector<1x64xf32> to vector<1x1x64xf32>
      %137 = vector.broadcast %134 : vector<8x2x1xf32> to vector<8x2x64xf32>
      %138 = vector.broadcast %136 : vector<1x1x64xf32> to vector<8x2x64xf32>
      %139 = arith.mulf %137, %138 : vector<8x2x64xf32>
      %c0_42 = arith.constant 0 : index
      %c0_43 = arith.constant 0 : index
      %140 = vector.load %arg3[%c0_42, %c0_43] : memref<1x64xf32, #tpu.memory_space<vmem>>, vector<1x64xf32>
      %141 = vector.shape_cast %140 : vector<1x64xf32> to vector<1x1x64xf32>
      %142 = vector.broadcast %141 : vector<1x1x64xf32> to vector<8x2x64xf32>
      %143 = arith.addf %139, %142 : vector<8x2x64xf32>
      %c0_44 = arith.constant 0 : index
      %c0_45 = arith.constant 0 : index
      %c0_46 = arith.constant 0 : index
      %144 = vector.load %arg13[%c0_44, %c0_45, %c0_46] : memref<8x2x64xf32, #tpu.memory_space<vmem>>, vector<8x2x64xf32>
      tpu.vector_store %arg13[%c0_44, %c0_45, %c0_46], %143 {strides = array<i32>} : memref<8x2x64xf32, #tpu.memory_space<vmem>>, vector<8x2x64xf32>,
    } else {
    }
    %c0 = arith.constant 0 : index
    %c0_1 = arith.constant 0 : index
    %c0_2 = arith.constant 0 : index
    %3 = vector.load %arg13[%c0, %c0_1, %c0_2] : memref<8x2x64xf32, #tpu.memory_space<vmem>>, vector<8x2x64xf32>
    %c0_3 = arith.constant 0 : index
    %c0_4 = arith.constant 0 : index
    %c0_5 = arith.constant 0 : index
    %4 = vector.load %arg6[%c0_3, %c0_4, %c0_5] : memref<1x9x64xf32, #tpu.memory_space<vmem>>, vector<1x9x64xf32>
    %5 = vector.shape_cast %4 : vector<1x9x64xf32> to vector<9x64xf32>
    %6 = vector.extract_strided_slice %5 {offsets = [0, 0], sizes = [1, 64], strides = [1, 1]} : vector<9x64xf32> to vector<1x64xf32>
    %7 = vector.extract_strided_slice %5 {offsets = [1, 0], sizes = [1, 64], strides = [1, 1]} : vector<9x64xf32> to vector<1x64xf32>
    %8 = vector.extract_strided_slice %5 {offsets = [2, 0], sizes = [1, 64], strides = [1, 1]} : vector<9x64xf32> to vector<1x64xf32>
    %9 = vector.extract_strided_slice %5 {offsets = [3, 0], sizes = [1, 64], strides = [1, 1]} : vector<9x64xf32> to vector<1x64xf32>
    %10 = vector.extract_strided_slice %5 {offsets = [4, 0], sizes = [1, 64], strides = [1, 1]} : vector<9x64xf32> to vector<1x64xf32>
    %11 = vector.extract_strided_slice %5 {offsets = [5, 0], sizes = [1, 64], strides = [1, 1]} : vector<9x64xf32> to vector<1x64xf32>
    %12 = vector.extract_strided_slice %5 {offsets = [6, 0], sizes = [1, 64], strides = [1, 1]} : vector<9x64xf32> to vector<1x64xf32>
    %13 = vector.extract_strided_slice %5 {offsets = [7, 0], sizes = [1, 64], strides = [1, 1]} : vector<9x64xf32> to vector<1x64xf32>
    %14 = vector.extract_strided_slice %5 {offsets = [8, 0], sizes = [1, 64], strides = [1, 1]} : vector<9x64xf32> to vector<1x64xf32>
    %15 = arith.truncf %3 : vector<8x2x64xf32> to vector<8x2x64xbf16>
    %c0_6 = arith.constant 0 : index
    %c0_7 = arith.constant 0 : index
    %c0_8 = arith.constant 0 : index
    %16 = vector.load %arg4[%c0_6, %c0_7, %c0_8] : memref<1x64x192xbf16, #tpu.memory_space<vmem>>, vector<1x64x192xbf16>
    %17 = vector.shape_cast %16 : vector<1x64x192xbf16> to vector<64x192xbf16>
    "tpu.trace_start"() <{level = 10 : i32, message = "sbd,de->sbe"}> : () -> ()
    %cst = arith.constant dense<0.000000e+00> : vector<8x2x192xf32>
    %18 = tpu.matmul %15, %17, %cst {dimension_numbers = #tpu.dot_dimension_numbers<[2], [0], [0, 1], [1], [0, 0, 0, 1, 1, 1], [], []>} : vector<8x2x64xbf16>, vector<64x192xbf16>, vector<8x2x192xf32> -> vector<8x2x192xf32>
    "tpu.trace_stop"() : () -> ()
    %19 = vector.extract_strided_slice %18 {offsets = [0, 0, 0], sizes = [8, 2, 64], strides = [1, 1, 1]} : vector<8x2x192xf32> to vector<8x2x64xf32>
    %20 = vector.shape_cast %6 : vector<1x64xf32> to vector<1x1x64xf32>
    %21 = vector.broadcast %20 : vector<1x1x64xf32> to vector<8x2x64xf32>
    %22 = arith.addf %19, %21 : vector<8x2x64xf32>
    %23 = vector.extract_strided_slice %18 {offsets = [0, 0, 64], sizes = [8, 2, 64], strides = [1, 1, 1]} : vector<8x2x192xf32> to vector<8x2x64xf32>
    %24 = vector.shape_cast %7 : vector<1x64xf32> to vector<1x1x64xf32>
    %25 = vector.broadcast %24 : vector<1x1x64xf32> to vector<8x2x64xf32>
    %26 = arith.addf %23, %25 : vector<8x2x64xf32>
    %27 = vector.extract_strided_slice %18 {offsets = [0, 0, 128], sizes = [8, 2, 64], strides = [1, 1, 1]} : vector<8x2x192xf32> to vector<8x2x64xf32>
    %28 = vector.shape_cast %8 : vector<1x64xf32> to vector<1x1x64xf32>
    %29 = vector.broadcast %28 : vector<1x1x64xf32> to vector<8x2x64xf32>
    %30 = arith.addf %27, %29 : vector<8x2x64xf32>
    %31 = vector.extract_strided_slice %22 {offsets = [0, 0, 0], sizes = [8, 2, 16], strides = [1, 1, 1]} : vector<8x2x64xf32> to vector<8x2x16xf32>
    %32 = vector.extract_strided_slice %26 {offsets = [0, 0, 0], sizes = [8, 2, 16], strides = [1, 1, 1]} : vector<8x2x64xf32> to vector<8x2x16xf32>
    %33 = vector.extract_strided_slice %30 {offsets = [0, 0, 0], sizes = [8, 2, 16], strides = [1, 1, 1]} : vector<8x2x64xf32> to vector<8x2x16xf32>
    "tpu.trace_start"() <{level = 10 : i32, message = "sbh,tbh->bst"}> : () -> ()
    %cst_9 = arith.constant dense<0.000000e+00> : vector<2x8x8xf32>
    %34 = tpu.matmul %31, %32, %cst_9 {dimension_numbers = #tpu.dot_dimension_numbers<[2], [2], [0], [0], [0, 1, 0, 0, 1, 0], [1], [1]>} : vector<8x2x16xf32>, vector<8x2x16xf32>, vector<2x8x8xf32> -> vector<2x8x8xf32>
    "tpu.trace_stop"() : () -> ()
    %cst_10 = arith.constant dense<0xFF800000> : vector<2x8xf32>
    %35 = vector.multi_reduction <maximumf>, %34, %cst_10 [2] : vector<2x8x8xf32> to vector<2x8xf32>
    %36 = vector.shape_cast %35 : vector<2x8xf32> to vector<2x8x1xf32>
    %37 = vector.broadcast %36 : vector<2x8x1xf32> to vector<2x8x8xf32>
    %38 = arith.subf %34, %37 : vector<2x8x8xf32>
    %39 = math.exp %38 : vector<2x8x8xf32>
    %cst_11 = arith.constant dense<0.000000e+00> : vector<2x8xf32>
    %40 = vector.multi_reduction <add>, %39, %cst_11 [2] : vector<2x8x8xf32> to vector<2x8xf32>
    %41 = vector.shape_cast %40 : vector<2x8xf32> to vector<2x8x1xf32>
    %42 = tpu.reciprocal %41 {approx = true} : vector<2x8x1xf32> -> vector<2x8x1xf32>
    %43 = vector.broadcast %42 : vector<2x8x1xf32> to vector<2x8x8xf32>
    %44 = arith.mulf %39, %43 : vector<2x8x8xf32>
    "tpu.trace_start"() <{level = 10 : i32, message = "bst,tbh->sbh"}> : () -> ()
    %cst_12 = arith.constant dense<0.000000e+00> : vector<2x16x8xf32>
    %45 = tpu.matmul %33, %44, %cst_12 {dimension_numbers = #tpu.dot_dimension_numbers<[0], [2], [2], [1], [0, 1, 0, 2, 1, 1], [1], [0]>} : vector<8x2x16xf32>, vector<2x8x8xf32>, vector<2x16x8xf32> -> vector<2x16x8xf32>
    %46 = tpu.transpose %45, [2, 0, 1] : vector<2x16x8xf32> -> vector<8x2x16xf32>
    "tpu.trace_stop"() : () -> ()
    %47 = vector.extract_strided_slice %22 {offsets = [0, 0, 16], sizes = [8, 2, 16], strides = [1, 1, 1]} : vector<8x2x64xf32> to vector<8x2x16xf32>
    %48 = vector.extract_strided_slice %26 {offsets = [0, 0, 16], sizes = [8, 2, 16], strides = [1, 1, 1]} : vector<8x2x64xf32> to vector<8x2x16xf32>
    %49 = vector.extract_strided_slice %30 {offsets = [0, 0, 16], sizes = [8, 2, 16], strides = [1, 1, 1]} : vector<8x2x64xf32> to vector<8x2x16xf32>
    "tpu.trace_start"() <{level = 10 : i32, message = "sbh,tbh->bst"}> : () -> ()
    %cst_13 = arith.constant dense<0.000000e+00> : vector<2x8x8xf32>
    %50 = tpu.matmul %47, %48, %cst_13 {dimension_numbers = #tpu.dot_dimension_numbers<[2], [2], [0], [0], [0, 1, 0, 0, 1, 0], [1], [1]>} : vector<8x2x16xf32>, vector<8x2x16xf32>, vector<2x8x8xf32> -> vector<2x8x8xf32>
    "tpu.trace_stop"() : () -> ()
    %cst_14 = arith.constant dense<0xFF800000> : vector<2x8xf32>
    %51 = vector.multi_reduction <maximumf>, %50, %cst_14 [2] : vector<2x8x8xf32> to vector<2x8xf32>
    %52 = vector.shape_cast %51 : vector<2x8xf32> to vector<2x8x1xf32>
    %53 = vector.broadcast %52 : vector<2x8x1xf32> to vector<2x8x8xf32>
    %54 = arith.subf %50, %53 : vector<2x8x8xf32>
    %55 = math.exp %54 : vector<2x8x8xf32>
    %cst_15 = arith.constant dense<0.000000e+00> : vector<2x8xf32>
    %56 = vector.multi_reduction <add>, %55, %cst_15 [2] : vector<2x8x8xf32> to vector<2x8xf32>
    %57 = vector.shape_cast %56 : vector<2x8xf32> to vector<2x8x1xf32>
    %58 = tpu.reciprocal %57 {approx = true} : vector<2x8x1xf32> -> vector<2x8x1xf32>
    %59 = vector.broadcast %58 : vector<2x8x1xf32> to vector<2x8x8xf32>
    %60 = arith.mulf %55, %59 : vector<2x8x8xf32>
    "tpu.trace_start"() <{level = 10 : i32, message = "bst,tbh->sbh"}> : () -> ()
    %cst_16 = arith.constant dense<0.000000e+00> : vector<2x16x8xf32>
    %61 = tpu.matmul %49, %60, %cst_16 {dimension_numbers = #tpu.dot_dimension_numbers<[0], [2], [2], [1], [0, 1, 0, 2, 1, 1], [1], [0]>} : vector<8x2x16xf32>, vector<2x8x8xf32>, vector<2x16x8xf32> -> vector<2x16x8xf32>
    %62 = tpu.transpose %61, [2, 0, 1] : vector<2x16x8xf32> -> vector<8x2x16xf32>
    "tpu.trace_stop"() : () -> ()
    %63 = vector.extract_strided_slice %22 {offsets = [0, 0, 32], sizes = [8, 2, 16], strides = [1, 1, 1]} : vector<8x2x64xf32> to vector<8x2x16xf32>
    %64 = vector.extract_strided_slice %26 {offsets = [0, 0, 32], sizes = [8, 2, 16], strides = [1, 1, 1]} : vector<8x2x64xf32> to vector<8x2x16xf32>
    %65 = vector.extract_strided_slice %30 {offsets = [0, 0, 32], sizes = [8, 2, 16], strides = [1, 1, 1]} : vector<8x2x64xf32> to vector<8x2x16xf32>
    "tpu.trace_start"() <{level = 10 : i32, message = "sbh,tbh->bst"}> : () -> ()
    %cst_17 = arith.constant dense<0.000000e+00> : vector<2x8x8xf32>
    %66 = tpu.matmul %63, %64, %cst_17 {dimension_numbers = #tpu.dot_dimension_numbers<[2], [2], [0], [0], [0, 1, 0, 0, 1, 0], [1], [1]>} : vector<8x2x16xf32>, vector<8x2x16xf32>, vector<2x8x8xf32> -> vector<2x8x8xf32>
    "tpu.trace_stop"() : () -> ()
    %cst_18 = arith.constant dense<0xFF800000> : vector<2x8xf32>
    %67 = vector.multi_reduction <maximumf>, %66, %cst_18 [2] : vector<2x8x8xf32> to vector<2x8xf32>
    %68 = vector.shape_cast %67 : vector<2x8xf32> to vector<2x8x1xf32>
    %69 = vector.broadcast %68 : vector<2x8x1xf32> to vector<2x8x8xf32>
    %70 = arith.subf %66, %69 : vector<2x8x8xf32>
    %71 = math.exp %70 : vector<2x8x8xf32>
    %cst_19 = arith.constant dense<0.000000e+00> : vector<2x8xf32>
    %72 = vector.multi_reduction <add>, %71, %cst_19 [2] : vector<2x8x8xf32> to vector<2x8xf32>
    %73 = vector.shape_cast %72 : vector<2x8xf32> to vector<2x8x1xf32>
    %74 = tpu.reciprocal %73 {approx = true} : vector<2x8x1xf32> -> vector<2x8x1xf32>
    %75 = vector.broadcast %74 : vector<2x8x1xf32> to vector<2x8x8xf32>
    %76 = arith.mulf %71, %75 : vector<2x8x8xf32>
    "tpu.trace_start"() <{level = 10 : i32, message = "bst,tbh->sbh"}> : () -> ()
    %cst_20 = arith.constant dense<0.000000e+00> : vector<2x16x8xf32>
    %77 = tpu.matmul %65, %76, %cst_20 {dimension_numbers = #tpu.dot_dimension_numbers<[0], [2], [2], [1], [0, 1, 0, 2, 1, 1], [1], [0]>} : vector<8x2x16xf32>, vector<2x8x8xf32>, vector<2x16x8xf32> -> vector<2x16x8xf32>
    %78 = tpu.transpose %77, [2, 0, 1] : vector<2x16x8xf32> -> vector<8x2x16xf32>
    "tpu.trace_stop"() : () -> ()
    %79 = vector.extract_strided_slice %22 {offsets = [0, 0, 48], sizes = [8, 2, 16], strides = [1, 1, 1]} : vector<8x2x64xf32> to vector<8x2x16xf32>
    %80 = vector.extract_strided_slice %26 {offsets = [0, 0, 48], sizes = [8, 2, 16], strides = [1, 1, 1]} : vector<8x2x64xf32> to vector<8x2x16xf32>
    %81 = vector.extract_strided_slice %30 {offsets = [0, 0, 48], sizes = [8, 2, 16], strides = [1, 1, 1]} : vector<8x2x64xf32> to vector<8x2x16xf32>
    "tpu.trace_start"() <{level = 10 : i32, message = "sbh,tbh->bst"}> : () -> ()
    %cst_21 = arith.constant dense<0.000000e+00> : vector<2x8x8xf32>
    %82 = tpu.matmul %79, %80, %cst_21 {dimension_numbers = #tpu.dot_dimension_numbers<[2], [2], [0], [0], [0, 1, 0, 0, 1, 0], [1], [1]>} : vector<8x2x16xf32>, vector<8x2x16xf32>, vector<2x8x8xf32> -> vector<2x8x8xf32>
    "tpu.trace_stop"() : () -> ()
    %cst_22 = arith.constant dense<0xFF800000> : vector<2x8xf32>
    %83 = vector.multi_reduction <maximumf>, %82, %cst_22 [2] : vector<2x8x8xf32> to vector<2x8xf32>
    %84 = vector.shape_cast %83 : vector<2x8xf32> to vector<2x8x1xf32>
    %85 = vector.broadcast %84 : vector<2x8x1xf32> to vector<2x8x8xf32>
    %86 = arith.subf %82, %85 : vector<2x8x8xf32>
    %87 = math.exp %86 : vector<2x8x8xf32>
    %cst_23 = arith.constant dense<0.000000e+00> : vector<2x8xf32>
    %88 = vector.multi_reduction <add>, %87, %cst_23 [2] : vector<2x8x8xf32> to vector<2x8xf32>
    %89 = vector.shape_cast %88 : vector<2x8xf32> to vector<2x8x1xf32>
    %90 = tpu.reciprocal %89 {approx = true} : vector<2x8x1xf32> -> vector<2x8x1xf32>
    %91 = vector.broadcast %90 : vector<2x8x1xf32> to vector<2x8x8xf32>
    %92 = arith.mulf %87, %91 : vector<2x8x8xf32>
    "tpu.trace_start"() <{level = 10 : i32, message = "bst,tbh->sbh"}> : () -> ()
    %cst_24 = arith.constant dense<0.000000e+00> : vector<2x16x8xf32>
    %93 = tpu.matmul %81, %92, %cst_24 {dimension_numbers = #tpu.dot_dimension_numbers<[0], [2], [2], [1], [0, 1, 0, 2, 1, 1], [1], [0]>} : vector<8x2x16xf32>, vector<2x8x8xf32>, vector<2x16x8xf32> -> vector<2x16x8xf32>
    %94 = tpu.transpose %93, [2, 0, 1] : vector<2x16x8xf32> -> vector<8x2x16xf32>
    "tpu.trace_stop"() : () -> ()
    %95 = tpu.concatenate %46, %62, %78, %94 in 2 : vector<8x2x16xf32>, vector<8x2x16xf32>, vector<8x2x16xf32>, vector<8x2x16xf32> -> vector<8x2x64xf32>
    %96 = arith.truncf %95 : vector<8x2x64xf32> to vector<8x2x64xbf16>
    %c0_25 = arith.constant 0 : index
    %c0_26 = arith.constant 0 : index
    %c0_27 = arith.constant 0 : index
    %97 = vector.load %arg5[%c0_25, %c0_26, %c0_27] : memref<1x64x64xbf16, #tpu.memory_space<vmem>>, vector<1x64x64xbf16>
    %98 = vector.shape_cast %97 : vector<1x64x64xbf16> to vector<64x64xbf16>
    "tpu.trace_start"() <{level = 10 : i32, message = "sbd,de->sbe"}> : () -> ()
    %cst_28 = arith.constant dense<0.000000e+00> : vector<8x2x64xf32>
    %99 = tpu.matmul %96, %98, %cst_28 {dimension_numbers = #tpu.dot_dimension_numbers<[2], [0], [0, 1], [1], [0, 0, 0, 1, 1, 1], [], []>} : vector<8x2x64xbf16>, vector<64x64xbf16>, vector<8x2x64xf32> -> vector<8x2x64xf32>
    "tpu.trace_stop"() : () -> ()
    %100 = vector.shape_cast %9 : vector<1x64xf32> to vector<1x1x64xf32>
    %101 = vector.broadcast %100 : vector<1x1x64xf32> to vector<8x2x64xf32>
    %102 = arith.addf %99, %101 : vector<8x2x64xf32>
    %103 = arith.addf %3, %102 : vector<8x2x64xf32>
    %cst_29 = arith.constant dense<0.000000e+00> : vector<8x2xf32>
    %104 = vector.multi_reduction <add>, %103, %cst_29 [2] : vector<8x2x64xf32> to vector<8x2xf32>
    %105 = vector.shape_cast %104 : vector<8x2xf32> to vector<8x2x1xf32>
    %cst_30 = arith.constant 6.400000e+01 : f32
    %106 = vector.broadcast %cst_30 : f32 to vector<8x2x1xf32>
    %107 = arith.divf %105, %106 : vector<8x2x1xf32>
    %108 = vector.broadcast %107 : vector<8x2x1xf32> to vector<8x2x64xf32>
    %109 = arith.subf %103, %108 : vector<8x2x64xf32>
    %110 = arith.mulf %109, %109 : vector<8x2x64xf32>
    %cst_31 = arith.constant dense<0.000000e+00> : vector<8x2xf32>
    %111 = vector.multi_reduction <add>, %110, %cst_31 [2] : vector<8x2x64xf32> to vector<8x2xf32>
    %112 = vector.shape_cast %111 : vector<8x2xf32> to vector<8x2x1xf32>
    %cst_32 = arith.constant 6.400000e+01 : f32
    %113 = vector.broadcast %cst_32 : f32 to vector<8x2x1xf32>
    %114 = arith.divf %112, %113 : vector<8x2x1xf32>
    %115 = vector.broadcast %107 : vector<8x2x1xf32> to vector<8x2x64xf32>
    %116 = arith.subf %103, %115 : vector<8x2x64xf32>
    %cst_33 = arith.constant 9.99999974E-6 : f32
    %117 = vector.broadcast %cst_33 : f32 to vector<8x2x1xf32>
    %118 = arith.addf %114, %117 : vector<8x2x1xf32>
    %119 = math.rsqrt %118 : vector<8x2x1xf32>
    %120 = vector.broadcast %119 : vector<8x2x1xf32> to vector<8x2x64xf32>
    %121 = arith.mulf %116, %120 : vector<8x2x64xf32>
    %122 = vector.shape_cast %10 : vector<1x64xf32> to vector<1x1x64xf32>
    %123 = vector.broadcast %122 : vector<1x1x64xf32> to vector<8x2x64xf32>
    %124 = arith.mulf %121, %123 : vector<8x2x64xf32>
    %125 = vector.shape_cast %11 : vector<1x64xf32> to vector<1x1x64xf32>
    %126 = vector.broadcast %125 : vector<1x1x64xf32> to vector<8x2x64xf32>
    %127 = arith.addf %124, %126 : vector<8x2x64xf32>
    %c1_i32 = arith.constant 1 : i32
    %128 = arith.cmpi slt, %arg0, %c1_i32 : i32
    %129 = arith.extui %128 : i1 to i32
    %c0_i32_34 = arith.constant 0 : i32
    %130 = arith.cmpi ne, %129, %c0_i32_34 : i32
    scf.if %130 {
      %134 = arith.truncf %127 : vector<8x2x64xf32> to vector<8x2x64xbf16>
      %cst_37 = arith.constant 0.000000e+00 : f32
      %135 = vector.broadcast %cst_37 : f32 to vector<8x2x64xf32>
      %c0_38 = arith.constant 0 : index
      %c0_39 = arith.constant 0 : index
      %c0_40 = arith.constant 0 : index
      %136 = vector.load %arg7[%c0_38, %c0_39, %c0_40] : memref<1x64x2048xbf16, #tpu.memory_space<vmem>>, vector<1x64x512xbf16>
      %137 = vector.shape_cast %136 : vector<1x64x512xbf16> to vector<64x512xbf16>
      %c0_41 = arith.constant 0 : index
      %c0_42 = arith.constant 0 : index
      %c0_43 = arith.constant 0 : index
      %138 = vector.load %arg8[%c0_41, %c0_42, %c0_43] : memref<1x1x2048xf32, #tpu.memory_space<vmem>>, vector<1x1x512xf32>
      %139 = vector.shape_cast %138 : vector<1x1x512xf32> to vector<1x512xf32>
      %c0_44 = arith.constant 0 : index
      %c0_45 = arith.constant 0 : index
      %c0_46 = arith.constant 0 : index
      %140 = vector.load %arg9[%c0_44, %c0_45, %c0_46] : memref<1x2048x64xbf16, #tpu.memory_space<vmem>>, vector<1x512x64xbf16>
      %141 = vector.shape_cast %140 : vector<1x512x64xbf16> to vector<512x64xbf16>
      "tpu.trace_start"() <{level = 10 : i32, message = "sbd,dc->sbc"}> : () -> ()
      %cst_47 = arith.constant dense<0.000000e+00> : vector<8x2x512xf32>
      %142 = tpu.matmul %134, %137, %cst_47 {dimension_numbers = #tpu.dot_dimension_numbers<[2], [0], [0, 1], [1], [0, 0, 0, 1, 1, 1], [], []>} : vector<8x2x64xbf16>, vector<64x512xbf16>, vector<8x2x512xf32> -> vector<8x2x512xf32>
      "tpu.trace_stop"() : () -> ()
      %143 = vector.shape_cast %139 : vector<1x512xf32> to vector<1x1x512xf32>
      %144 = vector.broadcast %143 : vector<1x1x512xf32> to vector<8x2x512xf32>
      %145 = arith.addf %142, %144 : vector<8x2x512xf32>
      %cst_48 = arith.constant 0.000000e+00 : f32
      %146 = vector.broadcast %cst_48 : f32 to vector<8x2x512xf32>
      %147 = arith.maximumf %145, %146 : vector<8x2x512xf32>
      %148 = arith.truncf %147 : vector<8x2x512xf32> to vector<8x2x512xbf16>
      "tpu.trace_start"() <{level = 10 : i32, message = "sbc,cd->sbd"}> : () -> ()
      %cst_49 = arith.constant dense<0.000000e+00> : vector<8x2x64xf32>
      %149 = tpu.matmul %148, %141, %cst_49 {dimension_numbers = #tpu.dot_dimension_numbers<[2], [0], [0, 1], [1], [0, 0, 0, 1, 1, 1], [], []>} : vector<8x2x512xbf16>, vector<512x64xbf16>, vector<8x2x64xf32> -> vector<8x2x64xf32>
      "tpu.trace_stop"() : () -> ()
      %150 = arith.addf %135, %149 : vector<8x2x64xf32>
      %c0_50 = arith.constant 0 : index
      %c0_51 = arith.constant 0 : index
      %c512 = arith.constant 512 : index
      %151 = vector.load %arg7[%c0_50, %c0_51, %c512] : memref<1x64x2048xbf16, #tpu.memory_space<vmem>>, vector<1x64x512xbf16>
      %152 = vector.shape_cast %151 : vector<1x64x512xbf16> to vector<64x512xbf16>
      %c0_52 = arith.constant 0 : index
      %c0_53 = arith.constant 0 : index
      %c512_54 = arith.constant 512 : index
      %153 = vector.load %arg8[%c0_52, %c0_53, %c512_54] : memref<1x1x2048xf32, #tpu.memory_space<vmem>>, vector<1x1x512xf32>
      %154 = vector.shape_cast %153 : vector<1x1x512xf32> to vector<1x512xf32>
      %c0_55 = arith.constant 0 : index
      %c512_56 = arith.constant 512 : index
      %c0_57 = arith.constant 0 : index
      %155 = vector.load %arg9[%c0_55, %c512_56, %c0_57] : memref<1x2048x64xbf16, #tpu.memory_space<vmem>>, vector<1x512x64xbf16>
      %156 = vector.shape_cast %155 : vector<1x512x64xbf16> to vector<512x64xbf16>
      "tpu.trace_start"() <{level = 10 : i32, message = "sbd,dc->sbc"}> : () -> ()
      %cst_58 = arith.constant dense<0.000000e+00> : vector<8x2x512xf32>
      %157 = tpu.matmul %134, %152, %cst_58 {dimension_numbers = #tpu.dot_dimension_numbers<[2], [0], [0, 1], [1], [0, 0, 0, 1, 1, 1], [], []>} : vector<8x2x64xbf16>, vector<64x512xbf16>, vector<8x2x512xf32> -> vector<8x2x512xf32>
      "tpu.trace_stop"() : () -> ()
      %158 = vector.shape_cast %154 : vector<1x512xf32> to vector<1x1x512xf32>
      %159 = vector.broadcast %158 : vector<1x1x512xf32> to vector<8x2x512xf32>
      %160 = arith.addf %157, %159 : vector<8x2x512xf32>
      %cst_59 = arith.constant 0.000000e+00 : f32
      %161 = vector.broadcast %cst_59 : f32 to vector<8x2x512xf32>
      %162 = arith.maximumf %160, %161 : vector<8x2x512xf32>
      %163 = arith.truncf %162 : vector<8x2x512xf32> to vector<8x2x512xbf16>
      "tpu.trace_start"() <{level = 10 : i32, message = "sbc,cd->sbd"}> : () -> ()
      %cst_60 = arith.constant dense<0.000000e+00> : vector<8x2x64xf32>
      %164 = tpu.matmul %163, %156, %cst_60 {dimension_numbers = #tpu.dot_dimension_numbers<[2], [0], [0, 1], [1], [0, 0, 0, 1, 1, 1], [], []>} : vector<8x2x512xbf16>, vector<512x64xbf16>, vector<8x2x64xf32> -> vector<8x2x64xf32>
      "tpu.trace_stop"() : () -> ()
      %165 = arith.addf %150, %164 : vector<8x2x64xf32>
      %c0_61 = arith.constant 0 : index
      %c0_62 = arith.constant 0 : index
      %c1024 = arith.constant 1024 : index
      %166 = vector.load %arg7[%c0_61, %c0_62, %c1024] : memref<1x64x2048xbf16, #tpu.memory_space<vmem>>, vector<1x64x512xbf16>
      %167 = vector.shape_cast %166 : vector<1x64x512xbf16> to vector<64x512xbf16>
      %c0_63 = arith.constant 0 : index
      %c0_64 = arith.constant 0 : index
      %c1024_65 = arith.constant 1024 : index
      %168 = vector.load %arg8[%c0_63, %c0_64, %c1024_65] : memref<1x1x2048xf32, #tpu.memory_space<vmem>>, vector<1x1x512xf32>
      %169 = vector.shape_cast %168 : vector<1x1x512xf32> to vector<1x512xf32>
      %c0_66 = arith.constant 0 : index
      %c1024_67 = arith.constant 1024 : index
      %c0_68 = arith.constant 0 : index
      %170 = vector.load %arg9[%c0_66, %c1024_67, %c0_68] : memref<1x2048x64xbf16, #tpu.memory_space<vmem>>, vector<1x512x64xbf16>
      %171 = vector.shape_cast %170 : vector<1x512x64xbf16> to vector<512x64xbf16>
      "tpu.trace_start"() <{level = 10 : i32, message = "sbd,dc->sbc"}> : () -> ()
      %cst_69 = arith.constant dense<0.000000e+00> : vector<8x2x512xf32>
      %172 = tpu.matmul %134, %167, %cst_69 {dimension_numbers = #tpu.dot_dimension_numbers<[2], [0], [0, 1], [1], [0, 0, 0, 1, 1, 1], [], []>} : vector<8x2x64xbf16>, vector<64x512xbf16>, vector<8x2x512xf32> -> vector<8x2x512xf32>
      "tpu.trace_stop"() : () -> ()
      %173 = vector.shape_cast %169 : vector<1x512xf32> to vector<1x1x512xf32>
      %174 = vector.broadcast %173 : vector<1x1x512xf32> to vector<8x2x512xf32>
      %175 = arith.addf %172, %174 : vector<8x2x512xf32>
      %cst_70 = arith.constant 0.000000e+00 : f32
      %176 = vector.broadcast %cst_70 : f32 to vector<8x2x512xf32>
      %177 = arith.maximumf %175, %176 : vector<8x2x512xf32>
      %178 = arith.truncf %177 : vector<8x2x512xf32> to vector<8x2x512xbf16>
      "tpu.trace_start"() <{level = 10 : i32, message = "sbc,cd->sbd"}> : () -> ()
      %cst_71 = arith.constant dense<0.000000e+00> : vector<8x2x64xf32>
      %179 = tpu.matmul %178, %171, %cst_71 {dimension_numbers = #tpu.dot_dimension_numbers<[2], [0], [0, 1], [1], [0, 0, 0, 1, 1, 1], [], []>} : vector<8x2x512xbf16>, vector<512x64xbf16>, vector<8x2x64xf32> -> vector<8x2x64xf32>
      "tpu.trace_stop"() : () -> ()
      %180 = arith.addf %165, %179 : vector<8x2x64xf32>
      %c0_72 = arith.constant 0 : index
      %c0_73 = arith.constant 0 : index
      %c1536 = arith.constant 1536 : index
      %181 = vector.load %arg7[%c0_72, %c0_73, %c1536] : memref<1x64x2048xbf16, #tpu.memory_space<vmem>>, vector<1x64x512xbf16>
      %182 = vector.shape_cast %181 : vector<1x64x512xbf16> to vector<64x512xbf16>
      %c0_74 = arith.constant 0 : index
      %c0_75 = arith.constant 0 : index
      %c1536_76 = arith.constant 1536 : index
      %183 = vector.load %arg8[%c0_74, %c0_75, %c1536_76] : memref<1x1x2048xf32, #tpu.memory_space<vmem>>, vector<1x1x512xf32>
      %184 = vector.shape_cast %183 : vector<1x1x512xf32> to vector<1x512xf32>
      %c0_77 = arith.constant 0 : index
      %c1536_78 = arith.constant 1536 : index
      %c0_79 = arith.constant 0 : index
      %185 = vector.load %arg9[%c0_77, %c1536_78, %c0_79] : memref<1x2048x64xbf16, #tpu.memory_space<vmem>>, vector<1x512x64xbf16>
      %186 = vector.shape_cast %185 : vector<1x512x64xbf16> to vector<512x64xbf16>
      "tpu.trace_start"() <{level = 10 : i32, message = "sbd,dc->sbc"}> : () -> ()
      %cst_80 = arith.constant dense<0.000000e+00> : vector<8x2x512xf32>
      %187 = tpu.matmul %134, %182, %cst_80 {dimension_numbers = #tpu.dot_dimension_numbers<[2], [0], [0, 1], [1], [0, 0, 0, 1, 1, 1], [], []>} : vector<8x2x64xbf16>, vector<64x512xbf16>, vector<8x2x512xf32> -> vector<8x2x512xf32>
      "tpu.trace_stop"() : () -> ()
      %188 = vector.shape_cast %184 : vector<1x512xf32> to vector<1x1x512xf32>
      %189 = vector.broadcast %188 : vector<1x1x512xf32> to vector<8x2x512xf32>
      %190 = arith.addf %187, %189 : vector<8x2x512xf32>
      %cst_81 = arith.constant 0.000000e+00 : f32
      %191 = vector.broadcast %cst_81 : f32 to vector<8x2x512xf32>
      %192 = arith.maximumf %190, %191 : vector<8x2x512xf32>
      %193 = arith.truncf %192 : vector<8x2x512xf32> to vector<8x2x512xbf16>
      "tpu.trace_start"() <{level = 10 : i32, message = "sbc,cd->sbd"}> : () -> ()
      %cst_82 = arith.constant dense<0.000000e+00> : vector<8x2x64xf32>
      %194 = tpu.matmul %193, %186, %cst_82 {dimension_numbers = #tpu.dot_dimension_numbers<[2], [0], [0, 1], [1], [0, 0, 0, 1, 1, 1], [], []>} : vector<8x2x512xbf16>, vector<512x64xbf16>, vector<8x2x64xf32> -> vector<8x2x64xf32>
      "tpu.trace_stop"() : () -> ()
      %195 = arith.addf %180, %194 : vector<8x2x64xf32>
      %196 = vector.shape_cast %12 : vector<1x64xf32> to vector<1x1x64xf32>
      %197 = vector.broadcast %196 : vector<1x1x64xf32> to vector<8x2x64xf32>
      %198 = arith.addf %195, %197 : vector<8x2x64xf32>
      %199 = arith.addf %127, %198 : vector<8x2x64xf32>
      %cst_83 = arith.constant dense<0.000000e+00> : vector<8x2xf32>
      %200 = vector.multi_reduction <add>, %199, %cst_83 [2] : vector<8x2x64xf32> to vector<8x2xf32>
      %201 = vector.shape_cast %200 : vector<8x2xf32> to vector<8x2x1xf32>
      %cst_84 = arith.constant 6.400000e+01 : f32
      %202 = vector.broadcast %cst_84 : f32 to vector<8x2x1xf32>
      %203 = arith.divf %201, %202 : vector<8x2x1xf32>
      %204 = vector.broadcast %203 : vector<8x2x1xf32> to vector<8x2x64xf32>
      %205 = arith.subf %199, %204 : vector<8x2x64xf32>
      %206 = arith.mulf %205, %205 : vector<8x2x64xf32>
      %cst_85 = arith.constant dense<0.000000e+00> : vector<8x2xf32>
      %207 = vector.multi_reduction <add>, %206, %cst_85 [2] : vector<8x2x64xf32> to vector<8x2xf32>
      %208 = vector.shape_cast %207 : vector<8x2xf32> to vector<8x2x1xf32>
      %cst_86 = arith.constant 6.400000e+01 : f32
      %209 = vector.broadcast %cst_86 : f32 to vector<8x2x1xf32>
      %210 = arith.divf %208, %209 : vector<8x2x1xf32>
      %211 = vector.broadcast %203 : vector<8x2x1xf32> to vector<8x2x64xf32>
      %212 = arith.subf %199, %211 : vector<8x2x64xf32>
      %cst_87 = arith.constant 9.99999974E-6 : f32
      %213 = vector.broadcast %cst_87 : f32 to vector<8x2x1xf32>
      %214 = arith.addf %210, %213 : vector<8x2x1xf32>
      %215 = math.rsqrt %214 : vector<8x2x1xf32>
      %216 = vector.broadcast %215 : vector<8x2x1xf32> to vector<8x2x64xf32>
      %217 = arith.mulf %212, %216 : vector<8x2x64xf32>
      %218 = vector.shape_cast %13 : vector<1x64xf32> to vector<1x1x64xf32>
      %219 = vector.broadcast %218 : vector<1x1x64xf32> to vector<8x2x64xf32>
      %220 = arith.mulf %217, %219 : vector<8x2x64xf32>
      %221 = vector.shape_cast %14 : vector<1x64xf32> to vector<1x1x64xf32>
      %222 = vector.broadcast %221 : vector<1x1x64xf32> to vector<8x2x64xf32>
      %223 = arith.addf %220, %222 : vector<8x2x64xf32>
      %c0_88 = arith.constant 0 : index
      %c0_89 = arith.constant 0 : index
      %c0_90 = arith.constant 0 : index
      %224 = vector.load %arg13[%c0_88, %c0_89, %c0_90] : memref<8x2x64xf32, #tpu.memory_space<vmem>>, vector<8x2x64xf32>
      tpu.vector_store %arg13[%c0_88, %c0_89, %c0_90], %223 {strides = array<i32>} : memref<8x2x64xf32, #tpu.memory_space<vmem>>, vector<8x2x64xf32>,
    } else {
    }
    %c1_i32_35 = arith.constant 1 : i32
    %131 = arith.cmpi eq, %arg0, %c1_i32_35 : i32
    %132 = arith.extui %131 : i1 to i32
    %c0_i32_36 = arith.constant 0 : i32
    %133 = arith.cmpi ne, %132, %c0_i32_36 : i32
    scf.if %133 {
      %134 = vector.extract_strided_slice %127 {offsets = [7, 0, 0], sizes = [1, 2, 64], strides = [1, 1, 1]} : vector<8x2x64xf32> to vector<1x2x64xf32>
      %135 = arith.truncf %134 : vector<1x2x64xf32> to vector<1x2x64xbf16>
      %cst_37 = arith.constant 0.000000e+00 : f32
      %136 = vector.broadcast %cst_37 : f32 to vector<1x2x64xf32>
      %c0_38 = arith.constant 0 : index
      %c0_39 = arith.constant 0 : index
      %c0_40 = arith.constant 0 : index
      %137 = vector.load %arg7[%c0_38, %c0_39, %c0_40] : memref<1x64x2048xbf16, #tpu.memory_space<vmem>>, vector<1x64x512xbf16>
      %138 = vector.shape_cast %137 : vector<1x64x512xbf16> to vector<64x512xbf16>
      %c0_41 = arith.constant 0 : index
      %c0_42 = arith.constant 0 : index
      %c0_43 = arith.constant 0 : index
      %139 = vector.load %arg8[%c0_41, %c0_42, %c0_43] : memref<1x1x2048xf32, #tpu.memory_space<vmem>>, vector<1x1x512xf32>
      %140 = vector.shape_cast %139 : vector<1x1x512xf32> to vector<1x512xf32>
      %c0_44 = arith.constant 0 : index
      %c0_45 = arith.constant 0 : index
      %c0_46 = arith.constant 0 : index
      %141 = vector.load %arg9[%c0_44, %c0_45, %c0_46] : memref<1x2048x64xbf16, #tpu.memory_space<vmem>>, vector<1x512x64xbf16>
      %142 = vector.shape_cast %141 : vector<1x512x64xbf16> to vector<512x64xbf16>
      "tpu.trace_start"() <{level = 10 : i32, message = "sbd,dc->sbc"}> : () -> ()
      %cst_47 = arith.constant dense<0.000000e+00> : vector<1x2x512xf32>
      %143 = tpu.matmul %135, %138, %cst_47 {dimension_numbers = #tpu.dot_dimension_numbers<[2], [0], [0, 1], [1], [0, 0, 0, 1, 1, 1], [], []>} : vector<1x2x64xbf16>, vector<64x512xbf16>, vector<1x2x512xf32> -> vector<1x2x512xf32>
      "tpu.trace_stop"() : () -> ()
      %144 = vector.shape_cast %140 : vector<1x512xf32> to vector<1x1x512xf32>
      %145 = vector.broadcast %144 : vector<1x1x512xf32> to vector<1x2x512xf32>
      %146 = arith.addf %143, %145 : vector<1x2x512xf32>
      %cst_48 = arith.constant 0.000000e+00 : f32
      %147 = vector.broadcast %cst_48 : f32 to vector<1x2x512xf32>
      %148 = arith.maximumf %146, %147 : vector<1x2x512xf32>
      %149 = arith.truncf %148 : vector<1x2x512xf32> to vector<1x2x512xbf16>
      "tpu.trace_start"() <{level = 10 : i32, message = "sbc,cd->sbd"}> : () -> ()
      %cst_49 = arith.constant dense<0.000000e+00> : vector<1x2x64xf32>
      %150 = tpu.matmul %149, %142, %cst_49 {dimension_numbers = #tpu.dot_dimension_numbers<[2], [0], [0, 1], [1], [0, 0, 0, 1, 1, 1], [], []>} : vector<1x2x512xbf16>, vector<512x64xbf16>, vector<1x2x64xf32> -> vector<1x2x64xf32>
      "tpu.trace_stop"() : () -> ()
      %151 = arith.addf %136, %150 : vector<1x2x64xf32>
      %c0_50 = arith.constant 0 : index
      %c0_51 = arith.constant 0 : index
      %c512 = arith.constant 512 : index
      %152 = vector.load %arg7[%c0_50, %c0_51, %c512] : memref<1x64x2048xbf16, #tpu.memory_space<vmem>>, vector<1x64x512xbf16>
      %153 = vector.shape_cast %152 : vector<1x64x512xbf16> to vector<64x512xbf16>
      %c0_52 = arith.constant 0 : index
      %c0_53 = arith.constant 0 : index
      %c512_54 = arith.constant 512 : index
      %154 = vector.load %arg8[%c0_52, %c0_53, %c512_54] : memref<1x1x2048xf32, #tpu.memory_space<vmem>>, vector<1x1x512xf32>
      %155 = vector.shape_cast %154 : vector<1x1x512xf32> to vector<1x512xf32>
      %c0_55 = arith.constant 0 : index
      %c512_56 = arith.constant 512 : index
      %c0_57 = arith.constant 0 : index
      %156 = vector.load %arg9[%c0_55, %c512_56, %c0_57] : memref<1x2048x64xbf16, #tpu.memory_space<vmem>>, vector<1x512x64xbf16>
      %157 = vector.shape_cast %156 : vector<1x512x64xbf16> to vector<512x64xbf16>
      "tpu.trace_start"() <{level = 10 : i32, message = "sbd,dc->sbc"}> : () -> ()
      %cst_58 = arith.constant dense<0.000000e+00> : vector<1x2x512xf32>
      %158 = tpu.matmul %135, %153, %cst_58 {dimension_numbers = #tpu.dot_dimension_numbers<[2], [0], [0, 1], [1], [0, 0, 0, 1, 1, 1], [], []>} : vector<1x2x64xbf16>, vector<64x512xbf16>, vector<1x2x512xf32> -> vector<1x2x512xf32>
      "tpu.trace_stop"() : () -> ()
      %159 = vector.shape_cast %155 : vector<1x512xf32> to vector<1x1x512xf32>
      %160 = vector.broadcast %159 : vector<1x1x512xf32> to vector<1x2x512xf32>
      %161 = arith.addf %158, %160 : vector<1x2x512xf32>
      %cst_59 = arith.constant 0.000000e+00 : f32
      %162 = vector.broadcast %cst_59 : f32 to vector<1x2x512xf32>
      %163 = arith.maximumf %161, %162 : vector<1x2x512xf32>
      %164 = arith.truncf %163 : vector<1x2x512xf32> to vector<1x2x512xbf16>
      "tpu.trace_start"() <{level = 10 : i32, message = "sbc,cd->sbd"}> : () -> ()
      %cst_60 = arith.constant dense<0.000000e+00> : vector<1x2x64xf32>
      %165 = tpu.matmul %164, %157, %cst_60 {dimension_numbers = #tpu.dot_dimension_numbers<[2], [0], [0, 1], [1], [0, 0, 0, 1, 1, 1], [], []>} : vector<1x2x512xbf16>, vector<512x64xbf16>, vector<1x2x64xf32> -> vector<1x2x64xf32>
      "tpu.trace_stop"() : () -> ()
      %166 = arith.addf %151, %165 : vector<1x2x64xf32>
      %c0_61 = arith.constant 0 : index
      %c0_62 = arith.constant 0 : index
      %c1024 = arith.constant 1024 : index
      %167 = vector.load %arg7[%c0_61, %c0_62, %c1024] : memref<1x64x2048xbf16, #tpu.memory_space<vmem>>, vector<1x64x512xbf16>
      %168 = vector.shape_cast %167 : vector<1x64x512xbf16> to vector<64x512xbf16>
      %c0_63 = arith.constant 0 : index
      %c0_64 = arith.constant 0 : index
      %c1024_65 = arith.constant 1024 : index
      %169 = vector.load %arg8[%c0_63, %c0_64, %c1024_65] : memref<1x1x2048xf32, #tpu.memory_space<vmem>>, vector<1x1x512xf32>
      %170 = vector.shape_cast %169 : vector<1x1x512xf32> to vector<1x512xf32>
      %c0_66 = arith.constant 0 : index
      %c1024_67 = arith.constant 1024 : index
      %c0_68 = arith.constant 0 : index
      %171 = vector.load %arg9[%c0_66, %c1024_67, %c0_68] : memref<1x2048x64xbf16, #tpu.memory_space<vmem>>, vector<1x512x64xbf16>
      %172 = vector.shape_cast %171 : vector<1x512x64xbf16> to vector<512x64xbf16>
      "tpu.trace_start"() <{level = 10 : i32, message = "sbd,dc->sbc"}> : () -> ()
      %cst_69 = arith.constant dense<0.000000e+00> : vector<1x2x512xf32>
      %173 = tpu.matmul %135, %168, %cst_69 {dimension_numbers = #tpu.dot_dimension_numbers<[2], [0], [0, 1], [1], [0, 0, 0, 1, 1, 1], [], []>} : vector<1x2x64xbf16>, vector<64x512xbf16>, vector<1x2x512xf32> -> vector<1x2x512xf32>
      "tpu.trace_stop"() : () -> ()
      %174 = vector.shape_cast %170 : vector<1x512xf32> to vector<1x1x512xf32>
      %175 = vector.broadcast %174 : vector<1x1x512xf32> to vector<1x2x512xf32>
      %176 = arith.addf %173, %175 : vector<1x2x512xf32>
      %cst_70 = arith.constant 0.000000e+00 : f32
      %177 = vector.broadcast %cst_70 : f32 to vector<1x2x512xf32>
      %178 = arith.maximumf %176, %177 : vector<1x2x512xf32>
      %179 = arith.truncf %178 : vector<1x2x512xf32> to vector<1x2x512xbf16>
      "tpu.trace_start"() <{level = 10 : i32, message = "sbc,cd->sbd"}> : () -> ()
      %cst_71 = arith.constant dense<0.000000e+00> : vector<1x2x64xf32>
      %180 = tpu.matmul %179, %172, %cst_71 {dimension_numbers = #tpu.dot_dimension_numbers<[2], [0], [0, 1], [1], [0, 0, 0, 1, 1, 1], [], []>} : vector<1x2x512xbf16>, vector<512x64xbf16>, vector<1x2x64xf32> -> vector<1x2x64xf32>
      "tpu.trace_stop"() : () -> ()
      %181 = arith.addf %166, %180 : vector<1x2x64xf32>
      %c0_72 = arith.constant 0 : index
      %c0_73 = arith.constant 0 : index
      %c1536 = arith.constant 1536 : index
      %182 = vector.load %arg7[%c0_72, %c0_73, %c1536] : memref<1x64x2048xbf16, #tpu.memory_space<vmem>>, vector<1x64x512xbf16>
      %183 = vector.shape_cast %182 : vector<1x64x512xbf16> to vector<64x512xbf16>
      %c0_74 = arith.constant 0 : index
      %c0_75 = arith.constant 0 : index
      %c1536_76 = arith.constant 1536 : index
      %184 = vector.load %arg8[%c0_74, %c0_75, %c1536_76] : memref<1x1x2048xf32, #tpu.memory_space<vmem>>, vector<1x1x512xf32>
      %185 = vector.shape_cast %184 : vector<1x1x512xf32> to vector<1x512xf32>
      %c0_77 = arith.constant 0 : index
      %c1536_78 = arith.constant 1536 : index
      %c0_79 = arith.constant 0 : index
      %186 = vector.load %arg9[%c0_77, %c1536_78, %c0_79] : memref<1x2048x64xbf16, #tpu.memory_space<vmem>>, vector<1x512x64xbf16>
      %187 = vector.shape_cast %186 : vector<1x512x64xbf16> to vector<512x64xbf16>
      "tpu.trace_start"() <{level = 10 : i32, message = "sbd,dc->sbc"}> : () -> ()
      %cst_80 = arith.constant dense<0.000000e+00> : vector<1x2x512xf32>
      %188 = tpu.matmul %135, %183, %cst_80 {dimension_numbers = #tpu.dot_dimension_numbers<[2], [0], [0, 1], [1], [0, 0, 0, 1, 1, 1], [], []>} : vector<1x2x64xbf16>, vector<64x512xbf16>, vector<1x2x512xf32> -> vector<1x2x512xf32>
      "tpu.trace_stop"() : () -> ()
      %189 = vector.shape_cast %185 : vector<1x512xf32> to vector<1x1x512xf32>
      %190 = vector.broadcast %189 : vector<1x1x512xf32> to vector<1x2x512xf32>
      %191 = arith.addf %188, %190 : vector<1x2x512xf32>
      %cst_81 = arith.constant 0.000000e+00 : f32
      %192 = vector.broadcast %cst_81 : f32 to vector<1x2x512xf32>
      %193 = arith.maximumf %191, %192 : vector<1x2x512xf32>
      %194 = arith.truncf %193 : vector<1x2x512xf32> to vector<1x2x512xbf16>
      "tpu.trace_start"() <{level = 10 : i32, message = "sbc,cd->sbd"}> : () -> ()
      %cst_82 = arith.constant dense<0.000000e+00> : vector<1x2x64xf32>
      %195 = tpu.matmul %194, %187, %cst_82 {dimension_numbers = #tpu.dot_dimension_numbers<[2], [0], [0, 1], [1], [0, 0, 0, 1, 1, 1], [], []>} : vector<1x2x512xbf16>, vector<512x64xbf16>, vector<1x2x64xf32> -> vector<1x2x64xf32>
      "tpu.trace_stop"() : () -> ()
      %196 = arith.addf %181, %195 : vector<1x2x64xf32>
      %197 = vector.shape_cast %12 : vector<1x64xf32> to vector<1x1x64xf32>
      %198 = vector.broadcast %197 : vector<1x1x64xf32> to vector<1x2x64xf32>
      %199 = arith.addf %196, %198 : vector<1x2x64xf32>
      %200 = arith.addf %134, %199 : vector<1x2x64xf32>
      %cst_83 = arith.constant dense<0.000000e+00> : vector<1x2xf32>
      %201 = vector.multi_reduction <add>, %200, %cst_83 [2] : vector<1x2x64xf32> to vector<1x2xf32>
      %202 = vector.shape_cast %201 : vector<1x2xf32> to vector<1x2x1xf32>
      %cst_84 = arith.constant 6.400000e+01 : f32
      %203 = vector.broadcast %cst_84 : f32 to vector<1x2x1xf32>
      %204 = arith.divf %202, %203 : vector<1x2x1xf32>
      %205 = vector.broadcast %204 : vector<1x2x1xf32> to vector<1x2x64xf32>
      %206 = arith.subf %200, %205 : vector<1x2x64xf32>
      %207 = arith.mulf %206, %206 : vector<1x2x64xf32>
      %cst_85 = arith.constant dense<0.000000e+00> : vector<1x2xf32>
      %208 = vector.multi_reduction <add>, %207, %cst_85 [2] : vector<1x2x64xf32> to vector<1x2xf32>
      %209 = vector.shape_cast %208 : vector<1x2xf32> to vector<1x2x1xf32>
      %cst_86 = arith.constant 6.400000e+01 : f32
      %210 = vector.broadcast %cst_86 : f32 to vector<1x2x1xf32>
      %211 = arith.divf %209, %210 : vector<1x2x1xf32>
      %212 = vector.broadcast %204 : vector<1x2x1xf32> to vector<1x2x64xf32>
      %213 = arith.subf %200, %212 : vector<1x2x64xf32>
      %cst_87 = arith.constant 9.99999974E-6 : f32
      %214 = vector.broadcast %cst_87 : f32 to vector<1x2x1xf32>
      %215 = arith.addf %211, %214 : vector<1x2x1xf32>
      %216 = math.rsqrt %215 : vector<1x2x1xf32>
      %217 = vector.broadcast %216 : vector<1x2x1xf32> to vector<1x2x64xf32>
      %218 = arith.mulf %213, %217 : vector<1x2x64xf32>
      %219 = vector.shape_cast %13 : vector<1x64xf32> to vector<1x1x64xf32>
      %220 = vector.broadcast %219 : vector<1x1x64xf32> to vector<1x2x64xf32>
      %221 = arith.mulf %218, %220 : vector<1x2x64xf32>
      %222 = vector.shape_cast %14 : vector<1x64xf32> to vector<1x1x64xf32>
      %223 = vector.broadcast %222 : vector<1x1x64xf32> to vector<1x2x64xf32>
      %224 = arith.addf %221, %223 : vector<1x2x64xf32>
      %225 = vector.shape_cast %224 : vector<1x2x64xf32> to vector<2x64xf32>
      %c0_88 = arith.constant 0 : index
      %c0_89 = arith.constant 0 : index
      %226 = vector.load %arg10[%c0_88, %c0_89] : memref<64x1xf32, #tpu.memory_space<vmem>>, vector<64x1xf32>
      %cst_90 = arith.constant dense<0.000000e+00> : vector<2x1xf32>
      %227 = tpu.matmul %225, %226, %cst_90 {dimension_numbers = #tpu.dot_dimension_numbers<[1], [0], [0], [1], [0, 0, 1, 1], [], []>} : vector<2x64xf32>, vector<64x1xf32>, vector<2x1xf32> -> vector<2x1xf32>
      %c0_91 = arith.constant 0 : index
      %c0_92 = arith.constant 0 : index
      %228 = vector.load %arg11[%c0_91, %c0_92] : memref<1x1xf32, #tpu.memory_space<vmem>>, vector<1x1xf32>
      %229 = vector.broadcast %228 : vector<1x1xf32> to vector<2x1xf32>
      %230 = arith.addf %227, %229 : vector<2x1xf32>
      %c0_93 = arith.constant 0 : index
      %c0_94 = arith.constant 0 : index
      %231 = vector.load %arg12[%c0_93, %c0_94] : memref<2x1xf32, #tpu.memory_space<vmem>>, vector<2x1xf32>
      tpu.vector_store %arg12[%c0_93, %c0_94], %230 {strides = array<i32>} : memref<2x1xf32, #tpu.memory_space<vmem>>, vector<2x1xf32>,
    } else {
    }
    return
  }
  func.func @transform_0(%arg0: i32) -> (i32, i32, i32) {
    %c0_i32 = arith.constant 0 : i32
    %c0_i32_0 = arith.constant 0 : i32
    %c0_i32_1 = arith.constant 0 : i32
    %c0_i32_2 = arith.constant 0 : i32
    return %c0_i32, %c0_i32_0, %c0_i32_1 : i32, i32, i32
  }
  func.func @transform_1(%arg0: i32) -> (i32, i32) {
    %c0_i32 = arith.constant 0 : i32
    %c0_i32_0 = arith.constant 0 : i32
    %c0_i32_1 = arith.constant 0 : i32
    return %c0_i32, %c0_i32_0 : i32, i32
  }
  func.func @transform_2(%arg0: i32) -> (i32, i32) {
    %c0_i32 = arith.constant 0 : i32
    %c0_i32_0 = arith.constant 0 : i32
    %c0_i32_1 = arith.constant 0 : i32
    return %c0_i32, %c0_i32_0 : i32, i32
  }
  func.func @transform_3(%arg0: i32) -> (i32, i32, i32) {
    %c0_i32 = arith.constant 0 : i32
    %c0_i32_0 = arith.constant 0 : i32
    %c0_i32_1 = arith.constant 0 : i32
    return %arg0, %c0_i32, %c0_i32_0 : i32, i32, i32
  }
  func.func @transform_4(%arg0: i32) -> (i32, i32, i32) {
    %c0_i32 = arith.constant 0 : i32
    %c0_i32_0 = arith.constant 0 : i32
    %c0_i32_1 = arith.constant 0 : i32
    return %arg0, %c0_i32, %c0_i32_0 : i32, i32, i32
  }
  func.func @transform_5(%arg0: i32) -> (i32, i32, i32) {
    %c0_i32 = arith.constant 0 : i32
    %c0_i32_0 = arith.constant 0 : i32
    %c0_i32_1 = arith.constant 0 : i32
    return %arg0, %c0_i32, %c0_i32_0 : i32, i32, i32
  }
  func.func @transform_6(%arg0: i32) -> (i32, i32, i32) {
    %c0_i32 = arith.constant 0 : i32
    %c0_i32_0 = arith.constant 0 : i32
    %c0_i32_1 = arith.constant 0 : i32
    return %arg0, %c0_i32, %c0_i32_0 : i32, i32, i32
  }
  func.func @transform_7(%arg0: i32) -> (i32, i32, i32) {
    %c0_i32 = arith.constant 0 : i32
    %c0_i32_0 = arith.constant 0 : i32
    %c0_i32_1 = arith.constant 0 : i32
    return %arg0, %c0_i32, %c0_i32_0 : i32, i32, i32
  }
  func.func @transform_8(%arg0: i32) -> (i32, i32, i32) {
    %c0_i32 = arith.constant 0 : i32
    %c0_i32_0 = arith.constant 0 : i32
    %c0_i32_1 = arith.constant 0 : i32
    return %arg0, %c0_i32, %c0_i32_0 : i32, i32, i32
  }
  func.func @transform_9(%arg0: i32) -> (i32, i32) {
    %c0_i32 = arith.constant 0 : i32
    %c0_i32_0 = arith.constant 0 : i32
    %c0_i32_1 = arith.constant 0 : i32
    return %c0_i32, %c0_i32_0 : i32, i32
  }
  func.func @transform_10(%arg0: i32) -> (i32, i32) {
    %c0_i32 = arith.constant 0 : i32
    %c0_i32_0 = arith.constant 0 : i32
    %c0_i32_1 = arith.constant 0 : i32
    return %c0_i32, %c0_i32_0 : i32, i32
  }
  func.func @transform_11(%arg0: i32) -> (i32, i32) {
    %c0_i32 = arith.constant 0 : i32
    %c0_i32_0 = arith.constant 0 : i32
    %c0_i32_1 = arith.constant 0 : i32
    return %c0_i32, %c0_i32_0 : i32, i32
  }
}

</mosaic_0001>

<bundles_post_ra>
// kernel: transformer_forward.1
= control target key start
LH: loop header
LB: loop body
LE: loop exit
PB: predicated region body
PF: predicated region fallthrough
CT: control target
= control target key end

     0   :  { %s22127_s19 = smov 0   ;;  %s24955_s0 = inlined_call_operand.vmem [shape: f32[8,2,1], index: 0, kind: input, shape index: {}]   ;;  %s24956_s1 = inlined_call_operand.vmem [shape: f32[1,64], index: 1, kind: input, shape index: {}]   ;;  %s24957_s2 = inlined_call_operand.vmem [shape: f32[1,64], index: 2, kind: input, shape index: {}]   ;;  %s24958_s3 = inlined_call_operand.vmem [shape: bf16[2,64,192], index: 3, kind: input, shape index: {}]   ;;  %s24959_s4 = inlined_call_operand.vmem [shape: bf16[2,64,64], index: 4, kind: input, shape index: {}]   ;;  %s24960_s5 = inlined_call_operand.vmem [shape: f32[2,9,64], index: 5, kind: input, shape index: {}]   ;;  %s24961_s6 = inlined_call_operand.vmem [shape: bf16[2,64,2048], index: 6, kind: input, shape index: {}]   ;;  %s24962_s7 = inlined_call_operand.vmem [shape: f32[2,1,2048], index: 7, kind: input, shape index: {}]   ;;  %s24963_s8 = inlined_call_operand.vmem [shape: bf16[2,2048,64], index: 8, kind: input, shape index: {}]   ;;  %s24964_s9 = inlined_call_operand.vmem [shape: f32[64,1], index: 9, kind: input, shape index: {}]   ;;  %s24965_s10 = inlined_call_operand.<no memory space> [shape: f32[1,1], index: 10, kind: input, shape index: {}]   ;;  %s24966_s11 = inlined_call_operand.vmem [shape: f32[2,1], index: 11, kind: output, shape index: {}]  }
   0x1   :  { %v16_v0 = vstv %s24965_s10 }
   0x2   :  { %17 = vst [vmem:[#allocation3] sm:$0x1] %v16_v0 }
   0x3 LB: > { %s22133_s20 = sadd.s32 4294967295, %s22042_s19   ;;  %p20458_p0 = scmp.ge.s32.totalorder %s22042_s19, 1  ;;  %s22042_s19 = sphi %s22127_s19, %s23_s19  }
   0x4   : > { %p383_p1 = scmp.lt.s32.totalorder %s22042_s19, 3 }
   0x6   : > { %p384_p2 = pnand %p20458_p0, %p383_p1 }
   0x8   : > { %387 = sbr.rel (%p384_p2) target bundleno = 8502 (0x2136), region = 64 }
   0xf   : > { %p442_p3 = scmp.lt.s32.totalorder %s22133_s20, 1  ;;  %p20470_p4 = scmp.ne.s32.totalorder %s22133_s20, 0 }
  0x10   : > { %v478_v1 = vld [vmem:[%s24955_s0 + $0x4] sm:$0x3] (!%p20470_p4)  ;;  %v476_v2 = vld [vmem:[%s24955_s0] sm:$0x3] (!%p20470_p4)  ;;  %v22044_v3 = vmov (!%p20470_p4), 0   ;;  %vm554_vm0 = vcmask (!%p20470_p4), 517120  }
  0x11   : > { %s443_s10 = scalar_select %p442_p3, %s22133_s20, 1 }
  0x12   : > { %475 = sbr.rel (%p20470_p4) target bundleno = 164 (0xa4), region = 68  ;;  %21628 = vset.pattern.permute.xlu1 (!%p20470_p4), %v22044_v3  ;;  %21627 = vset.pattern.permute.xlu0 (!%p20470_p4), %v22044_v3  ;;  %v479_v4 = vld [vmem:[%s24955_s0 + $0x6] sm:$0x3] (!%p20470_p4)  ;;  %v477_v5 = vld [vmem:[%s24955_s0 + $0x2] sm:$0x3] (!%p20470_p4) }
  0x13   : > { %s21017_s21 = sshll.u32 %s443_s10, 6  ;;  %s21018_s22 = sshll.u32 %s443_s10, 5  ;;  %497 = vperm.xlu1 (!%p20470_p4), %21628, %v478_v1   ;;  %487 = vperm.xlu0 (!%p20470_p4), %21627, %v476_v2   ;;  %v481_v6 = vld [vmem:[%s24955_s0 + $0xa] sm:$0x3] (!%p20470_p4)  ;;  %v480_v7 = vld [vmem:[%s24955_s0 + $0x8] sm:$0x3] (!%p20470_p4) }
  0x14   : > { %s22142_s25 = scalar_lea.vmem %s24958_s3, %s21017_s21  ;;  %s22147_s28 = scalar_lea.vmem %s24959_s4, %s21018_s22  ;;  %v483_v8 = vld [vmem:[%s24955_s0 + $0xe] sm:$0x3] (!%p20470_p4)  ;;  %v482_v9 = vld [vmem:[%s24955_s0 + $0xc] sm:$0x3] (!%p20470_p4)  ;;  %v20471_v10 = vld [vmem:[%s24956_s1] ss:$0 sm:$0xff] (!%p20470_p4) }
  0x15   : > { %s21019_s29 = sshll.u32 %s443_s10, 4  ;;  %s21020_s30 = sshll.u32 %s443_s10, 9  ;;  %v20472_v11 = vld [vmem:[%s24957_s2] ss:$0 sm:$0xff] (!%p20470_p4) }
  0x16   : > { %s22152_s14 = scalar_lea.vmem %s24960_s5, %s21019_s29  ;;  %s22157_s17 = scalar_lea.vmem %s24961_s6, %s21020_s30 }
  0x17   : > { %s22162_s23 = scalar_lea.vmem %s24962_s7, %s21019_s29  ;;  %s21021_s24 = sshll.u32 %s443_s10, 10  ;;  %502 = vperm.xlu1 (!%p20470_p4), %21628, %v479_v4   ;;  %492 = vperm.xlu0 (!%p20470_p4), %21627, %v477_v5  }
  0x18   : > { %s22167_s27 = scalar_lea.vmem %s24963_s8, %s21021_s24 }
  0x1b   : > { %512 = vperm.xlu1 %21628, %v481_v6   ;;  %507 = vperm.xlu0 %21627, %v480_v7  }
  0x1f   : > { %522 = vperm.xlu1 %21628, %v483_v8   ;;  %517 = vperm.xlu0 %21627, %v482_v9  }
  0x92   : > { %v498_v12 = vpop.permute.xlu1 %497  ;;  %v488_v13 = vpop.permute.xlu0 %487 }
  0x93   : > { %v533_v14 = vmul.f32 %v20471_v10, %v498_v12  ;;  %v531_v15 = vmul.f32 %v20471_v10, %v488_v13 }
  0x95   : > { %v548_v16 = vadd.f32 %v20472_v11, %v533_v14  ;;  %v546_v17 = vadd.f32 %v20472_v11, %v531_v15 }
  0x96   : > { %v503_v18 = vpop.permute.xlu1 %502  ;;  %v493_v19 = vpop.permute.xlu0 %492 }
  0x97   : > { %557 = vst.msk [vmem:[#allocation2 + $0x4] sm:$0x3] %vm554_vm0, %v548_v16  ;;  %555 = vst.msk [vmem:[#allocation2] sm:$0x3] %vm554_vm0, %v546_v17  ;;  %v534_v20 = vmul.f32 %v20471_v10, %v503_v18  ;;  %v532_v21 = vmul.f32 %v20471_v10, %v493_v19 }
  0x99   : > { %v549_v22 = vadd.f32 %v20472_v11, %v534_v20  ;;  %v547_v23 = vadd.f32 %v20472_v11, %v532_v21 }
  0x9a   : > { %v513_v24 = vpop.permute.xlu1 %512  ;;  %v508_v25 = vpop.permute.xlu0 %507 }
  0x9b   : > { %558 = vst.msk [vmem:[#allocation2 + $0x6] sm:$0x3] %vm554_vm0, %v549_v22  ;;  %556 = vst.msk [vmem:[#allocation2 + $0x2] sm:$0x3] %vm554_vm0, %v547_v23  ;;  %v536_v26 = vmul.f32 %v20471_v10, %v513_v24  ;;  %v535_v27 = vmul.f32 %v20471_v10, %v508_v25 }
  0x9d   : > { %v551_v28 = vadd.f32 %v20472_v11, %v536_v26  ;;  %v550_v29 = vadd.f32 %v20472_v11, %v535_v27 }
  0x9e   : > { %v523_v30 = vpop.permute.xlu1 %522  ;;  %v518_v31 = vpop.permute.xlu0 %517 }
  0x9f   : > { %560 = vst.msk [vmem:[#allocation2 + $0xa] sm:$0x3] %vm554_vm0, %v551_v28  ;;  %559 = vst.msk [vmem:[#allocation2 + $0x8] sm:$0x3] %vm554_vm0, %v550_v29  ;;  %v538_v32 = vmul.f32 %v20471_v10, %v523_v30  ;;  %v537_v33 = vmul.f32 %v20471_v10, %v518_v31 }
  0xa1   : > { %v553_v34 = vadd.f32 %v20472_v11, %v538_v32  ;;  %v552_v35 = vadd.f32 %v20472_v11, %v537_v33 }
  0xa3   : > { %562 = vst.msk [vmem:[#allocation2 + $0xe] sm:$0x3] %vm554_vm0, %v553_v34  ;;  %561 = vst.msk [vmem:[#allocation2 + $0xc] sm:$0x3] %vm554_vm0, %v552_v35 }
  0xa4 PF: > { %v22209_v36 = vld [vmem:[%s22152_s14 + $0x8] sm:$0x1]  ;;  %v604_v37 = vlaneseq  ;;  %v21689_v38 = vld [vmem:[%s22142_s25 + $0x4] ss:$8 sps:$4 sm:$0xff]   ;;  %v22045_v40 = vmov 0   ;;  %s22048_s21 = smov 64  }
  0xa5   : > { %25030 = vst [vmem:[#allocation4_spill] sm:$0xff] %v22209_v36  ;;  %v21691_v39 = vld [vmem:[%s22142_s25] ss:$8 sps:$4 sm:$0xff]   ;;  %722 = vmatprep.mubr.bf16.mxu0 %v22045_v40  ;;  %v21692_v41 = vld [vmem:[%s22142_s25 + $0x14] ss:$8 sps:$4 sm:$0xff]   ;;  %690 = vmatprep.subr.bf16.mxu0 %v21689_v38  ;;  %vm686_vm1 = vcmask 523264  }
  0xa6   : > { %v21694_v42 = vld [vmem:[%s22142_s25 + $0x10] ss:$8 sps:$4 sm:$0xff]   ;;  %691 = vmatpush1.bf16.msra.mxu0 %v21691_v39  ;;  %v22046_v43 = vmov 1966171168   ;;  %v22215_v45 = vshrl.u32 %v604_v37, 7  ;;  %v22224_v1 = vld [vmem:[%s22152_s14] sm:$0xff] }
  0xa7   : > { %v602_v44 = vunpack.c.l.s4 %v22046_v43  ;;  %692 = vmatprep.subr.bf16.mxu0 %v21692_v41  ;;  %v21695_v46 = vld [vmem:[%s22142_s25 + $0x24] ss:$8 sps:$4 sm:$0xff]   ;;  %v563_v47 = vld [vmem:[#allocation2] sm:$0x3]  ;;  %v22047_v48 = vmov 1983009808  }
  0xa8   : > { %25031 = vst [vmem:[#allocation5_spill] sm:$0xff] %v22215_v45  ;;  %v740_v49 = vunpack.c.l.s4 %v22047_v48  ;;  %v21697_v50 = vld [vmem:[%s22142_s25 + $0x20] ss:$8 sps:$4 sm:$0xff]   ;;  %v565_v52 = vld [vmem:[#allocation2 + $0x4] sm:$0x3]  ;;  %25033 = vst [vmem:[#allocation7_spill] sm:$0xff] %v22224_v1 }
  0xa9   : > { %v564_v51 = vld [vmem:[#allocation2 + $0x2] sm:$0x3]  ;;  %v566_v53 = vld [vmem:[#allocation2 + $0x6] sm:$0x3]  ;;  %v603_v54 = vunpack.c.0.s8 %v602_v44  ;;  %v567_v55 = vld [vmem:[#allocation2 + $0x8] sm:$0x3] }
  0xaa   : > { %v568_v56 = vld [vmem:[#allocation2 + $0xa] sm:$0x3]  ;;  %v569_v57 = vld [vmem:[#allocation2 + $0xc] sm:$0x3]  ;;  %v20473_v58 = vpack.c.bf16 %v564_v51, %v563_v47  ;;  %v20474_v59 = vpack.c.bf16 %v566_v53, %v565_v52  ;;  %v741_v60 = vunpack.c.0.s8 %v740_v49  ;;  %693 = vmatpush1.bf16.msra.mxu0 %v21694_v42  ;;  %v21698_v61 = vld [vmem:[%s22142_s25 + $0x34] ss:$8 sps:$4 sm:$0xff]  }
  0xab   : > { %v570_v62 = vld [vmem:[#allocation2 + $0xe] sm:$0x3]  ;;  %v20475_v63 = vpack.c.bf16 %v568_v56, %v567_v55  ;;  %v22221_v0 = vsub.s32 %v603_v54, %v22215_v45  ;;  %694 = vmatprep.subr.bf16.mxu0 %v21695_v46  ;;  %v22230_v4 = vsub.s32 1, %v22215_v45  ;;  %v21700_v10 = vld [vmem:[%s22142_s25 + $0x30] ss:$8 sps:$4 sm:$0xff]   ;;  %vm22051_vm2 = vmmov 0  }
  0xac   : > { %v20476_v2 = vpack.c.bf16 %v570_v62, %v569_v57  ;;  %v22227_v3 = vsub.s32 %v741_v60, %v22215_v45  ;;  %s22053_s25 = smov 48   ;;  %vm2129_vm3 = vcmask 130048   ;;  %vm2295_vm4 = vcmask 64512   ;;  %s22054_s24 = smov 112  }
  0xad   : > { %25032 = vst [vmem:[#allocation6_spill] sm:$0xff] %v22221_v0  ;;  %25034 = vst [vmem:[#allocation8_spill] sm:$0xff] %v22230_v4  ;;  %v607_v5 = vrot.slane %v20473_v58, %v22221_v0  ;;  %v614_v6 = vrot.slane %v20474_v59, %v22221_v0  ;;  %v621_v7 = vrot.slane %v20475_v63, %v22221_v0  ;;  %s22055_s22 = smov 32   ;;  %s22056_s26 = smov 96   ;;  %vm12614_vm5 = vcmask 261120  }
  0xae   : > { %v628_v8 = vrot.slane %v20476_v2, %v22221_v0  ;;  %v796_v9 = vrot.slane %v22224_v1, %v22230_v4  ;;  %695 = vmatpush1.bf16.msra.mxu0 %v21697_v50  ;;  %s22057_s12 = smov 16   ;;  %s22058_s13 = smov 80   ;;  %vm12623_vm6 = vcmask 392192   ;;  %vm12840_vm7 = vcmask 517120  }
  0xaf   : > { %v629_v11 = vcombine.low %v607_v5, %v614_v6  ;;  %696 = vmatprep.subr.bf16.mxu0 %v21698_v61  ;;  %p20535_p5 = scmp.ge.s32.totalorder %s22133_s20, 1 }
  0xb0   : > { %v630_v12 = vcombine.low %v621_v7, %v628_v8  ;;  %v804_v13 = vrot.slane %v796_v9, %v22227_v3 }
  0xb1   : > { %v637_v14 = vrot.slane %v629_v11, %v22221_v0 }
  0xb2   : > { %v644_v15 = vrot.slane %v630_v12, %v22221_v0  ;;  %805 = vrot.lane.b32.xlu0 %v804_v13, %s22048_s21  ;;  %697 = vmatpush1.bf16.msra.mxu0 %v21700_v10 }
  0xb4   : > { %v645_v16 = vcombine.low %v637_v14, %v644_v15  ;;  %v22049_v14 = vmov 1934713408  }
  0xb5   : > { %v846_v15 = vunpack.c.l.s4 %v22049_v14 }
  0xb6   : > { %20485 = vmatmul.mubr.msk.bf16.vlgmr.msra.gmra.mrb[0].mxu0 %vm686_vm1, %v645_v16 }
 0x124   : > { %v806_v27 = vpop.permute.xlu0 %805 }
 0x189   : > { %v724_v17 = vpop.f32.mrb[0].mxu0 }
 0x18a   : > { %v726_v18 = vpop.f32.mrb[1].mxu0 }
 0x18b   : > { %v737_v19 = vcombine.low %v724_v17, %v726_v18  ;;  %v738_v20 = vcombine.high %v724_v17, %v726_v18  ;;  %v728_v21 = vpop.f32.mrb[2].mxu0 }
 0x18c   : > { %v730_v22 = vpop.f32.mrb[3].mxu0 }
 0x18d   : > { %v22245_v23 = vrot.slane %v737_v19, %v22227_v3  ;;  %v22248_v24 = vrot.slane %v738_v20, %v22227_v3  ;;  %v755_v25 = vcombine.low %v728_v21, %v730_v22  ;;  %v756_v26 = vcombine.high %v728_v21, %v730_v22 }
 0x18e   : > { %v847_v20 = vunpack.c.0.s8 %v846_v15 }
 0x18f   : > { %v22252_v28 = vcombine.high %v22245_v23, %v22245_v23  ;;  %v22256_v29 = vcombine.high %v22248_v24, %v22248_v24  ;;  %v22259_v30 = vrot.slane %v755_v25, %v22227_v3  ;;  %v810_v31 = vadd.f32 %v806_v27, %v22248_v24 }
 0x190   : > { %v808_v32 = vadd.f32 %v806_v27, %v22245_v23  ;;  %v22264_v33 = vrot.slane %v756_v26, %v22227_v3 }
 0x191   : > { %v811_v34 = vadd.f32 %v806_v27, %v22256_v29  ;;  %v22269_v35 = vcombine.high %v22259_v30, %v22259_v30  ;;  %v22272_v37 = vrot.slane %v810_v31, %v22227_v3  ;;  %v809_v39 = vadd.f32 %v806_v27, %v22252_v28 }
 0x192   : > { %v22275_v38 = vrot.slane %v808_v32, %v22227_v3  ;;  %v22284_v40 = vcombine.high %v22264_v33, %v22264_v33  ;;  %v812_v43 = vadd.f32 %v806_v27, %v22259_v30  ;;  %v814_v48 = vadd.f32 %v806_v27, %v22264_v33 }
 0x193   : > { %25035 = vst [vmem:[#allocation9_spill] sm:$0xff] %v22272_v37  ;;  %948 = vrot.lane.b32.xlu1 %v22272_v37, %s22048_s21  ;;  %v22287_v41 = vrot.slane %v811_v34, %v22227_v3  ;;  %v22290_v42 = vrot.slane %v809_v39, %v22227_v3  ;;  %v813_v44 = vadd.f32 %v806_v27, %v22269_v35 }
 0x194   : > { %25036 = vst [vmem:[#allocation10_spill] sm:$0xff] %v22275_v38  ;;  %944 = vrot.lane.b32.xlu0 %v22275_v38, %s22048_s21  ;;  %v22299_v46 = vrot.slane %v812_v43, %v22227_v3  ;;  %v815_v49 = vadd.f32 %v806_v27, %v22284_v40  ;;  %v22311_v50 = vrot.slane %v814_v48, %v22227_v3 }
 0x195   : > { %25037 = vst [vmem:[#allocation11_spill] sm:$0xff] %v22287_v41  ;;  %25038 = vst [vmem:[#allocation12_spill] sm:$0xff] %v22290_v42  ;;  %v22302_v47 = vrot.slane %v813_v44, %v22227_v3  ;;  %v22337_v43 = vsub.s32 %v847_v20, %v22215_v45 }
 0x196   : > { %25039 = vst [vmem:[#allocation13_spill] sm:$0xff] %v22299_v46  ;;  %25041 = vst [vmem:[#allocation15_spill] sm:$0xff] %v22311_v50  ;;  %v22314_v51 = vrot.slane %v815_v49, %v22227_v3 }
 0x197   : > { %946 = vrot.lane.b32.xlu1 %v22290_v42, %s22048_s21  ;;  %25040 = vst [vmem:[#allocation14_spill] sm:$0xff] %v22302_v47 }
 0x198   : > { %950 = vrot.lane.b32.xlu0 %v22287_v41, %s22048_s21  ;;  %25042 = vst [vmem:[#allocation16_spill] sm:$0xff] %v22314_v51 }
 0x19b   : > { %952 = vrot.lane.b32.xlu1 %v22299_v46, %s22048_s21 }
 0x19c   : > { %954 = vrot.lane.b32.xlu0 %v22302_v47, %s22048_s21 }
 0x19f   : > { %956 = vrot.lane.b32.xlu1 %v22311_v50, %s22048_s21 }
 0x1a0   : > { %958 = vrot.lane.b32.xlu0 %v22314_v51, %s22048_s21 }
 0x205   : > { %v949_v52 = vpop.permute.xlu1 %948 }
 0x206   : > { %v945_v53 = vpop.permute.xlu0 %944  ;;  %1032 = vxpose.xlu0.b32.start.end [1/1] (short) (narrow) %v949_v52, 16 }
 0x207   : > { %968 = vxpose.xlu1.b32.start.end [1/1] (short) (narrow) %v945_v53, 16 }
 0x209   : > { %v947_v54 = vpop.permute.xlu1 %946 }
 0x20a   : > { %v951_v55 = vpop.permute.xlu0 %950 }
 0x20b   : > { %1000 = vxpose.xlu0.b32.start.end [1/1] (short) (narrow) %v947_v54, 16 }
 0x20d   : > { %v953_v56 = vpop.permute.xlu1 %952 }
 0x20e   : > { %1096 = vxpose.xlu1.b32.start.end [1/1] (short) (narrow) %v953_v56, 16  ;;  %v955_v58 = vpop.permute.xlu0 %954 }
 0x210   : > { %1064 = vxpose.xlu0.b32.start.end [1/1] (short) (narrow) %v951_v55, 16 }
 0x211   : > { %v957_v57 = vpop.permute.xlu1 %956 }
 0x212   : > { %v959_v59 = vpop.permute.xlu0 %958 }
 0x213   : > { %1160 = vxpose.xlu1.b32.start.end [1/1] (short) (narrow) %v957_v57, 16 }
 0x215   : > { %1128 = vxpose.xlu0.b32.start.end [1/1] (short) (narrow) %v955_v58, 16 }
 0x21a   : > { %1192 = vxpose.xlu0.b32.start.end [1/1] (short) (narrow) %v959_v59, 16 }
 0x286   : > { %v1048_v60 = vpop.trf.xlu0 }
 0x287   : > { %v984_v62 = vpop.trf.xlu1 }
 0x288   : > { %v1224_v16 = vcombine.low %v984_v62, %v1048_v60  ;;  %v1225_v39 = vcombine.high %v984_v62, %v1048_v60 }
 0x28a   : > { %v22320_v61 = vpop.trf.xlu0  ;;  %v1232_v21 = vrot.slane %v1224_v16, %v22227_v3  ;;  %v1239_v58 = vrot.slane %v1225_v39, %v22227_v3 }
 0x28b   : > { %v22322_v2 = vpop.trf.xlu1 }
 0x28c   : > { %v1360_v15 = vcombine.low %v22322_v2, %v22320_v61 }
 0x28e   : > { %v1016_v63 = vpop.trf.xlu0 }
 0x28f   : > { %v1112_v6 = vpop.trf.xlu1 }
 0x292   : > { %v22324_v5 = vpop.trf.xlu0 }
 0x293   : > { %v22328_v9 = vpop.trf.xlu1 }
 0x296   : > { %v1080_v7 = vpop.trf.xlu0 }
 0x297   : > { %v1240_v11 = vcombine.low %v1016_v63, %v1080_v7  ;;  %v1176_v12 = vpop.trf.xlu1  ;;  %v1241_v26 = vcombine.high %v1016_v63, %v1080_v7 }
 0x298   : > { %v1256_v18 = vcombine.low %v1112_v6, %v1176_v12  ;;  %v1257_v27 = vcombine.high %v1112_v6, %v1176_v12 }
 0x299   : > { %v1248_v17 = vrot.slane %v1240_v11, %v22227_v3  ;;  %v1255_v53 = vrot.slane %v1241_v26, %v22227_v3 }
 0x29a   : > { %v22326_v8 = vpop.trf.xlu0  ;;  %v1264_v31 = vrot.slane %v1256_v18, %v22227_v3  ;;  %v1271_v54 = vrot.slane %v1257_v27, %v22227_v3  ;;  %v1368_v27 = vrot.slane %v1360_v15, %v22227_v3 }
 0x29b   : > { %v1288_v34 = vcombine.low %v1232_v21, %v1248_v17  ;;  %v1289_v57 = vcombine.high %v1232_v21, %v1248_v17  ;;  %v1177_v59 = vpop.trf.xlu1  ;;  %v1304_v14 = vcombine.low %v1239_v58, %v1255_v53  ;;  %v1305_v21 = vcombine.high %v1239_v58, %v1255_v53 }
 0x29c   : > { %v1392_v11 = vcombine.low %v22328_v9, %v1177_v59 }
 0x29d   : > { %v1296_v55 = vrot.slane %v1288_v34, %v22337_v43  ;;  %v1303_v12 = vrot.slane %v1289_v57, %v22337_v43  ;;  %v1312_v26 = vrot.slane %v1304_v14, %v22337_v43  ;;  %v1319_v53 = vrot.slane %v1305_v21, %v22337_v43 }
 0x29e   : > { %v1144_v10 = vpop.trf.xlu0 }
 0x2a2   : > { %v22330_v13 = vpop.trf.xlu0 }
 0x2a6   : > { %v1208_v19 = vpop.trf.xlu0 }
 0x2a7   : > { %v1272_v22 = vcombine.low %v1144_v10, %v1208_v19  ;;  %v1273_v25 = vcombine.high %v1144_v10, %v1208_v19  ;;  %v1376_v10 = vcombine.low %v22324_v5, %v22326_v8 }
 0x2a9   : > { %v1280_v32 = vrot.slane %v1272_v22, %v22227_v3  ;;  %v1287_v44 = vrot.slane %v1273_v25, %v22227_v3  ;;  %v1384_v22 = vrot.slane %v1376_v10, %v22227_v3  ;;  %v1400_v25 = vrot.slane %v1392_v11, %v22227_v3 }
 0x2aa   : > { %v1209_v48 = vpop.trf.xlu0 }
 0x2ab   : > { %v1320_v49 = vcombine.low %v1264_v31, %v1280_v32  ;;  %v1321_v52 = vcombine.high %v1264_v31, %v1280_v32  ;;  %v1408_v60 = vcombine.low %v22330_v13, %v1209_v48  ;;  %v1336_v7 = vcombine.low %v1271_v54, %v1287_v44 }
 0x2ac   : > { %v1337_v16 = vcombine.high %v1271_v54, %v1287_v44  ;;  %v1409_v31 = vcombine.high %v22330_v13, %v1209_v48  ;;  %v1424_v54 = vcombine.low %v1368_v27, %v1384_v22 }
 0x2ad   : > { %v1328_v56 = vrot.slane %v1320_v49, %v22337_v43  ;;  %v1335_v6 = vrot.slane %v1321_v52, %v22337_v43  ;;  %v1416_v17 = vrot.slane %v1408_v60, %v22227_v3  ;;  %v1344_v20 = vrot.slane %v1336_v7, %v22337_v43 }
 0x2ae   : > { %v1351_v39 = vrot.slane %v1337_v16, %v22337_v43  ;;  %v1377_v49 = vcombine.high %v22324_v5, %v22326_v8  ;;  %v1393_v52 = vcombine.high %v22328_v9, %v1177_v59  ;;  %v1423_v13 = vrot.slane %v1409_v31, %v22227_v3 }
 0x2af   : > { %v1353_v62 = vcombine.high %v1296_v55, %v1328_v56  ;;  %v1352_v63 = vcombine.low %v1296_v55, %v1328_v56  ;;  %v1355_v18 = vcombine.high %v1303_v12, %v1335_v6  ;;  %v1354_v19 = vcombine.low %v1303_v12, %v1335_v6 }
 0x2b0   : > { %v1357_v32 = vcombine.high %v1312_v26, %v1344_v20  ;;  %v1356_v34 = vcombine.low %v1312_v26, %v1344_v20  ;;  %v1456_v44 = vcombine.low %v1400_v25, %v1416_v17  ;;  %v1361_v55 = vcombine.high %v22322_v2, %v22320_v61 }
 0x2b1   : > { %1528 = vxpose.xlu0.b32.start.end [1/1] (short) (narrow) %v1353_v62, 8  ;;  %1496 = vxpose.xlu1.b32.start.end [1/1] (short) (narrow) %v1352_v63, 8  ;;  %v1359_v48 = vcombine.high %v1319_v53, %v1351_v39  ;;  %v1358_v56 = vcombine.low %v1319_v53, %v1351_v39  ;;  %v1457_v58 = vcombine.high %v1400_v25, %v1416_v17  ;;  %v24969_v25 = vmov 0.0|0.0  }
 0x2b2   : > { %v1464_v57 = vrot.slane %v1456_v44, %v22337_v43  ;;  %v1391_v60 = vrot.slane %v1377_v49, %v22227_v3  ;;  %v1407_v5 = vrot.slane %v1393_v52, %v22227_v3  ;;  %v1432_v8 = vrot.slane %v1424_v54, %v22337_v43  ;;  %21563 = vmatprep.subr.bf16.mxu0 %v24969_v25 }
 0x2b3   : > { %v1425_v9 = vcombine.high %v1368_v27, %v1384_v22  ;;  %v1375_v59 = vrot.slane %v1361_v55, %v22227_v3  ;;  %v1471_v2 = vrot.slane %v1457_v58, %v22337_v43  ;;  %v24967_v26 = vmov 0.0  }
 0x2b4   : > { %v1489_v62 = vcombine.high %v1432_v8, %v1464_v57  ;;  %v1488_v61 = vcombine.low %v1432_v8, %v1464_v57  ;;  %v1472_v63 = vcombine.low %v1407_v5, %v1423_v13  ;;  %v1473_v14 = vcombine.high %v1407_v5, %v1423_v13  ;;  %21440 = vmatprep.mubr.msk.f32.mxu0 %vm22051_vm2, %v24967_v26 }
 0x2b5   : > { %1592 = vxpose.xlu0.b32.start.end [1/1] (short) (narrow) %v1355_v18, 8  ;;  %1560 = vxpose.xlu1.b32.start.end [1/1] (short) (narrow) %v1354_v19, 8  ;;  %v1439_v6 = vrot.slane %v1425_v9, %v22337_v43  ;;  %v1440_v7 = vcombine.low %v1375_v59, %v1391_v60  ;;  %v1441_v16 = vcombine.high %v1375_v59, %v1391_v60  ;;  %v22399_v27 = vsub.s32 2, %v22215_v45 }
 0x2b6   : > { %v1480_v12 = vrot.slane %v1472_v63, %v22337_v43  ;;  %v1487_v19 = vrot.slane %v1473_v14, %v22337_v43  ;;  %v822_v39 = vrot.slane %v22248_v24, 2  ;;  %v823_v49 = vrot.slane %v22256_v29, 2 }
 0x2b7   : > { %v1491_v10 = vcombine.high %v1439_v6, %v1471_v2  ;;  %v1490_v11 = vcombine.low %v1439_v6, %v1471_v2  ;;  %v1448_v15 = vrot.slane %v1440_v7, %v22337_v43  ;;  %v1455_v20 = vrot.slane %v1441_v16, %v22337_v43  ;;  %25043 = vst [vmem:[#allocation17_spill] sm:$0xff] %v22399_v27 }
 0x2b8   : > { %v819_v31 = vrot.slane %v22224_v1, %v22399_v27  ;;  %v824_v53 = vrot.slane %v22259_v30, 2  ;;  %v821_v54 = vrot.slane %v22252_v28, 2  ;;  %v827_v60 = vrot.slane %v22284_v40, 2 }
 0x2b9   : > { %1656 = vxpose.xlu0.b32.start.end [1/1] (short) (narrow) %v1357_v32, 8  ;;  %1624 = vxpose.xlu1.b32.start.end [1/1] (short) (narrow) %v1356_v34, 8  ;;  %v1493_v17 = vcombine.high %v1448_v15, %v1480_v12  ;;  %v1492_v18 = vcombine.low %v1448_v15, %v1480_v12  ;;  %v1495_v21 = vcombine.high %v1455_v20, %v1487_v19  ;;  %v820_v32 = vrot.slane %v22245_v23, 2 }
 0x2ba   : > { %v1494_v22 = vcombine.low %v1455_v20, %v1487_v19  ;;  %v22408_v44 = vadd.f32 %v822_v39, %v819_v31  ;;  %v22412_v52 = vadd.f32 %v823_v49, %v819_v31  ;;  %v22417_v55 = vadd.f32 %v824_v53, %v819_v31 }
 0x2bb   : > { %v22404_v34 = vadd.f32 %v820_v32, %v819_v31  ;;  %v22419_v13 = vadd.f32 %v821_v54, %v819_v31  ;;  %v22432_v5 = vadd.f32 %v827_v60, %v819_v31  ;;  %v22436_v7 = vsub.s32 0, %v22215_v45 }
 0x2bd   : > { %1720 = vxpose.xlu0.b32.start.end [1/1] (short) (narrow) %v1359_v48, 8  ;;  %1688 = vxpose.xlu1.b32.start.end [1/1] (short) (narrow) %v1358_v56, 8  ;;  %v826_v48 = vrot.slane %v22264_v33, 2  ;;  %v825_v56 = vrot.slane %v22269_v35, 2  ;;  %25044 = vst [vmem:[#allocation18_spill] sm:$0xff] %v22436_v7  ;;  %v784_v12 = vrot.slane %v22224_v1, %v22436_v7 }
 0x2bf   : > { %v22425_v57 = vadd.f32 %v826_v48, %v819_v31  ;;  %v22427_v58 = vadd.f32 %v825_v56, %v819_v31  ;;  %v22444_v31 = vadd.f32 %v784_v12, %v22284_v40  ;;  %v22447_v32 = vadd.f32 %v784_v12, %v22252_v28 }
 0x2c0   : > { %v22450_v39 = vadd.f32 %v784_v12, %v22256_v29  ;;  %v22453_v49 = vadd.f32 %v784_v12, %v22259_v30  ;;  %v22456_v53 = vadd.f32 %v784_v12, %v22264_v33  ;;  %v22465_v30 = vadd.f32 %v784_v12, %v22245_v23 }
 0x2c1   : > { %1784 = vxpose.xlu0.b32.start.end [1/1] (short) (narrow) %v1489_v62, 8  ;;  %1752 = vxpose.xlu1.b32.start.end [1/1] (short) (narrow) %v1488_v61, 8  ;;  %25046 = vst [vmem:[#allocation20_spill] sm:$0xff] %v22444_v31  ;;  %25047 = vst [vmem:[#allocation21_spill] sm:$0xff] %v22447_v32  ;;  %v22468_v33 = vadd.f32 %v784_v12, %v22248_v24 }
 0x2c5   : > { %1848 = vxpose.xlu0.b32.start.end [1/1] (short) (narrow) %v1491_v10, 8  ;;  %1816 = vxpose.xlu1.b32.start.end [1/1] (short) (narrow) %v1490_v11, 8 }
 0x2c9   : > { %1912 = vxpose.xlu0.b32.start.end [1/1] (short) (narrow) %v1493_v17, 8  ;;  %1880 = vxpose.xlu1.b32.start.end [1/1] (short) (narrow) %v1492_v18, 8 }
 0x2cd   : > { %1976 = vxpose.xlu0.b32.start.end [1/1] (short) (narrow) %v1495_v21, 8  ;;  %1944 = vxpose.xlu1.b32.start.end [1/1] (short) (narrow) %v1494_v22, 8  ;;  %v22441_v22 = vadd.f32 %v784_v12, %v22269_v35 }
 0x2cf   : > { %25045 = vst [vmem:[#allocation19_spill] sm:$0xff] %v22441_v22 }
 0x2eb   : > { %3824 = vrot.lane.b32.xlu1 %v22275_v38, %s22053_s25 }
 0x2ef   : > { %3828 = vrot.lane.b32.xlu1 %v22272_v37, %s22053_s25 }
 0x2f3   : > { %3830 = vrot.lane.b32.xlu1 %v22287_v41, %s22053_s25 }
 0x2f6   : > { %3826 = vrot.lane.b32.xlu0 %v22290_v42, %s22053_s25 }
 0x2f7   : > { %3832 = vrot.lane.b32.xlu1 %v22299_v46, %s22053_s25 }
 0x2fa   : > { %3836 = vrot.lane.b32.xlu0 %v22311_v50, %s22053_s25 }
 0x2fb   : > { %3834 = vrot.lane.b32.xlu1 %v22302_v47, %s22053_s25 }
 0x2ff   : > { %3838 = vrot.lane.b32.xlu1 %v22314_v51, %s22053_s25 }
 0x318   : > { %2318 = vxpose.xlu0.b32.start.end [1/1] (short) (narrow) %v22404_v34, 16 }
 0x31d   : > { %2382 = vxpose.xlu0.b32.start.end [1/1] (short) (narrow) %v22408_v44, 16 }
 0x322   : > { %2414 = vxpose.xlu0.b32.start.end [1/1] (short) (narrow) %v22412_v52, 16 }
 0x327   : > { %2446 = vxpose.xlu0.b32.start.end [1/1] (short) (narrow) %v22417_v55, 16 }
 0x328   : > { %2350 = vxpose.xlu1.b32.start.end [1/1] (short) (narrow) %v22419_v13, 16 }
 0x32c   : > { %2510 = vxpose.xlu0.b32.start.end [1/1] (short) (narrow) %v22425_v57, 16 }
 0x32d   : > { %2478 = vxpose.xlu1.b32.start.end [1/1] (short) (narrow) %v22427_v58, 16 }
 0x331   : > { %v1512_v8 = vpop.trf.xlu1  ;;  %v1544_v9 = vpop.trf.xlu0 }
 0x332   : > { %2542 = vxpose.xlu1.b32.start.end [1/1] (short) (narrow) %v22432_v5, 16 }
 0x335   : > { %v1576_v59 = vpop.trf.xlu1  ;;  %v1608_v62 = vpop.trf.xlu0 }
 0x336   : > { %v2008_v14 = vcombine.low %v1512_v8, %v1576_v59  ;;  %v2016_v15 = vcombine.low %v1544_v9, %v1608_v62  ;;  %v862_v8 = vcombine.low %v22453_v49, %v22441_v22  ;;  %v871_v9 = vcombine.low %v22456_v53, %v22444_v31 }
 0x337   : > { %v844_v59 = vcombine.low %v22465_v30, %v22447_v32  ;;  %v853_v62 = vcombine.low %v22468_v33, %v22450_v39 }
 0x338   : > { %v2015_v54 = vrot.slane %v2008_v14, %v22227_v3  ;;  %v2023_v35 = vrot.slane %v2016_v15, %v22227_v3  ;;  %v878_v12 = vrot.slane %v871_v9, %v22337_v43 }
 0x339   : > { %v1640_v61 = vpop.trf.xlu1  ;;  %v1672_v2 = vpop.trf.xlu0 }
 0x33d   : > { %v1704_v63 = vpop.trf.xlu1  ;;  %v1736_v6 = vpop.trf.xlu0 }
 0x33e   : > { %v2024_v18 = vcombine.low %v1640_v61, %v1704_v63  ;;  %v2032_v19 = vcombine.low %v1672_v2, %v1736_v6  ;;  %v2040_v61 = vcombine.low %v2015_v54, %v2023_v35 }
 0x340   : > { %v2031_v40 = vrot.slane %v2024_v18, %v22227_v3  ;;  %v2039_v28 = vrot.slane %v2032_v19, %v22227_v3  ;;  %v2047_v18 = vrot.slane %v2040_v61, %v22337_v43 }
 0x341   : > { %v1768_v10 = vpop.trf.xlu1  ;;  %v1800_v11 = vpop.trf.xlu0 }
 0x342   : > { %v2048_v23 = vcombine.low %v2031_v40, %v2039_v28 }
 0x344   : > { %v2055_v19 = vrot.slane %v2048_v23, %v22337_v43 }
 0x345   : > { %v1832_v16 = vpop.trf.xlu1  ;;  %v1864_v17 = vpop.trf.xlu0 }
 0x346   : > { %v2058_v20 = vcombine.low %v1768_v10, %v1832_v16  ;;  %v2066_v21 = vcombine.low %v1800_v11, %v1864_v17  ;;  %v869_v11 = vrot.slane %v862_v8, %v22337_v43  ;;  %v851_v16 = vrot.slane %v844_v59, %v22337_v43 }
 0x347   : > { %v860_v17 = vrot.slane %v853_v62, %v22337_v43  ;;  %v2056_v40 = vcombine.low %v2047_v18, %v2055_v19  ;;  %v2057_v62 = vcombine.high %v2047_v18, %v2055_v19 }
 0x348   : > { %v2065_v60 = vrot.slane %v2058_v20, %v22227_v3  ;;  %v2073_v29 = vrot.slane %v2066_v21, %v22227_v3  ;;  %v2113_v54 = vcombine.low %v869_v11, %v878_v12 }
 0x349   : > { %v1896_v48 = vpop.trf.xlu1  ;;  %v1928_v56 = vpop.trf.xlu0  ;;  %v20487_v59 = vcombine.high %v851_v16, %v860_v17 }
 0x34a   : > { %v2090_v6 = vcombine.low %v2065_v60, %v2073_v29  ;;  %v2127_v28 = vrot.slane %v2113_v54, %v22227_v3  ;;  %v20488_v60 = vcombine.high %v869_v11, %v878_v12 }
 0x34c   : > { %v2097_v20 = vrot.slane %v2090_v6, %v22337_v43  ;;  %v2214_v6 = vrot.slane %v20487_v59, %v22227_v3 }
 0x34d   : > { %v1960_v2 = vpop.trf.xlu1  ;;  %v1992_v63 = vpop.trf.xlu0 }
 0x34e   : > { %v2074_v10 = vcombine.low %v1896_v48, %v1960_v2  ;;  %v2082_v24 = vcombine.low %v1928_v56, %v1992_v63  ;;  %v2112_v48 = vcombine.low %v851_v16, %v860_v17  ;;  %v2221_v2 = vrot.slane %v20488_v60, %v22227_v3 }
 0x350   : > { %v2081_v14 = vrot.slane %v2074_v10, %v22227_v3  ;;  %v2089_v15 = vrot.slane %v2082_v24, %v22227_v3  ;;  %v2120_v9 = vrot.slane %v2112_v48, %v22227_v3  ;;  %v2222_v10 = vcombine.low %v2214_v6, %v2221_v2 }
 0x352   : > { %v2098_v21 = vcombine.low %v2081_v14, %v2089_v15  ;;  %v2128_v61 = vcombine.low %v2120_v9, %v2127_v28 }
 0x354   : > { %v2105_v35 = vrot.slane %v2098_v21, %v22337_v43 }
 0x356   : > { %v2106_v56 = vcombine.low %v2097_v20, %v2105_v35  ;;  %v2107_v29 = vcombine.high %v2097_v20, %v2105_v35 }
 0x358   : > { %v21564_v8 = vpack.c.bf16 %v2106_v56, %v2056_v40  ;;  %v21567_v63 = vpack.c.bf16 %v2107_v29, %v2057_v62 }
 0x35a   : > { %21565 = vmatpush3.bf16.msra.mxu0 %v21564_v8 }
 0x35b   : > { %21566 = vmatprep.subr.bf16.mxu0 %v24969_v25 }
 0x35d   : > { %v3825_v23 = vpop.permute.xlu1 %3824  ;;  %21441 = vmatmul.mubr.msk.f32.vlgmr.msra.gmra.mrb[4].mxu0 %vm2129_vm3, %v2128_v61 }
 0x35e   : > { %3848 = vxpose.xlu1.b32.start.end [1/1] (short) (narrow) %v3825_v23, 16  ;;  %21568 = vmatpush3.bf16.msra.mxu0 %v21567_v63 }
 0x35f   : > { %21447 = vmatprep.mubr.msk.f32.mxu0 %vm22051_vm2, %v24967_v26  ;;  %21572 = vmatprep.subr.bf16.mxu0 %v24969_v25 }
 0x361   : > { %21448 = vmatmul.mubr.msk.f32.vlgmr.msra.gmra.mrb[6].mxu0 %vm2129_vm3, %v2222_v10  ;;  %v3829_v11 = vpop.permute.xlu1 %3828 }
 0x362   : > { %21471 = vmatprep.mubr.msk.f32.mxu0 %vm22051_vm2, %v24967_v26 }
 0x365   : > { %v3831_v12 = vpop.permute.xlu1 %3830 }
 0x368   : > { %v3827_v24 = vpop.permute.xlu0 %3826 }
 0x369   : > { %3880 = vxpose.xlu1.b32.start.end [1/1] (short) (narrow) %v3827_v24, 16  ;;  %v3833_v14 = vpop.permute.xlu1 %3832 }
 0x36c   : > { %v3837_v16 = vpop.permute.xlu0 %3836 }
 0x36d   : > { %v3835_v15 = vpop.permute.xlu1 %3834 }
 0x36e   : > { %3912 = vxpose.xlu1.b32.start.end [1/1] (short) (narrow) %v3829_v11, 16 }
 0x371   : > { %v3839_v17 = vpop.permute.xlu1 %3838 }
 0x373   : > { %3944 = vxpose.xlu1.b32.start.end [1/1] (short) (narrow) %v3831_v12, 16 }
 0x378   : > { %3976 = vxpose.xlu1.b32.start.end [1/1] (short) (narrow) %v3833_v14, 16 }
 0x37d   : > { %4008 = vxpose.xlu1.b32.start.end [1/1] (short) (narrow) %v3835_v15, 16 }
 0x382   : > { %4040 = vxpose.xlu1.b32.start.end [1/1] (short) (narrow) %v3837_v16, 16 }
 0x387   : > { %4072 = vxpose.xlu1.b32.start.end [1/1] (short) (narrow) %v3839_v17, 16 }
 0x398   : > { %v2334_v18 = vpop.trf.xlu0 }
 0x39c   : > { %v2335_v19 = vpop.trf.xlu0 }
 0x3a0   : > { %v2398_v20 = vpop.trf.xlu0 }
 0x3a1   : > { %v2574_v40 = vcombine.low %v2334_v18, %v2398_v20  ;;  %v2575_v8 = vcombine.high %v2334_v18, %v2398_v20 }
 0x3a3   : > { %v2582_v9 = vrot.slane %v2574_v40, %v22227_v3  ;;  %v2589_v6 = vrot.slane %v2575_v8, %v22227_v3 }
 0x3a4   : > { %v2399_v21 = vpop.trf.xlu0 }
 0x3a5   : > { %v2710_v63 = vcombine.low %v2335_v19, %v2399_v21 }
 0x3a7   : > { %v2718_v20 = vrot.slane %v2710_v63, %v22227_v3 }
 0x3a8   : > { %v2366_v54 = vpop.trf.xlu1  ;;  %v2430_v35 = vpop.trf.xlu0 }
 0x3a9   : > { %v2590_v28 = vcombine.low %v2366_v54, %v2430_v35  ;;  %v2591_v59 = vcombine.high %v2366_v54, %v2430_v35 }
 0x3ab   : > { %v2598_v62 = vrot.slane %v2590_v28, %v22227_v3  ;;  %v2605_v10 = vrot.slane %v2591_v59, %v22227_v3  ;;  %v2711_v59 = vcombine.high %v2335_v19, %v2399_v21 }
 0x3ac   : > { %v2367_v48 = vpop.trf.xlu1  ;;  %v2431_v56 = vpop.trf.xlu0 }
 0x3ad   : > { %v2726_v23 = vcombine.low %v2367_v48, %v2431_v56  ;;  %v2638_v12 = vcombine.low %v2582_v9, %v2598_v62  ;;  %v2639_v14 = vcombine.high %v2582_v9, %v2598_v62  ;;  %v2727_v26 = vcombine.high %v2367_v48, %v2431_v56 }
 0x3ae   : > { %v2655_v62 = vcombine.high %v2589_v6, %v2605_v10 }
 0x3af   : > { %v2734_v54 = vrot.slane %v2726_v23, %v22227_v3  ;;  %v2653_v63 = vrot.slane %v2639_v14, %v22337_v43  ;;  %v2725_v14 = vrot.slane %v2711_v59, %v22227_v3 }
 0x3b0   : > { %v2494_v60 = vpop.trf.xlu1  ;;  %v2462_v29 = vpop.trf.xlu0  ;;  %v2669_v56 = vrot.slane %v2655_v62, %v22337_v43 }
 0x3b1   : > { %v2774_v36 = vcombine.low %v2718_v20, %v2734_v54 }
 0x3b4   : > { %v2495_v61 = vpop.trf.xlu1  ;;  %v2463_v2 = vpop.trf.xlu0 }
 0x3b8   : > { %v2558_v24 = vpop.trf.xlu1  ;;  %v2526_v11 = vpop.trf.xlu0 }
 0x3b9   : > { %v2622_v15 = vcombine.low %v2494_v60, %v2558_v24  ;;  %v2623_v16 = vcombine.high %v2494_v60, %v2558_v24  ;;  %v2606_v17 = vcombine.low %v2462_v29, %v2526_v11  ;;  %v2607_v18 = vcombine.high %v2462_v29, %v2526_v11 }
 0x3ba   : > { %v2646_v29 = vrot.slane %v2638_v12, %v22337_v43 }
 0x3bb   : > { %v2630_v35 = vrot.slane %v2622_v15, %v22227_v3  ;;  %v2637_v40 = vrot.slane %v2623_v16, %v22227_v3  ;;  %v2614_v28 = vrot.slane %v2606_v17, %v22227_v3  ;;  %v2621_v8 = vrot.slane %v2607_v18, %v22227_v3 }
 0x3bc   : > { %v2559_v25 = vpop.trf.xlu1  ;;  %v2527_v9 = vpop.trf.xlu0  ;;  %v2741_v18 = vrot.slane %v2727_v26, %v22227_v3 }
 0x3bd   : > { %v2758_v60 = vcombine.low %v2495_v61, %v2559_v25  ;;  %v2742_v24 = vcombine.low %v2463_v2, %v2527_v9  ;;  %v2670_v23 = vcombine.low %v2614_v28, %v2630_v35  ;;  %v2671_v11 = vcombine.high %v2614_v28, %v2630_v35 }
 0x3be   : > { %v2687_v15 = vcombine.high %v2621_v8, %v2637_v40  ;;  %v2759_v16 = vcombine.high %v2495_v61, %v2559_v25  ;;  %v2743_v1 = vcombine.high %v2463_v2, %v2527_v9  ;;  %v2654_v28 = vcombine.low %v2589_v6, %v2605_v10 }
 0x3bf   : > { %v2766_v17 = vrot.slane %v2758_v60, %v22227_v3  ;;  %v2750_v19 = vrot.slane %v2742_v24, %v22227_v3  ;;  %v2678_v21 = vrot.slane %v2670_v23, %v22337_v43  ;;  %v2685_v48 = vrot.slane %v2671_v11, %v22337_v43 }
 0x3c0   : > { %v2701_v12 = vrot.slane %v2687_v15, %v22337_v43  ;;  %v2775_v25 = vcombine.high %v2718_v20, %v2734_v54  ;;  %v2782_v2 = vrot.slane %v2774_v36, %v22337_v43  ;;  %v2773_v9 = vrot.slane %v2759_v16, %v22227_v3 }
 0x3c1   : > { %v2806_v35 = vcombine.low %v2750_v19, %v2766_v17  ;;  %v2702_v61 = vcombine.low %v2646_v29, %v2678_v21  ;;  %v2703_v60 = vcombine.high %v2646_v29, %v2678_v21  ;;  %v2757_v24 = vrot.slane %v2743_v1, %v22227_v3 }
 0x3c2   : > { %v2807_v23 = vcombine.high %v2750_v19, %v2766_v17  ;;  %v2686_v11 = vcombine.low %v2621_v8, %v2637_v40  ;;  %v2704_v62 = vcombine.low %v2653_v63, %v2685_v48  ;;  %v2709_v15 = vcombine.high %v2669_v56, %v2701_v12 }
 0x3c3   : > { %2846 = vxpose.xlu0.b32.start.end [1/1] (short) (narrow) %v2702_v61, 8  ;;  %2878 = vxpose.xlu1.b32.start.end [1/1] (short) (narrow) %v2703_v60, 8  ;;  %v2814_v59 = vrot.slane %v2806_v35, %v22337_v43  ;;  %v2662_v26 = vrot.slane %v2654_v28, %v22337_v43  ;;  %v2790_v6 = vcombine.low %v2725_v14, %v2741_v18 }
 0x3c4   : > { %v2822_v10 = vcombine.low %v2757_v24, %v2773_v9  ;;  %v2694_v20 = vrot.slane %v2686_v11, %v22337_v43  ;;  %v2789_v36 = vrot.slane %v2775_v25, %v22337_v43  ;;  %v2705_v54 = vcombine.high %v2653_v63, %v2685_v48 }
 0x3c5   : > { %v2839_v1 = vcombine.high %v2782_v2, %v2814_v59  ;;  %v2821_v40 = vrot.slane %v2807_v23, %v22337_v43  ;;  %v2791_v8 = vcombine.high %v2725_v14, %v2741_v18  ;;  %v2823_v29 = vcombine.high %v2757_v24, %v2773_v9 }
 0x3c6   : > { %v2798_v16 = vrot.slane %v2790_v6, %v22337_v43  ;;  %v2706_v17 = vcombine.low %v2662_v26, %v2694_v20  ;;  %v2830_v21 = vrot.slane %v2822_v10, %v22337_v43  ;;  %v2707_v28 = vcombine.high %v2662_v26, %v2694_v20 }
 0x3c7   : > { %2910 = vxpose.xlu0.b32.start.end [1/1] (short) (narrow) %v2704_v62, 8  ;;  %3070 = vxpose.xlu1.b32.start.end [1/1] (short) (narrow) %v2709_v15, 8  ;;  %v2841_v19 = vcombine.high %v2789_v36, %v2821_v40  ;;  %v2805_v35 = vrot.slane %v2791_v8, %v22337_v43  ;;  %v2837_v63 = vrot.slane %v2823_v29, %v22337_v43 }
 0x3c8   : > { %v2843_v25 = vcombine.high %v2798_v16, %v2830_v21  ;;  %v2708_v14 = vcombine.low %v2669_v56, %v2701_v12  ;;  %v2838_v18 = vcombine.low %v2782_v2, %v2814_v59  ;;  %v2840_v61 = vcombine.low %v2789_v36, %v2821_v40 }
 0x3c9   : > { %v2845_v48 = vcombine.high %v2805_v35, %v2837_v63  ;;  %v2842_v9 = vcombine.low %v2798_v16, %v2830_v21  ;;  %v2844_v23 = vcombine.low %v2805_v35, %v2837_v63 }
 0x3cb   : > { %2942 = vxpose.xlu0.b32.start.end [1/1] (short) (narrow) %v2705_v54, 8  ;;  %3134 = vxpose.xlu1.b32.start.end [1/1] (short) (narrow) %v2839_v1, 8 }
 0x3cf   : > { %2974 = vxpose.xlu0.b32.start.end [1/1] (short) (narrow) %v2706_v17, 8  ;;  %3198 = vxpose.xlu1.b32.start.end [1/1] (short) (narrow) %v2841_v19, 8 }
 0x3d3   : > { %3006 = vxpose.xlu0.b32.start.end [1/1] (short) (narrow) %v2707_v28, 8  ;;  %3262 = vxpose.xlu1.b32.start.end [1/1] (short) (narrow) %v2843_v25, 8 }
 0x3d7   : > { %3038 = vxpose.xlu0.b32.start.end [1/1] (short) (narrow) %v2708_v14, 8  ;;  %3326 = vxpose.xlu1.b32.start.end [1/1] (short) (narrow) %v2845_v48, 8 }
 0x3db   : > { %3102 = vxpose.xlu0.b32.start.end [1/1] (short) (narrow) %v2838_v18, 8 }
 0x3de   : > { %v3864_v60 = vpop.trf.xlu1 }
 0x3df   : > { %3166 = vxpose.xlu0.b32.start.end [1/1] (short) (narrow) %v2840_v61, 8 }
 0x3e2   : > { %v22532_v24 = vpop.trf.xlu1 }
 0x3e3   : > { %3230 = vxpose.xlu0.b32.start.end [1/1] (short) (narrow) %v2842_v9, 8 }
 0x3e7   : > { %3294 = vxpose.xlu0.b32.start.end [1/1] (short) (narrow) %v2844_v23, 8 }
 0x3e9   : > { %v3896_v11 = vpop.trf.xlu1 }
 0x3ed   : > { %v22534_v62 = vpop.trf.xlu1 }
 0x3f1   : > { %v3928_v15 = vpop.trf.xlu1 }
 0x3f2   : > { %v4104_v17 = vcombine.low %v3864_v60, %v3928_v15  ;;  %v4105_v23 = vcombine.high %v3864_v60, %v3928_v15 }
 0x3f4   : > { %v4112_v28 = vrot.slane %v4104_v17, %v22227_v3 }
 0x3f5   : > { %v22536_v26 = vpop.trf.xlu1 }
 0x3f6   : > { %v4241_v12 = vcombine.high %v22532_v24, %v22536_v26 }
 0x3f8   : > { %v22542_v6 = vrot.slane %v4241_v12, %v22227_v3 }
 0x3f9   : > { %v3960_v56 = vpop.trf.xlu1 }
 0x3fa   : > { %v4120_v29 = vcombine.low %v3896_v11, %v3960_v56  ;;  %v4121_v48 = vcombine.high %v3896_v11, %v3960_v56 }
 0x3fc   : > { %v4128_v19 = vrot.slane %v4120_v29, %v22227_v3  ;;  %v4135_v7 = vrot.slane %v4121_v48, %v22227_v3 }
 0x3fd   : > { %v3961_v2 = vpop.trf.xlu1 }
 0x3fe   : > { %v4257_v59 = vcombine.high %v22534_v62, %v3961_v2  ;;  %v4168_v18 = vcombine.low %v4112_v28, %v4128_v19 }
 0x400   : > { %v22545_v10 = vrot.slane %v4257_v59, %v22227_v3  ;;  %v4176_v11 = vrot.slane %v4168_v18, %v22337_v43 }
 0x401   : > { %v3992_v20 = vpop.trf.xlu1 }
 0x402   : > { %v4321_v36 = vcombine.high %v22542_v6, %v22545_v10 }
 0x405   : > { %v3993_v54 = vpop.trf.xlu1 }
 0x409   : > { %v4024_v1 = vpop.trf.xlu1 }
 0x40d   : > { %v4025_v40 = vpop.trf.xlu1 }
 0x411   : > { %v4056_v8 = vpop.trf.xlu1 }
 0x412   : > { %v4136_v21 = vcombine.low %v3992_v20, %v4056_v8  ;;  %v4137_v14 = vcombine.high %v3992_v20, %v4056_v8  ;;  %v4119_v20 = vrot.slane %v4105_v23, %v22227_v3 }
 0x414   : > { %v4144_v61 = vrot.slane %v4136_v21, %v22227_v3  ;;  %v4151_v17 = vrot.slane %v4137_v14, %v22227_v3  ;;  %v4184_v48 = vcombine.low %v4119_v20, %v4135_v7 }
 0x415   : > { %v4057_v16 = vpop.trf.xlu1 }
 0x416   : > { %v4273_v12 = vcombine.high %v3993_v54, %v4057_v16 }
 0x418   : > { %v22560_v60 = vrot.slane %v4273_v12, %v22227_v3 }
 0x419   : > { %v4088_v35 = vpop.trf.xlu1 }
 0x41a   : > { %v4152_v25 = vcombine.low %v4024_v1, %v4088_v35  ;;  %v4153_v63 = vcombine.high %v4024_v1, %v4088_v35  ;;  %v4169_v1 = vcombine.high %v4112_v28, %v4128_v19  ;;  %v4272_v28 = vcombine.low %v3993_v54, %v4057_v16 }
 0x41b   : > { %v4192_v54 = vrot.slane %v4184_v48, %v22337_v43 }
 0x41c   : > { %v4160_v9 = vrot.slane %v4152_v25, %v22227_v3  ;;  %v4167_v59 = vrot.slane %v4153_v63, %v22227_v3  ;;  %v4183_v14 = vrot.slane %v4169_v1, %v22337_v43 }
 0x41d   : > { %v4089_v27 = vpop.trf.xlu1 }
 0x41e   : > { %v4200_v4 = vcombine.low %v4144_v61, %v4160_v9  ;;  %v4201_v29 = vcombine.high %v4144_v61, %v4160_v9  ;;  %v4289_v45 = vcombine.high %v4025_v40, %v4089_v27  ;;  %v4216_v15 = vcombine.low %v4151_v17, %v4167_v59 }
 0x41f   : > { %v4288_v21 = vcombine.low %v4025_v40, %v4089_v27  ;;  %v4217_v18 = vcombine.high %v4151_v17, %v4167_v59  ;;  %v22574_v40 = vrot.slane %v4321_v36, %v22337_v43 }
 0x420   : > { %v4208_v56 = vrot.slane %v4200_v4, %v22337_v43  ;;  %v22563_v8 = vrot.slane %v4289_v45, %v22227_v3  ;;  %v4215_v63 = vrot.slane %v4201_v29, %v22337_v43  ;;  %v4256_v4 = vcombine.low %v22534_v62, %v3961_v2 }
 0x421   : > { %v4240_v45 = vcombine.low %v22532_v24, %v22536_v26  ;;  %v4224_v27 = vrot.slane %v4216_v15, %v22337_v43  ;;  %v4296_v61 = vrot.slane %v4288_v21, %v22227_v3  ;;  %v4185_v2 = vcombine.high %v4119_v20, %v4135_v7 }
 0x422   : > { %v4233_v35 = vcombine.high %v4176_v11, %v4208_v56  ;;  %v4232_v25 = vcombine.low %v4176_v11, %v4208_v56  ;;  %v4353_v19 = vcombine.high %v22560_v60, %v22563_v8  ;;  %v4235_v9 = vcombine.high %v4183_v14, %v4215_v63 }
 0x423   : > { %v4234_v23 = vcombine.low %v4183_v14, %v4215_v63  ;;  %v4264_v16 = vrot.slane %v4256_v4, %v22227_v3  ;;  %v4280_v24 = vrot.slane %v4272_v28, %v22227_v3  ;;  %v4248_v36 = vrot.slane %v4240_v45, %v22227_v3 }
 0x424   : > { %4408 = vxpose.xlu1.b32.start.end [1/1] (short) (narrow) %v4233_v35, 8  ;;  %4376 = vxpose.xlu0.b32.start.end [1/1] (short) (narrow) %v4232_v25, 8  ;;  %v22578_v62 = vrot.slane %v4353_v19, %v22337_v43  ;;  %v4237_v29 = vcombine.high %v4192_v54, %v4224_v27  ;;  %v4236_v17 = vcombine.low %v4192_v54, %v4224_v27 }
 0x425   : > { %v4336_v59 = vcombine.low %v4280_v24, %v4296_v61  ;;  %v4231_v7 = vrot.slane %v4217_v18, %v22337_v43  ;;  %v4304_v1 = vcombine.low %v4248_v36, %v4264_v16  ;;  %v4199_v11 = vrot.slane %v4185_v2, %v22337_v43 }
 0x426   : > { %v4374_v26 = vcombine.low %v22574_v40, %v22578_v62  ;;  %v4337_v56 = vcombine.high %v4280_v24, %v4296_v61  ;;  %v4305_v35 = vcombine.high %v4248_v36, %v4264_v16 }
 0x427   : > { %v4239_v20 = vcombine.high %v4199_v11, %v4231_v7  ;;  %v4238_v15 = vcombine.low %v4199_v11, %v4231_v7  ;;  %v4344_v21 = vrot.slane %v4336_v59, %v22337_v43  ;;  %v4312_v63 = vrot.slane %v4304_v1, %v22337_v43 }
 0x428   : > { %4472 = vxpose.xlu1.b32.start.end [1/1] (short) (narrow) %v4235_v9, 8  ;;  %4440 = vxpose.xlu0.b32.start.end [1/1] (short) (narrow) %v4234_v23, 8  ;;  %v4351_v28 = vrot.slane %v4337_v56, %v22337_v43  ;;  %v4319_v45 = vrot.slane %v4305_v35, %v22337_v43 }
 0x429   : > { %v4369_v19 = vcombine.high %v4312_v63, %v4344_v21  ;;  %v4368_v4 = vcombine.low %v4312_v63, %v4344_v21 }
 0x42a   : > { %v4371_v27 = vcombine.high %v4319_v45, %v4351_v28  ;;  %v4370_v61 = vcombine.low %v4319_v45, %v4351_v28 }
 0x42c   : > { %4536 = vxpose.xlu1.b32.start.end [1/1] (short) (narrow) %v4237_v29, 8  ;;  %4504 = vxpose.xlu0.b32.start.end [1/1] (short) (narrow) %v4236_v17, 8 }
 0x430   : > { %4600 = vxpose.xlu1.b32.start.end [1/1] (short) (narrow) %v4239_v20, 8  ;;  %4568 = vxpose.xlu0.b32.start.end [1/1] (short) (narrow) %v4238_v15, 8  ;;  %v22591_v25 = vpop.f32.mrb[4].mxu0 }
 0x431   : > { %v21442_v48 = vpop.f32.mrb[5].mxu0 }
 0x432   : > { %v2296_v48 = vsel %vm2295_vm4, %v22591_v25, -inf }
 0x434   : > { %4664 = vxpose.xlu1.b32.start.end [1/1] (short) (narrow) %v4369_v19, 8  ;;  %4632 = vxpose.xlu0.b32.start.end [1/1] (short) (narrow) %v4368_v4, 8  ;;  %v22595_v14 = vpop.f32.mrb[6].mxu0 }
 0x435   : > { %v21449_v18 = vpop.f32.mrb[7].mxu0  ;;  %v2299_v45 = vsel %vm2295_vm4, %v22595_v14, -inf }
 0x436   : > { %v4352_v18 = vcombine.low %v22560_v60, %v22563_v8 }
 0x438   : > { %4728 = vxpose.xlu1.b32.start.end [1/1] (short) (narrow) %v4371_v27, 8  ;;  %4696 = vxpose.xlu0.b32.start.end [1/1] (short) (narrow) %v4370_v61, 8  ;;  %v4320_v27 = vcombine.low %v22542_v6, %v22545_v10  ;;  %v4360_v61 = vrot.slane %v4352_v18, %v22337_v43 }
 0x443   : > { %v2862_v9 = vpop.trf.xlu0  ;;  %v2894_v54 = vpop.trf.xlu1 }
 0x447   : > { %v2926_v23 = vpop.trf.xlu0  ;;  %v3086_v59 = vpop.trf.xlu1 }
 0x448   : > { %v3358_v24 = vcombine.low %v2862_v9, %v2926_v23  ;;  %v4328_v9 = vrot.slane %v4320_v27, %v22337_v43 }
 0x44a   : > { %v3365_v17 = vrot.slane %v3358_v24, %v22227_v3  ;;  %v4373_v23 = vcombine.high %v4328_v9, %v4360_v61 }
 0x44b   : > { %v2958_v2 = vpop.trf.xlu0 }
 0x44c   : > { %v3366_v36 = vcombine.low %v2894_v54, %v2958_v2  ;;  %v4372_v2 = vcombine.low %v4328_v9, %v4360_v61  ;;  %v22625_v54 = vpop.trf.xlu1 }
 0x44e   : > { %v3373_v7 = vrot.slane %v3366_v36, %v22227_v3 }
 0x44f   : > { %v2990_v16 = vpop.trf.xlu0 }
 0x450   : > { %v3390_v15 = vcombine.low %v3365_v17, %v3373_v7 }
 0x452   : > { %v22603_v35 = vrot.slane %v3390_v15, %v22337_v43 }
 0x453   : > { %v3022_v29 = vpop.trf.xlu0 }
 0x454   : > { %v3382_v1 = vcombine.low %v3022_v29, %v3086_v59 }
 0x456   : > { %v3389_v56 = vrot.slane %v3382_v1, %v22227_v3 }
 0x457   : > { %v3054_v11 = vpop.trf.xlu0 }
 0x458   : > { %v3374_v20 = vcombine.low %v2990_v16, %v3054_v11  ;;  %v22627_v16 = vpop.trf.xlu1 }
 0x45a   : > { %v3381_v21 = vrot.slane %v3374_v20, %v22227_v3 }
 0x45b   : > { %v22629_v60 = vpop.trf.xlu0 }
 0x45c   : > { %v3398_v63 = vcombine.low %v3381_v21, %v3389_v56  ;;  %v22633_v6 = vpop.trf.xlu1 }
 0x45e   : > { %v22608_v19 = vrot.slane %v3398_v63, %v22337_v43 }
 0x45f   : > { %2297 = vmax.xlane.f32.xlu1 %v2296_v48  ;;  %v22637_v10 = vpop.trf.xlu0 }
 0x460   : > { %v3406_v4 = vcombine.low %v22603_v35, %v22608_v19  ;;  %v22641_v8 = vpop.trf.xlu1 }
 0x462   : > { %21452 = vmatprep.mubr.msk.f32.mxu1 %vm2295_vm4, %v3406_v4 }
 0x463   : > { %v22643_v24 = vpop.trf.xlu0 }
 0x465   : > { %2300 = vmax.xlane.f32.xlu0 %v2299_v45 }
 0x467   : > { %v3310_v59 = vpop.trf.xlu0 }
 0x492   : > { %4792 = vxpose.xlu1.b32.start.end [1/1] (short) (narrow) %v4373_v23, 8  ;;  %4760 = vxpose.xlu0.b32.start.end [1/1] (short) (narrow) %v4372_v2, 8 }
 0x4a4   : > { %v22647_v36 = vpop.trf.xlu1  ;;  %v22655_v17 = vpop.trf.xlu0 }
 0x4a8   : > { %v22653_v29 = vpop.trf.xlu1  ;;  %v22661_v1 = vpop.trf.xlu0 }
 0x4ac   : > { %v22659_v7 = vpop.trf.xlu1  ;;  %v22665_v56 = vpop.trf.xlu0 }
 0x4b0   : > { %3774 = vrot.lane.b32.xlu1 %v22441_v22, %s22054_s24  ;;  %v22663_v11 = vpop.trf.xlu1  ;;  %v22669_v15 = vpop.trf.xlu0 }
 0x4b4   : > { %v22667_v20 = vpop.trf.xlu1  ;;  %v22673_v63 = vpop.trf.xlu0 }
 0x4b8   : > { %v22671_v21 = vpop.trf.xlu1  ;;  %v22676_v45 = vpop.trf.xlu0 }
 0x4bb   : > { %3764 = vrot.lane.b32.xlu0 %v22465_v30, %s22054_s24 }
 0x4bf   : > { %3766 = vrot.lane.b32.xlu0 %v22447_v32, %s22054_s24 }
 0x4c3   : > { %3768 = vrot.lane.b32.xlu0 %v22468_v33, %s22054_s24 }
 0x4c7   : > { %3770 = vrot.lane.b32.xlu0 %v22450_v39, %s22054_s24 }
 0x4cb   : > { %3772 = vrot.lane.b32.xlu0 %v22453_v49, %s22054_s24 }
 0x4cf   : > { %3776 = vrot.lane.b32.xlu0 %v22456_v53, %s22054_s24 }
 0x4d3   : > { %3778 = vrot.lane.b32.xlu0 %v22444_v31, %s22054_s24 }
 0x4ec   : > { %v2298_v48 = vpop.xlane.xlu1 %2297 }
 0x4ed   : > { %v2302_v4 = vsub.f32 %v22591_v25, %v2298_v48  ;;  %v25048_v25 = vcombine.high %v22574_v40, %v22578_v62  ;;  %v22703_v40 = vrot.slane %v22408_v44, %v22227_v3  ;;  %v22719_v48 = vrot.slane %v22425_v57, %v22227_v3 }
 0x4ee   : > { %v3432_v57 = vcombine.low %v22633_v6, %v22641_v8 }
 0x4ef   : > { %v2304_v18 = vmul.f32 1.442695, %v2302_v4  ;;  %25050 = vst [vmem:[#allocation23_spill] sm:$0xff] %v22703_v40  ;;  %25052 = vst [vmem:[#allocation25_spill] sm:$0xff] %v22719_v48 }
 0x4f1   : > { %21705 = vpow2.f32 %v2304_v18 }
 0x4f2   : > { %v2301_v27 = vpop.xlane.xlu0 %2300 }
 0x4f3   : > { %v2303_v61 = vsub.f32 %v22595_v14, %v2301_v27 }
 0x4f5   : > { %v2306_v9 = vmul.f32 1.442695, %v2303_v61 }
 0x4f7   : > { %21707 = vpow2.f32 %v2306_v9  ;;  %v3416_v9 = vcombine.low %v22625_v54, %v22627_v16 }
 0x4fb   : > { %v21706_v23 = vpop.eup %21705 }
 0x4fc   : > { %v2308_v2 = vsel %vm2295_vm4, %v21706_v23, 0.0 }
 0x4fd   : > { %2309 = vadd.xlane.f32.xlu0 %v2308_v2  ;;  %v3408_v2 = vcombine.low %v22629_v60, %v22637_v10 }
 0x501   : > { %v21708_v28 = vpop.eup %21707 }
 0x502   : > { %v2311_v12 = vsel %vm2295_vm4, %v21708_v28, 0.0 }
 0x503   : > { %2312 = vadd.xlane.f32.xlu1 %v2311_v12  ;;  %v22697_v12 = vrot.slane %v22404_v34, %v22227_v3 }
 0x505   : > { %25049 = vst [vmem:[#allocation22_spill] sm:$0xff] %v22697_v12 }
 0x512   : > { %v22693_v14 = vpop.trf.xlu0  ;;  %v4808_v27 = vpop.trf.xlu1 }
 0x52a   : > { %4824 = vxpose.xlu0.b32.start.end [1/1] (short) (narrow) %v4374_v26, 8  ;;  %v22711_v26 = vrot.slane %v22417_v55, %v22227_v3 }
 0x52c   : > { %25051 = vst [vmem:[#allocation24_spill] sm:$0xff] %v22711_v26 }
 0x52d   : > { %v22705_v62 = vpop.permute.xlu0 %3764 }
 0x531   : > { %v22715_v34 = vpop.permute.xlu0 %3766 }
 0x535   : > { %v22723_v44 = vpop.permute.xlu0 %3768 }
 0x536   : > { %4856 = vxpose.xlu1.b32.start.end [1/1] (short) (narrow) %v25048_v25, 8  ;;  %v3424_v25 = vcombine.low %v22643_v24, %v3310_v59 }
 0x539   : > { %v22725_v4 = vpop.permute.xlu0 %3770 }
 0x53d   : > { %v22727_v18 = vpop.permute.xlu0 %3772 }
 0x541   : > { %v3777_v55 = vpop.permute.xlu0 %3776 }
 0x545   : > { %v3779_v61 = vpop.permute.xlu0 %3778 }
 0x553   : > { %6784 = vrot.lane.b32.xlu0 %v22290_v42, %s22055_s22 }
 0x557   : > { %6790 = vrot.lane.b32.xlu0 %v22299_v46, %s22055_s22 }
 0x55b   : > { %6794 = vrot.lane.b32.xlu0 %v22311_v50, %s22055_s22  ;;  %v3431_v50 = vrot.slane %v3424_v25, %v22227_v3 }
 0x55f   : > { %5260 = vrot.lane.b32.xlu0 %v22697_v12, %s22054_s24  ;;  %v3439_v12 = vrot.slane %v3432_v57, %v22227_v3  ;;  %v4938_v57 = vcombine.low %v22673_v63, %v22676_v45 }
 0x561   : > { %v3448_v60 = vcombine.low %v3431_v50, %v3439_v12  ;;  %v25055_v12 = vmov 0.0  }
 0x563   : > { %5264 = vrot.lane.b32.xlu0 %v22703_v40, %s22054_s24  ;;  %v3415_v40 = vrot.slane %v3408_v2, %v22227_v3  ;;  %v3455_v8 = vrot.slane %v3448_v60, %v22337_v43  ;;  %v25053_v2 = vcombine.high %v22603_v35, %v22608_v19  ;;  %v4888_v35 = vcombine.low %v22655_v17, %v22661_v1 }
 0x564   : > { %v4912_v19 = vcombine.low %v22659_v7, %v22663_v11  ;;  %v3815_v1 = vcombine.low %v3777_v55, %v3779_v61  ;;  %v4945_v11 = vrot.slane %v4938_v57, %v22227_v3  ;;  %v3788_v60 = vcombine.low %v22705_v62, %v22715_v34 }
 0x566   : > { %v3822_v55 = vrot.slane %v3815_v1, %v22337_v43 }
 0x567   : > { %5268 = vrot.lane.b32.xlu0 %v22711_v26, %s22054_s24  ;;  %v3423_v26 = vrot.slane %v3416_v9, %v22227_v3 }
 0x569   : > { %v3440_v16 = vcombine.low %v3415_v40, %v3423_v26  ;;  %v4904_v40 = vcombine.low %v22665_v56, %v22669_v15  ;;  %v4946_v26 = vcombine.low %v22667_v20, %v22671_v21  ;;  %v3797_v20 = vcombine.low %v22723_v44, %v22725_v4 }
 0x56b   : > { %5272 = vrot.lane.b32.xlu0 %v22719_v48, %s22054_s24  ;;  %v3775_v48 = vpop.permute.xlu1 %3774  ;;  %v3447_v6 = vrot.slane %v3440_v16, %v22337_v43  ;;  %v4911_v17 = vrot.slane %v4904_v40, %v22227_v3  ;;  %v4953_v7 = vrot.slane %v4946_v26, %v22227_v3 }
 0x56c   : > { %v3806_v15 = vcombine.low %v22727_v18, %v3775_v48 }
 0x56d   : > { %v3457_v50 = vcombine.high %v3447_v6, %v3455_v8  ;;  %v4970_v61 = vcombine.low %v4945_v11, %v4953_v7 }
 0x56e   : > { %v3813_v44 = vrot.slane %v3806_v15, %v22337_v43 }
 0x56f   : > { %v4977_v34 = vrot.slane %v4970_v61, %v22337_v43 }
 0x570   : > { %v20498_v62 = vcombine.high %v3813_v44, %v3822_v55 }
 0x58a   : > { %v2310_v0 = vpop.xlane.xlu0 %2309 }
 0x58b   : > { %21709 = vrcp.f32 %v2310_v0  ;;  %v3456_v0 = vcombine.low %v3447_v6, %v3455_v8  ;;  %v4993_v8 = vcombine.low %v3813_v44, %v3822_v55 }
 0x590   : > { %v2313_v54 = vpop.xlane.xlu1 %2312 }
 0x591   : > { %21711 = vrcp.f32 %v2313_v54 }
 0x595   : > { %v21710_v10 = vpop.eup %21709 }
 0x596   : > { %v2316_v24 = vmul.f32 %v21710_v10, %v21706_v23  ;;  %v25054_v23 = vmov 0.0|0.0  }
 0x598   : > { %21450 = vmatprep.subr.msk.mxu1 %vm2295_vm4, %v2316_v24 }
 0x599   : > { %21451 = vmatpush3.xpose.msk.msra.mxu1 %vm2295_vm4, %v2316_v24 }
 0x59b   : > { %v21712_v59 = vpop.eup %21711 }
 0x59c   : > { %21453 = vmatmul.mubr.msk.f32.vlgmr.msra.gmra.mrb[0].mxu1 %vm2295_vm4, %v3456_v0  ;;  %v2317_v9 = vmul.f32 %v21712_v59, %v21708_v28  ;;  %v4896_v28 = vcombine.low %v22647_v36, %v22653_v29  ;;  %v4895_v36 = vrot.slane %v4888_v35, %v22227_v3  ;;  %v4919_v29 = vrot.slane %v4912_v19, %v22227_v3 }
 0x59d   : > { %21457 = vmatprep.mubr.msk.f32.mxu1 %vm2295_vm4, %v25053_v2  ;;  %v5007_v35 = vrot.slane %v4993_v8, %v22227_v3  ;;  %v5100_v19 = vrot.slane %v20498_v62, %v22227_v3 }
 0x59e   : > { %21455 = vmatprep.subr.msk.mxu1 %vm2295_vm4, %v2317_v9  ;;  %v4903_v54 = vrot.slane %v4896_v28, %v22227_v3  ;;  %v4928_v45 = vcombine.low %v4911_v17, %v4919_v29 }
 0x59f   : > { %21456 = vmatpush3.xpose.msk.msra.mxu1 %vm2295_vm4, %v2317_v9 }
 0x5a0   : > { %21569 = vmatprep.subr.bf16.mxu1 %v25054_v23  ;;  %v4920_v63 = vcombine.low %v4895_v36, %v4903_v54  ;;  %v4935_v4 = vrot.slane %v4928_v45, %v22337_v43  ;;  %v22827_v45 = vrot.slane %v22412_v52, %v22227_v3 }
 0x5a2   : > { %21458 = vmatmul.mubr.msk.f32.vlgmr.msra.gmra.mrb[2].mxu1 %vm2295_vm4, %v3457_v50  ;;  %v4927_v48 = vrot.slane %v4920_v63, %v22337_v43  ;;  %v22821_v63 = vrot.slane %v22419_v13, %v22227_v3  ;;  %25063 = vst [vmem:[#allocation33_spill] sm:$0xff] %v22827_v45  ;;  %v22839_v13 = vrot.slane %v22432_v5, %v22227_v3 }
 0x5a3   : > { %21464 = vmatprep.mubr.msk.f32.mxu1 %vm22051_vm2, %v25055_v12 }
 0x5a4   : > { %v4936_v9 = vcombine.low %v4927_v48, %v4935_v4  ;;  %v4937_v50 = vcombine.high %v4927_v48, %v4935_v4  ;;  %25062 = vst [vmem:[#allocation32_spill] sm:$0xff] %v22821_v63  ;;  %25065 = vst [vmem:[#allocation35_spill] sm:$0xff] %v22839_v13 }
 0x5aa   : > { %v4840_v25 = vpop.trf.xlu0 }
 0x5ab   : > { %v4954_v56 = vcombine.low %v22693_v14, %v4840_v25  ;;  %v3804_v14 = vrot.slane %v3797_v20, %v22337_v43 }
 0x5ad   : > { %v4961_v10 = vrot.slane %v4954_v56, %v22227_v3 }
 0x5b6   : > { %v4872_v21 = vpop.trf.xlu1 }
 0x5b7   : > { %v4962_v16 = vcombine.low %v4808_v27, %v4872_v21  ;;  %v3795_v27 = vrot.slane %v3788_v60, %v22337_v43 }
 0x5b9   : > { %v4969_v6 = vrot.slane %v4962_v16, %v22227_v3  ;;  %v4992_v0 = vcombine.low %v3795_v27, %v3804_v14  ;;  %v20497_v59 = vcombine.high %v3795_v27, %v3804_v14  ;;  %v22833_v16 = vrot.slane %v22427_v58, %v22227_v3 }
 0x5bb   : > { %v4978_v18 = vcombine.low %v4961_v10, %v4969_v6  ;;  %v5000_v57 = vrot.slane %v4992_v0, %v22227_v3  ;;  %v5093_v25 = vrot.slane %v20497_v59, %v22227_v3  ;;  %25064 = vst [vmem:[#allocation34_spill] sm:$0xff] %v22833_v16 }
 0x5bd   : > { %v4985_v24 = vrot.slane %v4978_v18, %v22337_v43  ;;  %v5008_v54 = vcombine.low %v5000_v57, %v5007_v35  ;;  %v5101_v36 = vcombine.low %v5093_v25, %v5100_v19 }
 0x5bf   : > { %v4986_v2 = vcombine.low %v4977_v34, %v4985_v24  ;;  %v4987_v28 = vcombine.high %v4977_v34, %v4985_v24 }
 0x5c1   : > { %v21570_v40 = vpack.c.bf16 %v4986_v2, %v4936_v9  ;;  %v21573_v26 = vpack.c.bf16 %v4987_v28, %v4937_v50 }
 0x5c3   : > { %21571 = vmatpush3.bf16.msra.mxu1 %v21570_v40  ;;  %21574 = vmatpush3.bf16.msra.mxu0 %v21573_v26 }
 0x5c5   : > { %v6785_v60 = vpop.permute.xlu0 %6784 }
 0x5c6   : > { %21465 = vmatmul.mubr.msk.f32.vlgmr.msra.gmra.mrb[4].mxu1 %vm2129_vm3, %v5008_v54  ;;  %21472 = vmatmul.mubr.msk.f32.vlgmr.msra.gmra.mrb[8].mxu0 %vm2129_vm3, %v5101_v36 }
 0x5c9   : > { %v6791_v10 = vpop.permute.xlu0 %6790 }
 0x5cd   : > { %v6795_v14 = vpop.permute.xlu0 %6794 }
 0x5d1   : > { %v5261_v48 = vpop.permute.xlu0 %5260 }
 0x5d5   : > { %v5265_v18 = vpop.permute.xlu0 %5264 }
 0x5d9   : > { %v5269_v8 = vpop.permute.xlu0 %5268 }
 0x5dd   : > { %v5273_v34 = vpop.permute.xlu0 %5272 }
 0x66f   : > { %v22795_v29 = vpop.f32.mrb[0].mxu1 }
 0x670   : > { %25056 = vst [vmem:[#allocation26_spill] sm:$0xff] %v22795_v29  ;;  %v22797_v17 = vpop.f32.mrb[1].mxu1 }
 0x671   : > { %25057 = vst [vmem:[#allocation27_spill] sm:$0xff] %v22797_v17 }
 0x675   : > { %v22799_v1 = vpop.f32.mrb[2].mxu1 }
 0x676   : > { %25058 = vst [vmem:[#allocation28_spill] sm:$0xff] %v22799_v1  ;;  %v22801_v7 = vpop.f32.mrb[3].mxu1 }
 0x677   : > { %25059 = vst [vmem:[#allocation29_spill] sm:$0xff] %v22801_v7 }
 0x699   : > { %v22803_v11 = vpop.f32.mrb[4].mxu1  ;;  %v22805_v56 = vpop.f32.mrb[8].mxu0 }
 0x69a   : > { %25060 = vst [vmem:[#allocation30_spill] sm:$0xff] %v22803_v11  ;;  %25061 = vst [vmem:[#allocation31_spill] sm:$0xff] %v22805_v56  ;;  %v21466_v20 = vpop.f32.mrb[5].mxu1  ;;  %v21473_v15 = vpop.f32.mrb[9].mxu0  ;;  %v5177_v21 = vsel %vm2295_vm4, %v22805_v56, -inf }
 0x69b   : > { %5178 = vmax.xlane.f32.xlu1 %v5177_v21 }
 0x6ac   : > { %6782 = vrot.lane.b32.xlu1 %v22275_v38, %s22055_s22 }
 0x6b0   : > { %6786 = vrot.lane.b32.xlu1 %v22272_v37, %s22055_s22 }
 0x6b4   : > { %6788 = vrot.lane.b32.xlu1 %v22287_v41, %s22055_s22 }
 0x6b8   : > { %6792 = vrot.lane.b32.xlu1 %v22302_v47, %s22055_s22 }
 0x6bc   : > { %6796 = vrot.lane.b32.xlu1 %v22314_v51, %s22055_s22 }
 0x6c0   : > { %5262 = vrot.lane.b32.xlu1 %v22821_v63, %s22054_s24 }
 0x6c4   : > { %5266 = vrot.lane.b32.xlu1 %v22827_v45, %s22054_s24 }
 0x6c8   : > { %5270 = vrot.lane.b32.xlu1 %v22833_v16, %s22054_s24 }
 0x6cc   : > { %5274 = vrot.lane.b32.xlu1 %v22839_v13, %s22054_s24 }
 0x6f5   : > { %6838 = vxpose.xlu1.b32.start.end [1/1] (short) (narrow) %v6785_v60, 16 }
 0x728   : > { %v22843_v52 = vpop.xlane.xlu1 %5178 }
 0x729   : > { %25066 = vst [vmem:[#allocation36_spill] sm:$0xff] %v22843_v52 }
 0x72c   : > { %v6783_v55 = vpop.permute.xlu1 %6782 }
 0x72d   : > { %6806 = vxpose.xlu0.b32.start.end [1/1] (short) (narrow) %v6783_v55, 16 }
 0x730   : > { %v6787_v61 = vpop.permute.xlu1 %6786 }
 0x732   : > { %6870 = vxpose.xlu0.b32.start.end [1/1] (short) (narrow) %v6787_v61, 16 }
 0x734   : > { %v6789_v58 = vpop.permute.xlu1 %6788 }
 0x737   : > { %6902 = vxpose.xlu0.b32.start.end [1/1] (short) (narrow) %v6789_v58, 16 }
 0x738   : > { %v6793_v6 = vpop.permute.xlu1 %6792 }
 0x739   : > { %6966 = vxpose.xlu1.b32.start.end [1/1] (short) (narrow) %v6793_v6, 16 }
 0x73c   : > { %6934 = vxpose.xlu0.b32.start.end [1/1] (short) (narrow) %v6791_v10, 16  ;;  %v6797_v5 = vpop.permute.xlu1 %6796 }
 0x73e   : > { %7030 = vxpose.xlu1.b32.start.end [1/1] (short) (narrow) %v6797_v5, 16 }
 0x740   : > { %v5263_v44 = vpop.permute.xlu1 %5262 }
 0x741   : > { %6998 = vxpose.xlu0.b32.start.end [1/1] (short) (narrow) %v6795_v14, 16 }
 0x743   : > { %5316 = vxpose.xlu1.b32.start.end [1/1] (short) (narrow) %v5263_v44, 16 }
 0x744   : > { %v5267_v4 = vpop.permute.xlu1 %5266 }
 0x746   : > { %5284 = vxpose.xlu0.b32.start.end [1/1] (short) (narrow) %v5261_v48, 16 }
 0x748   : > { %5380 = vxpose.xlu1.b32.start.end [1/1] (short) (narrow) %v5267_v4, 16  ;;  %v5271_v27 = vpop.permute.xlu1 %5270 }
 0x74b   : > { %5348 = vxpose.xlu0.b32.start.end [1/1] (short) (narrow) %v5265_v18, 16 }
 0x74c   : > { %v5275_v62 = vpop.permute.xlu1 %5274 }
 0x74d   : > { %5444 = vxpose.xlu1.b32.start.end [1/1] (short) (narrow) %v5271_v27, 16 }
 0x750   : > { %5412 = vxpose.xlu0.b32.start.end [1/1] (short) (narrow) %v5269_v8, 16 }
 0x752   : > { %5508 = vxpose.xlu1.b32.start.end [1/1] (short) (narrow) %v5275_v62, 16 }
 0x755   : > { %5476 = vxpose.xlu0.b32.start.end [1/1] (short) (narrow) %v5273_v34, 16 }
 0x775   : > { %v22847_v0 = vpop.trf.xlu1 }
 0x779   : > { %v22851_v9 = vpop.trf.xlu1 }
 0x7ad   : > { %v22845_v24 = vpop.trf.xlu0 }
 0x7b1   : > { %v22849_v59 = vpop.trf.xlu0 }
 0x7b5   : > { %v22853_v2 = vpop.trf.xlu0 }
 0x7b6   : > { %v7062_v29 = vcombine.low %v22845_v24, %v22853_v2 }
 0x7b8   : > { %v22910_v37 = vrot.slane %v7062_v29, %v22227_v3 }
 0x7b9   : > { %v22855_v50 = vpop.trf.xlu0  ;;  %v22857_v28 = vpop.trf.xlu1 }
 0x7bd   : > { %v22859_v35 = vpop.trf.xlu0  ;;  %v22861_v19 = vpop.trf.xlu1 }
 0x7be   : > { %v7078_v17 = vcombine.low %v22847_v0, %v22859_v35 }
 0x7c1   : > { %v22863_v40 = vpop.trf.xlu0  ;;  %v22865_v26 = vpop.trf.xlu1 }
 0x7c5   : > { %v22867_v57 = vpop.trf.xlu0  ;;  %v22869_v25 = vpop.trf.xlu1 }
 0x7c9   : > { %v22871_v54 = vpop.trf.xlu0  ;;  %v5332_v36 = vpop.trf.xlu1 }
 0x7cd   : > { %v22873_v20 = vpop.trf.xlu0  ;;  %v22875_v15 = vpop.trf.xlu1 }
 0x7d1   : > { %v22877_v21 = vpop.trf.xlu0  ;;  %v5396_v60 = vpop.trf.xlu1 }
 0x7d2   : > { %v5556_v27 = vcombine.low %v5332_v36, %v5396_v60  ;;  %v5557_v13 = vcombine.high %v5332_v36, %v5396_v60 }
 0x7d4   : > { %v5564_v16 = vrot.slane %v5556_v27, %v22227_v3 }
 0x7d5   : > { %v5300_v55 = vpop.trf.xlu0  ;;  %v22879_v61 = vpop.trf.xlu1 }
 0x7d6   : > { %v5693_v63 = vcombine.high %v22875_v15, %v22879_v61 }
 0x7d9   : > { %v22881_v58 = vpop.trf.xlu0  ;;  %v5460_v10 = vpop.trf.xlu1 }
 0x7dd   : > { %v5364_v6 = vpop.trf.xlu0  ;;  %v22885_v5 = vpop.trf.xlu1 }
 0x7de   : > { %v5540_v4 = vcombine.low %v5300_v55, %v5364_v6  ;;  %v5541_v62 = vcombine.high %v5300_v55, %v5364_v6 }
 0x7e0   : > { %v5548_v34 = vrot.slane %v5540_v4, %v22227_v3  ;;  %v5555_v4 = vrot.slane %v5541_v62, %v22227_v3 }
 0x7e1   : > { %v22883_v14 = vpop.trf.xlu0  ;;  %v5524_v18 = vpop.trf.xlu1 }
 0x7e2   : > { %v5677_v44 = vcombine.high %v22881_v58, %v22883_v14  ;;  %v5588_v1 = vcombine.low %v5460_v10, %v5524_v18  ;;  %v5589_v7 = vcombine.high %v5460_v10, %v5524_v18  ;;  %v7094_v10 = vcombine.low %v22867_v57, %v22873_v20 }
 0x7e3   : > { %v5604_v18 = vcombine.low %v5548_v34, %v5564_v16  ;;  %v5605_v12 = vcombine.high %v5548_v34, %v5564_v16 }
 0x7e4   : > { %v5691_v46 = vrot.slane %v5677_v44, %v22227_v3  ;;  %v5596_v36 = vrot.slane %v5588_v1, %v22227_v3  ;;  %v5603_v60 = vrot.slane %v5589_v7, %v22227_v3  ;;  %v5707_v1 = vrot.slane %v5693_v63, %v22227_v3 }
 0x7e5   : > { %v5428_v48 = vpop.trf.xlu0  ;;  %v22899_v51 = vpop.trf.xlu1  ;;  %v7102_v29 = vrot.slane %v7094_v10, %v22227_v3  ;;  %v5612_v42 = vrot.slane %v5604_v18, %v22337_v43  ;;  %v7095_v18 = vcombine.high %v22867_v57, %v22873_v20 }
 0x7e6   : > { %v5725_v62 = vcombine.high %v22885_v5, %v22899_v51  ;;  %v5756_v47 = vcombine.low %v5691_v46, %v5707_v1  ;;  %v5757_v31 = vcombine.high %v5691_v46, %v5707_v1 }
 0x7e8   : > { %v5739_v63 = vrot.slane %v5725_v62, %v22227_v3 }
 0x7e9   : > { %v22889_v8 = vpop.trf.xlu0 }
 0x7ed   : > { %v5492_v45 = vpop.trf.xlu0 }
 0x7ee   : > { %v5572_v55 = vcombine.low %v5428_v48, %v5492_v45  ;;  %v5573_v6 = vcombine.high %v5428_v48, %v5492_v45  ;;  %v22913_v45 = vrot.slane %v7078_v17, %v22227_v3  ;;  %v5571_v48 = vrot.slane %v5557_v13, %v22227_v3 }
 0x7f0   : > { %v5580_v27 = vrot.slane %v5572_v55, %v22227_v3  ;;  %v5587_v41 = vrot.slane %v5573_v6, %v22227_v3  ;;  %v7110_v6 = vcombine.low %v22857_v28, %v22865_v26  ;;  %v5620_v13 = vcombine.low %v5555_v4, %v5571_v48 }
 0x7f1   : > { %v22918_v44 = vpop.trf.xlu0  ;;  %v5621_v56 = vcombine.high %v5555_v4, %v5571_v48 }
 0x7f2   : > { %v5636_v7 = vcombine.low %v5580_v27, %v5596_v36  ;;  %v5637_v38 = vcombine.high %v5580_v27, %v5596_v36  ;;  %v5652_v55 = vcombine.low %v5587_v41, %v5603_v60  ;;  %v5709_v17 = vcombine.high %v22889_v8, %v22918_v44 }
 0x7f3   : > { %v5653_v36 = vcombine.high %v5587_v41, %v5603_v60  ;;  %v7118_v34 = vrot.slane %v7110_v6, %v22227_v3  ;;  %v5619_v41 = vrot.slane %v5605_v12, %v22337_v43  ;;  %v5628_v46 = vrot.slane %v5620_v13, %v22337_v43 }
 0x7f4   : > { %v5644_v23 = vrot.slane %v5636_v7, %v22337_v43  ;;  %v5723_v27 = vrot.slane %v5709_v17, %v22227_v3  ;;  %v5651_v10 = vrot.slane %v5637_v38, %v22337_v43  ;;  %v5660_v16 = vrot.slane %v5652_v55, %v22337_v43 }
 0x7f5   : > { %v7158_v60 = vcombine.low %v7102_v29, %v7118_v34  ;;  %v5667_v57 = vrot.slane %v5653_v36, %v22337_v43  ;;  %v7111_v12 = vcombine.high %v22857_v28, %v22865_v26  ;;  %v7127_v6 = vcombine.high %v22910_v37, %v22913_v45 }
 0x7f6   : > { %v5669_v22 = vcombine.high %v5612_v42, %v5644_v23  ;;  %v5668_v32 = vcombine.low %v5612_v42, %v5644_v23  ;;  %v5788_v52 = vcombine.low %v5723_v27, %v5739_v63  ;;  %v5789_v11 = vcombine.high %v5723_v27, %v5739_v63 }
 0x7f7   : > { %v22938_v42 = vrot.slane %v5756_v47, %v22337_v43  ;;  %v22944_v23 = vrot.slane %v5757_v31, %v22337_v43  ;;  %v5670_v4 = vcombine.low %v5619_v41, %v5651_v10  ;;  %v5673_v48 = vcombine.high %v5628_v46, %v5660_v16 }
 0x7f8   : > { %5844 = vxpose.xlu0.b32.start.end [1/1] (short) (narrow) %v5669_v22, 8  ;;  %5812 = vxpose.xlu1.b32.start.end [1/1] (short) (narrow) %v5668_v32, 8  ;;  %v22941_v38 = vrot.slane %v5788_v52, %v22337_v43  ;;  %v22948_v22 = vrot.slane %v5789_v11, %v22337_v43  ;;  %v7079_v32 = vcombine.high %v22847_v0, %v22859_v35 }
 0x7f9   : > { %v7126_v47 = vcombine.low %v22910_v37, %v22913_v45  ;;  %v5635_v52 = vrot.slane %v5621_v56, %v22337_v43  ;;  %v7063_v0 = vcombine.high %v22845_v24, %v22853_v2  ;;  %v7109_v35 = vrot.slane %v7095_v18, %v22227_v3 }
 0x7fa   : > { %v5808_v31 = vcombine.low %v22938_v42, %v22941_v38  ;;  %v5809_v11 = vcombine.high %v22938_v42, %v22941_v38  ;;  %v5811_v20 = vcombine.high %v22944_v23, %v22948_v22  ;;  %v5810_v28 = vcombine.low %v22944_v23, %v22948_v22  ;;  %v25072_v38 = vld [vmem:[#allocation20_spill] sm:$0xff] }
 0x7fb   : > { %v7159_v56 = vcombine.high %v7102_v29, %v7118_v34  ;;  %v5671_v26 = vcombine.high %v5619_v41, %v5651_v10  ;;  %v5675_v62 = vcombine.high %v5635_v52, %v5667_v57  ;;  %v7166_v1 = vrot.slane %v7158_v60, %v22337_v43 }
 0x7fc   : > { %5876 = vxpose.xlu0.b32.start.end [1/1] (short) (narrow) %v5670_v4, 8  ;;  %5972 = vxpose.xlu1.b32.start.end [1/1] (short) (narrow) %v5673_v48, 8  ;;  %v7093_v7 = vrot.slane %v7079_v32, %v22227_v3  ;;  %v7125_v55 = vrot.slane %v7111_v12, %v22227_v3  ;;  %v7134_v24 = vrot.slane %v7126_v47, %v22337_v43 }
 0x7fd   : > { %v7077_v2 = vrot.slane %v7063_v0, %v22227_v3  ;;  %v7230_v29 = vcombine.low %v22871_v54, %v22877_v21  ;;  %v5672_v13 = vcombine.low %v5628_v46, %v5660_v16  ;;  %v7173_v36 = vrot.slane %v7159_v56, %v22337_v43 }
 0x7fe   : > { %v7174_v17 = vcombine.low %v7109_v35, %v7125_v55  ;;  %v7191_v63 = vcombine.high %v7134_v24, %v7166_v1  ;;  %v7214_v10 = vcombine.low %v22851_v9, %v22863_v40  ;;  %v7246_v37 = vcombine.low %v22861_v19, %v22869_v25 }
 0x7ff   : > { %v7142_v27 = vcombine.low %v7077_v2, %v7093_v7  ;;  %v7141_v45 = vrot.slane %v7127_v6, %v22337_v43  ;;  %v7198_v34 = vcombine.low %v22849_v59, %v22855_v50  ;;  %v7175_v18 = vcombine.high %v7109_v35, %v7125_v55 }
 0x800   : > { %5908 = vxpose.xlu0.b32.start.end [1/1] (short) (narrow) %v5671_v26, 8  ;;  %6036 = vxpose.xlu1.b32.start.end [1/1] (short) (narrow) %v5675_v62, 8  ;;  %v7238_v16 = vrot.slane %v7230_v29, %v22227_v3  ;;  %v5674_v41 = vcombine.low %v5635_v52, %v5667_v57  ;;  %v7182_v60 = vrot.slane %v7174_v17, %v22337_v43 }
 0x801   : > { %v7193_v46 = vcombine.high %v7141_v45, %v7173_v36  ;;  %v7143_v4 = vcombine.high %v7077_v2, %v7093_v7  ;;  %v7222_v48 = vrot.slane %v7214_v10, %v22227_v3  ;;  %v7254_v32 = vrot.slane %v7246_v37, %v22227_v3 }
 0x802   : > { %v7150_v47 = vrot.slane %v7142_v27, %v22337_v43  ;;  %v7206_v12 = vrot.slane %v7198_v34, %v22227_v3  ;;  %v7231_v0 = vcombine.high %v22871_v54, %v22877_v21  ;;  %v7190_v56 = vcombine.low %v7134_v24, %v7166_v1 }
 0x803   : > { %v7294_v35 = vcombine.low %v7238_v16, %v7254_v32  ;;  %v7189_v52 = vrot.slane %v7175_v18, %v22337_v43  ;;  %v7215_v26 = vcombine.high %v22851_v9, %v22863_v40  ;;  %v7247_v62 = vcombine.high %v22861_v19, %v22869_v25 }
 0x804   : > { %5940 = vxpose.xlu0.b32.start.end [1/1] (short) (narrow) %v5672_v13, 8  ;;  %7366 = vxpose.xlu1.b32.start.end [1/1] (short) (narrow) %v7191_v63, 8  ;;  %v7195_v57 = vcombine.high %v7150_v47, %v7182_v60  ;;  %v7262_v7 = vcombine.low %v7206_v12, %v7222_v48  ;;  %v7157_v55 = vrot.slane %v7143_v4, %v22337_v43 }
 0x805   : > { %v7199_v6 = vcombine.high %v22849_v59, %v22855_v50  ;;  %v7245_v54 = vrot.slane %v7231_v0, %v22227_v3  ;;  %v7295_v21 = vcombine.high %v7238_v16, %v7254_v32  ;;  %v7192_v1 = vcombine.low %v7141_v45, %v7173_v36 }
 0x806   : > { %v7197_v24 = vcombine.high %v7157_v55, %v7189_v52  ;;  %v7302_v2 = vrot.slane %v7294_v35, %v22337_v43  ;;  %v7229_v9 = vrot.slane %v7215_v26, %v22227_v3  ;;  %v7261_v40 = vrot.slane %v7247_v62, %v22227_v3 }
 0x807   : > { %v7263_v19 = vcombine.high %v7206_v12, %v7222_v48  ;;  %v7270_v25 = vrot.slane %v7262_v7, %v22337_v43  ;;  %v7213_v17 = vrot.slane %v7199_v6, %v22227_v3  ;;  %v5708_v59 = vcombine.low %v22889_v8, %v22918_v44 }
 0x808   : > { %6004 = vxpose.xlu0.b32.start.end [1/1] (short) (narrow) %v5674_v41, 8  ;;  %7430 = vxpose.xlu1.b32.start.end [1/1] (short) (narrow) %v7193_v46, 8  ;;  %v7310_v29 = vcombine.low %v7245_v54, %v7261_v40  ;;  %v7194_v50 = vcombine.low %v7150_v47, %v7182_v60  ;;  %v7309_v63 = vrot.slane %v7295_v21, %v22337_v43  ;;  %v25067_v21 = vld [vmem:[#allocation30_spill] sm:$0xff] }
 0x809   : > { %v7327_v13 = vcombine.high %v7270_v25, %v7302_v2  ;;  %v7278_v36 = vcombine.low %v7213_v17, %v7229_v9  ;;  %v5676_v27 = vcombine.low %v22881_v58, %v22883_v14  ;;  %v5724_v10 = vcombine.low %v22885_v5, %v22899_v51 }
 0x80a   : > { %v7277_v37 = vrot.slane %v7263_v19, %v22337_v43  ;;  %v7311_v45 = vcombine.high %v7245_v54, %v7261_v40  ;;  %v5692_v34 = vcombine.low %v22875_v15, %v22879_v61  ;;  %v5716_v8 = vrot.slane %v5708_v59, %v22227_v3 }
 0x80b   : > { %v7196_v44 = vcombine.low %v7157_v55, %v7189_v52  ;;  %v7318_v16 = vrot.slane %v7310_v29, %v22337_v43  ;;  %v7279_v41 = vcombine.high %v7213_v17, %v7229_v9  ;;  %v5684_v58 = vrot.slane %v5676_v27, %v22227_v3 }
 0x80c   : > { %7334 = vxpose.xlu0.b32.start.end [1/1] (short) (narrow) %v7190_v56, 8  ;;  %7494 = vxpose.xlu1.b32.start.end [1/1] (short) (narrow) %v7195_v57, 8  ;;  %v7329_v18 = vcombine.high %v7277_v37, %v7309_v63  ;;  %v5732_v14 = vrot.slane %v5724_v10, %v22227_v3  ;;  %v7286_v51 = vrot.slane %v7278_v36, %v22337_v43 }
 0x80d   : > { %v5700_v5 = vrot.slane %v5692_v34, %v22227_v3  ;;  %v7326_v60 = vcombine.low %v7270_v25, %v7302_v2  ;;  %v7325_v61 = vrot.slane %v7311_v45, %v22337_v43  ;;  %v7293_v48 = vrot.slane %v7279_v41, %v22337_v43  ;;  %v25069_v2 = vld [vmem:[#allocation31_spill] sm:$0xff] }
 0x80e   : > { %v5772_v46 = vcombine.low %v5716_v8, %v5732_v14  ;;  %v7331_v15 = vcombine.high %v7286_v51, %v7318_v16  ;;  %v5773_v32 = vcombine.high %v5716_v8, %v5732_v14  ;;  %v7328_v47 = vcombine.low %v7277_v37, %v7309_v63 }
 0x80f   : > { %v5740_v4 = vcombine.low %v5684_v58, %v5700_v5  ;;  %v7333_v12 = vcombine.high %v7293_v48, %v7325_v61  ;;  %v5741_v35 = vcombine.high %v5684_v58, %v5700_v5  ;;  %v7330_v57 = vcombine.low %v7286_v51, %v7318_v16 }
 0x810   : > { %7398 = vxpose.xlu0.b32.start.end [1/1] (short) (narrow) %v7192_v1, 8  ;;  %7558 = vxpose.xlu1.b32.start.end [1/1] (short) (narrow) %v7197_v24, 8  ;;  %v5780_v0 = vrot.slane %v5772_v46, %v22337_v43  ;;  %v5787_v26 = vrot.slane %v5773_v32, %v22337_v43  ;;  %v7332_v7 = vcombine.low %v7293_v48, %v7325_v61  ;;  %v5174_v1 = vsel %vm2295_vm4, %v25067_v21, -inf  ;;  %v25068_v24 = vld [vmem:[#allocation36_spill] sm:$0xff] }
 0x811   : > { %v5748_v56 = vrot.slane %v5740_v4, %v22337_v43  ;;  %v5755_v62 = vrot.slane %v5741_v35, %v22337_v43  ;;  %v5181_v9 = vsub.f32 %v25069_v2, %v25068_v24  ;;  %v25071_v4 = vld [vmem:[#allocation19_spill] sm:$0xff] }
 0x813   : > { %v5805_v52 = vcombine.high %v5748_v56, %v5780_v0  ;;  %v5807_v55 = vcombine.high %v5755_v62, %v5787_v26  ;;  %v5804_v6 = vcombine.low %v5748_v56, %v5780_v0  ;;  %v5806_v54 = vcombine.low %v5755_v62, %v5787_v26 }
 0x814   : > { %7462 = vxpose.xlu0.b32.start.end [1/1] (short) (narrow) %v7194_v50, 8  ;;  %7622 = vxpose.xlu1.b32.start.end [1/1] (short) (narrow) %v7327_v13, 8  ;;  %v5184_v40 = vmul.f32 1.442695, %v5181_v9 }
 0x816   : > { %21713 = vpow2.f32 %v5184_v40 }
 0x818   : > { %7526 = vxpose.xlu0.b32.start.end [1/1] (short) (narrow) %v7196_v44, 8  ;;  %7686 = vxpose.xlu1.b32.start.end [1/1] (short) (narrow) %v7329_v18, 8 }
 0x81c   : > { %7590 = vxpose.xlu0.b32.start.end [1/1] (short) (narrow) %v7326_v60, 8  ;;  %7750 = vxpose.xlu1.b32.start.end [1/1] (short) (narrow) %v7331_v15, 8  ;;  %v25070_v15 = vld [vmem:[#allocation21_spill] sm:$0xff] }
 0x820   : > { %7654 = vxpose.xlu0.b32.start.end [1/1] (short) (narrow) %v7328_v47, 8  ;;  %7814 = vxpose.xlu1.b32.start.end [1/1] (short) (narrow) %v7333_v12, 8  ;;  %v23043_v19 = vpop.eup %21713 }
 0x821   : > { %v5189_v29 = vsel %vm2295_vm4, %v23043_v19, 0.0 }
 0x824   : > { %7718 = vxpose.xlu0.b32.start.end [1/1] (short) (narrow) %v7330_v57, 8  ;;  %6100 = vxpose.xlu1.b32.start.end [1/1] (short) (narrow) %v5805_v52, 8 }
 0x828   : > { %7782 = vxpose.xlu0.b32.start.end [1/1] (short) (narrow) %v7332_v7, 8  ;;  %6164 = vxpose.xlu1.b32.start.end [1/1] (short) (narrow) %v5807_v55, 8 }
 0x82c   : > { %6068 = vxpose.xlu0.b32.start.end [1/1] (short) (narrow) %v5804_v6, 8 }
 0x830   : > { %6132 = vxpose.xlu0.b32.start.end [1/1] (short) (narrow) %v5806_v54, 8 }
 0x846   : > { %6722 = vrot.lane.b32.xlu1 %v22465_v30, %s22056_s26 }
 0x84a   : > { %6726 = vrot.lane.b32.xlu1 %v22468_v33, %s22056_s26 }
 0x84e   : > { %6728 = vrot.lane.b32.xlu1 %v22450_v39, %s22056_s26 }
 0x852   : > { %6730 = vrot.lane.b32.xlu1 %v22453_v49, %s22056_s26 }
 0x856   : > { %6734 = vrot.lane.b32.xlu1 %v22456_v53, %s22056_s26 }
 0x85d   : > { %5175 = vmax.xlane.f32.xlu0 %v5174_v1 }
 0x878   : > { %v5828_v25 = vpop.trf.xlu1  ;;  %v5860_v17 = vpop.trf.xlu0 }
 0x87a   : > { %5190 = vadd.xlane.f32.xlu1 %v5189_v29 }
 0x87c   : > { %v5892_v59 = vpop.trf.xlu0  ;;  %v5988_v50 = vpop.trf.xlu1 }
 0x87d   : > { %v6324_v63 = vcombine.low %v5828_v25, %v5892_v59 }
 0x87f   : > { %v6331_v45 = vrot.slane %v6324_v63, %v22227_v3 }
 0x880   : > { %v5924_v13 = vpop.trf.xlu0  ;;  %v6052_v27 = vpop.trf.xlu1 }
 0x881   : > { %v6332_v36 = vcombine.low %v5860_v17, %v5924_v13  ;;  %v6348_v37 = vcombine.low %v5988_v50, %v6052_v27  ;;  %v25075_v27 = vld [vmem:[#allocation14_spill] sm:$0xff] }
 0x883   : > { %v6339_v34 = vrot.slane %v6332_v36, %v22227_v3  ;;  %v6355_v44 = vrot.slane %v6348_v37, %v22227_v3  ;;  %v25074_v36 = vld [vmem:[#allocation12_spill] sm:$0xff] }
 0x884   : > { %v5956_v10 = vpop.trf.xlu0  ;;  %v23061_v60 = vpop.trf.xlu1 }
 0x885   : > { %v6356_v18 = vcombine.low %v6331_v45, %v6339_v34 }
 0x887   : > { %v6363_v58 = vrot.slane %v6356_v18, %v22337_v43 }
 0x888   : > { %v6020_v8 = vpop.trf.xlu0  ;;  %v23070_v61 = vpop.trf.xlu1 }
 0x889   : > { %v6340_v16 = vcombine.low %v5956_v10, %v6020_v8  ;;  %v7854_v23 = vcombine.low %v23061_v60, %v23070_v61 }
 0x88a   : > { %6196 = vxpose.xlu0.b32.start.end [1/1] (short) (narrow) %v5808_v31, 8 }
 0x88b   : > { %v6347_v41 = vrot.slane %v6340_v16, %v22227_v3 }
 0x88c   : > { %v23066_v31 = vpop.trf.xlu0  ;;  %v7510_v42 = vpop.trf.xlu1 }
 0x88d   : > { %v6364_v14 = vcombine.low %v6347_v41, %v6355_v44 }
 0x88f   : > { %v6371_v51 = vrot.slane %v6364_v14, %v22337_v43 }
 0x890   : > { %v23074_v48 = vpop.trf.xlu0  ;;  %v7574_v32 = vpop.trf.xlu1 }
 0x891   : > { %v6372_v5 = vcombine.low %v6363_v58, %v6371_v51  ;;  %v6373_v46 = vcombine.high %v6363_v58, %v6371_v51  ;;  %v7870_v22 = vcombine.low %v7510_v42, %v7574_v32  ;;  %v7846_v18 = vcombine.low %v23066_v31, %v23074_v48 }
 0x893   : > { %21476 = vmatprep.mubr.msk.f32.mxu1 %vm2295_vm4, %v6372_v5  ;;  %21481 = vmatprep.mubr.msk.f32.mxu0 %vm2295_vm4, %v6373_v46  ;;  %v7861_v5 = vrot.slane %v7854_v23, %v22227_v3  ;;  %v7877_v46 = vrot.slane %v7870_v22, %v22227_v3 }
 0x894   : > { %v7638_v47 = vpop.trf.xlu1 }
 0x898   : > { %v7702_v0 = vpop.trf.xlu1 }
 0x89c   : > { %v7766_v56 = vpop.trf.xlu1 }
 0x8a0   : > { %v7830_v52 = vpop.trf.xlu1 }
 0x8a1   : > { %v7920_v16 = vcombine.low %v7766_v56, %v7830_v52 }
 0x8a3   : > { %v7927_v60 = vrot.slane %v7920_v16, %v22227_v3 }
 0x8a4   : > { %v6116_v62 = vpop.trf.xlu1 }
 0x8a8   : > { %v6180_v55 = vpop.trf.xlu1 }
 0x8a9   : > { %v6382_v42 = vcombine.low %v6116_v62, %v6180_v55 }
 0x8ad   : > { %6228 = vxpose.xlu1.b32.start.end [1/1] (short) (narrow) %v5809_v11, 8  ;;  %v23078_v11 = vpop.trf.xlu0 }
 0x8b1   : > { %6292 = vxpose.xlu1.b32.start.end [1/1] (short) (narrow) %v5811_v20, 8  ;;  %v7542_v20 = vpop.trf.xlu0 }
 0x8b2   : > { %v7862_v41 = vcombine.low %v23078_v11, %v7542_v20 }
 0x8b3   : > { %6724 = vrot.lane.b32.xlu0 %v25070_v15, %s22056_s26 }
 0x8b4   : > { %v7869_v61 = vrot.slane %v7862_v41, %v22227_v3 }
 0x8b5   : > { %v7606_v12 = vpop.trf.xlu0 }
 0x8b7   : > { %6732 = vrot.lane.b32.xlu0 %v25071_v4, %s22056_s26 }
 0x8b8   : > { %v23082_v1 = vpop.permute.xlu1 %6722 }
 0x8b9   : > { %v7670_v35 = vpop.trf.xlu0 }
 0x8ba   : > { %v7896_v58 = vcombine.low %v7606_v12, %v7670_v35 }
 0x8bb   : > { %6736 = vrot.lane.b32.xlu0 %v25072_v38, %s22056_s26 }
 0x8bc   : > { %v23085_v9 = vpop.permute.xlu1 %6726  ;;  %v7903_v31 = vrot.slane %v7896_v58, %v22227_v3 }
 0x8bd   : > { %v7734_v57 = vpop.trf.xlu0 }
 0x8c0   : > { %v23087_v40 = vpop.permute.xlu1 %6728 }
 0x8c1   : > { %v7798_v26 = vpop.trf.xlu0 }
 0x8c2   : > { %v7912_v14 = vcombine.low %v7734_v57, %v7798_v26 }
 0x8c4   : > { %v23090_v29 = vpop.permute.xlu1 %6730  ;;  %v7919_v48 = vrot.slane %v7912_v14, %v22227_v3 }
 0x8c5   : > { %v23080_v7 = vpop.trf.xlu0 }
 0x8c6   : > { %v7936_v56 = vcombine.low %v7919_v48, %v7927_v60 }
 0x8c8   : > { %v6735_v59 = vpop.permute.xlu1 %6734 }
 0x8c9   : > { %v6148_v6 = vpop.trf.xlu0 }
 0x8ca   : > { %v6374_v11 = vcombine.low %v23080_v7, %v6148_v6  ;;  %v6755_v7 = vcombine.low %v23085_v9, %v23087_v40 }
 0x8cc   : > { %v6381_v57 = vrot.slane %v6374_v11, %v22227_v3  ;;  %v6762_v9 = vrot.slane %v6755_v7, %v22337_v43 }
 0x8ea   : > { %v5176_v54 = vpop.xlane.xlu0 %5175 }
 0x8eb   : > { %v5180_v24 = vsub.f32 %v25067_v21, %v5176_v54  ;;  %v25073_v21 = vmov 0.0|0.0  }
 0x8ed   : > { %v5182_v2 = vmul.f32 1.442695, %v5180_v24  ;;  %v7853_v24 = vrot.slane %v7846_v18, %v22227_v3 }
 0x8ef   : > { %21715 = vpow2.f32 %v5182_v2  ;;  %v7878_v20 = vcombine.low %v7853_v24, %v7861_v5  ;;  %v25076_v24 = vmov 0.0  }
 0x8f1   : > { %v7885_v2 = vrot.slane %v7878_v20, %v22337_v43 }
 0x8f9   : > { %v21716_v25 = vpop.eup %21715 }
 0x8fa   : > { %v5186_v17 = vsel %vm2295_vm4, %v21716_v25, 0.0 }
 0x8fb   : > { %5187 = vadd.xlane.f32.xlu0 %v5186_v17 }
 0x907   : > { %v5191_v50 = vpop.xlane.xlu1 %5190 }
 0x908   : > { %21717 = vrcp.f32 %v5191_v50  ;;  %v7943_v50 = vrot.slane %v7936_v56, %v22337_v43  ;;  %v25083_v56 = vld [vmem:[#allocation11_spill] sm:$0xff] }
 0x90a   : > { %v6212_v10 = vpop.trf.xlu0 }
 0x912   : > { %v21718_v13 = vpop.eup %21717 }
 0x913   : > { %v5195_v63 = vmul.f32 %v21718_v13, %v23043_v19 }
 0x915   : > { %21479 = vmatprep.subr.msk.mxu0 %vm2295_vm4, %v5195_v63 }
 0x916   : > { %21480 = vmatpush3.xpose.msk.msra.mxu0 %vm2295_vm4, %v5195_v63 }
 0x917   : > { %21578 = vmatprep.subr.bf16.mxu0 %v25073_v21 }
 0x925   : > { %v6725_v37 = vpop.permute.xlu0 %6724 }
 0x926   : > { %v6746_v52 = vcombine.low %v23082_v1, %v6725_v37 }
 0x928   : > { %6260 = vxpose.xlu0.b32.start.end [1/1] (short) (narrow) %v5810_v28, 8  ;;  %v7904_v28 = vcombine.low %v7638_v47, %v7702_v0  ;;  %v7886_v47 = vcombine.low %v7869_v61, %v7877_v46  ;;  %v6389_v0 = vrot.slane %v6382_v42, %v22227_v3  ;;  %v6753_v1 = vrot.slane %v6746_v52, %v22337_v43  ;;  %v25085_v52 = vld [vmem:[#allocation15_spill] sm:$0xff] }
 0x929   : > { %v6733_v19 = vpop.permute.xlu0 %6732 }
 0x92a   : > { %v7911_v54 = vrot.slane %v7904_v28, %v22227_v3  ;;  %v6764_v26 = vcombine.low %v23090_v29, %v6733_v19  ;;  %v7893_v17 = vrot.slane %v7886_v47, %v22337_v43  ;;  %v6406_v13 = vcombine.low %v6381_v57, %v6389_v0  ;;  %v25081_v0 = vld [vmem:[#allocation10_spill] sm:$0xff]  ;;  %v25084_v57 = vld [vmem:[#allocation13_spill] sm:$0xff] }
 0x92b   : > { %v20507_v23 = vcombine.high %v6753_v1, %v6762_v9 }
 0x92c   : > { %v7928_v35 = vcombine.low %v7903_v31, %v7911_v54  ;;  %v6771_v29 = vrot.slane %v6764_v26, %v22337_v43  ;;  %v7894_v37 = vcombine.low %v7885_v2, %v7893_v17  ;;  %v25086_v26 = vld [vmem:[#allocation22_spill] sm:$0xff] }
 0x92d   : > { %v6737_v45 = vpop.permute.xlu0 %6736  ;;  %v6244_v51 = vpop.trf.xlu1  ;;  %v8051_v5 = vrot.slane %v20507_v23, %v22227_v3 }
 0x92e   : > { %v6773_v12 = vcombine.low %v6735_v59, %v6737_v45  ;;  %v7935_v59 = vrot.slane %v7928_v35, %v22337_v43  ;;  %v7895_v45 = vcombine.high %v7885_v2, %v7893_v17  ;;  %v25082_v35 = vld [vmem:[#allocation9_spill] sm:$0xff] }
 0x92f   : > { %v25089_v2 = vld [vmem:[#allocation25_spill] sm:$0xff] }
 0x930   : > { %v6780_v6 = vrot.slane %v6773_v12, %v22337_v43  ;;  %v7944_v19 = vcombine.low %v7935_v59, %v7943_v50 }
 0x931   : > { %v6308_v32 = vpop.trf.xlu1 }
 0x932   : > { %v6398_v62 = vcombine.low %v6244_v51, %v6308_v32  ;;  %v7951_v40 = vcombine.low %v6771_v29, %v6780_v6  ;;  %v21576_v58 = vpack.c.bf16 %v7944_v19, %v7894_v37  ;;  %v25094_v37 = vld [vmem:[#allocation35_spill] sm:$0xff] }
 0x934   : > { %v6405_v63 = vrot.slane %v6398_v62, %v22227_v3  ;;  %v7965_v28 = vrot.slane %v7951_v40, %v22227_v3  ;;  %v25087_v62 = vld [vmem:[#allocation23_spill] sm:$0xff]  ;;  %v25091_v40 = vld [vmem:[#allocation32_spill] sm:$0xff] }
 0x951   : > { %9678 = vrot.lane.b32.xlu0 %v25074_v36, %s22057_s12 }
 0x955   : > { %9686 = vrot.lane.b32.xlu0 %v25075_v27, %s22057_s12  ;;  %v20508_v27 = vcombine.high %v6771_v29, %v6780_v6 }
 0x957   : > { %v8058_v18 = vrot.slane %v20508_v27, %v22227_v3  ;;  %v25092_v27 = vld [vmem:[#allocation33_spill] sm:$0xff] }
 0x959   : > { %v8059_v54 = vcombine.low %v8051_v5, %v8058_v18 }
 0x988   : > { %v5188_v34 = vpop.xlane.xlu0 %5187 }
 0x989   : > { %21719 = vrcp.f32 %v5188_v34  ;;  %v7945_v34 = vcombine.high %v7935_v59, %v7943_v50 }
 0x98b   : > { %v21579_v14 = vpack.c.bf16 %v7945_v34, %v7895_v45 }
 0x993   : > { %v21720_v8 = vpop.eup %21719 }
 0x994   : > { %v5194_v44 = vmul.f32 %v21720_v8, %v21716_v25  ;;  %v6413_v8 = vrot.slane %v6406_v13, %v22337_v43 }
 0x996   : > { %21474 = vmatprep.subr.msk.mxu1 %vm2295_vm4, %v5194_v44 }
 0x997   : > { %21475 = vmatpush3.xpose.msk.msra.mxu1 %vm2295_vm4, %v5194_v44  ;;  %v7950_v44 = vcombine.low %v6753_v1, %v6762_v9  ;;  %v25090_v9 = vld [vmem:[#allocation16_spill] sm:$0xff] }
 0x998   : > { %21575 = vmatprep.subr.bf16.mxu1 %v25073_v21 }
 0x999   : > { %v7958_v51 = vrot.slane %v7950_v44, %v22227_v3 }
 0x99b   : > { %v7966_v46 = vcombine.low %v7958_v51, %v7965_v28 }
 0x9a8   : > { %v6276_v55 = vpop.trf.xlu0 }
 0x9a9   : > { %v6390_v25 = vcombine.low %v6212_v10, %v6276_v55  ;;  %v25088_v55 = vld [vmem:[#allocation24_spill] sm:$0xff] }
 0x9ab   : > { %v6397_v36 = vrot.slane %v6390_v25, %v22227_v3 }
 0x9ad   : > { %v6414_v10 = vcombine.low %v6397_v36, %v6405_v63 }
 0x9af   : > { %v6421_v22 = vrot.slane %v6414_v10, %v22337_v43  ;;  %v25093_v10 = vld [vmem:[#allocation34_spill] sm:$0xff] }
 0x9b1   : > { %v6422_v16 = vcombine.low %v6413_v8, %v6421_v22  ;;  %v6423_v41 = vcombine.high %v6413_v8, %v6421_v22 }
 0x9b3   : > { %21477 = vmatmul.mubr.msk.f32.vlgmr.msra.gmra.mrb[6].mxu1 %vm2295_vm4, %v6422_v16  ;;  %21482 = vmatmul.mubr.msk.f32.vlgmr.msra.gmra.mrb[10].mxu0 %vm2295_vm4, %v6423_v41 }
 0x9b4   : > { %21577 = vmatpush3.bf16.msra.mxu1 %v21576_v58  ;;  %21580 = vmatpush3.bf16.msra.mxu0 %v21579_v14 }
 0x9b5   : > { %21488 = vmatprep.mubr.msk.f32.mxu1 %vm22051_vm2, %v25076_v24  ;;  %21495 = vmatprep.mubr.msk.f32.mxu0 %vm22051_vm2, %v25076_v24 }
 0x9b7   : > { %21489 = vmatmul.mubr.msk.f32.vlgmr.msra.gmra.mrb[8].mxu1 %vm2129_vm3, %v7966_v46  ;;  %21496 = vmatmul.mubr.msk.f32.vlgmr.msra.gmra.mrb[12].mxu0 %vm2129_vm3, %v8059_v54 }
 0x9c3   : > { %v9679_v60 = vpop.permute.xlu0 %9678 }
 0x9c4   : > { %9732 = vxpose.xlu0.b32.start.end [1/1] (short) (narrow) %v9679_v60, 16 }
 0x9c7   : > { %v9687_v50 = vpop.permute.xlu0 %9686 }
 0xa44   : > { %v9748_v44 = vpop.trf.xlu0 }
 0xa48   : > { %v23198_v22 = vpop.trf.xlu0 }
 0xa86   : > { %v23150_v61 = vpop.f32.mrb[6].mxu1  ;;  %v23152_v42 = vpop.f32.mrb[10].mxu0 }
 0xa87   : > { %25077 = vst [vmem:[#allocation30_spill] sm:$0xff] %v23150_v61  ;;  %25078 = vst [vmem:[#allocation36_spill] sm:$0xff] %v23152_v42  ;;  %v23154_v31 = vpop.f32.mrb[7].mxu1  ;;  %v23156_v48 = vpop.f32.mrb[11].mxu0 }
 0xa88   : > { %25079 = vst [vmem:[#allocation31_spill] sm:$0xff] %v23154_v31  ;;  %25080 = vst [vmem:[#allocation21_spill] sm:$0xff] %v23156_v48 }
 0xa8a   : > { %v23158_v11 = vpop.f32.mrb[8].mxu1  ;;  %v8128_v32 = vpop.f32.mrb[12].mxu0 }
 0xa8b   : > { %v21490_v20 = vpop.f32.mrb[9].mxu1  ;;  %v21497_v47 = vpop.f32.mrb[13].mxu0  ;;  %v8135_v12 = vsel %vm2295_vm4, %v8128_v32, -inf  ;;  %v8132_v23 = vsel %vm2295_vm4, %v23158_v11, -inf }
 0xa8c   : > { %8136 = vmax.xlane.f32.xlu1 %v8135_v12 }
 0xa9d   : > { %9676 = vrot.lane.b32.xlu1 %v25081_v0, %s22057_s12 }
 0xaa1   : > { %9680 = vrot.lane.b32.xlu1 %v25082_v35, %s22057_s12 }
 0xaa5   : > { %9682 = vrot.lane.b32.xlu1 %v25083_v56, %s22057_s12 }
 0xaa9   : > { %9684 = vrot.lane.b32.xlu1 %v25084_v57, %s22057_s12 }
 0xaad   : > { %9688 = vrot.lane.b32.xlu1 %v25085_v52, %s22057_s12 }
 0xab1   : > { %8154 = vrot.lane.b32.xlu1 %v25086_v26, %s22056_s26 }
 0xab5   : > { %8158 = vrot.lane.b32.xlu1 %v25087_v62, %s22056_s26 }
 0xab9   : > { %8162 = vrot.lane.b32.xlu1 %v25088_v55, %s22056_s26 }
 0xabd   : > { %8166 = vrot.lane.b32.xlu1 %v25089_v2, %s22056_s26 }
 0xb19   : > { %v8137_v7 = vpop.xlane.xlu1 %8136 }
 0xb1a   : > { %v8139_v19 = vsub.f32 %v8128_v32, %v8137_v7 }
 0xb1c   : > { %v8142_v45 = vmul.f32 1.442695, %v8139_v19 }
 0xb1d   : > { %v9677_v6 = vpop.permute.xlu1 %9676 }
 0xb1e   : > { %9700 = vxpose.xlu1.b32.start.end [1/1] (short) (narrow) %v9677_v6, 16  ;;  %21721 = vpow2.f32 %v8142_v45 }
 0xb21   : > { %v9681_v25 = vpop.permute.xlu1 %9680 }
 0xb22   : > { %9764 = vxpose.xlu0.b32.start.end [1/1] (short) (narrow) %v9681_v25, 16 }
 0xb25   : > { %v9683_v17 = vpop.permute.xlu1 %9682 }
 0xb27   : > { %9796 = vxpose.xlu0.b32.start.end [1/1] (short) (narrow) %v9683_v17, 16 }
 0xb28   : > { %v21722_v34 = vpop.eup %21721 }
 0xb29   : > { %v9685_v59 = vpop.permute.xlu1 %9684  ;;  %v8147_v8 = vsel %vm2295_vm4, %v21722_v34, 0.0 }
 0xb2a   : > { %9828 = vxpose.xlu1.b32.start.end [1/1] (short) (narrow) %v9685_v59, 16 }
 0xb2c   : > { %9860 = vxpose.xlu0.b32.start.end [1/1] (short) (narrow) %v9687_v50, 16 }
 0xb2d   : > { %v9689_v13 = vpop.permute.xlu1 %9688 }
 0xb2f   : > { %9892 = vxpose.xlu1.b32.start.end [1/1] (short) (narrow) %v9689_v13, 16 }
 0xb31   : > { %v8155_v1 = vpop.permute.xlu1 %8154 }
 0xb34   : > { %8178 = vxpose.xlu1.b32.start.end [1/1] (short) (narrow) %v8155_v1, 16 }
 0xb35   : > { %v8159_v29 = vpop.permute.xlu1 %8158 }
 0xb39   : > { %8242 = vxpose.xlu1.b32.start.end [1/1] (short) (narrow) %v8159_v29, 16  ;;  %v8163_v63 = vpop.permute.xlu1 %8162 }
 0xb3d   : > { %v8167_v36 = vpop.permute.xlu1 %8166 }
 0xb3e   : > { %8306 = vxpose.xlu1.b32.start.end [1/1] (short) (narrow) %v8163_v63, 16 }
 0xb43   : > { %8370 = vxpose.xlu1.b32.start.end [1/1] (short) (narrow) %v8167_v36, 16 }
 0xb59   : > { %9690 = vrot.lane.b32.xlu0 %v25090_v9, %s22057_s12 }
 0xb5d   : > { %8156 = vrot.lane.b32.xlu0 %v25091_v40, %s22056_s26 }
 0xb61   : > { %8160 = vrot.lane.b32.xlu0 %v25092_v27, %s22056_s26 }
 0xb65   : > { %8164 = vrot.lane.b32.xlu0 %v25093_v10, %s22056_s26 }
 0xb69   : > { %8168 = vrot.lane.b32.xlu0 %v25094_v37, %s22056_s26 }
 0xb6d   : > { %9618 = vrot.lane.b32.xlu0 %v25070_v15, %s22058_s13 }
 0xb71   : > { %9626 = vrot.lane.b32.xlu0 %v25071_v4, %s22058_s13 }
 0xb75   : > { %9630 = vrot.lane.b32.xlu0 %v25072_v38, %s22058_s13 }
 0xb94   : > { %8148 = vadd.xlane.f32.xlu0 %v8147_v8 }
 0xb98   : > { %8133 = vmax.xlane.f32.xlu0 %v8132_v23 }
 0xb9e   : > { %v9716_v28 = vpop.trf.xlu1 }
 0xba2   : > { %v9780_v15 = vpop.trf.xlu0  ;;  %v23234_v50 = vpop.trf.xlu1 }
 0xba3   : > { %v9956_v18 = vcombine.low %v9716_v28, %v9780_v15  ;;  %v9957_v38 = vcombine.high %v9716_v28, %v9780_v15 }
 0xba5   : > { %v23203_v14 = vrot.slane %v9956_v18, %v22227_v3  ;;  %v23206_v51 = vrot.slane %v9957_v38, %v22227_v3 }
 0xba6   : > { %v23200_v4 = vpop.trf.xlu0 }
 0xbaa   : > { %v9812_v16 = vpop.trf.xlu0  ;;  %v23236_v13 = vpop.trf.xlu1 }
 0xbab   : > { %v9972_v41 = vcombine.low %v9748_v44, %v9812_v16  ;;  %v9973_v58 = vcombine.high %v9748_v44, %v9812_v16 }
 0xbad   : > { %v23209_v5 = vrot.slane %v9972_v41, %v22227_v3  ;;  %v23212_v46 = vrot.slane %v9973_v58, %v22227_v3 }
 0xbae   : > { %v23222_v47 = vpop.trf.xlu0  ;;  %v23240_v63 = vpop.trf.xlu1 }
 0xbb2   : > { %v23224_v12 = vpop.trf.xlu0  ;;  %v23243_v36 = vpop.trf.xlu1 }
 0xbb6   : > { %v23226_v0 = vpop.trf.xlu0  ;;  %v23245_v9 = vpop.trf.xlu1 }
 0xbba   : > { %v8194_v19 = vpop.trf.xlu1 }
 0xbbe   : > { %v23249_v8 = vpop.trf.xlu1 }
 0xbcb   : > { %v9691_v35 = vpop.permute.xlu0 %9690 }
 0xbcc   : > { %9924 = vxpose.xlu0.b32.start.end [1/1] (short) (narrow) %v9691_v35, 16 }
 0xbcf   : > { %v8157_v56 = vpop.permute.xlu0 %8156 }
 0xbd1   : > { %8210 = vxpose.xlu0.b32.start.end [1/1] (short) (narrow) %v8157_v56, 16 }
 0xbd3   : > { %v8161_v57 = vpop.permute.xlu0 %8160 }
 0xbd6   : > { %8274 = vxpose.xlu0.b32.start.end [1/1] (short) (narrow) %v8161_v57, 16 }
 0xbd7   : > { %v8165_v52 = vpop.permute.xlu0 %8164 }
 0xbdb   : > { %8338 = vxpose.xlu0.b32.start.end [1/1] (short) (narrow) %v8165_v52, 16  ;;  %v8169_v7 = vpop.permute.xlu0 %8168 }
 0xbdf   : > { %v23228_v6 = vpop.permute.xlu0 %9618 }
 0xbe0   : > { %8402 = vxpose.xlu0.b32.start.end [1/1] (short) (narrow) %v8169_v7, 16  ;;  %25095 = vst [vmem:[#allocation19_spill] sm:$0xff] %v23228_v6 }
 0xbe3   : > { %v23230_v25 = vpop.permute.xlu0 %9626 }
 0xbe4   : > { %25096 = vst [vmem:[#allocation20_spill] sm:$0xff] %v23230_v25 }
 0xbe7   : > { %v23232_v17 = vpop.permute.xlu0 %9630 }
 0xbe8   : > { %25097 = vst [vmem:[#allocation12_spill] sm:$0xff] %v23232_v17 }
 0xc21   : > { %v8149_v59 = vpop.xlane.xlu0 %8148 }
 0xc22   : > { %21723 = vrcp.f32 %v8149_v59 }
 0xc25   : > { %v23247_v45 = vpop.xlane.xlu0 %8133 }
 0xc2c   : > { %v21724_v1 = vpop.eup %21723 }
 0xc2d   : > { %v8153_v29 = vmul.f32 %v21724_v1, %v21722_v34  ;;  %v8258_v34 = vpop.trf.xlu1 }
 0xc2e   : > { %v8434_v7 = vcombine.low %v8194_v19, %v8258_v34  ;;  %v8435_v60 = vcombine.high %v8194_v19, %v8258_v34 }
 0xc2f   : > { %21503 = vmatprep.subr.msk.mxu0 %vm2295_vm4, %v8153_v29 }
 0xc30   : > { %21504 = vmatpush3.xpose.msk.msra.mxu0 %vm2295_vm4, %v8153_v29  ;;  %v8442_v54 = vrot.slane %v8434_v7, %v22227_v3 }
 0xc31   : > { %21584 = vmatprep.subr.bf16.mxu0 %v25073_v21  ;;  %v23255_v28 = vpop.trf.xlu1 }
 0xc32   : > { %v8571_v48 = vcombine.high %v23249_v8, %v23255_v28 }
 0xc35   : > { %v8322_v38 = vpop.trf.xlu1 }
 0xc39   : > { %v23261_v58 = vpop.trf.xlu1 }
 0xc3d   : > { %v8386_v57 = vpop.trf.xlu1 }
 0xc3e   : > { %v8466_v59 = vcombine.low %v8322_v38, %v8386_v57  ;;  %v8467_v1 = vcombine.high %v8322_v38, %v8386_v57  ;;  %v8449_v57 = vrot.slane %v8435_v60, %v22227_v3 }
 0xc40   : > { %v8474_v10 = vrot.slane %v8466_v59, %v22227_v3 }
 0xc41   : > { %v23267_v61 = vpop.trf.xlu1 }
 0xc4c   : > { %v23251_v44 = vpop.trf.xlu0 }
 0xc50   : > { %v23253_v23 = vpop.trf.xlu0 }
 0xc54   : > { %v8226_v15 = vpop.trf.xlu0 }
 0xc58   : > { %v23257_v18 = vpop.trf.xlu0 }
 0xc5c   : > { %v8290_v16 = vpop.trf.xlu0 }
 0xc5d   : > { %v8450_v56 = vcombine.low %v8226_v15, %v8290_v16  ;;  %v8451_v29 = vcombine.high %v8226_v15, %v8290_v16  ;;  %v8481_v15 = vrot.slane %v8467_v1, %v22227_v3 }
 0xc5f   : > { %v8458_v20 = vrot.slane %v8450_v56, %v22227_v3  ;;  %v8465_v38 = vrot.slane %v8451_v29, %v22227_v3  ;;  %v9988_v29 = vcombine.low %v23236_v13, %v23243_v36 }
 0xc60   : > { %v23259_v41 = vpop.trf.xlu0 }
 0xc61   : > { %v8587_v37 = vcombine.high %v23257_v18, %v23259_v41  ;;  %v8498_v16 = vcombine.low %v8442_v54, %v8458_v20  ;;  %v8499_v24 = vcombine.high %v8442_v54, %v8458_v20  ;;  %v8514_v6 = vcombine.low %v8449_v57, %v8465_v38 }
 0xc62   : > { %v9996_v20 = vrot.slane %v9988_v29, %v22227_v3 }
 0xc63   : > { %v8506_v25 = vrot.slane %v8498_v16, %v22337_v43 }
 0xc64   : > { %v8354_v35 = vpop.trf.xlu0 }
 0xc68   : > { %v23263_v52 = vpop.trf.xlu0 }
 0xc6c   : > { %v8418_v32 = vpop.trf.xlu0 }
 0xc6d   : > { %v8482_v31 = vcombine.low %v8354_v35, %v8418_v32  ;;  %v8483_v42 = vcombine.high %v8354_v35, %v8418_v32  ;;  %v10004_v32 = vcombine.low %v23224_v12, %v23251_v44  ;;  %v8603_v35 = vcombine.high %v23261_v58, %v23267_v61 }
 0xc6f   : > { %v8490_v19 = vrot.slane %v8482_v31, %v22227_v3  ;;  %v8497_v34 = vrot.slane %v8483_v42, %v22227_v3  ;;  %v23288_v31 = vrot.slane %v8571_v48, %v22227_v3  ;;  %v23291_v42 = vrot.slane %v8587_v37, %v22227_v3 }
 0xc70   : > { %v23282_v56 = vpop.trf.xlu0 }
 0xc71   : > { %v8530_v7 = vcombine.low %v8474_v10, %v8490_v19  ;;  %v8531_v59 = vcombine.high %v8474_v10, %v8490_v19  ;;  %v8546_v1 = vcombine.low %v8481_v15, %v8497_v34  ;;  %v8619_v40 = vcombine.high %v23263_v52, %v23282_v56 }
 0xc72   : > { %v10012_v10 = vrot.slane %v10004_v32, %v22227_v3  ;;  %v23299_v19 = vrot.slane %v8603_v35, %v22227_v3  ;;  %v8547_v17 = vcombine.high %v8481_v15, %v8497_v34  ;;  %v8651_v16 = vcombine.high %v23288_v31, %v23291_v42 }
 0xc73   : > { %v8538_v60 = vrot.slane %v8530_v7, %v22337_v43  ;;  %v23302_v48 = vrot.slane %v8619_v40, %v22227_v3  ;;  %v8545_v2 = vrot.slane %v8531_v59, %v22337_v43  ;;  %v8554_v54 = vrot.slane %v8546_v1, %v22337_v43 }
 0xc74   : > { %v8515_v35 = vcombine.high %v8449_v57, %v8465_v38  ;;  %v8513_v40 = vrot.slane %v8499_v24, %v22337_v43  ;;  %v8522_v15 = vrot.slane %v8514_v6, %v22337_v43  ;;  %v10052_v34 = vcombine.low %v9996_v20, %v10012_v10 }
 0xc75   : > { %v8563_v37 = vcombine.high %v8506_v25, %v8538_v60  ;;  %v8562_v21 = vcombine.low %v8506_v25, %v8538_v60  ;;  %v8683_v32 = vcombine.high %v23299_v19, %v23302_v48  ;;  %v10005_v25 = vcombine.high %v23224_v12, %v23251_v44 }
 0xc76   : > { %v8564_v7 = vcombine.low %v8513_v40, %v8545_v2  ;;  %v8566_v59 = vcombine.low %v8522_v15, %v8554_v54  ;;  %v8561_v1 = vrot.slane %v8547_v17, %v22337_v43  ;;  %v9989_v38 = vcombine.high %v23236_v13, %v23243_v36 }
 0xc77   : > { %8738 = vxpose.xlu0.b32.start.end [1/1] (short) (narrow) %v8563_v37, 8  ;;  %8706 = vxpose.xlu1.b32.start.end [1/1] (short) (narrow) %v8562_v21, 8  ;;  %v23317_v29 = vrot.slane %v8683_v32, %v22337_v43  ;;  %v23322_v21 = vrot.slane %v8651_v16, %v22337_v43  ;;  %v8529_v24 = vrot.slane %v8515_v35, %v22337_v43 }
 0xc78   : > { %v10019_v12 = vrot.slane %v10005_v25, %v22227_v3  ;;  %v10053_v44 = vcombine.high %v9996_v20, %v10012_v10  ;;  %v8565_v17 = vcombine.high %v8513_v40, %v8545_v2  ;;  %v10060_v60 = vrot.slane %v10052_v34, %v22337_v43 }
 0xc79   : > { %v8704_v6 = vcombine.low %v23322_v21, %v23317_v29  ;;  %v8568_v57 = vcombine.low %v8529_v24, %v8561_v1  ;;  %v10003_v37 = vrot.slane %v9989_v38, %v22227_v3  ;;  %v25098_v13 = vcombine.low %v23203_v14, %v23209_v5 }
 0xc7a   : > { %v10140_v32 = vcombine.low %v23226_v0, %v23253_v23  ;;  %v8567_v35 = vcombine.high %v8522_v15, %v8554_v54  ;;  %v10067_v2 = vrot.slane %v10053_v44, %v22337_v43  ;;  %v10092_v10 = vcombine.low %v23234_v50, %v23200_v4 }
 0xc7b   : > { %8770 = vxpose.xlu0.b32.start.end [1/1] (short) (narrow) %v8564_v7, 8  ;;  %8834 = vxpose.xlu1.b32.start.end [1/1] (short) (narrow) %v8566_v59, 8  ;;  %v10028_v36 = vrot.slane %v25098_v13, %v22337_v43  ;;  %v10068_v16 = vcombine.low %v10003_v37, %v10019_v12  ;;  %v10108_v20 = vcombine.low %v23198_v22, %v23222_v47 }
 0xc7c   : > { %v10124_v40 = vcombine.low %v23240_v63, %v23245_v9  ;;  %v25099_v34 = vcombine.high %v23203_v14, %v23209_v5  ;;  %v10069_v54 = vcombine.high %v10003_v37, %v10019_v12  ;;  %v10148_v15 = vrot.slane %v10140_v32, %v22227_v3 }
 0xc7d   : > { %v10084_v25 = vcombine.low %v10028_v36, %v10060_v60  ;;  %v8569_v59 = vcombine.high %v8529_v24, %v8561_v1  ;;  %v10076_v44 = vrot.slane %v10068_v16, %v22337_v43  ;;  %v25100_v14 = vcombine.low %v23206_v51, %v23212_v46 }
 0xc7e   : > { %v10035_v7 = vrot.slane %v25099_v34, %v22337_v43  ;;  %v10132_v13 = vrot.slane %v10124_v40, %v22227_v3  ;;  %v10141_v12 = vcombine.high %v23226_v0, %v23253_v23  ;;  %v10085_v24 = vcombine.high %v10028_v36, %v10060_v60 }
 0xc7f   : > { %8802 = vxpose.xlu0.b32.start.end [1/1] (short) (narrow) %v8565_v17, 8  ;;  %8898 = vxpose.xlu1.b32.start.end [1/1] (short) (narrow) %v8568_v57, 8  ;;  %v10100_v17 = vrot.slane %v10092_v10, %v22227_v3  ;;  %v10116_v57 = vrot.slane %v10108_v20, %v22227_v3  ;;  %v10044_v5 = vrot.slane %v25100_v14, %v22337_v43 }
 0xc80   : > { %v10086_v38 = vcombine.low %v10035_v7, %v10067_v2  ;;  %v10188_v1 = vcombine.low %v10132_v13, %v10148_v15  ;;  %v10083_v16 = vrot.slane %v10069_v54, %v22337_v43  ;;  %v10109_v32 = vcombine.high %v23198_v22, %v23222_v47 }
 0xc81   : > { %v10088_v37 = vcombine.low %v10044_v5, %v10076_v44  ;;  %v10156_v10 = vcombine.low %v10100_v17, %v10116_v57  ;;  %v25101_v0 = vcombine.high %v23206_v51, %v23212_v46  ;;  %v10155_v60 = vrot.slane %v10141_v12, %v22227_v3 }
 0xc82   : > { %v10189_v36 = vcombine.high %v10132_v13, %v10148_v15  ;;  %v10087_v20 = vcombine.high %v10035_v7, %v10067_v2  ;;  %v10196_v22 = vrot.slane %v10188_v1, %v22337_v43  ;;  %v8618_v46 = vcombine.low %v23263_v52, %v23282_v56 }
 0xc83   : > { %8866 = vxpose.xlu0.b32.start.end [1/1] (short) (narrow) %v8567_v35, 8  ;;  %10228 = vxpose.xlu1.b32.start.end [1/1] (short) (narrow) %v10084_v25, 8  ;;  %v10093_v35 = vcombine.high %v23234_v50, %v23200_v4  ;;  %v10125_v25 = vcombine.high %v23240_v63, %v23245_v9  ;;  %v10051_v23 = vrot.slane %v25101_v0, %v22337_v43 }
 0xc84   : > { %v10123_v4 = vrot.slane %v10109_v32, %v22227_v3  ;;  %v10157_v63 = vcombine.high %v10100_v17, %v10116_v57  ;;  %v10164_v9 = vrot.slane %v10156_v10, %v22337_v43  ;;  %v10089_v34 = vcombine.high %v10044_v5, %v10076_v44 }
 0xc85   : > { %v10090_v40 = vcombine.low %v10051_v23, %v10083_v16  ;;  %v10107_v47 = vrot.slane %v10093_v35, %v22227_v3  ;;  %v10139_v50 = vrot.slane %v10125_v25, %v22227_v3  ;;  %v10203_v7 = vrot.slane %v10189_v36, %v22337_v43 }
 0xc86   : > { %v10220_v2 = vcombine.low %v10164_v9, %v10196_v22  ;;  %v8586_v15 = vcombine.low %v23257_v18, %v23259_v41  ;;  %v8570_v57 = vcombine.low %v23249_v8, %v23255_v28  ;;  %v8626_v52 = vrot.slane %v8618_v46, %v22227_v3 }
 0xc87   : > { %8930 = vxpose.xlu0.b32.start.end [1/1] (short) (narrow) %v8569_v59, 8  ;;  %10292 = vxpose.xlu1.b32.start.end [1/1] (short) (narrow) %v10086_v38, 8  ;;  %v10204_v51 = vcombine.low %v10139_v50, %v10155_v60  ;;  %v10172_v54 = vcombine.low %v10107_v47, %v10123_v4  ;;  %v8602_v59 = vcombine.low %v23261_v58, %v23267_v61 }
 0xc88   : > { %v10171_v38 = vrot.slane %v10157_v63, %v22337_v43  ;;  %v10205_v17 = vcombine.high %v10139_v50, %v10155_v60  ;;  %v10091_v56 = vcombine.high %v10051_v23, %v10083_v16  ;;  %v10173_v14 = vcombine.high %v10107_v47, %v10123_v4 }
 0xc89   : > { %v10212_v13 = vrot.slane %v10204_v51, %v22337_v43  ;;  %v8594_v18 = vrot.slane %v8586_v15, %v22227_v3  ;;  %v8610_v41 = vrot.slane %v8602_v59, %v22227_v3  ;;  %v10180_v61 = vrot.slane %v10172_v54, %v22337_v43 }
 0xc8a   : > { %v10222_v44 = vcombine.low %v10171_v38, %v10203_v7  ;;  %v8578_v58 = vrot.slane %v8570_v57, %v22227_v3  ;;  %v10221_v12 = vcombine.high %v10164_v9, %v10196_v22  ;;  %v10219_v28 = vrot.slane %v10205_v17, %v22337_v43 }
 0xc8b   : > { %10260 = vxpose.xlu0.b32.start.end [1/1] (short) (narrow) %v10085_v24, 8  ;;  %10356 = vxpose.xlu1.b32.start.end [1/1] (short) (narrow) %v10088_v37, 8  ;;  %v8666_v5 = vcombine.low %v8610_v41, %v8626_v52  ;;  %v10224_v8 = vcombine.low %v10180_v61, %v10212_v13  ;;  %v10187_v24 = vrot.slane %v10173_v14, %v22337_v43 }
 0xc8c   : > { %v8634_v1 = vcombine.low %v8578_v58, %v8594_v18  ;;  %v8667_v37 = vcombine.high %v8610_v41, %v8626_v52  ;;  %v10223_v16 = vcombine.high %v10171_v38, %v10203_v7  ;;  %v8635_v25 = vcombine.high %v8578_v58, %v8594_v18 }
 0xc8d   : > { %v10226_v32 = vcombine.low %v10187_v24, %v10219_v28  ;;  %v8674_v35 = vrot.slane %v8666_v5, %v22337_v43  ;;  %v8682_v0 = vcombine.low %v23299_v19, %v23302_v48  ;;  %v10225_v23 = vcombine.high %v10180_v61, %v10212_v13 }
 0xc8e   : > { %v8642_v10 = vrot.slane %v8634_v1, %v22337_v43  ;;  %v8681_v36 = vrot.slane %v8667_v37, %v22337_v43  ;;  %v10227_v22 = vcombine.high %v10187_v24, %v10219_v28 }
 0xc8f   : > { %10324 = vxpose.xlu0.b32.start.end [1/1] (short) (narrow) %v10087_v20, 8  ;;  %10420 = vxpose.xlu1.b32.start.end [1/1] (short) (narrow) %v10090_v40, 8  ;;  %v8650_v20 = vcombine.low %v23288_v31, %v23291_v42  ;;  %v8649_v40 = vrot.slane %v8635_v25, %v22337_v43  ;;  %v8690_v47 = vrot.slane %v8682_v0, %v22337_v43 }
 0xc90   : > { %v8698_v60 = vcombine.low %v8642_v10, %v8674_v35  ;;  %v8699_v19 = vcombine.high %v8642_v10, %v8674_v35  ;;  %v8705_v31 = vcombine.high %v23322_v21, %v23317_v29  ;;  %v8138_v42 = vsub.f32 %v23158_v11, %v23247_v45  ;;  %v25102_v21 = vld [vmem:[#allocation25_spill] sm:$0xff] }
 0xc91   : > { %v8700_v4 = vcombine.low %v8649_v40, %v8681_v36  ;;  %v8658_v50 = vrot.slane %v8650_v20, %v22337_v43  ;;  %v8701_v63 = vcombine.high %v8649_v40, %v8681_v36 }
 0xc92   : > { %v8140_v51 = vmul.f32 1.442695, %v8138_v42 }
 0xc93   : > { %10388 = vxpose.xlu0.b32.start.end [1/1] (short) (narrow) %v10089_v34, 8  ;;  %10484 = vxpose.xlu1.b32.start.end [1/1] (short) (narrow) %v10220_v2, 8  ;;  %v8702_v48 = vcombine.low %v8658_v50, %v8690_v47  ;;  %v8703_v9 = vcombine.high %v8658_v50, %v8690_v47 }
 0xc94   : > { %21725 = vpow2.f32 %v8140_v51 }
 0xc97   : > { %10452 = vxpose.xlu0.b32.start.end [1/1] (short) (narrow) %v10091_v56, 8  ;;  %10548 = vxpose.xlu1.b32.start.end [1/1] (short) (narrow) %v10222_v44, 8 }
 0xc9b   : > { %10516 = vxpose.xlu0.b32.start.end [1/1] (short) (narrow) %v10221_v12, 8  ;;  %10612 = vxpose.xlu1.b32.start.end [1/1] (short) (narrow) %v10224_v8, 8 }
 0xc9f   : > { %10580 = vxpose.xlu0.b32.start.end [1/1] (short) (narrow) %v10223_v16, 8  ;;  %10676 = vxpose.xlu1.b32.start.end [1/1] (short) (narrow) %v10226_v32, 8 }
 0xca3   : > { %10644 = vxpose.xlu0.b32.start.end [1/1] (short) (narrow) %v10225_v23, 8  ;;  %8962 = vxpose.xlu1.b32.start.end [1/1] (short) (narrow) %v8698_v60, 8 }
 0xca7   : > { %10708 = vxpose.xlu0.b32.start.end [1/1] (short) (narrow) %v10227_v22, 8  ;;  %9026 = vxpose.xlu1.b32.start.end [1/1] (short) (narrow) %v8700_v4, 8  ;;  %v25103_v4 = vmov 0.0|0.0  }
 0xcab   : > { %8994 = vxpose.xlu0.b32.start.end [1/1] (short) (narrow) %v8699_v19, 8  ;;  %9090 = vxpose.xlu1.b32.start.end [1/1] (short) (narrow) %v8702_v48, 8 }
 0xcaf   : > { %9058 = vxpose.xlu0.b32.start.end [1/1] (short) (narrow) %v8701_v63, 8 }
 0xcb3   : > { %9122 = vxpose.xlu0.b32.start.end [1/1] (short) (narrow) %v8703_v9, 8 }
 0xcb7   : > { %9186 = vxpose.xlu0.b32.start.end [1/1] (short) (narrow) %v8705_v31, 8 }
 0xcc9   : > { %9616 = vrot.lane.b32.xlu1 %v22465_v30, %s22058_s13  ;;  %v21726_v30 = vpop.eup %21725 }
 0xccd   : > { %9620 = vrot.lane.b32.xlu1 %v22468_v33, %s22058_s13  ;;  %v8144_v33 = vsel %vm2295_vm4, %v21726_v30, 0.0 }
 0xcd1   : > { %9622 = vrot.lane.b32.xlu1 %v22450_v39, %s22058_s13 }
 0xcd5   : > { %9624 = vrot.lane.b32.xlu1 %v22453_v49, %s22058_s13 }
 0xcd9   : > { %9628 = vrot.lane.b32.xlu1 %v22456_v53, %s22058_s13 }
 0xcf7   : > { %v8722_v46 = vpop.trf.xlu1  ;;  %v8754_v34 = vpop.trf.xlu0 }
 0xcfb   : > { %v8786_v2 = vpop.trf.xlu0  ;;  %v8850_v7 = vpop.trf.xlu1 }
 0xcfc   : > { %v9218_v54 = vcombine.low %v8722_v46, %v8786_v2 }
 0xcfd   : > { %8145 = vadd.xlane.f32.xlu1 %v8144_v33 }
 0xcfe   : > { %v9225_v53 = vrot.slane %v9218_v54, %v22227_v3 }
 0xcff   : > { %v8818_v39 = vpop.trf.xlu0  ;;  %v8914_v49 = vpop.trf.xlu1 }
 0xd00   : > { %v9226_v15 = vcombine.low %v8754_v34, %v8818_v39  ;;  %v9234_v38 = vcombine.low %v8850_v7, %v8914_v49 }
 0xd02   : > { %v9233_v11 = vrot.slane %v9226_v15, %v22227_v3  ;;  %v9241_v17 = vrot.slane %v9234_v38, %v22227_v3 }
 0xd03   : > { %v8882_v59 = vpop.trf.xlu0  ;;  %v10244_v61 = vpop.trf.xlu1 }
 0xd04   : > { %v9250_v57 = vcombine.low %v9225_v53, %v9233_v11  ;;  %v25104_v11 = vld [vmem:[#allocation12_spill] sm:$0xff] }
 0xd06   : > { %v9257_v44 = vrot.slane %v9250_v57, %v22337_v43 }
 0xd07   : > { %v8946_v45 = vpop.trf.xlu0  ;;  %v10308_v58 = vpop.trf.xlu1 }
 0xd08   : > { %v9242_v52 = vcombine.low %v8882_v59, %v8946_v45  ;;  %v10740_v19 = vcombine.low %v10244_v61, %v10308_v58 }
 0xd0a   : > { %v9249_v56 = vrot.slane %v9242_v52, %v22227_v3 }
 0xd0b   : > { %v10372_v5 = vpop.trf.xlu1 }
 0xd0c   : > { %v9258_v13 = vcombine.low %v9241_v17, %v9249_v56 }
 0xd0e   : > { %v9265_v14 = vrot.slane %v9258_v13, %v22337_v43 }
 0xd0f   : > { %v10436_v12 = vpop.trf.xlu1 }
 0xd10   : > { %v9266_v18 = vcombine.low %v9257_v44, %v9265_v14  ;;  %v9267_v41 = vcombine.high %v9257_v44, %v9265_v14  ;;  %v10756_v48 = vcombine.low %v10372_v5, %v10436_v12  ;;  %v25106_v5 = vld [vmem:[#allocation19_spill] sm:$0xff] }
 0xd12   : > { %21500 = vmatprep.mubr.msk.f32.mxu1 %vm2295_vm4, %v9266_v18  ;;  %21505 = vmatprep.mubr.msk.f32.mxu0 %vm2295_vm4, %v9267_v41  ;;  %v10763_v2 = vrot.slane %v10756_v48, %v22227_v3  ;;  %v25105_v18 = vld [vmem:[#allocation20_spill] sm:$0xff] }
 0xd13   : > { %v10500_v8 = vpop.trf.xlu1 }
 0xd17   : > { %v10564_v28 = vpop.trf.xlu1 }
 0xd18   : > { %v10790_v63 = vcombine.low %v10500_v8, %v10564_v28 }
 0xd1a   : > { %v10797_v33 = vrot.slane %v10790_v63, %v22227_v3 }
 0xd1b   : > { %v10628_v1 = vpop.trf.xlu1 }
 0xd1f   : > { %v10692_v24 = vpop.trf.xlu1 }
 0xd20   : > { %v10806_v9 = vcombine.low %v10628_v1, %v10692_v24 }
 0xd22   : > { %v10813_v7 = vrot.slane %v10806_v9, %v22227_v3 }
 0xd23   : > { %v8978_v29 = vpop.trf.xlu1 }
 0xd30   : > { %9154 = vxpose.xlu1.b32.start.end [1/1] (short) (narrow) %v8704_v6, 8  ;;  %v9042_v6 = vpop.trf.xlu1 }
 0xd31   : > { %v9268_v15 = vcombine.low %v8978_v29, %v9042_v6 }
 0xd33   : > { %v9275_v52 = vrot.slane %v9268_v15, %v22227_v3 }
 0xd34   : > { %v23439_v37 = vpop.trf.xlu1 }
 0xd3b   : > { %v23441_v16 = vpop.permute.xlu1 %9616 }
 0xd3c   : > { %v9640_v12 = vcombine.low %v23441_v16, %v25106_v5 }
 0xd3f   : > { %v9621_v32 = vpop.permute.xlu1 %9620 }
 0xd4e   : > { %11048 = vrot.lane.b32.xlu1 %v25086_v26, %s22058_s13  ;;  %v10276_v26 = vpop.trf.xlu0 }
 0xd52   : > { %11052 = vrot.lane.b32.xlu1 %v25087_v62, %s22058_s13  ;;  %v10340_v35 = vpop.trf.xlu0  ;;  %v9623_v62 = vpop.permute.xlu1 %9622 }
 0xd53   : > { %v10748_v31 = vcombine.low %v10276_v26, %v10340_v35  ;;  %v9649_v14 = vcombine.low %v9621_v32, %v9623_v62  ;;  %v9647_v62 = vrot.slane %v9640_v12, %v22337_v43 }
 0xd55   : > { %v10755_v39 = vrot.slane %v10748_v31, %v22227_v3  ;;  %v9656_v26 = vrot.slane %v9649_v14, %v22337_v43 }
 0xd56   : > { %11054 = vrot.lane.b32.xlu1 %v25092_v27, %s22058_s13  ;;  %v10404_v25 = vpop.trf.xlu0  ;;  %v9625_v10 = vpop.permute.xlu1 %9624 }
 0xd57   : > { %v9658_v41 = vcombine.low %v9625_v10, %v25105_v18 }
 0xd59   : > { %v9665_v32 = vrot.slane %v9658_v41, %v22337_v43 }
 0xd5a   : > { %11056 = vrot.lane.b32.xlu1 %v25088_v55, %s22058_s13  ;;  %v10468_v0 = vpop.trf.xlu0  ;;  %v9629_v27 = vpop.permute.xlu1 %9628 }
 0xd5b   : > { %v10764_v42 = vcombine.low %v10404_v25, %v10468_v0  ;;  %v9667_v45 = vcombine.low %v9629_v27, %v25104_v11 }
 0xd5d   : > { %v10771_v54 = vrot.slane %v10764_v42, %v22227_v3  ;;  %v9674_v8 = vrot.slane %v9667_v45, %v22337_v43  ;;  %v25108_v45 = vld [vmem:[#allocation32_spill] sm:$0xff] }
 0xd5e   : > { %11060 = vrot.lane.b32.xlu1 %v25102_v21, %s22058_s13  ;;  %v10532_v23 = vpop.trf.xlu0 }
 0xd5f   : > { %v10780_v57 = vcombine.low %v10763_v2, %v10771_v54  ;;  %v10845_v25 = vcombine.low %v9665_v32, %v9674_v8  ;;  %v20518_v10 = vcombine.high %v9665_v32, %v9674_v8 }
 0xd61   : > { %v10787_v24 = vrot.slane %v10780_v57, %v22337_v43  ;;  %v25110_v57 = vld [vmem:[#allocation35_spill] sm:$0xff] }
 0xd62   : > { %v10596_v55 = vpop.trf.xlu0 }
 0xd63   : > { %v10798_v51 = vcombine.low %v10532_v23, %v10596_v55  ;;  %v10844_v55 = vcombine.low %v9647_v62, %v9656_v26 }
 0xd65   : > { %v10805_v49 = vrot.slane %v10798_v51, %v22227_v3  ;;  %v10852_v63 = vrot.slane %v10844_v55, %v22227_v3  ;;  %v25107_v51 = vmov 0.0  }
 0xd66   : > { %v10660_v36 = vpop.trf.xlu0 }
 0xd67   : > { %v10822_v56 = vcombine.low %v10797_v33, %v10805_v49 }
 0xd69   : > { %v10829_v29 = vrot.slane %v10822_v56, %v22337_v43 }
 0xd6a   : > { %v10724_v22 = vpop.trf.xlu0 }
 0xd6b   : > { %v10814_v46 = vcombine.low %v10660_v36, %v10724_v22  ;;  %v20517_v36 = vcombine.high %v9647_v62, %v9656_v26  ;;  %v10859_v22 = vrot.slane %v10845_v25, %v22227_v3 }
 0xd6d   : > { %v10821_v59 = vrot.slane %v10814_v46, %v22227_v3  ;;  %v10945_v9 = vrot.slane %v20517_v36, %v22227_v3  ;;  %v10860_v31 = vcombine.low %v10852_v63, %v10859_v22 }
 0xd6e   : > { %v9010_v47 = vpop.trf.xlu0 }
 0xd6f   : > { %v10830_v44 = vcombine.low %v10813_v7, %v10821_v59 }
 0xd71   : > { %v10837_v21 = vrot.slane %v10830_v44, %v22337_v43 }
 0xd72   : > { %v9074_v50 = vpop.trf.xlu0 }
 0xd73   : > { %v9276_v38 = vcombine.low %v9010_v47, %v9074_v50  ;;  %v10838_v23 = vcombine.low %v10829_v29, %v10837_v21 }
 0xd75   : > { %v9283_v13 = vrot.slane %v9276_v38, %v22227_v3 }
 0xd76   : > { %v9138_v34 = vpop.trf.xlu0 }
 0xd77   : > { %v9300_v6 = vcombine.low %v9275_v52, %v9283_v13 }
 0xd7a   : > { %v9202_v53 = vpop.trf.xlu0 }
 0xd7b   : > { %v9292_v61 = vcombine.low %v9138_v34, %v9202_v53 }
 0xd7d   : > { %v9299_v35 = vrot.slane %v9292_v61, %v22227_v3 }
 0xd8a   : > { %v8146_v60 = vpop.xlane.xlu1 %8145 }
 0xd8b   : > { %21727 = vrcp.f32 %v8146_v60  ;;  %v10839_v60 = vcombine.high %v10829_v29, %v10837_v21 }
 0xd95   : > { %v21728_v20 = vpop.eup %21727 }
 0xd96   : > { %v8152_v40 = vmul.f32 %v21728_v20, %v21726_v30  ;;  %v10747_v30 = vrot.slane %v10740_v19, %v22227_v3  ;;  %v9307_v20 = vrot.slane %v9300_v6, %v22337_v43 }
 0xd98   : > { %21498 = vmatprep.subr.msk.mxu1 %vm2295_vm4, %v8152_v40  ;;  %v10772_v17 = vcombine.low %v10747_v30, %v10755_v39 }
 0xd99   : > { %21499 = vmatpush3.xpose.msk.msra.mxu1 %vm2295_vm4, %v8152_v40 }
 0xd9a   : > { %21581 = vmatprep.subr.bf16.mxu1 %v25103_v4  ;;  %v10779_v28 = vrot.slane %v10772_v17, %v22337_v43  ;;  %v10952_v4 = vrot.slane %v20518_v10, %v22227_v3  ;;  %v25109_v17 = vld [vmem:[#allocation34_spill] sm:$0xff] }
 0xd9c   : > { %v10788_v0 = vcombine.low %v10779_v28, %v10787_v24  ;;  %v10789_v27 = vcombine.high %v10779_v28, %v10787_v24  ;;  %v10953_v42 = vcombine.low %v10945_v9, %v10952_v4 }
 0xd9e   : > { %v21582_v19 = vpack.c.bf16 %v10838_v23, %v10788_v0  ;;  %v21585_v48 = vpack.c.bf16 %v10839_v60, %v10789_v27 }
 0xdb0   : > { %v9170_v58 = vpop.trf.xlu1 }
 0xdb1   : > { %v9284_v1 = vcombine.low %v23439_v37, %v9170_v58 }
 0xdb3   : > { %v9291_v16 = vrot.slane %v9284_v1, %v22227_v3 }
 0xdb5   : > { %v9308_v37 = vcombine.low %v9291_v16, %v9299_v35 }
 0xdb7   : > { %v9315_v40 = vrot.slane %v9308_v37, %v22337_v43 }
 0xdb9   : > { %v9316_v47 = vcombine.low %v9307_v20, %v9315_v40  ;;  %v9317_v50 = vcombine.high %v9307_v20, %v9315_v40 }
 0xdbb   : > { %21501 = vmatmul.mubr.msk.f32.vlgmr.msra.gmra.mrb[10].mxu1 %vm2295_vm4, %v9316_v47  ;;  %21506 = vmatmul.mubr.msk.f32.vlgmr.msra.gmra.mrb[14].mxu0 %vm2295_vm4, %v9317_v50 }
 0xdbc   : > { %21583 = vmatpush3.bf16.msra.mxu1 %v21582_v19  ;;  %21586 = vmatpush3.bf16.msra.mxu0 %v21585_v48 }
 0xdbd   : > { %21512 = vmatprep.mubr.msk.f32.mxu1 %vm22051_vm2, %v25107_v51  ;;  %21519 = vmatprep.mubr.msk.f32.mxu0 %vm22051_vm2, %v25107_v51 }
 0xdbf   : > { %21513 = vmatmul.mubr.msk.f32.vlgmr.msra.gmra.mrb[12].mxu1 %vm2129_vm3, %v10860_v31  ;;  %21520 = vmatmul.mubr.msk.f32.vlgmr.msra.gmra.mrb[16].mxu0 %vm2129_vm3, %v10953_v42 }
 0xdc0   : > { %v11049_v46 = vpop.permute.xlu1 %11048 }
 0xdc1   : > { %11072 = vxpose.xlu1.b32.start.end [1/1] (short) (narrow) %v11049_v46, 16 }
 0xdc4   : > { %v11053_v34 = vpop.permute.xlu1 %11052 }
 0xdc8   : > { %v11055_v30 = vpop.permute.xlu1 %11054 }
 0xdcc   : > { %v11057_v2 = vpop.permute.xlu1 %11056 }
 0xdcd   : > { %11200 = vxpose.xlu1.b32.start.end [1/1] (short) (narrow) %v11057_v2, 16 }
 0xdd0   : > { %v11061_v33 = vpop.permute.xlu1 %11060 }
 0xdd2   : > { %11264 = vxpose.xlu1.b32.start.end [1/1] (short) (narrow) %v11061_v33, 16 }
 0xe41   : > { %v11088_v41 = vpop.trf.xlu1 }
 0xe45   : > { %v23511_v5 = vpop.trf.xlu1 }
 0xe4d   : > { %v11216_v8 = vpop.trf.xlu1 }
 0xe51   : > { %v23519_v29 = vpop.trf.xlu1 }
 0xe55   : > { %v11280_v25 = vpop.trf.xlu1 }
 0xe56   : > { %v11360_v27 = vcombine.low %v11216_v8, %v11280_v25  ;;  %v11361_v22 = vcombine.high %v11216_v8, %v11280_v25 }
 0xe58   : > { %v11368_v47 = vrot.slane %v11360_v27, %v22227_v3 }
 0xe59   : > { %v11281_v55 = vpop.trf.xlu1 }
 0xe5a   : > { %v11497_v48 = vcombine.high %v23519_v29, %v11281_v55  ;;  %v11496_v33 = vcombine.low %v23519_v29, %v11281_v55 }
 0xe8e   : > { %v23485_v7 = vpop.f32.mrb[10].mxu1  ;;  %v23487_v39 = vpop.f32.mrb[14].mxu0 }
 0xe8f   : > { %v23489_v54 = vpop.f32.mrb[11].mxu1  ;;  %v23491_v15 = vpop.f32.mrb[15].mxu0 }
 0xe92   : > { %v23493_v49 = vpop.f32.mrb[12].mxu1  ;;  %v23495_v59 = vpop.f32.mrb[16].mxu0 }
 0xe93   : > { %v21514_v38 = vpop.f32.mrb[13].mxu1  ;;  %v21521_v53 = vpop.f32.mrb[17].mxu0  ;;  %v11029_v11 = vsel %vm2295_vm4, %v23495_v59, -inf }
 0xe94   : > { %11030 = vmax.xlane.f32.xlu0 %v11029_v11 }
 0xeaa   : > { %11050 = vrot.lane.b32.xlu0 %v25108_v45, %s22058_s13  ;;  %v11511_v45 = vrot.slane %v11497_v48, %v22227_v3 }
 0xeae   : > { %11058 = vrot.lane.b32.xlu0 %v25109_v17, %s22058_s13 }
 0xeb2   : > { %11062 = vrot.lane.b32.xlu0 %v25110_v57, %s22058_s13 }
 0xf21   : > { %v23505_v52 = vpop.xlane.xlu0 %11030 }
 0xf22   : > { %v11033_v56 = vsub.f32 %v23495_v59, %v23505_v52 }
 0xf25   : > { %v11051_v44 = vpop.permute.xlu0 %11050 }
 0xf26   : > { %11104 = vxpose.xlu0.b32.start.end [1/1] (short) (narrow) %v11051_v44, 16 }
 0xf29   : > { %v11059_v13 = vpop.permute.xlu0 %11058 }
 0xf2b   : > { %11136 = vxpose.xlu0.b32.start.end [1/1] (short) (narrow) %v11053_v34, 16  ;;  %v11375_v34 = vrot.slane %v11361_v22, %v22227_v3 }
 0xf2d   : > { %v11063_v14 = vpop.permute.xlu0 %11062 }
 0xf30   : > { %11168 = vxpose.xlu0.b32.start.end [1/1] (short) (narrow) %v11055_v30, 16 }
 0xf35   : > { %11232 = vxpose.xlu0.b32.start.end [1/1] (short) (narrow) %v11059_v13, 16 }
 0xf3a   : > { %11296 = vxpose.xlu0.b32.start.end [1/1] (short) (narrow) %v11063_v14, 16 }
 0xfa6   : > { %v11120_v18 = vpop.trf.xlu0 }
 0xfaa   : > { %v23509_v61 = vpop.trf.xlu0 }
 0xfae   : > { %v11152_v58 = vpop.trf.xlu0 }
 0xfaf   : > { %v11328_v37 = vcombine.low %v11088_v41, %v11152_v58  ;;  %v11329_v19 = vcombine.high %v11088_v41, %v11152_v58 }
 0xfb1   : > { %v11336_v60 = vrot.slane %v11328_v37, %v22227_v3  ;;  %v11343_v11 = vrot.slane %v11329_v19, %v22227_v3 }
 0xfb2   : > { %v23513_v12 = vpop.trf.xlu0 }
 0xfb3   : > { %v11465_v1 = vcombine.high %v23511_v5, %v23513_v12 }
 0xfb5   : > { %v11479_v6 = vrot.slane %v11465_v1, %v22227_v3  ;;  %v11464_v1 = vcombine.low %v23511_v5, %v23513_v12 }
 0xfb6   : > { %v11184_v28 = vpop.trf.xlu0 }
 0xfb7   : > { %v11344_v62 = vcombine.low %v11120_v18, %v11184_v28  ;;  %v11345_v40 = vcombine.high %v11120_v18, %v11184_v28 }
 0xfb9   : > { %v11352_v0 = vrot.slane %v11344_v62, %v22227_v3  ;;  %v11359_v46 = vrot.slane %v11345_v40, %v22227_v3 }
 0xfba   : > { %v23517_v24 = vpop.trf.xlu0 }
 0xfbb   : > { %v11481_v21 = vcombine.high %v23509_v61, %v23517_v24  ;;  %v11392_v4 = vcombine.low %v11336_v60, %v11352_v0  ;;  %v11393_v2 = vcombine.high %v11336_v60, %v11352_v0  ;;  %v11408_v41 = vcombine.low %v11343_v11, %v11359_v46 }
 0xfbc   : > { %v11480_v58 = vcombine.low %v23509_v61, %v23517_v24  ;;  %v11409_v12 = vcombine.high %v11343_v11, %v11359_v46 }
 0xfbd   : > { %v11495_v26 = vrot.slane %v11481_v21, %v22227_v3  ;;  %v11400_v38 = vrot.slane %v11392_v4, %v22337_v43  ;;  %v11407_v21 = vrot.slane %v11393_v2, %v22337_v43  ;;  %v11416_v37 = vrot.slane %v11408_v41, %v22337_v43 }
 0xfbe   : > { %v11248_v32 = vpop.trf.xlu0  ;;  %v11423_v4 = vrot.slane %v11409_v12, %v22337_v43 }
 0xfbf   : > { %v11544_v35 = vcombine.low %v11479_v6, %v11495_v26  ;;  %v11545_v16 = vcombine.high %v11479_v6, %v11495_v26 }
 0xfc1   : > { %v11552_v29 = vrot.slane %v11544_v35, %v22337_v43  ;;  %v23549_v62 = vrot.slane %v11545_v16, %v22337_v43  ;;  %v11488_v35 = vrot.slane %v11480_v58, %v22227_v3 }
 0xfc2   : > { %v11249_v10 = vpop.trf.xlu0 }
 0xfc6   : > { %v11312_v23 = vpop.trf.xlu0 }
 0xfc7   : > { %v11376_v36 = vcombine.low %v11248_v32, %v11312_v23  ;;  %v11377_v20 = vcombine.high %v11248_v32, %v11312_v23  ;;  %v11472_v23 = vrot.slane %v11464_v1, %v22227_v3 }
 0xfc9   : > { %v11384_v50 = vrot.slane %v11376_v36, %v22227_v3  ;;  %v11391_v63 = vrot.slane %v11377_v20, %v22227_v3  ;;  %v11528_v22 = vcombine.low %v11472_v23, %v11488_v35 }
 0xfca   : > { %v11313_v9 = vpop.trf.xlu0 }
 0xfcb   : > { %v11424_v31 = vcombine.low %v11368_v47, %v11384_v50  ;;  %v11425_v42 = vcombine.high %v11368_v47, %v11384_v50  ;;  %v11513_v30 = vcombine.high %v11249_v10, %v11313_v9  ;;  %v11440_v17 = vcombine.low %v11375_v34, %v11391_v63 }
 0xfcc   : > { %v11512_v44 = vcombine.low %v11249_v10, %v11313_v9  ;;  %v11441_v6 = vcombine.high %v11375_v34, %v11391_v63  ;;  %v11504_v10 = vrot.slane %v11496_v33, %v22227_v3  ;;  %v11529_v63 = vcombine.high %v11472_v23, %v11488_v35 }
 0xfcd   : > { %v11432_v53 = vrot.slane %v11424_v31, %v22337_v43  ;;  %v11527_v57 = vrot.slane %v11513_v30, %v22227_v3  ;;  %v11439_v18 = vrot.slane %v11425_v42, %v22337_v43  ;;  %v11448_v32 = vrot.slane %v11440_v17, %v22337_v43  ;;  %v25112_v17 = vld [vmem:[#allocation36_spill] sm:$0xff] }
 0xfce   : > { %v11520_v61 = vrot.slane %v11512_v44, %v22227_v3  ;;  %v11455_v40 = vrot.slane %v11441_v6, %v22337_v43  ;;  %v11536_v9 = vrot.slane %v11528_v22, %v22337_v43  ;;  %v11543_v34 = vrot.slane %v11529_v63, %v22337_v43 }
 0xfcf   : > { %v11457_v13 = vcombine.high %v11400_v38, %v11432_v53  ;;  %v11456_v14 = vcombine.low %v11400_v38, %v11432_v53  ;;  %v11576_v8 = vcombine.low %v11511_v45, %v11527_v57  ;;  %v11577_v28 = vcombine.high %v11511_v45, %v11527_v57  ;;  %v25111_v45 = vld [vmem:[#allocation21_spill] sm:$0xff] }
 0xfd0   : > { %v11459_v24 = vcombine.high %v11407_v21, %v11439_v18  ;;  %v11458_v25 = vcombine.low %v11407_v21, %v11439_v18  ;;  %v11560_v55 = vcombine.low %v11504_v10, %v11520_v61  ;;  %v11461_v36 = vcombine.high %v11416_v37, %v11448_v32 }
 0xfd1   : > { %11632 = vxpose.xlu0.b32.start.end [1/1] (short) (narrow) %v11457_v13, 8  ;;  %11600 = vxpose.xlu1.b32.start.end [1/1] (short) (narrow) %v11456_v14, 8  ;;  %v11584_v26 = vrot.slane %v11576_v8, %v22337_v43  ;;  %v23553_v5 = vrot.slane %v11577_v28, %v22337_v43  ;;  %v11460_v20 = vcombine.low %v11416_v37, %v11448_v32  ;;  %v11036_v33 = vmul.f32 1.442695, %v11033_v56 }
 0xfd2   : > { %v11561_v47 = vcombine.high %v11504_v10, %v11520_v61  ;;  %v11463_v50 = vcombine.high %v11423_v4, %v11455_v40  ;;  %v11462_v19 = vcombine.low %v11423_v4, %v11455_v40  ;;  %v11568_v48 = vrot.slane %v11560_v55, %v22337_v43 }
 0xfd3   : > { %v11597_v0 = vcombine.high %v11552_v29, %v11584_v26  ;;  %v11596_v27 = vcombine.low %v11552_v29, %v11584_v26  ;;  %v11599_v16 = vcombine.high %v23549_v62, %v23553_v5  ;;  %v11598_v60 = vcombine.low %v23549_v62, %v23553_v5 }
 0xfd4   : > { %v11593_v31 = vcombine.high %v11536_v9, %v11568_v48  ;;  %v11592_v42 = vcombine.low %v11536_v9, %v11568_v48  ;;  %v11575_v46 = vrot.slane %v11561_v47, %v22337_v43  ;;  %21729 = vpow2.f32 %v11036_v33 }
 0xfd5   : > { %11696 = vxpose.xlu0.b32.start.end [1/1] (short) (narrow) %v11459_v24, 8  ;;  %11664 = vxpose.xlu1.b32.start.end [1/1] (short) (narrow) %v11458_v25, 8  ;;  %v11026_v38 = vsel %vm2295_vm4, %v23493_v49, -inf }
 0xfd6   : > { %v11595_v30 = vcombine.high %v11543_v34, %v11575_v46  ;;  %v11594_v2 = vcombine.low %v11543_v34, %v11575_v46 }
 0xfd9   : > { %11760 = vxpose.xlu0.b32.start.end [1/1] (short) (narrow) %v11461_v36, 8  ;;  %11728 = vxpose.xlu1.b32.start.end [1/1] (short) (narrow) %v11460_v20, 8 }
 0xfdd   : > { %11824 = vxpose.xlu0.b32.start.end [1/1] (short) (narrow) %v11463_v50, 8  ;;  %11792 = vxpose.xlu1.b32.start.end [1/1] (short) (narrow) %v11462_v19, 8  ;;  %v25113_v19 = vld [vmem:[#allocation31_spill] sm:$0xff] }
 0xfde   : > { %v21730_v53 = vpop.eup %21729 }
 0xfdf   : > { %v11041_v11 = vsel %vm2295_vm4, %v21730_v53, 0.0 }
 0xfe1   : > { %11888 = vxpose.xlu0.b32.start.end [1/1] (short) (narrow) %v11593_v31, 8  ;;  %11856 = vxpose.xlu1.b32.start.end [1/1] (short) (narrow) %v11592_v42, 8 }
 0xfe5   : > { %11952 = vxpose.xlu0.b32.start.end [1/1] (short) (narrow) %v11595_v30, 8  ;;  %11920 = vxpose.xlu1.b32.start.end [1/1] (short) (narrow) %v11594_v2, 8 }
0x100c   : > { %11027 = vmax.xlane.f32.xlu1 %v11026_v38 }
0x1012   : > { %11042 = vadd.xlane.f32.xlu0 %v11041_v11 }
0x103f   : > { %12016 = vxpose.xlu0.b32.start.end [1/1] (short) (narrow) %v11597_v0, 8  ;;  %11984 = vxpose.xlu1.b32.start.end [1/1] (short) (narrow) %v11596_v27, 8 }
0x1043   : > { %12080 = vxpose.xlu0.b32.start.end [1/1] (short) (narrow) %v11599_v16, 8 }
0x1047   : > { %6624 = vxpose.xlu0.b32.start [1/2] (short) (narrow) %v25111_v45, 8 }
0x104b   : > { %6625 = vxpose.xlu0.b32.end [2/2] (short) (narrow) %v25112_v17, 8 }
0x104f   : > { %9518 = vxpose.xlu0.b32.start [1/2] (short) (narrow) %v23491_v15, 8 }
0x1051   : > { %v11616_v59 = vpop.trf.xlu1  ;;  %v11648_v52 = vpop.trf.xlu0 }
0x1053   : > { %9519 = vxpose.xlu0.b32.end [2/2] (short) (narrow) %v23487_v39, 8 }
0x1055   : > { %v11680_v56 = vpop.trf.xlu1  ;;  %v11712_v57 = vpop.trf.xlu0 }
0x1056   : > { %v12112_v44 = vcombine.low %v11616_v59, %v11680_v56  ;;  %v12120_v13 = vcombine.low %v11648_v52, %v11712_v57 }
0x1058   : > { %v12119_v41 = vrot.slane %v12112_v44, %v22227_v3  ;;  %v12127_v58 = vrot.slane %v12120_v13, %v22227_v3 }
0x1059   : > { %v11744_v14 = vpop.trf.xlu1  ;;  %v11776_v18 = vpop.trf.xlu0 }
0x105a   : > { %v12144_v1 = vcombine.low %v12119_v41, %v12127_v58 }
0x105c   : > { %v12151_v32 = vrot.slane %v12144_v1, %v22337_v43 }
0x105d   : > { %v11808_v8 = vpop.trf.xlu1  ;;  %v11840_v28 = vpop.trf.xlu0 }
0x105e   : > { %v12128_v29 = vcombine.low %v11744_v14, %v11808_v8  ;;  %v12136_v21 = vcombine.low %v11776_v18, %v11840_v28 }
0x1060   : > { %v12135_v15 = vrot.slane %v12128_v29, %v22227_v3  ;;  %v12143_v6 = vrot.slane %v12136_v21, %v22227_v3 }
0x1061   : > { %v11872_v39 = vpop.trf.xlu1  ;;  %v11904_v26 = vpop.trf.xlu0 }
0x1062   : > { %v12152_v61 = vcombine.low %v12135_v15, %v12143_v6 }
0x1064   : > { %v12159_v24 = vrot.slane %v12152_v61, %v22337_v43 }
0x1065   : > { %v11936_v25 = vpop.trf.xlu1  ;;  %v11968_v12 = vpop.trf.xlu0 }
0x1066   : > { %v12160_v35 = vcombine.low %v12151_v32, %v12159_v24  ;;  %v12161_v10 = vcombine.high %v12151_v32, %v12159_v24  ;;  %v12162_v37 = vcombine.low %v11872_v39, %v11936_v25  ;;  %v12170_v0 = vcombine.low %v11904_v26, %v11968_v12 }
0x1068   : > { %21524 = vmatprep.mubr.msk.f32.mxu1 %vm2295_vm4, %v12160_v35  ;;  %21529 = vmatprep.mubr.msk.f32.mxu0 %vm2295_vm4, %v12161_v10  ;;  %v12169_v27 = vrot.slane %v12162_v37, %v22227_v3  ;;  %v12177_v16 = vrot.slane %v12170_v0, %v22227_v3 }
0x106a   : > { %v12194_v23 = vcombine.low %v12169_v27, %v12177_v16 }
0x106c   : > { %v12201_v45 = vrot.slane %v12194_v23, %v22337_v43 }
0x1099   : > { %v11028_v55 = vpop.xlane.xlu1 %11027 }
0x109a   : > { %v11032_v36 = vsub.f32 %v23493_v49, %v11028_v55  ;;  %v25114_v49 = vld [vmem:[#allocation30_spill] sm:$0xff] }
0x109c   : > { %v11034_v20 = vmul.f32 1.442695, %v11032_v36 }
0x109e   : > { %21731 = vpow2.f32 %v11034_v20 }
0x109f   : > { %v11043_v40 = vpop.xlane.xlu0 %11042 }
0x10a0   : > { %21733 = vrcp.f32 %v11043_v40 }
0x10a8   : > { %v21732_v22 = vpop.eup %21731 }
0x10a9   : > { %v11038_v4 = vsel %vm2295_vm4, %v21732_v22, 0.0 }
0x10aa   : > { %v21734_v47 = vpop.eup %21733  ;;  %11039 = vadd.xlane.f32.xlu1 %v11038_v4 }
0x10ab   : > { %v11047_v50 = vmul.f32 %v21734_v47, %v21730_v53 }
0x10ad   : > { %21527 = vmatprep.subr.msk.mxu0 %vm2295_vm4, %v11047_v50 }
0x10ae   : > { %21528 = vmatpush3.xpose.msk.msra.mxu0 %vm2295_vm4, %v11047_v50 }
0x10bf   : > { %v12000_v48 = vpop.trf.xlu1  ;;  %v12032_v62 = vpop.trf.xlu0 }
0x10c3   : > { %v12096_v5 = vpop.trf.xlu0 }
0x10c7   : > { %v6640_v46 = vpop.trf.xlu0 }
0x10c8   : > { %v23607_v2 = vrot.slane %v6640_v46, %v22227_v3 }
0x10cf   : > { %v9534_v44 = vpop.trf.xlu0 }
0x10d0   : > { %v9565_v41 = vcombine.high %v9534_v44, %v25107_v51  ;;  %v9572_v1 = vrot.slane %v9534_v44, %v22227_v3 }
0x10d2   : > { %v9579_v32 = vrot.slane %v9565_v41, %v22227_v3 }
0x10dd   : > { %12048 = vxpose.xlu1.b32.start.end [1/1] (short) (narrow) %v11598_v60, 8  ;;  %v12186_v60 = vcombine.low %v12032_v62, %v12096_v5 }
0x10e1   : > { %6592 = vxpose.xlu1.b32.start [1/2] (short) (narrow) %v25113_v19, 8 }
0x10e5   : > { %6593 = vxpose.xlu1.b32.end [2/2] (short) (narrow) %v25114_v49, 8 }
0x10e9   : > { %9486 = vxpose.xlu1.b32.start [1/2] (short) (narrow) %v23489_v54, 8  ;;  %v6671_v54 = vcombine.high %v6640_v46, %v25107_v51 }
0x10eb   : > { %v6685_v17 = vrot.slane %v6671_v54, %v22227_v3 }
0x10ed   : > { %9487 = vxpose.xlu1.b32.end [2/2] (short) (narrow) %v23485_v7, 8  ;;  %v12193_v7 = vrot.slane %v12186_v60, %v22227_v3 }
0x1137   : > { %v11040_v63 = vpop.xlane.xlu1 %11039 }
0x1138   : > { %21735 = vrcp.f32 %v11040_v63 }
0x1142   : > { %v21736_v9 = vpop.eup %21735 }
0x1143   : > { %v11046_v31 = vmul.f32 %v21736_v9, %v21732_v22 }
0x1145   : > { %21522 = vmatprep.subr.msk.mxu1 %vm2295_vm4, %v11046_v31 }
0x1146   : > { %21523 = vmatpush3.xpose.msk.msra.mxu1 %vm2295_vm4, %v11046_v31 }
0x1147   : > { %21532 = vmatprep.subr.bf16.mxu1 %v25107_v51 }
0x115d   : > { %v12064_v42 = vpop.trf.xlu1 }
0x115e   : > { %v12178_v34 = vcombine.low %v12000_v48, %v12064_v42 }
0x1160   : > { %v12185_v30 = vrot.slane %v12178_v34, %v22227_v3 }
0x1161   : > { %v6608_v33 = vpop.trf.xlu1 }
0x1162   : > { %v12202_v38 = vcombine.low %v12185_v30, %v12193_v7  ;;  %v6656_v53 = vcombine.high %v6608_v33, %v25107_v51  ;;  %v6663_v11 = vrot.slane %v6608_v33, %v22227_v3 }
0x1164   : > { %v12209_v59 = vrot.slane %v12202_v38, %v22337_v43  ;;  %v6670_v52 = vrot.slane %v6656_v53, %v22227_v3  ;;  %v6686_v56 = vcombine.low %v6663_v11, %v23607_v2  ;;  %v6687_v57 = vcombine.high %v6663_v11, %v23607_v2 }
0x1166   : > { %v12210_v13 = vcombine.low %v12201_v45, %v12209_v59  ;;  %v12211_v14 = vcombine.high %v12201_v45, %v12209_v59  ;;  %v6694_v18 = vrot.slane %v6686_v56, %v22337_v43  ;;  %v6702_v58 = vcombine.low %v6670_v52, %v6685_v17 }
0x1167   : > { %v6703_v8 = vcombine.high %v6670_v52, %v6685_v17  ;;  %v6701_v63 = vrot.slane %v6687_v57, %v22337_v43 }
0x1168   : > { %21525 = vmatmul.mubr.msk.f32.vlgmr.msra.gmra.mrb[14].mxu1 %vm2295_vm4, %v12210_v13  ;;  %21530 = vmatmul.mubr.msk.f32.vlgmr.msra.gmra.mrb[18].mxu0 %vm2295_vm4, %v12211_v14  ;;  %v6718_v28 = vcombine.high %v6694_v18, %v25107_v51  ;;  %v6710_v29 = vrot.slane %v6702_v58, %v22337_v43 }
0x1169   : > { %v6717_v21 = vrot.slane %v6703_v8, %v22337_v43  ;;  %v9502_v15 = vpop.trf.xlu1  ;;  %21540 = vmatprep.mubr.msk.bf16.mxu1 %vm22051_vm2, %v25107_v51  ;;  %v6719_v9 = vcombine.high %v6701_v63, %v25107_v51 }
0x116a   : > { %v21629_v6 = vpack.i.bf16 %v6718_v28, %v6694_v18  ;;  %v9550_v39 = vcombine.high %v9502_v15, %v25107_v51  ;;  %v9557_v26 = vrot.slane %v9502_v15, %v22227_v3  ;;  %v6720_v61 = vcombine.high %v6710_v29, %v25107_v51 }
0x116b   : > { %v6721_v35 = vcombine.high %v6717_v21, %v25107_v51  ;;  %v21634_v62 = vpack.i.bf16 %v6719_v9, %v6701_v63 }
0x116c   : > { %21630 = vrot.lane.b32.xlu1 %v21629_v6, %s22057_s12  ;;  %v9564_v24 = vrot.slane %v9550_v39, %v22227_v3  ;;  %v9580_v25 = vcombine.low %v9557_v26, %v9572_v1  ;;  %v9581_v12 = vcombine.high %v9557_v26, %v9572_v1  ;;  %v21639_v10 = vpack.i.bf16 %v6720_v61, %v6710_v29  ;;  %v25115_v39 = vld [vmem:[#allocation27_spill] sm:$0xff]  ;;  %v25116_v26 = vld [vmem:[#allocation26_spill] sm:$0xff]  ;;  %v25118_v61 = vld [vmem:[#allocation28_spill] sm:$0xff] }
0x116d   : > { %v21644_v55 = vpack.i.bf16 %v6721_v35, %v6717_v21  ;;  %v21704_v35 = vld [vmem:[%s22147_s28 + $0x18] sm:$0xff]  }
0x116e   : > { %v9588_v37 = vrot.slane %v9580_v25, %v22337_v43  ;;  %v9596_v0 = vcombine.low %v9564_v24, %v9579_v32  ;;  %v9595_v27 = vrot.slane %v9581_v12, %v22337_v43  ;;  %v9597_v16 = vcombine.high %v9564_v24, %v9579_v32  ;;  %v25117_v32 = vld [vmem:[#allocation29_spill] sm:$0xff]  ;;  %v21702_v25 = vld [vmem:[%s22147_s28 + $0x8] sm:$0xff]   ;;  %v21703_v12 = vld [vmem:[%s22147_s28 + $0x10] sm:$0xff]  }
0x116f   : > { %v21701_v24 = vld [vmem:[%s22147_s28] sm:$0xff]  }
0x1170   : > { %v9612_v23 = vcombine.high %v9588_v37, %v25107_v51  ;;  %21640 = vrot.lane.b32.xlu1 %v21639_v10, %s22057_s12  ;;  %v9611_v36 = vrot.slane %v9597_v16, %v22337_v43  ;;  %v9613_v20 = vcombine.high %v9595_v27, %v25107_v51  ;;  %v9604_v31 = vrot.slane %v9596_v0, %v22337_v43 }
0x1171   : > { %21533 = vmatpush3.bf16.msra.mxu1 %v21701_v24 }
0x1172   : > { %v21649_v40 = vpack.i.bf16 %v9612_v23, %v9588_v37  ;;  %v21654_v22 = vpack.i.bf16 %v9613_v20, %v9595_v27  ;;  %v9615_v4 = vcombine.high %v9611_v36, %v25107_v51  ;;  %v9614_v5 = vcombine.high %v9604_v31, %v25107_v51  ;;  %21534 = vmatprep.subr.bf16.mxu1 %v25107_v51 }
0x1174   : > { %21645 = vrot.lane.b32.xlu1 %v21644_v55, %s22057_s12  ;;  %v21664_v47 = vpack.i.bf16 %v9615_v4, %v9611_v36  ;;  %v21659_v60 = vpack.i.bf16 %v9614_v5, %v9604_v31 }
0x1175   : > { %21535 = vmatpush3.bf16.msra.mxu1 %v21702_v25 }
0x1176   : > { %21536 = vmatprep.subr.bf16.mxu1 %v25107_v51 }
0x1178   : > { %21650 = vrot.lane.b32.xlu1 %v21649_v40, %s22055_s22 }
0x1179   : > { %21537 = vmatpush3.bf16.msra.mxu1 %v21703_v12 }
0x117a   : > { %21538 = vmatprep.subr.bf16.mxu1 %v25107_v51 }
0x117c   : > { %21655 = vrot.lane.b32.xlu1 %v21654_v22, %s22055_s22 }
0x117d   : > { %21539 = vmatpush3.bf16.msra.mxu1 %v21704_v35 }
0x1180   : > { %21665 = vrot.lane.b32.xlu1 %v21664_v47, %s22055_s22 }
0x11de   : > { %v23651_v42 = vpop.permute.xlu1 %21630 }
0x11df   : > { %v21633_v20 = vunpack.i.h.bf16 %v23651_v42  ;;  %v21632_v40 = vunpack.i.l.bf16 %v23651_v42 }
0x11e2   : > { %v23653_v46 = vpop.permute.xlu1 %21640 }
0x11e3   : > { %v21643_v22 = vunpack.i.h.bf16 %v23653_v46  ;;  %v21642_v4 = vunpack.i.l.bf16 %v23653_v46 }
0x11e6   : > { %v23655_v34 = vpop.permute.xlu1 %21645 }
0x11e7   : > { %v21648_v47 = vunpack.i.h.bf16 %v23655_v34 }
0x11ea   : > { %v23657_v54 = vpop.permute.xlu1 %21650 }
0x11ee   : > { %v23659_v7 = vpop.permute.xlu1 %21655 }
0x11ef   : > { %v21658_v63 = vunpack.i.h.bf16 %v23659_v7  ;;  %v21657_v9 = vunpack.i.l.bf16 %v23659_v7 }
0x11f2   : > { %v23661_v30 = vpop.permute.xlu1 %21665 }
0x11f3   : > { %v21667_v46 = vunpack.i.l.bf16 %v23661_v30 }
0x123b   : > { %v21526_v50 = vpop.f32.mrb[14].mxu1  ;;  %v21531_v19 = vpop.f32.mrb[18].mxu0 }
0x123c   : > { %v12287_v49 = vpop.f32.mrb[15].mxu1  ;;  %v12371_v48 = vpop.f32.mrb[19].mxu0 }
0x123d   : > { %12380 = vxpose.xlu1.b32.start [1/2] (short) (narrow) %v12287_v49, 8  ;;  %12412 = vxpose.xlu0.b32.start [1/2] (short) (narrow) %v12371_v48, 8  ;;  %v21653_v49 = vunpack.i.h.bf16 %v23657_v54  ;;  %v21652_v48 = vunpack.i.l.bf16 %v23657_v54 }
0x1241   : > { %12381 = vxpose.xlu1.b32.end [2/2] (short) (narrow) %v21526_v50, 8  ;;  %12413 = vxpose.xlu0.b32.end [2/2] (short) (narrow) %v21531_v19, 8  ;;  %v21647_v50 = vunpack.i.l.bf16 %v23655_v34 }
0x126a   : > { %21635 = vrot.lane.b32.xlu0 %v21634_v62, %s22057_s12  ;;  %v21668_v62 = vunpack.i.h.bf16 %v23661_v30 }
0x126e   : > { %21660 = vrot.lane.b32.xlu0 %v21659_v60, %s22055_s22 }
0x12bd   : > { %v12396_v2 = vpop.trf.xlu1  ;;  %v12428_v33 = vpop.trf.xlu0 }
0x12be   : > { %v12444_v38 = vcombine.high %v12396_v2, %v25107_v51  ;;  %v12451_v53 = vrot.slane %v12396_v2, %v22227_v3  ;;  %v12459_v11 = vcombine.high %v12428_v33, %v25107_v51  ;;  %v12466_v45 = vrot.slane %v12428_v33, %v22227_v3 }
0x12c0   : > { %v12458_v17 = vrot.slane %v12444_v38, %v22227_v3  ;;  %v12473_v59 = vrot.slane %v12459_v11, %v22227_v3  ;;  %v12474_v52 = vcombine.low %v12451_v53, %v12466_v45  ;;  %v12475_v56 = vcombine.high %v12451_v53, %v12466_v45 }
0x12c2   : > { %v12482_v57 = vrot.slane %v12474_v52, %v22337_v43  ;;  %v12489_v44 = vrot.slane %v12475_v56, %v22337_v43  ;;  %v12490_v13 = vcombine.low %v12458_v17, %v12473_v59  ;;  %v12491_v14 = vcombine.high %v12458_v17, %v12473_v59 }
0x12c4   : > { %v12498_v18 = vrot.slane %v12490_v13, %v22337_v43  ;;  %v12505_v41 = vrot.slane %v12491_v14, %v22337_v43  ;;  %v12506_v58 = vcombine.high %v12482_v57, %v25107_v51  ;;  %v12507_v8 = vcombine.high %v12489_v44, %v25107_v51 }
0x12c6   : > { %v21674_v28 = vpack.i.bf16 %v12507_v8, %v12489_v44  ;;  %v21669_v1 = vpack.i.bf16 %v12506_v58, %v12482_v57  ;;  %v12509_v29 = vcombine.high %v12505_v41, %v25107_v51  ;;  %v12508_v21 = vcombine.high %v12498_v18, %v25107_v51 }
0x12c8   : > { %21675 = vrot.lane.b32.xlu1 %v21674_v28, %s22053_s25  ;;  %21670 = vrot.lane.b32.xlu0 %v21669_v1, %s22053_s25  ;;  %v21684_v15 = vpack.i.bf16 %v12509_v29, %v12505_v41  ;;  %v21679_v6 = vpack.i.bf16 %v12508_v21, %v12498_v18 }
0x12cc   : > { %21685 = vrot.lane.b32.xlu1 %v21684_v15, %s22053_s25  ;;  %21680 = vrot.lane.b32.xlu0 %v21679_v6, %s22053_s25 }
0x12dc   : > { %v21636_v10 = vpop.permute.xlu0 %21635 }
0x12dd   : > { %v21638_v34 = vunpack.i.h.bf16 %v21636_v10  ;;  %v21637_v2 = vunpack.i.l.bf16 %v21636_v10 }
0x12e0   : > { %v23692_v37 = vpop.permute.xlu0 %21660 }
0x12e1   : > { %v21663_v33 = vunpack.i.h.bf16 %v23692_v37  ;;  %v21662_v54 = vunpack.i.l.bf16 %v23692_v37 }
0x12ea   : > { %3626 = vxpose.xlu0.b32.start [1/2] (short) (narrow) %v25115_v39, 8 }
0x12ee   : > { %3627 = vxpose.xlu0.b32.end [2/2] (short) (narrow) %v25116_v26, 8 }
0x12f5   : > { %3658 = vxpose.xlu1.b32.start [1/2] (short) (narrow) %v25117_v32, 8 }
0x12f9   : > { %3659 = vxpose.xlu1.b32.end [2/2] (short) (narrow) %v25118_v61, 8 }
0x133a   : > { %v23694_v0 = vpop.permute.xlu0 %21670  ;;  %v23696_v27 = vpop.permute.xlu1 %21675 }
0x133b   : > { %v21678_v11 = vunpack.i.h.bf16 %v23696_v27  ;;  %v21677_v45 = vunpack.i.l.bf16 %v23696_v27  ;;  %v21673_v56 = vunpack.i.h.bf16 %v23694_v0  ;;  %v21672_v57 = vunpack.i.l.bf16 %v23694_v0 }
0x133e   : > { %v23698_v16 = vpop.permute.xlu0 %21680  ;;  %v23700_v55 = vpop.permute.xlu1 %21685 }
0x133f   : > { %v21688_v44 = vunpack.i.h.bf16 %v23700_v55  ;;  %v21687_v13 = vunpack.i.l.bf16 %v23700_v55  ;;  %v21683_v8 = vunpack.i.h.bf16 %v23698_v16  ;;  %v21682_v28 = vunpack.i.l.bf16 %v23698_v16 }
0x136a   : > { %v3642_v23 = vpop.trf.xlu0 }
0x136b   : > { %v3690_v36 = vcombine.high %v3642_v23, %v25107_v51  ;;  %v3697_v19 = vrot.slane %v3642_v23, %v22227_v3 }
0x136d   : > { %v3704_v42 = vrot.slane %v3690_v36, %v22227_v3 }
0x1375   : > { %v3674_v31 = vpop.trf.xlu1 }
0x1376   : > { %v3705_v5 = vcombine.high %v3674_v31, %v25107_v51  ;;  %v3712_v60 = vrot.slane %v3674_v31, %v22227_v3 }
0x1378   : > { %v3719_v38 = vrot.slane %v3705_v5, %v22227_v3  ;;  %v3720_v7 = vcombine.low %v3697_v19, %v3712_v60  ;;  %v3721_v53 = vcombine.high %v3697_v19, %v3712_v60 }
0x137a   : > { %v3728_v17 = vrot.slane %v3720_v7, %v22337_v43  ;;  %v3735_v30 = vrot.slane %v3721_v53, %v22337_v43  ;;  %v3736_v59 = vcombine.low %v3704_v42, %v3719_v38  ;;  %v3737_v52 = vcombine.high %v3704_v42, %v3719_v38 }
0x137c   : > { %v3744_v14 = vrot.slane %v3736_v59, %v22337_v43  ;;  %v3751_v18 = vrot.slane %v3737_v52, %v22337_v43  ;;  %v3752_v41 = vcombine.high %v3728_v17, %v25107_v51  ;;  %v3753_v58 = vcombine.high %v3735_v30, %v25107_v51 }
0x137d   : > { %v12606_v1 = vsel %vm2129_vm3, %v3728_v17, %v21632_v40  ;;  %v12608_v29 = vsel %vm2129_vm3, %v3735_v30, %v21637_v2 }
0x137e   : > { %v3754_v21 = vcombine.high %v3744_v14, %v25107_v51  ;;  %v3755_v15 = vcombine.high %v3751_v18, %v25107_v51  ;;  %v12607_v6 = vsel %vm2129_vm3, %v3752_v41, %v21633_v20  ;;  %v12609_v43 = vsel %vm2129_vm3, %v3753_v58, %v21638_v34  ;;  %v25120_v34 = vld [vmem:[#allocation5_spill] sm:$0xff] }
0x137f   : > { %v12610_v39 = vsel %vm2129_vm3, %v3744_v14, %v21642_v4  ;;  %v12612_v26 = vsel %vm2129_vm3, %v3751_v18, %v21647_v50  ;;  %v12615_v32 = vsel %vm12614_vm5, %v12606_v1, %v21652_v48  ;;  %v12616_v61 = vsel %vm12614_vm5, %v12607_v6, %v21653_v49  ;;  %v25119_v49 = vld [vmem:[#allocation6_spill] sm:$0xff] }
0x1380   : > { %v12611_v24 = vsel %vm2129_vm3, %v3754_v21, %v21643_v22  ;;  %v12613_v25 = vsel %vm2129_vm3, %v3755_v15, %v21648_v47  ;;  %v12617_v12 = vsel %vm12614_vm5, %v12608_v29, %v21657_v9  ;;  %v12618_v51 = vsel %vm12614_vm5, %v12609_v43, %v21658_v63  ;;  %v21754_v41 = vld [vmem:[#allocation2] sm:$0x3]  ;;  %v21756_v29 = vld [vmem:[#allocation2 + $0x4] sm:$0x3] }
0x1381   : > { %v12619_v35 = vsel %vm12614_vm5, %v12610_v39, %v21662_v54  ;;  %v12620_v10 = vsel %vm12614_vm5, %v12611_v24, %v21663_v33  ;;  %v12621_v37 = vsel %vm12614_vm5, %v12612_v26, %v21667_v46  ;;  %v12622_v0 = vsel %vm12614_vm5, %v12613_v25, %v21668_v62  ;;  %v23773_v33 = vld [vmem:[%s22152_s14] sm:$0xff]  ;;  %v21757_v39 = vld [vmem:[#allocation2 + $0x8] sm:$0x3] }
0x1382   : > { %v12624_v27 = vsel %vm12623_vm6, %v12615_v32, %v21672_v57  ;;  %v12625_v16 = vsel %vm12623_vm6, %v12616_v61, %v21673_v56  ;;  %v12626_v23 = vsel %vm12623_vm6, %v12617_v12, %v21677_v45  ;;  %v12627_v55 = vsel %vm12623_vm6, %v12618_v51, %v21678_v11  ;;  %v21758_v24 = vld [vmem:[#allocation2 + $0x6] sm:$0x3]  ;;  %v21759_v51 = vld [vmem:[#allocation2 + $0xc] sm:$0x3] }
0x1383   : > { %v12628_v36 = vsel %vm12623_vm6, %v12619_v35, %v21682_v28  ;;  %v12629_v20 = vsel %vm12623_vm6, %v12620_v10, %v21683_v8  ;;  %v12630_v40 = vsel %vm12623_vm6, %v12621_v37, %v21687_v13  ;;  %v12631_v22 = vsel %vm12623_vm6, %v12622_v0, %v21688_v44  ;;  %v21755_v8 = vld [vmem:[#allocation2 + $0x2] sm:$0x3]  ;;  %v21760_v37 = vld [vmem:[#allocation2 + $0xa] sm:$0x3] }
0x1384   : > { %v20526_v4 = vpack.c.bf16 %v12625_v16, %v12624_v27  ;;  %v20527_v47 = vpack.c.bf16 %v12627_v55, %v12626_v23  ;;  %v20528_v50 = vpack.c.bf16 %v12629_v20, %v12628_v36  ;;  %v20529_v19 = vpack.c.bf16 %v12631_v22, %v12630_v40  ;;  %v21761_v55 = vld [vmem:[#allocation2 + $0xe] sm:$0x3] }
0x1385   : > { %v23770_v2 = vsub.s32 3, %v25120_v34 }
0x1386   : > { %v12670_v48 = vrot.slane %v20526_v4, %v25119_v49  ;;  %v12677_v63 = vrot.slane %v20527_v47, %v25119_v49  ;;  %v12684_v9 = vrot.slane %v20528_v50, %v25119_v49  ;;  %v12691_v31 = vrot.slane %v20529_v19, %v25119_v49 }
0x1387   : > { %v12651_v54 = vrot.slane %v23773_v33, %v23770_v2 }
0x1388   : > { %v12692_v62 = vcombine.low %v12670_v48, %v12677_v63  ;;  %v12693_v5 = vcombine.low %v12684_v9, %v12691_v31 }
0x1389   : > { %v12734_v38 = vcombine.low %v12651_v54, %v12651_v54 }
0x138a   : > { %v12700_v60 = vrot.slane %v12692_v62, %v25119_v49  ;;  %v12707_v42 = vrot.slane %v12693_v5, %v25119_v49 }
0x138b   : > { %v12741_v7 = vrot.slane %v12734_v38, %v22227_v3 }
0x138c   : > { %v12708_v46 = vcombine.low %v12700_v60, %v12707_v42 }
0x138d   : > { %v12742_v53 = vcombine.low %v12741_v7, %v12741_v7 }
0x138e   : > { %21541 = vmatmul.mubr.msk.bf16.vlgmr.msra.gmra.mrb[16].mxu1 %vm686_vm1, %v12708_v46 }
0x1461   : > { %v12781_v11 = vpop.f32.mrb[16].mxu1 }
0x1462   : > { %v12782_v45 = vadd.f32 %v12781_v11, %v12742_v53  ;;  %v21542_v17 = vpop.f32.mrb[17].mxu1 }
0x1463   : > { %v12784_v30 = vpop.f32.mrb[18].mxu1 }
0x1464   : > { %v12790_v59 = vcombine.high %v12782_v45, %v12782_v45  ;;  %v12797_v52 = vrot.slane %v12782_v45, %v22227_v3  ;;  %v12785_v56 = vadd.f32 %v12784_v30, %v12742_v53  ;;  %v21543_v57 = vpop.f32.mrb[19].mxu1 }
0x1466   : > { %v12804_v44 = vrot.slane %v12790_v59, %v22227_v3  ;;  %v12805_v13 = vcombine.high %v12797_v52, %v12797_v52  ;;  %v12807_v14 = vcombine.high %v12785_v56, %v12785_v56  ;;  %v12814_v18 = vrot.slane %v12785_v56, %v22227_v3 }
0x1467   : > { %v12832_v58 = vadd.f32 %v21754_v41, %v12797_v52 }
0x1468   : > { %v12833_v28 = vadd.f32 %v21755_v8, %v12805_v13  ;;  %v12834_v21 = vadd.f32 %v21756_v29, %v12804_v44  ;;  %v12806_v15 = vcombine.high %v12804_v44, %v12804_v44  ;;  %v12821_v6 = vrot.slane %v12807_v14, %v22227_v3 }
0x1469   : > { %v12841_v1 = vsel %vm12840_vm7, %v12832_v58, 0.0  ;;  %v12836_v26 = vadd.f32 %v21757_v39, %v12814_v18  ;;  %v12822_v32 = vcombine.high %v12814_v18, %v12814_v18 }
0x146a   : > { %12842 = vadd.xlane.f32.xlu0 %v12841_v1  ;;  %v12844_v43 = vsel %vm12840_vm7, %v12833_v28, 0.0  ;;  %v12847_v61 = vsel %vm12840_vm7, %v12834_v21, 0.0  ;;  %v12835_v25 = vadd.f32 %v21758_v24, %v12806_v15  ;;  %v12838_v35 = vadd.f32 %v21759_v51, %v12821_v6 }
0x146b   : > { %12845 = vadd.xlane.f32.xlu1 %v12844_v43  ;;  %v12853_v12 = vsel %vm12840_vm7, %v12836_v26, 0.0  ;;  %v12837_v0 = vadd.f32 %v21760_v37, %v12822_v32  ;;  %v12823_v27 = vcombine.high %v12821_v6, %v12821_v6 }
0x146c   : > { %v12850_v10 = vsel %vm12840_vm7, %v12835_v25, 0.0  ;;  %v12859_v16 = vsel %vm12840_vm7, %v12838_v35, 0.0 }
0x146d   : > { %v12856_v23 = vsel %vm12840_vm7, %v12837_v0, 0.0  ;;  %v12839_v36 = vadd.f32 %v21761_v55, %v12823_v27 }
0x146e   : > { %12848 = vadd.xlane.f32.xlu0 %v12847_v61 }
0x146f   : > { %12854 = vadd.xlane.f32.xlu1 %v12853_v12  ;;  %v12862_v20 = vsel %vm12840_vm7, %v12839_v36, 0.0 }
0x1472   : > { %12851 = vadd.xlane.f32.xlu0 %v12850_v10 }
0x1473   : > { %12860 = vadd.xlane.f32.xlu1 %v12859_v16 }
0x1476   : > { %12857 = vadd.xlane.f32.xlu0 %v12856_v23  ;;  %v12960_v23 = vsub.s32 5, %v25120_v34 }
0x147a   : > { %12863 = vadd.xlane.f32.xlu0 %v12862_v20 }
0x14f7   : > { %v12843_v40 = vpop.xlane.xlu0 %12842 }
0x14f8   : > { %v12866_v22 = vmul.f32 0.015625, %v12843_v40  ;;  %v12846_v4 = vpop.xlane.xlu1 %12845 }
0x14f9   : > { %v12867_v47 = vmul.f32 0.015625, %v12846_v4 }
0x14fa   : > { %v23790_v50 = vsub.f32 %v12832_v58, %v12866_v22 }
0x14fb   : > { %v23792_v19 = vsub.f32 %v12833_v28, %v12867_v47  ;;  %v12849_v49 = vpop.xlane.xlu0 %12848 }
0x14fc   : > { %v12868_v48 = vmul.f32 0.015625, %v12849_v49  ;;  %v12855_v63 = vpop.xlane.xlu1 %12854  ;;  %v12882_v9 = vmul.f32 %v23790_v50, %v23790_v50 }
0x14fd   : > { %v12870_v31 = vmul.f32 0.015625, %v12855_v63  ;;  %v12883_v62 = vmul.f32 %v23792_v19, %v23792_v19  ;;  %v12961_v63 = vrot.slane %v23773_v33, %v12960_v23 }
0x14fe   : > { %v23798_v5 = vsub.f32 %v12834_v21, %v12868_v48  ;;  %v12890_v60 = vsel %vm12840_vm7, %v12882_v9, 0.0 }
0x14ff   : > { %v23801_v42 = vsub.f32 %v12836_v26, %v12870_v31  ;;  %v12852_v46 = vpop.xlane.xlu0 %12851  ;;  %12891 = vadd.xlane.f32.xlu1 %v12890_v60  ;;  %v12893_v54 = vsel %vm12840_vm7, %v12883_v62, 0.0 }
0x1500   : > { %v12869_v38 = vmul.f32 0.015625, %v12852_v46  ;;  %v12861_v7 = vpop.xlane.xlu1 %12860  ;;  %12894 = vadd.xlane.f32.xlu0 %v12893_v54  ;;  %v12884_v53 = vmul.f32 %v23798_v5, %v23798_v5 }
0x1501   : > { %v12872_v11 = vmul.f32 0.015625, %v12861_v7  ;;  %v12886_v30 = vmul.f32 %v23801_v42, %v23801_v42 }
0x1502   : > { %v23806_v45 = vsub.f32 %v12835_v25, %v12869_v38  ;;  %v12896_v17 = vsel %vm12840_vm7, %v12884_v53, 0.0 }
0x1503   : > { %v23811_v59 = vsub.f32 %v12838_v35, %v12872_v11  ;;  %v12858_v52 = vpop.xlane.xlu0 %12857  ;;  %12897 = vadd.xlane.f32.xlu1 %v12896_v17  ;;  %v12902_v13 = vsel %vm12840_vm7, %v12886_v30, 0.0 }
0x1504   : > { %v12871_v56 = vmul.f32 0.015625, %v12858_v52  ;;  %v12885_v57 = vmul.f32 %v23806_v45, %v23806_v45 }
0x1505   : > { %v12888_v18 = vmul.f32 %v23811_v59, %v23811_v59 }
0x1506   : > { %v23815_v44 = vsub.f32 %v12837_v0, %v12871_v56  ;;  %v12899_v14 = vsel %vm12840_vm7, %v12885_v57, 0.0  ;;  %v12948_v0 = vsub.s32 4, %v25120_v34 }
0x1507   : > { %12903 = vadd.xlane.f32.xlu1 %v12902_v13  ;;  %12900 = vadd.xlane.f32.xlu0 %v12899_v14  ;;  %v12864_v41 = vpop.xlane.xlu0 %12863  ;;  %v12908_v1 = vsel %vm12840_vm7, %v12888_v18, 0.0 }
0x1508   : > { %v12873_v58 = vmul.f32 0.015625, %v12864_v41  ;;  %v12887_v8 = vmul.f32 %v23815_v44, %v23815_v44  ;;  %v12949_v22 = vrot.slane %v23773_v33, %v12948_v0  ;;  %v12987_v0 = vld [vmem:[%s22157_s17 + $0x88] sm:$0xff] (!%p20535_p5) }
0x150a   : > { %v23823_v28 = vsub.f32 %v12839_v36, %v12873_v58  ;;  %v12905_v29 = vsel %vm12840_vm7, %v12887_v8, 0.0 }
0x150b   : > { %12909 = vadd.xlane.f32.xlu1 %v12908_v1  ;;  %12906 = vadd.xlane.f32.xlu0 %v12905_v29 }
0x150c   : > { %v12889_v21 = vmul.f32 %v23823_v28, %v23823_v28 }
0x150e   : > { %v12911_v15 = vsel %vm12840_vm7, %v12889_v21, 0.0 }
0x150f   : > { %12912 = vadd.xlane.f32.xlu0 %v12911_v15 }
0x158c   : > { %v12892_v6 = vpop.xlane.xlu1 %12891 }
0x158d   : > { %v12914_v43 = vmul.f32 0.015625, %v12892_v6  ;;  %v12895_v39 = vpop.xlane.xlu0 %12894 }
0x158e   : > { %v12915_v26 = vmul.f32 0.015625, %v12895_v39 }
0x158f   : > { %v12922_v32 = vadd.f32 1e-05, %v12914_v43  ;;  %v12983_v43 = vld [vmem:[%s22157_s17 + $0x8] sm:$0xff] (!%p20535_p5) }
0x1590   : > { %v12923_v61 = vadd.f32 1e-05, %v12915_v26  ;;  %v12898_v24 = vpop.xlane.xlu1 %12897 }
0x1591   : > { %21737 = vrsqrt.f32 %v12922_v32  ;;  %v12916_v25 = vmul.f32 0.015625, %v12898_v24  ;;  %v12985_v32 = vld [vmem:[%s22157_s17 + $0x48] sm:$0xff] (!%p20535_p5)  ;;  %v12986_v24 = vld [vmem:[%s22157_s17 + $0x80] sm:$0xff] (!%p20535_p5) }
0x1592   : > { %21739 = vrsqrt.f32 %v12923_v61 }
0x1593   : > { %v12924_v12 = vadd.f32 1e-05, %v12916_v25  ;;  %v12988_v25 = vld [vmem:[%s22157_s17 + $0xc0] sm:$0xff] (!%p20535_p5) }
0x1594   : > { %v12904_v51 = vpop.xlane.xlu1 %12903  ;;  %v12901_v35 = vpop.xlane.xlu0 %12900 }
0x1595   : > { %21741 = vrsqrt.f32 %v12924_v12  ;;  %v12918_v10 = vmul.f32 0.015625, %v12904_v51  ;;  %v12917_v37 = vmul.f32 0.015625, %v12901_v35  ;;  %v25024_v12 = vmov (!%p20535_p5), 0  }
0x1596   : > { %13293 = vmatprep.mubr.bf16.mxu0 (!%p20535_p5), %v25024_v12  ;;  %13336 = vmatprep.mubr.bf16.mxu1 (!%p20535_p5), %v25024_v12  ;;  %v20543_v35 = vcombine.high (!%p20535_p5), %v12983_v43, %v12985_v32 }
0x1597   : > { %v12926_v27 = vadd.f32 1e-05, %v12918_v10  ;;  %v12925_v16 = vadd.f32 1e-05, %v12917_v37  ;;  %v20542_v10 = vcombine.low (!%p20535_p5), %v12983_v43, %v12985_v32  ;;  %v20545_v37 = vcombine.high (!%p20535_p5), %v12986_v24, %v12988_v25 }
0x1598   : > { %v12910_v55 = vpop.xlane.xlu1 %12909  ;;  %v12907_v36 = vpop.xlane.xlu0 %12906  ;;  %13304 = vmatprep.subr.bf16.mxu1 (!%p20535_p5), %v20543_v35 }
0x1599   : > { %21743 = vrsqrt.f32 %v12926_v27  ;;  %v12920_v20 = vmul.f32 0.015625, %v12910_v55  ;;  %v12919_v40 = vmul.f32 0.015625, %v12907_v36  ;;  %v12989_v27 = vld [vmem:[%s22157_s17 + $0xc8] sm:$0xff] (!%p20535_p5)  ;;  %v12992_v36 = vld [vmem:[%s22157_s17 + $0x140] sm:$0xff] (!%p20535_p5)  ;;  %13305 = vmatpush1.bf16.msra.mxu1 (!%p20535_p5), %v20542_v10  ;;  %v13663_v10 = vld [vmem:[%s22157_s17 + $0x190] sm:$0xff] (!%p20535_p5) }
0x159a   : > { %21745 = vrsqrt.f32 %v12925_v16  ;;  %v12990_v16 = vld [vmem:[%s22157_s17 + $0x100] sm:$0xff] (!%p20535_p5)  ;;  %v20547_v55 = vcombine.high (!%p20535_p5), %v12987_v0, %v12989_v27 }
0x159b   : > { %v21738_v4 = vpop.eup %21737  ;;  %v12928_v47 = vadd.f32 1e-05, %v12920_v20  ;;  %v12927_v49 = vadd.f32 1e-05, %v12919_v40  ;;  %v12991_v20 = vld [vmem:[%s22157_s17 + $0x108] sm:$0xff] (!%p20535_p5) }
0x159c   : > { %v21740_v48 = vpop.eup %21739  ;;  %v12938_v9 = vmul.f32 %v21738_v4, %v23790_v50  ;;  %v12913_v31 = vpop.xlane.xlu0 %12912  ;;  %v12993_v40 = vld [vmem:[%s22157_s17 + $0x148] sm:$0xff] (!%p20535_p5)  ;;  %13306 = vmatprep.subr.bf16.mxu1 (!%p20535_p5), %v20547_v55 }
0x159d   : > { %v12939_v62 = vmul.f32 %v21740_v48, %v23792_v19  ;;  %21747 = vrsqrt.f32 %v12928_v47  ;;  %v12921_v34 = vmul.f32 0.015625, %v12913_v31  ;;  %v20546_v48 = vcombine.low (!%p20535_p5), %v12987_v0, %v12989_v27  ;;  %v12994_v31 = vld [vmem:[%s22157_s17 + $0x180] sm:$0xff] (!%p20535_p5) }
0x159e   : > { %v12950_v60 = vmul.f32 %v12949_v22, %v12938_v9  ;;  %21749 = vrsqrt.f32 %v12927_v49  ;;  %v20544_v49 = vcombine.low (!%p20535_p5), %v12986_v24, %v12988_v25  ;;  %v20551_v9 = vcombine.high (!%p20535_p5), %v12991_v20, %v12993_v40  ;;  %v13660_v24 = vld [vmem:[%s22157_s17 + $0x118] sm:$0xff] (!%p20535_p5) }
0x159f   : > { %v21742_v46 = vpop.eup %21741  ;;  %v12951_v54 = vmul.f32 %v12949_v22, %v12939_v62  ;;  %v12929_v38 = vadd.f32 1e-05, %v12921_v34  ;;  %v12996_v62 = vld [vmem:[%s22157_s17 + $0x1c0] sm:$0xff] (!%p20535_p5)  ;;  %13307 = vmatpush1.bf16.msra.mxu1 (!%p20535_p5), %v20546_v48  ;;  %v13662_v25 = vld [vmem:[%s22157_s17 + $0x158] sm:$0xff] (!%p20535_p5) }
0x15a0   : > { %v23836_v7 = vadd.f32 %v12961_v63, %v12950_v60  ;;  %v12940_v53 = vmul.f32 %v21742_v46, %v23798_v5  ;;  %v12995_v46 = vld [vmem:[%s22157_s17 + $0x188] sm:$0xff] (!%p20535_p5)  ;;  %13308 = vmatprep.subr.bf16.mxu1 (!%p20535_p5), %v20551_v9  ;;  %v20571_v55 = vcombine.high (!%p20535_p5), %v13660_v24, %v13662_v25  ;;  %v21762_v48 = vld [vmem:[%s22167_s27 + $0x140] sm:$0xff] (!%p20535_p5)  }
0x15a1   : > { %v23839_v11 = vadd.f32 %v12961_v63, %v12951_v54  ;;  %21751 = vrsqrt.f32 %v12929_v38  ;;  %v12997_v54 = vld [vmem:[%s22157_s17 + $0x1c8] sm:$0xff] (!%p20535_p5)  ;;  %v21764_v9 = vld [vmem:[%s22167_s27 + $0x100] sm:$0xff] (!%p20535_p5)  }
0x15a2   : > { %v12952_v33 = vmul.f32 %v12949_v22, %v12940_v53  ;;  %v20548_v53 = vcombine.low (!%p20535_p5), %v12990_v16, %v12992_v36 }
0x15a3   : > { %v21744_v17 = vpop.eup %21743 }
0x15a4   : > { %v21746_v50 = vpop.eup %21745  ;;  %v23841_v30 = vadd.f32 %v12961_v63, %v12952_v33  ;;  %v12942_v19 = vmul.f32 %v21744_v17, %v23801_v42  ;;  %v20550_v17 = vcombine.low (!%p20535_p5), %v12991_v20, %v12993_v40  ;;  %v20570_v20 = vcombine.low (!%p20535_p5), %v13660_v24, %v13662_v25  ;;  %v12998_v24 = vld [vmem:[%s22162_s23] sm:$0xf] (!%p20535_p5) }
0x15a5   : > { %v12941_v52 = vmul.f32 %v21746_v50, %v23806_v45  ;;  %v20553_v50 = vcombine.high (!%p20535_p5), %v12994_v31, %v12996_v62  ;;  %v25125_v25 = vld [vmem:[#allocation18_spill] sm:$0xff] (!%p20535_p5) }
0x15a6   : > { %v12954_v56 = vmul.f32 %v12949_v22, %v12942_v19  ;;  %v13651_v19 = vld [vmem:[%s22157_s17 + $0x10] sm:$0xff] (!%p20535_p5)  ;;  %13309 = vmatpush1.bf16.msra.mxu1 (!%p20535_p5), %v20550_v17  ;;  %v21774_v17 = vld [vmem:[%s22167_s27 + $0x158] sm:$0xff] (!%p20535_p5)  }
0x15a7   : > { %v21748_v57 = vpop.eup %21747  ;;  %v12953_v13 = vmul.f32 %v12949_v22, %v12941_v52  ;;  %v20555_v52 = vcombine.high (!%p20535_p5), %v12995_v46, %v12997_v54 }
0x15a8   : > { %v21750_v14 = vpop.eup %21749  ;;  %v23845_v18 = vadd.f32 %v12961_v63, %v12954_v56  ;;  %v12944_v5 = vmul.f32 %v21748_v57, %v23811_v59  ;;  %v12982_v59 = vld [vmem:[%s22157_s17] sm:$0xff] (!%p20535_p5)  ;;  %v13653_v56 = vld [vmem:[%s22157_s17 + $0x50] sm:$0xff] (!%p20535_p5)  ;;  %v13652_v57 = vld [vmem:[%s22157_s17 + $0x18] sm:$0xff] (!%p20535_p5) }
0x15a9   : > { %v23848_v41 = vadd.f32 %v12961_v63, %v12953_v13  ;;  %v12943_v58 = vmul.f32 %v21750_v14, %v23815_v44  ;;  %v12984_v44 = vld [vmem:[%s22157_s17 + $0x40] sm:$0xff] (!%p20535_p5)  ;;  %v13654_v13 = vld [vmem:[%s22157_s17 + $0x58] sm:$0xff] (!%p20535_p5)  ;;  %13310 = vmatprep.subr.bf16.mxu1 (!%p20535_p5), %v20555_v52 }
0x15aa   : > { %v12956_v8 = vmul.f32 %v12949_v22, %v12944_v5  ;;  %v20541_v26 = vcombine.high (!%p20535_p5), %v12982_v59, %v12984_v44  ;;  %v20540_v61 = vcombine.low (!%p20535_p5), %v12982_v59, %v12984_v44  ;;  %v13658_v59 = vld [vmem:[%s22157_s17 + $0xd8] sm:$0xff] (!%p20535_p5)  ;;  %v20563_v44 = vcombine.high (!%p20535_p5), %v13652_v57, %v13654_v13 }
0x15ab   : > { %v21752_v1 = vpop.eup %21751  ;;  %v12955_v29 = vmul.f32 %v12949_v22, %v12943_v58  ;;  %v20537_v39 = vpack.c.bf16 (!%p20535_p5), %v23848_v41, %v23841_v30  ;;  %v20552_v58 = vcombine.low (!%p20535_p5), %v12994_v31, %v12996_v62  ;;  %v20562_v32 = vcombine.low (!%p20535_p5), %v13652_v57, %v13654_v13  ;;  %v21765_v31 = vld [vmem:[%s22167_s27 + $0x180] sm:$0xff] (!%p20535_p5)   ;;  %v21766_v62 = vld [vmem:[%s22167_s27 + $0x148] sm:$0xff] (!%p20535_p5)   ;;  %v21777_v52 = vld [vmem:[%s22167_s27 + $0x198] sm:$0xff] (!%p20535_p5)  }
0x15ac   : > { %v23851_v21 = vadd.f32 %v12961_v63, %v12956_v8  ;;  %v12945_v42 = vmul.f32 %v21752_v1, %v23823_v28  ;;  %12973 = sbr.rel (%p20535_p5) target bundleno = 6990 (0x1b4e), region = 72  ;;  %v20536_v28 = vpack.c.bf16 (!%p20535_p5), %v23839_v11, %v23836_v7  ;;  %13261 = vmatprep.subr.bf16.mxu0 (!%p20535_p5), %v20541_v26  ;;  %v13655_v8 = vld [vmem:[%s22157_s17 + $0x90] sm:$0xff] (!%p20535_p5)  ;;  %v21779_v57 = vld [vmem:[%s22167_s27 + $0x1e0] sm:$0xff] (!%p20535_p5)  }
0x15ad   : > { %v23854_v45 = vadd.f32 %v12961_v63, %v12955_v29  ;;  %13262 = vmatpush1.bf16.msra.mxu0 (!%p20535_p5), %v20540_v61  ;;  %v13657_v1 = vld [vmem:[%s22157_s17 + $0xd0] sm:$0xff] (!%p20535_p5)  ;;  %v20554_v29 = vcombine.low (!%p20535_p5), %v12995_v46, %v12997_v54  ;;  %v21769_v46 = vld [vmem:[%s22167_s27 + $0x188] sm:$0xff] (!%p20535_p5)   ;;  %v21780_v13 = vld [vmem:[%s22167_s27 + $0x120] sm:$0xff] (!%p20535_p5)  }
0x15ae   : > { %25121 = vst [vmem:[#allocation14_spill] sm:$0xff] %v23851_v21  ;;  %v12957_v15 = vmul.f32 %v12949_v22, %v12945_v42  ;;  %v25124_v22 = vld [vmem:[#allocation6_spill] sm:$0xff] (!%p20535_p5)  ;;  %13263 = vmatprep.subr.bf16.mxu0 (!%p20535_p5), %v20545_v37  ;;  %v20561_v42 = vcombine.high (!%p20535_p5), %v13651_v19, %v13653_v56  ;;  %v13661_v26 = vld [vmem:[%s22157_s17 + $0x150] sm:$0xff] (!%p20535_p5)  ;;  %v20565_v61 = vcombine.high (!%p20535_p5), %v13655_v8, %v13657_v1 }
0x15af   : > { %25122 = vst [vmem:[#allocation10_spill] sm:$0xff] %v23854_v45  ;;  %v20538_v51 = vpack.c.bf16 (!%p20535_p5), %v23854_v45, %v23845_v18  ;;  %v13115_v4 = vrot.slane (!%p20535_p5), %v20536_v28, %v25124_v22  ;;  %v13122_v47 = vrot.slane (!%p20535_p5), %v20537_v39, %v25124_v22  ;;  %v20560_v28 = vcombine.low (!%p20535_p5), %v13651_v19, %v13653_v56  ;;  %v13659_v39 = vld [vmem:[%s22157_s17 + $0x110] sm:$0xff] (!%p20535_p5)  ;;  %v21776_v19 = vld [vmem:[%s22167_s27 + $0x118] sm:$0xff] (!%p20535_p5)   ;;  %v21778_v56 = vld [vmem:[%s22167_s27 + $0x160] sm:$0xff] (!%p20535_p5)  }
0x15b0   : > { %v23856_v6 = vadd.f32 %v12961_v63, %v12957_v15  ;;  %v20549_v63 = vcombine.high (!%p20535_p5), %v12990_v16, %v12992_v36  ;;  %v13656_v15 = vld [vmem:[%s22157_s17 + $0x98] sm:$0xff] (!%p20535_p5)  ;;  %13311 = vmatpush1.bf16.msra.mxu1 (!%p20535_p5), %v20554_v29  ;;  %v20564_v35 = vcombine.low (!%p20535_p5), %v13655_v8, %v13657_v1  ;;  %v13665_v37 = vld [vmem:[%s22157_s17 + $0x1d0] sm:$0xff] (!%p20535_p5)  ;;  %v20569_v27 = vcombine.high (!%p20535_p5), %v13659_v39, %v13661_v26  ;;  %v21784_v8 = vld [vmem:[%s22167_s27 + $0x128] sm:$0xff] (!%p20535_p5)  }
0x15b1   : > { %v13129_v34 = vrot.slane (!%p20535_p5), %v20538_v51, %v25124_v22  ;;  %v13137_v38 = vcombine.low (!%p20535_p5), %v13115_v4, %v13122_v47  ;;  %13264 = vmatpush1.bf16.msra.mxu0 (!%p20535_p5), %v20544_v49  ;;  %13913 = vmatprep.subr.bf16.mxu1 (!%p20535_p5), %v20563_v44  ;;  %v20567_v51 = vcombine.high (!%p20535_p5), %v13656_v15, %v13658_v59  ;;  %v13664_v16 = vld [vmem:[%s22157_s17 + $0x198] sm:$0xff] (!%p20535_p5)  ;;  %v21770_v54 = vld [vmem:[%s22167_s27 + $0x150] sm:$0xff] (!%p20535_p5)   ;;  %v21785_v1 = vld [vmem:[%s22167_s27 + $0x1a8] sm:$0xff] (!%p20535_p5)  }
0x15b2   : > { %25123 = vst [vmem:[#allocation9_spill] sm:$0xff] %v23856_v6  ;;  %v20539_v23 = vpack.c.bf16 (!%p20535_p5), %v23856_v6, %v23851_v21  ;;  %13265 = vmatprep.subr.bf16.mxu0 (!%p20535_p5), %v20549_v63  ;;  %v20566_v0 = vcombine.low (!%p20535_p5), %v13656_v15, %v13658_v59  ;;  %v20568_v36 = vcombine.low (!%p20535_p5), %v13659_v39, %v13661_v26  ;;  %v21763_v63 = vld [vmem:[%s22167_s27 + $0x1c0] sm:$0xff] (!%p20535_p5)   ;;  %v21786_v29 = vld [vmem:[%s22167_s27 + $0x170] sm:$0xff] (!%p20535_p5)   ;;  %v21790_v44 = vld [vmem:[%s22167_s27 + $0x178] sm:$0xff] (!%p20535_p5)  }
0x15b3   : > { %v13145_v14 = vrot.slane %v13137_v38, %v25124_v22  ;;  %v20573_v40 = vcombine.high %v13663_v10, %v13665_v37  ;;  %v20572_v47 = vcombine.low %v13663_v10, %v13665_v37  ;;  %v21771_v38 = vld [vmem:[%s22167_s27 + $0x1d0] sm:$0xff]   ;;  %v21792_v39 = vld [vmem:[%s22167_s27 + $0x138] sm:$0xff]  }
0x15b4   : > { %v13136_v60 = vrot.slane %v20539_v23, %v25124_v22  ;;  %v13666_v23 = vld [vmem:[%s22157_s17 + $0x1d8] sm:$0xff]  ;;  %v21788_v15 = vld [vmem:[%s22167_s27 + $0x130] sm:$0xff]  }
0x15b5   : > { %13266 = vmatpush1.bf16.msra.mxu0 %v20548_v53  ;;  %v20575_v4 = vcombine.high %v13664_v16, %v13666_v23  ;;  %v20574_v49 = vcombine.low %v13664_v16, %v13666_v23  ;;  %v21772_v53 = vld [vmem:[%s22167_s27 + $0x110] sm:$0xff]   ;;  %v21793_v26 = vld [vmem:[%s22167_s27 + $0x1b8] sm:$0xff]  }
0x15b6   : > { %v13138_v33 = vcombine.low %v13129_v34, %v13136_v60  ;;  %13267 = vmatprep.subr.bf16.mxu0 %v20553_v50  ;;  %v21767_v34 = vld [vmem:[%s22167_s27 + $0x1c8] sm:$0xff]   ;;  %v21775_v50 = vld [vmem:[%s22167_s27 + $0x1d8] sm:$0xff]   ;;  %v21789_v59 = vld [vmem:[%s22167_s27 + $0x1b0] sm:$0xff]  }
0x15b7   : > { %v21768_v60 = vld [vmem:[%s22167_s27 + $0x108] sm:$0xff]   ;;  %v25127_v37 = vld [vmem:[#allocation17_spill] sm:$0xff] }
0x15b8   : > { %v13152_v5 = vrot.slane %v13138_v33, %v25124_v22  ;;  %v21773_v33 = vld [vmem:[%s22167_s27 + $0x190] sm:$0xff]  }
0x15b9   : > { %13268 = vmatpush1.bf16.msra.mxu0 %v20552_v58  ;;  %v21783_v58 = vld [vmem:[%s22167_s27 + $0x1e8] sm:$0xff]  }
0x15ba   : > { %v23899_v43 = vcombine.low %v13145_v14, %v13152_v5  ;;  %13870 = vmatprep.subr.bf16.mxu0 %v20561_v42  ;;  %v21781_v14 = vld [vmem:[%s22167_s27 + $0x1a0] sm:$0xff]   ;;  %v21782_v5 = vld [vmem:[%s22167_s27 + $0x168] sm:$0xff]   ;;  %v21787_v42 = vld [vmem:[%s22167_s27 + $0x1f0] sm:$0xff]  }
0x15bc   : > { %20558 = vmatmul.mubr.msk.bf16.vlgmr.msra.gmra.mrb[0].mxu0 %vm686_vm1, %v23899_v43  ;;  %20559 = vmatmul.mubr.msk.bf16.vlgmr.msra.gmra.mrb[0].mxu1 %vm686_vm1, %v23899_v43 }
0x15bd   : > { %13871 = vmatpush1.bf16.msra.mxu0 %v20560_v28  ;;  %13914 = vmatpush1.bf16.msra.mxu1 %v20562_v32  ;;  %v21791_v28 = vld [vmem:[%s22167_s27 + $0x1f8] sm:$0xff]   ;;  %v21794_v32 = vld [vmem:[%s22167_s27 + $0x40] sm:$0xff]  }
0x15be   : > { %13872 = vmatprep.subr.bf16.mxu0 %v20565_v61  ;;  %13915 = vmatprep.subr.bf16.mxu1 %v20567_v51  ;;  %v21795_v61 = vld [vmem:[%s22167_s27 + $0xc0] sm:$0xff]   ;;  %v13067_v51 = vrot.slane %v12998_v24, %v25125_v25 }
0x15bf   : > { %13902 = vmatprep.mubr.bf16.mxu0 %v25024_v12  ;;  %13945 = vmatprep.mubr.bf16.mxu1 %v25024_v12 }
0x15c1   : > { %13873 = vmatpush1.bf16.msra.mxu0 %v20564_v35  ;;  %13916 = vmatpush1.bf16.msra.mxu1 %v20566_v0  ;;  %v25126_v35 = vld [vmem:[#allocation8_spill] sm:$0xff]  ;;  %v13075_v0 = vrot.slane %v12998_v24, %v25127_v37 }
0x15c2   : > { %13874 = vmatprep.subr.bf16.mxu0 %v20569_v27  ;;  %13917 = vmatprep.subr.bf16.mxu1 %v20571_v55  ;;  %v13071_v10 = vrot.slane %v12998_v24, %v25126_v35  ;;  %v13079_v27 = vrot.slane %v12998_v24, %v23770_v2  ;;  %v13667_v55 = vld [vmem:[%s22162_s23 + $0x4] sm:$0xf] }
0x15c4   : > { %v13080_v16 = vcombine.low %v13067_v51, %v13071_v10  ;;  %v13081_v23 = vcombine.low %v13075_v0, %v13079_v27 }
0x15c5   : > { %13875 = vmatpush1.bf16.msra.mxu0 %v20568_v36  ;;  %13918 = vmatpush1.bf16.msra.mxu1 %v20570_v20 }
0x15c6   : > { %13876 = vmatprep.subr.bf16.mxu0 %v20573_v40  ;;  %13919 = vmatprep.subr.bf16.mxu1 %v20575_v4  ;;  %v13088_v36 = vrot.slane %v13080_v16, %v22227_v3  ;;  %v13095_v20 = vrot.slane %v13081_v23, %v22227_v3  ;;  %v13736_v40 = vrot.slane %v13667_v55, %v25125_v25 }
0x15c7   : > { %v13740_v4 = vrot.slane %v13667_v55, %v25126_v35 }
0x15c9   : > { %13877 = vmatpush1.bf16.msra.mxu0 %v20572_v47  ;;  %13920 = vmatpush1.bf16.msra.mxu1 %v20574_v49  ;;  %v13744_v47 = vrot.slane %v13667_v55, %v25127_v37  ;;  %v13748_v49 = vrot.slane %v13667_v55, %v23770_v2 }
0x15ca   : > { %21075 = vmatprep.subr.bf16.mxu0 %v21762_v48  ;;  %21097 = vmatprep.subr.bf16.mxu1 %v21763_v63  ;;  %v20556_v48 = vcombine.low %v13088_v36, %v13088_v36  ;;  %v20557_v63 = vcombine.low %v13095_v20, %v13095_v20 }
0x15cc   : > { %20578 = vmatmul.mubr.msk.bf16.vlgmr.msra.gmra.mrb[4].mxu0 %vm686_vm1, %v23899_v43  ;;  %20579 = vmatmul.mubr.msk.bf16.vlgmr.msra.gmra.mrb[4].mxu1 %vm686_vm1, %v23899_v43 }
0x15cd   : > { %21076 = vmatpush3.bf16.msra.mxu0 %v21764_v9  ;;  %21098 = vmatpush3.bf16.msra.mxu1 %v21765_v31  ;;  %v13749_v9 = vcombine.low %v13736_v40, %v13740_v4  ;;  %v13750_v31 = vcombine.low %v13744_v47, %v13748_v49 }
0x15ce   : > { %21077 = vmatprep.subr.bf16.mxu0 %v21766_v62  ;;  %21099 = vmatprep.subr.bf16.mxu1 %v21767_v34  ;;  %v13242_v62 = vrot.slane %v20556_v48, %v22227_v3  ;;  %v13249_v34 = vrot.slane %v20557_v63, %v22227_v3 }
0x15d1   : > { %21078 = vmatpush3.bf16.msra.mxu0 %v21768_v60  ;;  %21100 = vmatpush3.bf16.msra.mxu1 %v21769_v46  ;;  %v13757_v60 = vrot.slane %v13749_v9, %v22227_v3  ;;  %v13764_v46 = vrot.slane %v13750_v31, %v22227_v3 }
0x15d2   : > { %21079 = vmatprep.subr.bf16.mxu0 %v21770_v54  ;;  %21101 = vmatprep.subr.bf16.mxu1 %v21771_v38  ;;  %v13250_v54 = vcombine.low %v13242_v62, %v13242_v62  ;;  %v13252_v38 = vcombine.low %v13249_v34, %v13249_v34 }
0x15d5   : > { %21080 = vmatpush3.bf16.msra.mxu0 %v21772_v53  ;;  %21102 = vmatpush3.bf16.msra.mxu1 %v21773_v33  ;;  %v13251_v53 = vcombine.high %v13242_v62, %v13242_v62  ;;  %v13253_v33 = vcombine.high %v13249_v34, %v13249_v34 }
0x15d6   : > { %21081 = vmatprep.subr.bf16.mxu0 %v21774_v17  ;;  %21103 = vmatprep.subr.bf16.mxu1 %v21775_v50  ;;  %v20576_v17 = vcombine.low %v13757_v60, %v13757_v60  ;;  %v20577_v50 = vcombine.low %v13764_v46, %v13764_v46 }
0x15d9   : > { %21082 = vmatpush3.bf16.msra.mxu0 %v21776_v19  ;;  %21104 = vmatpush3.bf16.msra.mxu1 %v21777_v52 }
0x15da   : > { %21083 = vmatprep.subr.bf16.mxu0 %v21778_v56  ;;  %21105 = vmatprep.subr.bf16.mxu1 %v21779_v57 }
0x15dd   : > { %21084 = vmatpush3.bf16.msra.mxu0 %v21780_v13  ;;  %21106 = vmatpush3.bf16.msra.mxu1 %v21781_v14 }
0x15de   : > { %21085 = vmatprep.subr.bf16.mxu0 %v21782_v5  ;;  %21107 = vmatprep.subr.bf16.mxu1 %v21783_v58 }
0x15e1   : > { %21086 = vmatpush3.bf16.msra.mxu0 %v21784_v8  ;;  %21108 = vmatpush3.bf16.msra.mxu1 %v21785_v1 }
0x15e2   : > { %21087 = vmatprep.subr.bf16.mxu0 %v21786_v29  ;;  %21109 = vmatprep.subr.bf16.mxu1 %v21787_v42 }
0x15e5   : > { %21088 = vmatpush3.bf16.msra.mxu0 %v21788_v15  ;;  %21110 = vmatpush3.bf16.msra.mxu1 %v21789_v59  ;;  %v13854_v15 = vrot.slane %v20576_v17, %v22227_v3  ;;  %v13861_v59 = vrot.slane %v20577_v50, %v22227_v3 }
0x15e6   : > { %21089 = vmatprep.subr.bf16.mxu0 %v21790_v44  ;;  %21111 = vmatprep.subr.bf16.mxu1 %v21791_v28 }
0x15e7   : > { %v23981_v47 = vcombine.low %v13854_v15, %v13854_v15  ;;  %v23983_v49 = vcombine.low %v13861_v59, %v13861_v59  ;;  %v23987_v60 = vcombine.high %v13854_v15, %v13854_v15  ;;  %v23989_v46 = vcombine.high %v13861_v59, %v13861_v59 }
0x15e9   : > { %21090 = vmatpush3.bf16.msra.mxu0 %v21792_v39  ;;  %21112 = vmatpush3.bf16.msra.mxu1 %v21793_v26 }
0x15ea   : > { %21119 = vmatprep.subr.bf16.mxu0 %v21794_v32  ;;  %21141 = vmatprep.subr.bf16.mxu1 %v21795_v61 }
0x168f   : > { %v13295_v19 = vpop.f32.mrb[0].mxu0  ;;  %v13338_v56 = vpop.f32.mrb[0].mxu1 }
0x1690   : > { %v13296_v52 = vadd.f32 %v13295_v19, %v13250_v54  ;;  %v13297_v57 = vpop.f32.mrb[1].mxu0  ;;  %v13339_v13 = vadd.f32 %v13338_v56, %v13252_v38  ;;  %v13340_v5 = vpop.f32.mrb[1].mxu1 }
0x1691   : > { %v13298_v14 = vadd.f32 %v13297_v57, %v13251_v53  ;;  %v13299_v58 = vpop.f32.mrb[2].mxu0  ;;  %v13341_v8 = vadd.f32 %v13340_v5, %v13253_v33  ;;  %v13342_v29 = vpop.f32.mrb[2].mxu1 }
0x1692   : > { %v13300_v1 = vadd.f32 %v13299_v58, %v13250_v54  ;;  %v13301_v42 = vpop.f32.mrb[3].mxu0  ;;  %v13343_v39 = vadd.f32 %v13342_v29, %v13252_v38  ;;  %v13344_v32 = vpop.f32.mrb[3].mxu1 }
0x1693   : > { %v13355_v44 = vcombine.low %v13296_v52, %v13298_v14  ;;  %v13356_v28 = vcombine.high %v13296_v52, %v13298_v14  ;;  %v13302_v26 = vadd.f32 %v13301_v42, %v13251_v53  ;;  %v13357_v61 = vcombine.low %v13339_v13, %v13341_v8 }
0x1694   : > { %v13358_v24 = vcombine.high %v13339_v13, %v13341_v8  ;;  %v13345_v51 = vadd.f32 %v13344_v32, %v13253_v33 }
0x1695   : > { %v13365_v10 = vrot.slane %v13355_v44, %v22227_v3  ;;  %v13372_v0 = vrot.slane %v13356_v28, %v22227_v3  ;;  %v13391_v27 = vcombine.low %v13300_v1, %v13302_v26  ;;  %v13392_v16 = vcombine.high %v13300_v1, %v13302_v26 }
0x1696   : > { %v13379_v23 = vrot.slane %v13357_v61, %v22227_v3  ;;  %v13386_v55 = vrot.slane %v13358_v24, %v22227_v3  ;;  %v13393_v36 = vcombine.low %v13343_v39, %v13345_v51  ;;  %v13394_v20 = vcombine.high %v13343_v39, %v13345_v51 }
0x1697   : > { %v23976_v40 = vrot.slane %v13391_v27, %v22227_v3  ;;  %v23979_v4 = vrot.slane %v13392_v16, %v22227_v3 }
0x1698   : > { %v13387_v48 = vcombine.low %v13365_v10, %v13379_v23  ;;  %v13388_v63 = vcombine.high %v13365_v10, %v13379_v23  ;;  %v13389_v9 = vcombine.low %v13372_v0, %v13386_v55  ;;  %v13390_v31 = vcombine.high %v13372_v0, %v13386_v55 }
0x1699   : > { %v13415_v62 = vrot.slane %v13393_v36, %v22227_v3  ;;  %v13422_v34 = vrot.slane %v13394_v20, %v22227_v3 }
0x169a   : > { %v13435_v54 = vmax.f32 %v13387_v48, 0.0  ;;  %v13436_v38 = vmax.f32 %v13388_v63, 0.0  ;;  %v13437_v53 = vmax.f32 %v13389_v9, 0.0  ;;  %v13438_v33 = vmax.f32 %v13390_v31, 0.0 }
0x169b   : > { %v13423_v17 = vcombine.low %v23976_v40, %v13415_v62  ;;  %v13424_v50 = vcombine.high %v23976_v40, %v13415_v62  ;;  %v13425_v19 = vcombine.low %v23979_v4, %v13422_v34  ;;  %v13426_v52 = vcombine.high %v23979_v4, %v13422_v34 }
0x169c   : > { %v13451_v56 = vcombine.high %v13435_v54, %v13435_v54  ;;  %v13458_v57 = vrot.slane %v13435_v54, %v22227_v3  ;;  %v13468_v13 = vcombine.high %v13436_v38, %v13436_v38  ;;  %v13475_v14 = vrot.slane %v13436_v38, %v22227_v3 }
0x169d   : > { %v13485_v5 = vcombine.high %v13437_v53, %v13437_v53  ;;  %v13492_v58 = vrot.slane %v13437_v53, %v22227_v3  ;;  %v13502_v8 = vcombine.high %v13438_v33, %v13438_v33  ;;  %v13509_v1 = vrot.slane %v13438_v33, %v22227_v3 }
0x169e   : > { %v13465_v29 = vrot.slane %v13451_v56, %v22227_v3  ;;  %v13466_v42 = vcombine.high %v13458_v57, %v13458_v57  ;;  %v13482_v15 = vrot.slane %v13468_v13, %v22227_v3  ;;  %v13483_v59 = vcombine.high %v13475_v14, %v13475_v14 }
0x169f   : > { %v13499_v44 = vrot.slane %v13485_v5, %v22227_v3  ;;  %v13500_v28 = vcombine.high %v13492_v58, %v13492_v58  ;;  %v13516_v39 = vrot.slane %v13502_v8, %v22227_v3  ;;  %v13517_v26 = vcombine.high %v13509_v1, %v13509_v1  ;;  %v24003_v32 = vpop.f32.mrb[4].mxu0  ;;  %v13947_v0 = vpop.f32.mrb[4].mxu1 }
0x16a0   : > { %v13467_v61 = vcombine.high %v13465_v29, %v13465_v29  ;;  %v13484_v24 = vcombine.high %v13482_v15, %v13482_v15  ;;  %v24005_v51 = vpack.c.bf16 %v13466_v42, %v13458_v57  ;;  %v24007_v10 = vpack.c.bf16 %v13483_v59, %v13475_v14  ;;  %v24009_v27 = vpop.f32.mrb[5].mxu0  ;;  %v13949_v20 = vpop.f32.mrb[5].mxu1 }
0x16a1   : > { %v13501_v16 = vcombine.high %v13499_v44, %v13499_v44  ;;  %v13518_v23 = vcombine.high %v13516_v39, %v13516_v39  ;;  %v24011_v55 = vpack.c.bf16 %v13500_v28, %v13492_v58  ;;  %v24013_v36 = vpack.c.bf16 %v13517_v26, %v13509_v1  ;;  %v13908_v40 = vpop.f32.mrb[6].mxu0  ;;  %v13951_v31 = vpop.f32.mrb[6].mxu1 }
0x16a2   : > { %v24015_v4 = vpack.c.bf16 %v13467_v61, %v13465_v29  ;;  %v24019_v63 = vpack.c.bf16 %v13484_v24, %v13482_v15  ;;  %v13910_v62 = vpop.f32.mrb[7].mxu0  ;;  %v13953_v33 = vpop.f32.mrb[7].mxu1  ;;  %v13439_v13 = vmax.f32 %v13423_v17, 0.0  ;;  %v13440_v14 = vmax.f32 %v13424_v50, 0.0 }
0x16a3   : > { %v24023_v34 = vpack.c.bf16 %v13501_v16, %v13499_v44  ;;  %v24027_v38 = vpack.c.bf16 %v13518_v23, %v13516_v39  ;;  %v13441_v8 = vmax.f32 %v13425_v19, 0.0  ;;  %v13442_v1 = vmax.f32 %v13426_v52, 0.0 }
0x16a4   : > { %v13519_v29 = vcombine.high %v13439_v13, %v13439_v13  ;;  %v13526_v42 = vrot.slane %v13439_v13, %v22227_v3  ;;  %v13536_v15 = vcombine.high %v13440_v14, %v13440_v14  ;;  %v13543_v59 = vrot.slane %v13440_v14, %v22227_v3 }
0x16a5   : > { %v13553_v44 = vcombine.high %v13441_v8, %v13441_v8  ;;  %v13560_v28 = vrot.slane %v13441_v8, %v22227_v3  ;;  %v13570_v39 = vcombine.high %v13442_v1, %v13442_v1  ;;  %v13577_v17 = vrot.slane %v13442_v1, %v22227_v3 }
0x16a6   : > { %v13533_v50 = vrot.slane %v13519_v29, %v22227_v3  ;;  %v13534_v26 = vcombine.high %v13526_v42, %v13526_v42  ;;  %v13550_v61 = vrot.slane %v13536_v15, %v22227_v3  ;;  %v13551_v24 = vcombine.high %v13543_v59, %v13543_v59 }
0x16a7   : > { %v13567_v19 = vrot.slane %v13553_v44, %v22227_v3  ;;  %v13568_v52 = vcombine.high %v13560_v28, %v13560_v28  ;;  %v13584_v16 = vrot.slane %v13570_v39, %v22227_v3  ;;  %v13585_v23 = vcombine.high %v13577_v17, %v13577_v17 }
0x16a8   : > { %v13535_v13 = vcombine.high %v13533_v50, %v13533_v50  ;;  %v13552_v14 = vcombine.high %v13550_v61, %v13550_v61  ;;  %v24047_v12 = vpack.c.bf16 %v13534_v26, %v13526_v42  ;;  %v24049_v8 = vpack.c.bf16 %v13551_v24, %v13543_v59 }
0x16a9   : > { %v13569_v53 = vcombine.high %v13567_v19, %v13567_v19  ;;  %v13586_v1 = vcombine.high %v13584_v16, %v13584_v16  ;;  %v24051_v58 = vpack.c.bf16 %v13568_v52, %v13560_v28  ;;  %v24053_v29 = vpack.c.bf16 %v13585_v23, %v13577_v17 }
0x16aa   : > { %v24055_v15 = vpack.c.bf16 %v13535_v13, %v13533_v50  ;;  %v24059_v54 = vpack.c.bf16 %v13552_v14, %v13550_v61  ;;  %v13905_v61 = vadd.f32 %v24003_v32, %v23981_v47  ;;  %v13907_v52 = vadd.f32 %v24009_v27, %v23987_v60 }
0x16ab   : > { %v24063_v42 = vpack.c.bf16 %v13569_v53, %v13567_v19  ;;  %v24067_v26 = vpack.c.bf16 %v13586_v1, %v13584_v16  ;;  %v13948_v53 = vadd.f32 %v13947_v0, %v23983_v49  ;;  %v13950_v16 = vadd.f32 %v13949_v20, %v23989_v46 }
0x16ac   : > { %v13909_v23 = vadd.f32 %v13908_v40, %v23981_v47  ;;  %v13952_v13 = vadd.f32 %v13951_v31, %v23983_v49  ;;  %v13911_v14 = vadd.f32 %v13910_v62, %v23987_v60  ;;  %v13954_v32 = vadd.f32 %v13953_v33, %v23989_v46 }
0x16ad   : > { %v13964_v0 = vcombine.low %v13905_v61, %v13907_v52  ;;  %v13965_v1 = vcombine.high %v13905_v61, %v13907_v52  ;;  %v13966_v28 = vcombine.low %v13948_v53, %v13950_v16  ;;  %v13967_v59 = vcombine.high %v13948_v53, %v13950_v16 }
0x16ae   : > { %v14000_v24 = vcombine.low %v13909_v23, %v13911_v14  ;;  %v14001_v39 = vcombine.high %v13909_v23, %v13911_v14  ;;  %v14002_v19 = vcombine.low %v13952_v13, %v13954_v32  ;;  %v14003_v50 = vcombine.high %v13952_v13, %v13954_v32 }
0x16af   : > { %v13974_v27 = vrot.slane %v13964_v0, %v22227_v3  ;;  %v13981_v20 = vrot.slane %v13965_v1, %v22227_v3  ;;  %v13988_v47 = vrot.slane %v13966_v28, %v22227_v3  ;;  %v13995_v49 = vrot.slane %v13967_v59, %v22227_v3 }
0x16b0   : > { %v14010_v60 = vrot.slane %v14000_v24, %v22227_v3  ;;  %v14017_v46 = vrot.slane %v14001_v39, %v22227_v3  ;;  %v14024_v40 = vrot.slane %v14002_v19, %v22227_v3  ;;  %v14031_v31 = vrot.slane %v14003_v50, %v22227_v3 }
0x16b1   : > { %v13996_v62 = vcombine.low %v13974_v27, %v13988_v47  ;;  %v13997_v33 = vcombine.high %v13974_v27, %v13988_v47  ;;  %v13998_v61 = vcombine.low %v13981_v20, %v13995_v49  ;;  %v13999_v53 = vcombine.high %v13981_v20, %v13995_v49 }
0x16b2   : > { %v14032_v52 = vcombine.low %v14010_v60, %v14024_v40  ;;  %v14033_v16 = vcombine.high %v14010_v60, %v14024_v40  ;;  %v14034_v23 = vcombine.low %v14017_v46, %v14031_v31  ;;  %v14035_v13 = vcombine.high %v14017_v46, %v14031_v31 }
0x16b3   : > { %v14044_v14 = vmax.f32 %v13996_v62, 0.0  ;;  %v14045_v28 = vmax.f32 %v13997_v33, 0.0  ;;  %v14046_v32 = vmax.f32 %v13998_v61, 0.0  ;;  %v14047_v59 = vmax.f32 %v13999_v53, 0.0 }
0x16b4   : > { %v14048_v0 = vmax.f32 %v14032_v52, 0.0  ;;  %v14049_v24 = vmax.f32 %v14033_v16, 0.0  ;;  %v14050_v1 = vmax.f32 %v14034_v23, 0.0  ;;  %v14051_v39 = vmax.f32 %v14035_v13, 0.0 }
0x16b5   : > { %v14060_v44 = vcombine.high %v14044_v14, %v14044_v14  ;;  %v14067_v19 = vrot.slane %v14044_v14, %v22227_v3  ;;  %v14077_v50 = vcombine.high %v14045_v28, %v14045_v28  ;;  %v14084_v27 = vrot.slane %v14045_v28, %v22227_v3 }
0x16b6   : > { %v14094_v47 = vcombine.high %v14046_v32, %v14046_v32  ;;  %v14101_v20 = vrot.slane %v14046_v32, %v22227_v3  ;;  %v14111_v49 = vcombine.high %v14047_v59, %v14047_v59  ;;  %v14118_v60 = vrot.slane %v14047_v59, %v22227_v3 }
0x16b7   : > { %v14074_v46 = vrot.slane %v14060_v44, %v22227_v3  ;;  %v14075_v40 = vcombine.high %v14067_v19, %v14067_v19  ;;  %v14091_v31 = vrot.slane %v14077_v50, %v22227_v3  ;;  %v14092_v62 = vcombine.high %v14084_v27, %v14084_v27 }
0x16b8   : > { %v14108_v33 = vrot.slane %v14094_v47, %v22227_v3  ;;  %v14109_v61 = vcombine.high %v14101_v20, %v14101_v20  ;;  %v14125_v53 = vrot.slane %v14111_v49, %v22227_v3  ;;  %v14126_v52 = vcombine.high %v14118_v60, %v14118_v60 }
0x16b9   : > { %v14076_v16 = vcombine.high %v14074_v46, %v14074_v46  ;;  %v14093_v23 = vcombine.high %v14091_v31, %v14091_v31  ;;  %v20580_v13 = vpack.c.bf16 %v14075_v40, %v14067_v19  ;;  %v20582_v14 = vpack.c.bf16 %v14092_v62, %v14084_v27 }
0x16ba   : > { %v14110_v28 = vcombine.high %v14108_v33, %v14108_v33  ;;  %v14127_v32 = vcombine.high %v14125_v53, %v14125_v53  ;;  %v20584_v17 = vpack.c.bf16 %v14109_v61, %v14101_v20  ;;  %v20586_v59 = vpack.c.bf16 %v14126_v52, %v14118_v60 }
0x16bb   : > { %v20581_v5 = vpack.c.bf16 %v14076_v16, %v14074_v46  ;;  %v14300_v44 = vrot.slane %v20580_v13, %v25124_v22  ;;  %v20583_v9 = vpack.c.bf16 %v14093_v23, %v14091_v31  ;;  %v14324_v50 = vrot.slane %v20582_v14, %v25124_v22 }
0x16bc   : > { %v20585_v57 = vpack.c.bf16 %v14110_v28, %v14108_v33  ;;  %v14348_v47 = vrot.slane %v20584_v17, %v25124_v22  ;;  %v20587_v48 = vpack.c.bf16 %v14127_v32, %v14125_v53  ;;  %v14372_v49 = vrot.slane %v20586_v59, %v25124_v22 }
0x16bd   : > { %v14307_v56 = vrot.slane %v20581_v5, %v25124_v22  ;;  %v14331_v19 = vrot.slane %v20583_v9, %v25124_v22  ;;  %v14128_v27 = vcombine.high %v14048_v0, %v14048_v0  ;;  %v14135_v20 = vrot.slane %v14048_v0, %v22227_v3 }
0x16be   : > { %v14355_v60 = vrot.slane %v20585_v57, %v25124_v22  ;;  %v14379_v46 = vrot.slane %v20587_v48, %v25124_v22  ;;  %v14145_v40 = vcombine.high %v14049_v24, %v14049_v24  ;;  %v14152_v31 = vrot.slane %v14049_v24, %v22227_v3 }
0x16bf   : > { %v14142_v62 = vrot.slane %v14128_v27, %v22227_v3  ;;  %v14143_v17 = vcombine.high %v14135_v20, %v14135_v20  ;;  %v14162_v33 = vcombine.high %v14050_v1, %v14050_v1  ;;  %v14169_v61 = vrot.slane %v14050_v1, %v22227_v3 }
0x16c0   : > { %v14159_v5 = vrot.slane %v14145_v40, %v22227_v3  ;;  %v14160_v53 = vcombine.high %v14152_v31, %v14152_v31  ;;  %v14179_v9 = vcombine.high %v14051_v39, %v14051_v39  ;;  %v14186_v52 = vrot.slane %v14051_v39, %v22227_v3 }
0x16c1   : > { %v14144_v0 = vcombine.high %v14142_v62, %v14142_v62  ;;  %v14176_v57 = vrot.slane %v14162_v33, %v22227_v3  ;;  %v14177_v16 = vcombine.high %v14169_v61, %v14169_v61  ;;  %v20588_v48 = vpack.c.bf16 %v14143_v17, %v14135_v20 }
0x16c2   : > { %v14161_v23 = vcombine.high %v14159_v5, %v14159_v5  ;;  %v14193_v24 = vrot.slane %v14179_v9, %v22227_v3  ;;  %v14194_v13 = vcombine.high %v14186_v52, %v14186_v52  ;;  %v20590_v14 = vpack.c.bf16 %v14160_v53, %v14152_v31 }
0x16c3   : > { %v14178_v28 = vcombine.high %v14176_v57, %v14176_v57  ;;  %v20589_v32 = vpack.c.bf16 %v14144_v0, %v14142_v62  ;;  %v14396_v1 = vrot.slane %v20588_v48, %v25124_v22  ;;  %v20592_v59 = vpack.c.bf16 %v14177_v16, %v14169_v61 }
0x16c4   : > { %v14195_v27 = vcombine.high %v14193_v24, %v14193_v24  ;;  %v20591_v40 = vpack.c.bf16 %v14161_v23, %v14159_v5  ;;  %v14420_v6 = vrot.slane %v20590_v14, %v25124_v22  ;;  %v20594_v39 = vpack.c.bf16 %v14194_v13, %v14186_v52 }
0x16c5   : > { %v14403_v21 = vrot.slane %v20589_v32, %v25124_v22  ;;  %v20593_v33 = vpack.c.bf16 %v14178_v28, %v14176_v57  ;;  %v14444_v20 = vrot.slane %v20592_v59, %v25124_v22  ;;  %v14308_v17 = vcombine.low %v14300_v44, %v14307_v56 }
0x16c6   : > { %v14427_v9 = vrot.slane %v20591_v40, %v25124_v22  ;;  %v20595_v45 = vpack.c.bf16 %v14195_v27, %v14193_v24  ;;  %v14468_v31 = vrot.slane %v20594_v39, %v25124_v22  ;;  %v14332_v62 = vcombine.low %v14324_v50, %v14331_v19 }
0x16c7   : > { %v14451_v53 = vrot.slane %v20593_v33, %v25124_v22  ;;  %v14315_v61 = vrot.slane %v14308_v17, %v25124_v22  ;;  %v14356_v5 = vcombine.low %v14348_v47, %v14355_v60  ;;  %v14380_v0 = vcombine.low %v14372_v49, %v14379_v46 }
0x16c8   : > { %v14475_v52 = vrot.slane %v20595_v45, %v25124_v22  ;;  %v14339_v16 = vrot.slane %v14332_v62, %v25124_v22  ;;  %v14404_v57 = vcombine.low %v14396_v1, %v14403_v21  ;;  %v14428_v48 = vcombine.low %v14420_v6, %v14427_v9 }
0x16c9   : > { %v14363_v56 = vrot.slane %v14356_v5, %v25124_v22  ;;  %v14387_v44 = vrot.slane %v14380_v0, %v25124_v22  ;;  %v14452_v23 = vcombine.low %v14444_v20, %v14451_v53  ;;  %v25128_v50 = vrot.slane %v24015_v4, %v25124_v22 }
0x16ca   : > { %v25129_v19 = vrot.slane %v24005_v51, %v25124_v22  ;;  %v14411_v47 = vrot.slane %v14404_v57, %v25124_v22  ;;  %v14435_v45 = vrot.slane %v14428_v48, %v25124_v22  ;;  %v14476_v49 = vcombine.low %v14468_v31, %v14475_v52 }
0x16cb   : > { %v14484_v60 = vcombine.low %v14315_v61, %v14339_v16  ;;  %v14459_v21 = vrot.slane %v14452_v23, %v25124_v22  ;;  %v14485_v6 = vcombine.low %v14363_v56, %v14387_v44  ;;  %v25130_v13 = vrot.slane %v24019_v63, %v25124_v22 }
0x16cc   : > { %v14878_v24 = vcombine.low %v25129_v19, %v25128_v50  ;;  %v25131_v4 = vrot.slane %v24007_v10, %v25124_v22  ;;  %v14483_v51 = vrot.slane %v14476_v49, %v25124_v22  ;;  %v14486_v28 = vcombine.low %v14411_v47, %v14435_v45 }
0x16cd   : > { %v14494_v32 = vrot.slane %v14484_v60, %v25124_v22  ;;  %v25132_v1 = vrot.slane %v24023_v34, %v25124_v22  ;;  %v25133_v59 = vrot.slane %v24011_v55, %v25124_v22  ;;  %v14501_v40 = vrot.slane %v14485_v6, %v25124_v22 }
0x16ce   : > { %v14885_v46 = vrot.slane %v14878_v24, %v25124_v22  ;;  %v14902_v14 = vcombine.low %v25131_v4, %v25130_v13  ;;  %v25134_v10 = vrot.slane %v24027_v38, %v25124_v22  ;;  %v25135_v39 = vrot.slane %v24013_v36, %v25124_v22 }
0x16cf   : > { %v14926_v27 = vcombine.low %v25133_v59, %v25132_v1  ;;  %v25136_v20 = vrot.slane %v24055_v15, %v25124_v22  ;;  %v25137_v34 = vrot.slane %v24047_v12, %v25124_v22  ;;  %v14487_v55 = vcombine.low %v14459_v21, %v14483_v51  ;;  %v21798_v59 = vld [vmem:[%s22167_s27 + $0x48] sm:$0xff]  }
0x16d0   : > { %v14909_v63 = vrot.slane %v14902_v14, %v25124_v22  ;;  %v14950_v33 = vcombine.low %v25135_v39, %v25134_v10  ;;  %v14508_v9 = vrot.slane %v14486_v28, %v25124_v22  ;;  %v25138_v62 = vrot.slane %v24059_v54, %v25124_v22  ;;  %v21796_v28 = vld [vmem:[%s22167_s27] sm:$0xff]   ;;  %v21800_v39 = vld [vmem:[%s22167_s27 + $0x8] sm:$0xff]  }
0x16d1   : > { %v14974_v17 = vcombine.low %v25137_v34, %v25136_v20  ;;  %v14933_v31 = vrot.slane %v14926_v27, %v25124_v22  ;;  %v25139_v38 = vrot.slane %v24049_v8, %v25124_v22  ;;  %v14517_v53 = vcombine.high %v14494_v32, %v14501_v40  ;;  %v21799_v27 = vld [vmem:[%s22167_s27 + $0xc8] sm:$0xff]  }
0x16d2   : > { %v14516_v61 = vcombine.low %v14494_v32, %v14501_v40  ;;  %v14957_v15 = vrot.slane %v14950_v33, %v25124_v22  ;;  %v14515_v12 = vrot.slane %v14487_v55, %v25124_v22  ;;  %v25140_v52 = vrot.slane %v24063_v42, %v25124_v22  ;;  %v21797_v32 = vld [vmem:[%s22167_s27 + $0x80] sm:$0xff]   ;;  %v21801_v33 = vld [vmem:[%s22167_s27 + $0x88] sm:$0xff]   ;;  %v21802_v55 = vld [vmem:[%s22167_s27 + $0x50] sm:$0xff]  }
0x16d3   : > { %v14998_v36 = vcombine.low %v25139_v38, %v25138_v62  ;;  %v14981_v5 = vrot.slane %v14974_v17, %v25124_v22  ;;  %v25141_v54 = vrot.slane %v24051_v58, %v25124_v22  ;;  %v25142_v8 = vrot.slane %v24067_v26, %v25124_v22 }
0x16d4   : > { %v25143_v57 = vrot.slane %v24053_v29, %v25124_v22  ;;  %v15054_v56 = vcombine.low %v14885_v46, %v14909_v63  ;;  %v15055_v44 = vcombine.low %v14933_v31, %v14957_v15  ;;  %v14519_v23 = vcombine.high %v14508_v9, %v14515_v12  ;;  %v21806_v15 = vld [vmem:[%s22167_s27 + $0x58] sm:$0xff]  }
0x16d5   : > { %v15005_v0 = vrot.slane %v14998_v36, %v25124_v22  ;;  %v15022_v16 = vcombine.low %v25141_v54, %v25140_v52  ;;  %v14518_v50 = vcombine.low %v14508_v9, %v14515_v12  ;;  %v14533_v42 = vrot.slane %v14517_v53, %v25124_v22  ;;  %v21803_v9 = vld [vmem:[%s22167_s27 + $0xd0] sm:$0xff]   ;;  %v21808_v12 = vld [vmem:[%s22167_s27 + $0x18] sm:$0xff]   ;;  %v21810_v52 = vld [vmem:[%s22167_s27 + $0x60] sm:$0xff]  }
0x16d6   : > { %v15046_v48 = vcombine.low %v25143_v57, %v25142_v8  ;;  %v15064_v47 = vrot.slane %v15054_v56, %v25124_v22  ;;  %v15071_v26 = vrot.slane %v15055_v44, %v25124_v22  ;;  %v14547_v29 = vrot.slane %v14519_v23, %v25124_v22  ;;  %v21804_v53 = vld [vmem:[%s22167_s27 + $0x10] sm:$0xff]   ;;  %v21811_v54 = vld [vmem:[%s22167_s27 + $0xe0] sm:$0xff]   ;;  %v21814_v57 = vld [vmem:[%s22167_s27 + $0x68] sm:$0xff]  }
0x16d7   : > { %v15029_v19 = vrot.slane %v15022_v16, %v25124_v22  ;;  %v15056_v58 = vcombine.low %v14981_v5, %v15005_v0  ;;  %v14526_v45 = vrot.slane %v14516_v61, %v25124_v22  ;;  %v14540_v49 = vrot.slane %v14518_v50, %v25124_v22  ;;  %v21805_v61 = vld [vmem:[%s22167_s27 + $0x90] sm:$0xff]   ;;  %v21807_v5 = vld [vmem:[%s22167_s27 + $0xd8] sm:$0xff]   ;;  %v21812_v16 = vld [vmem:[%s22167_s27 + $0x20] sm:$0xff]  }
0x16d8   : > { %v15053_v24 = vrot.slane %v15046_v48, %v25124_v22  ;;  %v15087_v6 = vcombine.high %v15064_v47, %v15071_v26  ;;  %v15086_v46 = vcombine.low %v15064_v47, %v15071_v26  ;;  %v14550_v13 = vcombine.low %v14533_v42, %v14547_v29  ;;  %v21809_v0 = vld [vmem:[%s22167_s27 + $0x98] sm:$0xff]   ;;  %v21813_v8 = vld [vmem:[%s22167_s27 + $0xa0] sm:$0xff]   ;;  %v21815_v48 = vld [vmem:[%s22167_s27 + $0xe8] sm:$0xff]  }
0x16d9   : > { %v15078_v21 = vrot.slane %v15056_v58, %v25124_v22  ;;  %v14551_v4 = vcombine.high %v14533_v42, %v14547_v29  ;;  %v14548_v14 = vcombine.low %v14526_v45, %v14540_v49  ;;  %v14549_v51 = vcombine.high %v14526_v45, %v14540_v49  ;;  %v21816_v56 = vld [vmem:[%s22167_s27 + $0x28] sm:$0xff]   ;;  %v21818_v23 = vld [vmem:[%s22167_s27 + $0x70] sm:$0xff]   ;;  %v21822_v42 = vld [vmem:[%s22167_s27 + $0x78] sm:$0xff]  }
0x16da   : > { %v15057_v60 = vcombine.low %v15029_v19, %v15053_v24  ;;  %14780 = vmatprep.mubr.bf16.mxu0 %v14550_v13  ;;  %v15103_v10 = vrot.slane %v15087_v6, %v25124_v22  ;;  %v24214_v34 = vrot.slane %v15086_v46, %v25124_v22  ;;  %v21817_v44 = vld [vmem:[%s22167_s27 + $0xa8] sm:$0xff]   ;;  %v21819_v50 = vld [vmem:[%s22167_s27 + $0xf0] sm:$0xff]   ;;  %v21823_v58 = vld [vmem:[%s22167_s27 + $0xf8] sm:$0xff]  }
0x16db   : > { %14821 = vmatprep.mubr.bf16.mxu1 %v14551_v4  ;;  %14781 = vmatmul.mubr.bf16.vlgmr.msra.gmra.mrb[8].mxu0 %v14548_v14  ;;  %v21820_v19 = vld [vmem:[%s22167_s27 + $0x30] sm:$0xff]   ;;  %v15444_v47 = vld [vmem:[%s22157_s17 + $0x20] sm:$0xff]  ;;  %v15445_v29 = vld [vmem:[%s22157_s17 + $0x28] sm:$0xff] }
0x16dc   : > { %v15085_v1 = vrot.slane %v15057_v60, %v25124_v22  ;;  %14822 = vmatmul.mubr.bf16.vlgmr.msra.gmra.mrb[8].mxu1 %v14549_v51  ;;  %21120 = vmatpush3.bf16.msra.mxu0 %v21796_v28  ;;  %v21821_v24 = vld [vmem:[%s22167_s27 + $0xb0] sm:$0xff]   ;;  %v15446_v26 = vld [vmem:[%s22157_s17 + $0x60] sm:$0xff]  ;;  %v15447_v45 = vld [vmem:[%s22157_s17 + $0x68] sm:$0xff] }
0x16dd   : > { %21142 = vmatpush3.bf16.msra.mxu1 %v21797_v32  ;;  %21121 = vmatprep.subr.bf16.mxu0 %v21798_v59  ;;  %v21824_v49 = vld [vmem:[%s22167_s27 + $0x38] sm:$0xff]   ;;  %v20679_v6 = vcombine.high %v15445_v29, %v15447_v45  ;;  %v15448_v46 = vld [vmem:[%s22157_s17 + $0xa0] sm:$0xff]  ;;  %v15449_v4 = vld [vmem:[%s22157_s17 + $0xa8] sm:$0xff]  ;;  %v20676_v51 = vcombine.low %v15444_v47, %v15446_v26  ;;  %v20678_v28 = vcombine.low %v15445_v29, %v15447_v45 }
0x16de   : > { %v15089_v40 = vcombine.high %v15078_v21, %v15085_v1  ;;  %v15088_v63 = vcombine.low %v15078_v21, %v15085_v1  ;;  %21143 = vmatprep.subr.bf16.mxu1 %v21799_v27  ;;  %v21825_v60 = vld [vmem:[%s22167_s27 + $0xb8] sm:$0xff]   ;;  %v20677_v21 = vcombine.high %v15444_v47, %v15446_v26  ;;  %v15450_v13 = vld [vmem:[%s22157_s17 + $0xe0] sm:$0xff]  ;;  %v15451_v14 = vld [vmem:[%s22157_s17 + $0xe8] sm:$0xff] }
0x16df   : > { %v20681_v32 = vcombine.high %v15448_v46, %v15450_v13  ;;  %v20683_v1 = vcombine.high %v15449_v4, %v15451_v14  ;;  %v15452_v59 = vld [vmem:[%s22157_s17 + $0x120] sm:$0xff]  ;;  %v21846_v45 = vld [vmem:[%s22167_s27 + $0x268] sm:$0xff]  }
0x16e0   : > { %v15117_v20 = vrot.slane %v15089_v40, %v25124_v22  ;;  %v24217_v17 = vrot.slane %v15088_v63, %v25124_v22  ;;  %21122 = vmatpush3.bf16.msra.mxu0 %v21800_v39  ;;  %v15454_v27 = vld [vmem:[%s22157_s17 + $0x160] sm:$0xff]  ;;  %v15453_v40 = vld [vmem:[%s22157_s17 + $0x128] sm:$0xff]  ;;  %v20682_v39 = vcombine.low %v15449_v4, %v15451_v14  ;;  %v24305_v4 = vld [vmem:[%s22157_s17 + $0x70] sm:$0xff] }
0x16e1   : > { %21144 = vmatpush3.bf16.msra.mxu1 %v21801_v33  ;;  %21123 = vmatprep.subr.bf16.mxu0 %v21802_v55  ;;  %v15455_v63 = vld [vmem:[%s22157_s17 + $0x168] sm:$0xff]  ;;  %v20685_v33 = vcombine.high %v15452_v59, %v15454_v27  ;;  %v15456_v55 = vld [vmem:[%s22157_s17 + $0x1a0] sm:$0xff]  ;;  %v24308_v14 = vld [vmem:[%s22157_s17 + $0x38] sm:$0xff] }
0x16e2   : > { %v15120_v31 = vcombine.low %v15103_v10, %v15117_v20  ;;  %v15121_v62 = vcombine.high %v15103_v10, %v15117_v20  ;;  %v15118_v38 = vcombine.low %v24214_v34, %v24217_v17  ;;  %v15119_v36 = vcombine.high %v24214_v34, %v24217_v17  ;;  %21145 = vmatprep.subr.bf16.mxu1 %v21803_v9  ;;  %v15458_v9 = vld [vmem:[%s22157_s17 + $0x1e0] sm:$0xff] }
0x16e3   : > { %v20680_v10 = vcombine.low %v15448_v46, %v15450_v13  ;;  %v20687_v20 = vcombine.high %v15453_v40, %v15455_v63  ;;  %v20684_v34 = vcombine.low %v15452_v59, %v15454_v27  ;;  %v20686_v17 = vcombine.low %v15453_v40, %v15455_v63  ;;  %v21843_v47 = vld [vmem:[%s22167_s27 + $0x2e0] sm:$0xff]   ;;  %v21851_v46 = vld [vmem:[%s22167_s27 + $0x2f0] sm:$0xff]   ;;  %v21854_v27 = vld [vmem:[%s22167_s27 + $0x278] sm:$0xff]  }
0x16e4   : > { %15350 = vmatprep.mubr.bf16.mxu0 %v15120_v31  ;;  %15391 = vmatprep.mubr.bf16.mxu1 %v15121_v62  ;;  %v15457_v31 = vld [vmem:[%s22157_s17 + $0x1a8] sm:$0xff]  ;;  %v21844_v26 = vld [vmem:[%s22167_s27 + $0x220] sm:$0xff]   ;;  %v24302_v13 = vld [vmem:[%s22157_s17 + $0x30] sm:$0xff] }
0x16e5   : > { %21124 = vmatpush3.bf16.msra.mxu0 %v21804_v53  ;;  %21146 = vmatpush3.bf16.msra.mxu1 %v21805_v61  ;;  %v15459_v62 = vld [vmem:[%s22157_s17 + $0x1e8] sm:$0xff]  ;;  %v25144_v53 = vmov 0   ;;  %v20688_v61 = vcombine.low %v15456_v55, %v15458_v9  ;;  %v21845_v29 = vld [vmem:[%s22167_s27 + $0x2a0] sm:$0xff]   ;;  %v21855_v40 = vld [vmem:[%s22167_s27 + $0x2f8] sm:$0xff]  }
0x16e6   : > { %21125 = vmatprep.subr.bf16.mxu0 %v21806_v15  ;;  %21147 = vmatprep.subr.bf16.mxu1 %v21807_v5  ;;  %v20690_v15 = vcombine.low %v15457_v31, %v15459_v62  ;;  %v21826_v5 = vld [vmem:[%s22167_s27 + $0x240] sm:$0xff]   ;;  %v21856_v63 = vld [vmem:[%s22167_s27 + $0x238] sm:$0xff]  }
0x16e9   : > { %21126 = vmatpush3.bf16.msra.mxu0 %v21808_v12  ;;  %21148 = vmatpush3.bf16.msra.mxu1 %v21809_v0  ;;  %v21827_v12 = vld [vmem:[%s22167_s27 + $0x2c0] sm:$0xff]  }
0x16ea   : > { %21127 = vmatprep.subr.bf16.mxu0 %v21810_v52  ;;  %21149 = vmatprep.subr.bf16.mxu1 %v21811_v54  ;;  %v21828_v0 = vld [vmem:[%s22167_s27 + $0x200] sm:$0xff]   ;;  %v21830_v54 = vld [vmem:[%s22167_s27 + $0x248] sm:$0xff]  }
0x16eb   : > { %v21829_v52 = vld [vmem:[%s22167_s27 + $0x280] sm:$0xff]  }
0x16ed   : > { %21128 = vmatpush3.bf16.msra.mxu0 %v21812_v16  ;;  %21150 = vmatpush3.bf16.msra.mxu1 %v21813_v8  ;;  %v21831_v16 = vld [vmem:[%s22167_s27 + $0x2c8] sm:$0xff]  }
0x16ee   : > { %21129 = vmatprep.subr.bf16.mxu0 %v21814_v57  ;;  %21151 = vmatprep.subr.bf16.mxu1 %v21815_v48  ;;  %v21832_v8 = vld [vmem:[%s22167_s27 + $0x208] sm:$0xff]   ;;  %v21834_v48 = vld [vmem:[%s22167_s27 + $0x250] sm:$0xff]  }
0x16ef   : > { %v21833_v57 = vld [vmem:[%s22167_s27 + $0x288] sm:$0xff]  }
0x16f1   : > { %21130 = vmatpush3.bf16.msra.mxu0 %v21816_v56  ;;  %21152 = vmatpush3.bf16.msra.mxu1 %v21817_v44  ;;  %v21835_v56 = vld [vmem:[%s22167_s27 + $0x2d0] sm:$0xff]  }
0x16f2   : > { %21131 = vmatprep.subr.bf16.mxu0 %v21818_v23  ;;  %21153 = vmatprep.subr.bf16.mxu1 %v21819_v50  ;;  %v21836_v44 = vld [vmem:[%s22167_s27 + $0x210] sm:$0xff]   ;;  %v21838_v50 = vld [vmem:[%s22167_s27 + $0x258] sm:$0xff]  }
0x16f3   : > { %v21837_v23 = vld [vmem:[%s22167_s27 + $0x290] sm:$0xff]  }
0x16f5   : > { %21132 = vmatpush3.bf16.msra.mxu0 %v21820_v19  ;;  %21154 = vmatpush3.bf16.msra.mxu1 %v21821_v24  ;;  %v21839_v19 = vld [vmem:[%s22167_s27 + $0x2d8] sm:$0xff]  }
0x16f6   : > { %21133 = vmatprep.subr.bf16.mxu0 %v21822_v42  ;;  %21155 = vmatprep.subr.bf16.mxu1 %v21823_v58  ;;  %v21840_v24 = vld [vmem:[%s22167_s27 + $0x218] sm:$0xff]   ;;  %v21842_v58 = vld [vmem:[%s22167_s27 + $0x260] sm:$0xff]  }
0x16f7   : > { %v21841_v42 = vld [vmem:[%s22167_s27 + $0x298] sm:$0xff]  }
0x16f9   : > { %21134 = vmatpush3.bf16.msra.mxu0 %v21824_v49  ;;  %21156 = vmatpush3.bf16.msra.mxu1 %v21825_v60  ;;  %v21847_v49 = vld [vmem:[%s22167_s27 + $0x2e8] sm:$0xff]  }
0x16fa   : > { %15663 = vmatprep.subr.bf16.mxu0 %v20677_v21  ;;  %15706 = vmatprep.subr.bf16.mxu1 %v20679_v6  ;;  %v21848_v60 = vld [vmem:[%s22167_s27 + $0x228] sm:$0xff]   ;;  %v21850_v6 = vld [vmem:[%s22167_s27 + $0x270] sm:$0xff]  }
0x16fb   : > { %v21849_v21 = vld [vmem:[%s22167_s27 + $0x2a8] sm:$0xff]  }
0x16fc   : > { %15351 = vmatmul.mubr.bf16.vlgmr.msra.gmra.mrb[12].mxu0 %v15118_v38  ;;  %15392 = vmatmul.mubr.bf16.vlgmr.msra.gmra.mrb[12].mxu1 %v15119_v36  ;;  %v20689_v38 = vcombine.high %v15456_v55, %v15458_v9  ;;  %v20691_v36 = vcombine.high %v15457_v31, %v15459_v62 }
0x16fd   : > { %15664 = vmatpush1.bf16.msra.mxu0 %v20676_v51  ;;  %15707 = vmatpush1.bf16.msra.mxu1 %v20678_v28  ;;  %v20744_v51 = vcombine.low %v24302_v13, %v24305_v4  ;;  %v24313_v28 = vld [vmem:[%s22157_s17 + $0x78] sm:$0xff] }
0x16fe   : > { %15665 = vmatprep.subr.bf16.mxu0 %v20681_v32  ;;  %15708 = vmatprep.subr.bf16.mxu1 %v20683_v1  ;;  %v21852_v32 = vld [vmem:[%s22167_s27 + $0x230] sm:$0xff]   ;;  %v20746_v59 = vcombine.low %v24308_v14, %v24313_v28 }
0x16ff   : > { %15695 = vmatprep.mubr.bf16.mxu0 %v25144_v53  ;;  %15738 = vmatprep.mubr.bf16.mxu1 %v25144_v53  ;;  %v21853_v1 = vld [vmem:[%s22167_s27 + $0x2b0] sm:$0xff]  }
0x1701   : > { %15666 = vmatpush1.bf16.msra.mxu0 %v20680_v10  ;;  %15709 = vmatpush1.bf16.msra.mxu1 %v20682_v39  ;;  %v21857_v10 = vld [vmem:[%s22167_s27 + $0x2b8] sm:$0xff]   ;;  %v20745_v39 = vcombine.high %v24302_v13, %v24305_v4 }
0x1702   : > { %15667 = vmatprep.subr.bf16.mxu0 %v20685_v33  ;;  %15710 = vmatprep.subr.bf16.mxu1 %v20687_v20  ;;  %v20747_v33 = vcombine.high %v24308_v14, %v24313_v28 }
0x1705   : > { %15668 = vmatpush1.bf16.msra.mxu0 %v20684_v34  ;;  %15711 = vmatpush1.bf16.msra.mxu1 %v20686_v17 }
0x1706   : > { %15669 = vmatprep.subr.bf16.mxu0 %v20689_v38  ;;  %15712 = vmatprep.subr.bf16.mxu1 %v20691_v36 }
0x1709   : > { %15670 = vmatpush1.bf16.msra.mxu0 %v20688_v61  ;;  %15713 = vmatpush1.bf16.msra.mxu1 %v20690_v15 }
0x170a   : > { %21163 = vmatprep.subr.bf16.mxu0 %v21826_v5  ;;  %21185 = vmatprep.subr.bf16.mxu1 %v21827_v12 }
0x170c   : > { %20694 = vmatmul.mubr.msk.bf16.vlgmr.msra.gmra.mrb[16].mxu0 %vm686_vm1, %v23899_v43  ;;  %20695 = vmatmul.mubr.msk.bf16.vlgmr.msra.gmra.mrb[16].mxu1 %vm686_vm1, %v23899_v43 }
0x170d   : > { %21164 = vmatpush3.bf16.msra.mxu0 %v21828_v0  ;;  %21186 = vmatpush3.bf16.msra.mxu1 %v21829_v52  ;;  %v15460_v52 = vld [vmem:[%s22162_s23 + $0x8] sm:$0xf] }
0x170e   : > { %21165 = vmatprep.subr.bf16.mxu0 %v21830_v54  ;;  %21187 = vmatprep.subr.bf16.mxu1 %v21831_v16  ;;  %v15529_v54 = vrot.slane %v15460_v52, %v25125_v25  ;;  %v15533_v16 = vrot.slane %v15460_v52, %v25126_v35 }
0x1711   : > { %21166 = vmatpush3.bf16.msra.mxu0 %v21832_v8  ;;  %21188 = vmatpush3.bf16.msra.mxu1 %v21833_v57  ;;  %v15537_v8 = vrot.slane %v15460_v52, %v25127_v37  ;;  %v15541_v57 = vrot.slane %v15460_v52, %v23770_v2 }
0x1712   : > { %21167 = vmatprep.subr.bf16.mxu0 %v21834_v48  ;;  %21189 = vmatprep.subr.bf16.mxu1 %v21835_v56  ;;  %v15542_v48 = vcombine.low %v15529_v54, %v15533_v16 }
0x1713   : > { %v15543_v56 = vcombine.low %v15537_v8, %v15541_v57 }
0x1715   : > { %21168 = vmatpush3.bf16.msra.mxu0 %v21836_v44  ;;  %21190 = vmatpush3.bf16.msra.mxu1 %v21837_v23 }
0x1716   : > { %21169 = vmatprep.subr.bf16.mxu0 %v21838_v50  ;;  %21191 = vmatprep.subr.bf16.mxu1 %v21839_v19 }
0x1719   : > { %21170 = vmatpush3.bf16.msra.mxu0 %v21840_v24  ;;  %21192 = vmatpush3.bf16.msra.mxu1 %v21841_v42  ;;  %v15550_v24 = vrot.slane %v15542_v48, %v22227_v3  ;;  %v15557_v42 = vrot.slane %v15543_v56, %v22227_v3 }
0x171a   : > { %21171 = vmatprep.subr.bf16.mxu0 %v21842_v58  ;;  %21193 = vmatprep.subr.bf16.mxu1 %v21843_v47 }
0x171d   : > { %21172 = vmatpush3.bf16.msra.mxu0 %v21844_v26  ;;  %21194 = vmatpush3.bf16.msra.mxu1 %v21845_v29 }
0x171e   : > { %21173 = vmatprep.subr.bf16.mxu0 %v21846_v45  ;;  %21195 = vmatprep.subr.bf16.mxu1 %v21847_v49 }
0x1721   : > { %21174 = vmatpush3.bf16.msra.mxu0 %v21848_v60  ;;  %21196 = vmatpush3.bf16.msra.mxu1 %v21849_v21 }
0x1722   : > { %21175 = vmatprep.subr.bf16.mxu0 %v21850_v6  ;;  %21197 = vmatprep.subr.bf16.mxu1 %v21851_v46  ;;  %v20692_v46 = vcombine.low %v15550_v24, %v15550_v24 }
0x1725   : > { %21176 = vmatpush3.bf16.msra.mxu0 %v21852_v32  ;;  %21198 = vmatpush3.bf16.msra.mxu1 %v21853_v1  ;;  %v20693_v32 = vcombine.low %v15557_v42, %v15557_v42 }
0x1726   : > { %21177 = vmatprep.subr.bf16.mxu0 %v21854_v27  ;;  %21199 = vmatprep.subr.bf16.mxu1 %v21855_v40 }
0x1729   : > { %21178 = vmatpush3.bf16.msra.mxu0 %v21856_v63  ;;  %21200 = vmatpush3.bf16.msra.mxu1 %v21857_v10  ;;  %v15647_v63 = vrot.slane %v20692_v46, %v22227_v3  ;;  %v15654_v10 = vrot.slane %v20693_v32, %v22227_v3 }
0x172a   : > { %16894 = vmatprep.subr.bf16.mxu0 %v20745_v39  ;;  %16937 = vmatprep.subr.bf16.mxu1 %v20747_v33 }
0x172b   : > { %v15655_v39 = vcombine.low %v15647_v63, %v15647_v63  ;;  %v15657_v33 = vcombine.low %v15654_v10, %v15654_v10 }
0x17ae   : > { %v21091_v20 = vpop.f32.mrb[8].mxu0 }
0x17af   : > { %v21113_v55 = vpop.f32.mrb[8].mxu1  ;;  %v21092_v9 = vpop.f32.mrb[9].mxu0 }
0x17b0   : > { %v21114_v31 = vpop.f32.mrb[9].mxu1  ;;  %v21093_v62 = vadd.f32 %v21092_v9, %v21091_v20  ;;  %v21094_v17 = vpop.f32.mrb[10].mxu0  ;;  %v15656_v20 = vcombine.high %v15647_v63, %v15647_v63 }
0x17b1   : > { %v21115_v34 = vadd.f32 %v21114_v31, %v21113_v55  ;;  %v21116_v38 = vpop.f32.mrb[10].mxu1  ;;  %v21095_v36 = vpop.f32.mrb[11].mxu0  ;;  %v15658_v55 = vcombine.high %v15654_v10, %v15654_v10 }
0x17b2   : > { %v21117_v61 = vpop.f32.mrb[11].mxu1  ;;  %v21096_v5 = vadd.f32 %v21095_v36, %v21094_v17 }
0x17b3   : > { %v14824_v15 = vadd.f32 %v21115_v34, %v21093_v62  ;;  %v21118_v12 = vadd.f32 %v21117_v61, %v21116_v38 }
0x17b5   : > { %v14827_v0 = vadd.f32 %v21118_v12, %v21096_v5 }
0x17cf   : > { %v21135_v44 = vpop.f32.mrb[12].mxu0  ;;  %v21157_v23 = vpop.f32.mrb[12].mxu1 }
0x17d0   : > { %v21136_v50 = vpop.f32.mrb[13].mxu0  ;;  %v21158_v19 = vpop.f32.mrb[13].mxu1 }
0x17d1   : > { %v21137_v58 = vadd.f32 %v21136_v50, %v21135_v44  ;;  %v21159_v47 = vadd.f32 %v21158_v19, %v21157_v23  ;;  %v21138_v26 = vpop.f32.mrb[14].mxu0  ;;  %v21160_v29 = vpop.f32.mrb[14].mxu1 }
0x17d2   : > { %v21139_v45 = vpop.f32.mrb[15].mxu0  ;;  %v21161_v49 = vpop.f32.mrb[15].mxu1 }
0x17d3   : > { %v15353_v60 = vadd.f32 %v21137_v58, %v14824_v15  ;;  %v21140_v21 = vadd.f32 %v21139_v45, %v21138_v26  ;;  %v21162_v6 = vadd.f32 %v21161_v49, %v21160_v29 }
0x17d5   : > { %v24334_v1 = vadd.f32 %v21159_v47, %v15353_v60  ;;  %v15356_v27 = vadd.f32 %v21140_v21, %v14827_v0 }
0x17d7   : > { %v24336_v40 = vadd.f32 %v21162_v6, %v15356_v27 }
0x17df   : > { %v15697_v9 = vpop.f32.mrb[16].mxu0  ;;  %v15740_v31 = vpop.f32.mrb[16].mxu1 }
0x17e0   : > { %v15698_v62 = vadd.f32 %v15697_v9, %v15655_v39  ;;  %v15741_v34 = vadd.f32 %v15740_v31, %v15657_v33  ;;  %v15699_v17 = vpop.f32.mrb[17].mxu0  ;;  %v15742_v38 = vpop.f32.mrb[17].mxu1 }
0x17e1   : > { %v15700_v36 = vadd.f32 %v15699_v17, %v15656_v20  ;;  %v15743_v61 = vadd.f32 %v15742_v38, %v15658_v55  ;;  %v15701_v15 = vpop.f32.mrb[18].mxu0  ;;  %v15744_v5 = vpop.f32.mrb[18].mxu1 }
0x17e2   : > { %v15702_v12 = vadd.f32 %v15701_v15, %v15655_v39  ;;  %v15745_v0 = vadd.f32 %v15744_v5, %v15657_v33  ;;  %v15703_v52 = vpop.f32.mrb[19].mxu0  ;;  %v15746_v54 = vpop.f32.mrb[19].mxu1 }
0x17e3   : > { %v15757_v16 = vcombine.low %v15698_v62, %v15700_v36  ;;  %v15758_v8 = vcombine.high %v15698_v62, %v15700_v36  ;;  %v15759_v57 = vcombine.low %v15741_v34, %v15743_v61  ;;  %v15760_v48 = vcombine.high %v15741_v34, %v15743_v61 }
0x17e4   : > { %v15704_v56 = vadd.f32 %v15703_v52, %v15656_v20  ;;  %v15747_v44 = vadd.f32 %v15746_v54, %v15658_v55 }
0x17e5   : > { %v15767_v23 = vrot.slane %v15757_v16, %v22227_v3  ;;  %v15774_v50 = vrot.slane %v15758_v8, %v22227_v3  ;;  %v15781_v19 = vrot.slane %v15759_v57, %v22227_v3  ;;  %v15788_v24 = vrot.slane %v15760_v48, %v22227_v3 }
0x17e6   : > { %v15793_v42 = vcombine.low %v15702_v12, %v15704_v56  ;;  %v15794_v58 = vcombine.high %v15702_v12, %v15704_v56  ;;  %v15795_v47 = vcombine.low %v15745_v0, %v15747_v44  ;;  %v15796_v26 = vcombine.high %v15745_v0, %v15747_v44 }
0x17e7   : > { %v15789_v29 = vcombine.low %v15767_v23, %v15781_v19  ;;  %v15790_v45 = vcombine.high %v15767_v23, %v15781_v19  ;;  %v15791_v49 = vcombine.low %v15774_v50, %v15788_v24  ;;  %v15792_v60 = vcombine.high %v15774_v50, %v15788_v24 }
0x17e8   : > { %v15803_v21 = vrot.slane %v15793_v42, %v22227_v3  ;;  %v15810_v6 = vrot.slane %v15794_v58, %v22227_v3  ;;  %v15817_v46 = vrot.slane %v15795_v47, %v22227_v3  ;;  %v15824_v32 = vrot.slane %v15796_v26, %v22227_v3 }
0x17e9   : > { %v15837_v27 = vmax.f32 %v15789_v29, 0.0  ;;  %v15838_v63 = vmax.f32 %v15790_v45, 0.0  ;;  %v15839_v10 = vmax.f32 %v15791_v49, 0.0  ;;  %v15840_v39 = vmax.f32 %v15792_v60, 0.0 }
0x17ea   : > { %v15825_v33 = vcombine.low %v15803_v21, %v15817_v46  ;;  %v15826_v20 = vcombine.high %v15803_v21, %v15817_v46  ;;  %v15827_v55 = vcombine.low %v15810_v6, %v15824_v32  ;;  %v15828_v9 = vcombine.high %v15810_v6, %v15824_v32 }
0x17eb   : > { %v15853_v31 = vcombine.high %v15837_v27, %v15837_v27  ;;  %v15860_v62 = vrot.slane %v15837_v27, %v22227_v3  ;;  %v15870_v34 = vcombine.high %v15838_v63, %v15838_v63  ;;  %v15877_v17 = vrot.slane %v15838_v63, %v22227_v3 }
0x17ec   : > { %v15887_v38 = vcombine.high %v15839_v10, %v15839_v10  ;;  %v15894_v36 = vrot.slane %v15839_v10, %v22227_v3  ;;  %v15904_v61 = vcombine.high %v15840_v39, %v15840_v39  ;;  %v15911_v15 = vrot.slane %v15840_v39, %v22227_v3 }
0x17ed   : > { %v15867_v5 = vrot.slane %v15853_v31, %v22227_v3  ;;  %v15868_v12 = vcombine.high %v15860_v62, %v15860_v62  ;;  %v15884_v0 = vrot.slane %v15870_v34, %v22227_v3  ;;  %v15885_v52 = vcombine.high %v15877_v17, %v15877_v17 }
0x17ee   : > { %v15901_v54 = vrot.slane %v15887_v38, %v22227_v3  ;;  %v15902_v16 = vcombine.high %v15894_v36, %v15894_v36  ;;  %v15918_v8 = vrot.slane %v15904_v61, %v22227_v3  ;;  %v15919_v57 = vcombine.high %v15911_v15, %v15911_v15 }
0x17ef   : > { %v15869_v48 = vcombine.high %v15867_v5, %v15867_v5  ;;  %v15886_v56 = vcombine.high %v15884_v0, %v15884_v0  ;;  %v20696_v44 = vpack.c.bf16 %v15868_v12, %v15860_v62  ;;  %v20698_v23 = vpack.c.bf16 %v15885_v52, %v15877_v17 }
0x17f0   : > { %v15903_v50 = vcombine.high %v15901_v54, %v15901_v54  ;;  %v15920_v19 = vcombine.high %v15918_v8, %v15918_v8  ;;  %v20700_v24 = vpack.c.bf16 %v15902_v16, %v15894_v36  ;;  %v20702_v42 = vpack.c.bf16 %v15919_v57, %v15911_v15 }
0x17f1   : > { %v20697_v58 = vpack.c.bf16 %v15869_v48, %v15867_v5  ;;  %v16093_v47 = vrot.slane %v20696_v44, %v25124_v22  ;;  %v20699_v26 = vpack.c.bf16 %v15886_v56, %v15884_v0  ;;  %v16117_v29 = vrot.slane %v20698_v23, %v25124_v22 }
0x17f2   : > { %v20701_v45 = vpack.c.bf16 %v15903_v50, %v15901_v54  ;;  %v16141_v49 = vrot.slane %v20700_v24, %v25124_v22  ;;  %v20703_v60 = vpack.c.bf16 %v15920_v19, %v15918_v8  ;;  %v16165_v21 = vrot.slane %v20702_v42, %v25124_v22 }
0x17f3   : > { %v16100_v6 = vrot.slane %v20697_v58, %v25124_v22  ;;  %v16124_v46 = vrot.slane %v20699_v26, %v25124_v22  ;;  %v15841_v32 = vmax.f32 %v15825_v33, 0.0  ;;  %v15842_v27 = vmax.f32 %v15826_v20, 0.0 }
0x17f4   : > { %v16148_v63 = vrot.slane %v20701_v45, %v25124_v22  ;;  %v16172_v10 = vrot.slane %v20703_v60, %v25124_v22  ;;  %v15843_v39 = vmax.f32 %v15827_v55, 0.0  ;;  %v15844_v31 = vmax.f32 %v15828_v9, 0.0 }
0x17f5   : > { %v15921_v62 = vcombine.high %v15841_v32, %v15841_v32  ;;  %v15928_v34 = vrot.slane %v15841_v32, %v22227_v3  ;;  %v15938_v17 = vcombine.high %v15842_v27, %v15842_v27  ;;  %v15945_v38 = vrot.slane %v15842_v27, %v22227_v3 }
0x17f6   : > { %v15955_v36 = vcombine.high %v15843_v39, %v15843_v39  ;;  %v15962_v61 = vrot.slane %v15843_v39, %v22227_v3  ;;  %v15972_v15 = vcombine.high %v15844_v31, %v15844_v31  ;;  %v15979_v5 = vrot.slane %v15844_v31, %v22227_v3 }
0x17f7   : > { %v15935_v33 = vrot.slane %v15921_v62, %v22227_v3  ;;  %v15936_v20 = vcombine.high %v15928_v34, %v15928_v34  ;;  %v15952_v12 = vrot.slane %v15938_v17, %v22227_v3  ;;  %v15953_v0 = vcombine.high %v15945_v38, %v15945_v38 }
0x17f8   : > { %v15969_v55 = vrot.slane %v15955_v36, %v22227_v3  ;;  %v15970_v9 = vcombine.high %v15962_v61, %v15962_v61  ;;  %v15986_v52 = vrot.slane %v15972_v15, %v22227_v3  ;;  %v15987_v54 = vcombine.high %v15979_v5, %v15979_v5 }
0x17f9   : > { %v15937_v16 = vcombine.high %v15935_v33, %v15935_v33  ;;  %v15954_v8 = vcombine.high %v15952_v12, %v15952_v12  ;;  %v20704_v57 = vpack.c.bf16 %v15936_v20, %v15928_v34  ;;  %v20706_v48 = vpack.c.bf16 %v15953_v0, %v15945_v38 }
0x17fa   : > { %v15971_v56 = vcombine.high %v15969_v55, %v15969_v55  ;;  %v15988_v44 = vcombine.high %v15986_v52, %v15986_v52  ;;  %v20708_v23 = vpack.c.bf16 %v15970_v9, %v15962_v61  ;;  %v20710_v50 = vpack.c.bf16 %v15987_v54, %v15979_v5 }
0x17fb   : > { %v20705_v19 = vpack.c.bf16 %v15937_v16, %v15935_v33  ;;  %v16189_v24 = vrot.slane %v20704_v57, %v25124_v22  ;;  %v20707_v42 = vpack.c.bf16 %v15954_v8, %v15952_v12  ;;  %v16213_v58 = vrot.slane %v20706_v48, %v25124_v22 }
0x17fc   : > { %v20709_v26 = vpack.c.bf16 %v15971_v56, %v15969_v55  ;;  %v16237_v45 = vrot.slane %v20708_v23, %v25124_v22  ;;  %v20711_v60 = vpack.c.bf16 %v15988_v44, %v15986_v52  ;;  %v16261_v32 = vrot.slane %v20710_v50, %v25124_v22  ;;  %v16679_v44 = vld [vmem:[%s22157_s17 + $0xb0] sm:$0xff] }
0x17fd   : > { %v16196_v27 = vrot.slane %v20705_v19, %v25124_v22  ;;  %v16220_v39 = vrot.slane %v20707_v42, %v25124_v22  ;;  %v16101_v31 = vcombine.low %v16093_v47, %v16100_v6  ;;  %v16125_v62 = vcombine.low %v16117_v29, %v16124_v46  ;;  %v16681_v42 = vld [vmem:[%s22157_s17 + $0xf0] sm:$0xff] }
0x17fe   : > { %v16244_v34 = vrot.slane %v20709_v26, %v25124_v22  ;;  %v16268_v17 = vrot.slane %v20711_v60, %v25124_v22  ;;  %v16149_v38 = vcombine.low %v16141_v49, %v16148_v63  ;;  %v16173_v36 = vcombine.low %v16165_v21, %v16172_v10  ;;  %v16682_v26 = vld [vmem:[%s22157_s17 + $0xf8] sm:$0xff] }
0x17ff   : > { %v16108_v61 = vrot.slane %v16101_v31, %v25124_v22  ;;  %v16132_v15 = vrot.slane %v16125_v62, %v25124_v22  ;;  %v16197_v5 = vcombine.low %v16189_v24, %v16196_v27  ;;  %v16221_v33 = vcombine.low %v16213_v58, %v16220_v39  ;;  %v16680_v58 = vld [vmem:[%s22157_s17 + $0xb8] sm:$0xff]  ;;  %v16683_v62 = vld [vmem:[%s22157_s17 + $0x130] sm:$0xff] }
0x1800   : > { %v16156_v20 = vrot.slane %v16149_v38, %v25124_v22  ;;  %v16180_v12 = vrot.slane %v16173_v36, %v25124_v22  ;;  %v16245_v0 = vcombine.low %v16237_v45, %v16244_v34  ;;  %v16269_v55 = vcombine.low %v16261_v32, %v16268_v17  ;;  %v16685_v34 = vld [vmem:[%s22157_s17 + $0x170] sm:$0xff]  ;;  %v16684_v17 = vld [vmem:[%s22157_s17 + $0x138] sm:$0xff] }
0x1801   : > { %v16204_v47 = vrot.slane %v16197_v5, %v25124_v22  ;;  %v16228_v29 = vrot.slane %v16221_v33, %v25124_v22  ;;  %v16277_v6 = vcombine.low %v16108_v61, %v16132_v15  ;;  %v20749_v39 = vcombine.high %v16679_v44, %v16681_v42  ;;  %v16686_v38 = vld [vmem:[%s22157_s17 + $0x178] sm:$0xff]  ;;  %v16687_v33 = vld [vmem:[%s22157_s17 + $0x1b0] sm:$0xff] }
0x1802   : > { %v16252_v49 = vrot.slane %v16245_v0, %v25124_v22  ;;  %v16276_v21 = vrot.slane %v16269_v55, %v25124_v22  ;;  %v16278_v46 = vcombine.low %v16156_v20, %v16180_v12  ;;  %v20751_v31 = vcombine.high %v16680_v58, %v16682_v26  ;;  %v16689_v20 = vld [vmem:[%s22157_s17 + $0x1f0] sm:$0xff]  ;;  %v16688_v12 = vld [vmem:[%s22157_s17 + $0x1b8] sm:$0xff]  ;;  %v21859_v55 = vld [vmem:[%s22167_s27 + $0x3c0] sm:$0xff]  }
0x1803   : > { %v16279_v63 = vcombine.low %v16204_v47, %v16228_v29  ;;  %v16287_v10 = vrot.slane %v16277_v6, %v25124_v22  ;;  %v20748_v36 = vcombine.low %v16679_v44, %v16681_v42  ;;  %v20750_v61 = vcombine.low %v16680_v58, %v16682_v26  ;;  %v16690_v0 = vld [vmem:[%s22157_s17 + $0x1f8] sm:$0xff]  ;;  %v21860_v47 = vld [vmem:[%s22167_s27 + $0x300] sm:$0xff]   ;;  %v21862_v6 = vld [vmem:[%s22167_s27 + $0x348] sm:$0xff]  }
0x1804   : > { %v16280_v9 = vcombine.low %v16252_v49, %v16276_v21  ;;  %v16294_v52 = vrot.slane %v16278_v46, %v25124_v22  ;;  %v20753_v15 = vcombine.high %v16683_v62, %v16685_v34  ;;  %v20755_v5 = vcombine.high %v16684_v17, %v16686_v38  ;;  %v21861_v29 = vld [vmem:[%s22167_s27 + $0x380] sm:$0xff]   ;;  %v21863_v49 = vld [vmem:[%s22167_s27 + $0x3c8] sm:$0xff]   ;;  %v21882_v42 = vld [vmem:[%s22167_s27 + $0x370] sm:$0xff]  }
0x1805   : > { %v16301_v54 = vrot.slane %v16279_v63, %v25124_v22  ;;  %v20752_v13 = vcombine.low %v16683_v62, %v16685_v34  ;;  %v20754_v4 = vcombine.low %v16684_v17, %v16686_v38  ;;  %v20757_v14 = vcombine.high %v16687_v33, %v16689_v20  ;;  %v21864_v21 = vld [vmem:[%s22167_s27 + $0x308] sm:$0xff]   ;;  %v21867_v63 = vld [vmem:[%s22167_s27 + $0x3d0] sm:$0xff]   ;;  %v21877_v44 = vld [vmem:[%s22167_s27 + $0x3a0] sm:$0xff]  }
0x1806   : > { %v16308_v16 = vrot.slane %v16280_v9, %v25124_v22  ;;  %v16310_v8 = vcombine.high %v16287_v10, %v16294_v52  ;;  %v16309_v57 = vcombine.low %v16287_v10, %v16294_v52  ;;  %v20756_v28 = vcombine.low %v16687_v33, %v16689_v20  ;;  %v21865_v46 = vld [vmem:[%s22167_s27 + $0x388] sm:$0xff]   ;;  %v21868_v10 = vld [vmem:[%s22167_s27 + $0x310] sm:$0xff]   ;;  %v21870_v52 = vld [vmem:[%s22167_s27 + $0x358] sm:$0xff]  }
0x1807   : > { %v21869_v9 = vld [vmem:[%s22167_s27 + $0x390] sm:$0xff]  }
0x1808   : > { %v16312_v48 = vcombine.high %v16301_v54, %v16308_v16  ;;  %v16311_v56 = vcombine.low %v16301_v54, %v16308_v16  ;;  %v16326_v23 = vrot.slane %v16310_v8, %v25124_v22  ;;  %v16319_v19 = vrot.slane %v16309_v57, %v25124_v22  ;;  %v21871_v54 = vld [vmem:[%s22167_s27 + $0x3d8] sm:$0xff]   ;;  %v21874_v57 = vld [vmem:[%s22167_s27 + $0x360] sm:$0xff]   ;;  %v21883_v58 = vld [vmem:[%s22167_s27 + $0x3f0] sm:$0xff]  }
0x1809   : > { %v21872_v16 = vld [vmem:[%s22167_s27 + $0x318] sm:$0xff]   ;;  %v21884_v26 = vld [vmem:[%s22167_s27 + $0x330] sm:$0xff]  }
0x180a   : > { %v16340_v50 = vrot.slane %v16312_v48, %v25124_v22  ;;  %v16333_v24 = vrot.slane %v16311_v56, %v25124_v22  ;;  %v21873_v8 = vld [vmem:[%s22167_s27 + $0x398] sm:$0xff]   ;;  %v21875_v48 = vld [vmem:[%s22167_s27 + $0x3e0] sm:$0xff]  }
0x180b   : > { %v21876_v56 = vld [vmem:[%s22167_s27 + $0x320] sm:$0xff]  }
0x180c   : > { %v16343_v45 = vcombine.low %v16326_v23, %v16340_v50  ;;  %v16344_v60 = vcombine.high %v16326_v23, %v16340_v50  ;;  %v16341_v32 = vcombine.low %v16319_v19, %v16333_v24  ;;  %v16342_v27 = vcombine.high %v16319_v19, %v16333_v24  ;;  %v21878_v23 = vld [vmem:[%s22167_s27 + $0x368] sm:$0xff]  }
0x180d   : > { %v21879_v50 = vld [vmem:[%s22167_s27 + $0x3e8] sm:$0xff]  }
0x180e   : > { %16573 = vmatprep.mubr.bf16.mxu0 %v16343_v45  ;;  %16614 = vmatprep.mubr.bf16.mxu1 %v16344_v60  ;;  %v21880_v19 = vld [vmem:[%s22167_s27 + $0x328] sm:$0xff]   ;;  %v21885_v45 = vld [vmem:[%s22167_s27 + $0x3b0] sm:$0xff]   ;;  %v21886_v60 = vld [vmem:[%s22167_s27 + $0x378] sm:$0xff]  }
0x180f   : > { %16574 = vmatmul.mubr.bf16.vlgmr.msra.gmra.mrb[20].mxu0 %v16341_v32  ;;  %16615 = vmatmul.mubr.bf16.vlgmr.msra.gmra.mrb[20].mxu1 %v16342_v27  ;;  %v21881_v24 = vld [vmem:[%s22167_s27 + $0x3a8] sm:$0xff]   ;;  %v21887_v32 = vld [vmem:[%s22167_s27 + $0x3f8] sm:$0xff]  }
0x1810   : > { %16895 = vmatpush1.bf16.msra.mxu0 %v20744_v51  ;;  %16938 = vmatpush1.bf16.msra.mxu1 %v20746_v59  ;;  %v20759_v51 = vcombine.high %v16688_v12, %v16690_v0  ;;  %v20758_v59 = vcombine.low %v16688_v12, %v16690_v0  ;;  %v21888_v27 = vld [vmem:[%s22167_s27 + $0x338] sm:$0xff]  }
0x1811   : > { %16896 = vmatprep.subr.bf16.mxu0 %v20749_v39  ;;  %16939 = vmatprep.subr.bf16.mxu1 %v20751_v31  ;;  %v21889_v39 = vld [vmem:[%s22167_s27 + $0x3b8] sm:$0xff]   ;;  %v16691_v31 = vld [vmem:[%s22162_s23 + $0xc] sm:$0xf] }
0x1812   : > { %16926 = vmatprep.mubr.bf16.mxu0 %v25144_v53  ;;  %16969 = vmatprep.mubr.bf16.mxu1 %v25144_v53  ;;  %v21858_v53 = vld [vmem:[%s22167_s27 + $0x340] sm:$0xff]   ;;  %v16760_v62 = vrot.slane %v16691_v31, %v25125_v25  ;;  %v16764_v34 = vrot.slane %v16691_v31, %v25126_v35  ;;  %v16768_v17 = vrot.slane %v16691_v31, %v25127_v37 }
0x1813   : > { %v16772_v38 = vrot.slane %v16691_v31, %v23770_v2  ;;  %v15409_v37 = vrot.slane %v24334_v1, %v22227_v3 }
0x1814   : > { %16897 = vmatpush1.bf16.msra.mxu0 %v20748_v36  ;;  %16940 = vmatpush1.bf16.msra.mxu1 %v20750_v61  ;;  %v16773_v36 = vcombine.low %v16760_v62, %v16764_v34 }
0x1815   : > { %16898 = vmatprep.subr.bf16.mxu0 %v20753_v15  ;;  %16941 = vmatprep.subr.bf16.mxu1 %v20755_v5  ;;  %v16774_v61 = vcombine.low %v16768_v17, %v16772_v38  ;;  %v15402_v15 = vcombine.high %v24334_v1, %v24334_v1  ;;  %v15417_v1 = vcombine.high %v15409_v37, %v15409_v37 }
0x1816   : > { %v16781_v0 = vrot.slane %v16773_v36, %v22227_v3 }
0x1818   : > { %16899 = vmatpush1.bf16.msra.mxu0 %v20752_v13  ;;  %16942 = vmatpush1.bf16.msra.mxu1 %v20754_v4  ;;  %v16788_v13 = vrot.slane %v16774_v61, %v22227_v3 }
0x1819   : > { %16900 = vmatprep.subr.bf16.mxu0 %v20757_v14  ;;  %16943 = vmatprep.subr.bf16.mxu1 %v20759_v51 }
0x181c   : > { %16901 = vmatpush1.bf16.msra.mxu0 %v20756_v28  ;;  %16944 = vmatpush1.bf16.msra.mxu1 %v20758_v59  ;;  %v15416_v28 = vrot.slane %v15402_v15, %v22227_v3  ;;  %v15419_v59 = vcombine.high %v24336_v40, %v24336_v40 }
0x181d   : > { %21207 = vmatprep.subr.bf16.mxu0 %v21858_v53  ;;  %21229 = vmatprep.subr.bf16.mxu1 %v21859_v55 }
0x181f   : > { %20762 = vmatmul.mubr.msk.bf16.vlgmr.msra.gmra.mrb[24].mxu0 %vm686_vm1, %v23899_v43  ;;  %20763 = vmatmul.mubr.msk.bf16.vlgmr.msra.gmra.mrb[24].mxu1 %vm686_vm1, %v23899_v43  ;;  %v21866_v43 = vld [vmem:[%s22167_s27 + $0x350] sm:$0xff]  }
0x1820   : > { %21208 = vmatpush3.bf16.msra.mxu0 %v21860_v47  ;;  %21230 = vmatpush3.bf16.msra.mxu1 %v21861_v29 }
0x1821   : > { %21209 = vmatprep.subr.bf16.mxu0 %v21862_v6  ;;  %21231 = vmatprep.subr.bf16.mxu1 %v21863_v49  ;;  %v15426_v49 = vrot.slane %v24336_v40, %v22227_v3 }
0x1824   : > { %21210 = vmatpush3.bf16.msra.mxu0 %v21864_v21  ;;  %21232 = vmatpush3.bf16.msra.mxu1 %v21865_v46  ;;  %v20760_v21 = vcombine.low %v16781_v0, %v16781_v0  ;;  %v20761_v46 = vcombine.low %v16788_v13, %v16788_v13 }
0x1825   : > { %21211 = vmatprep.subr.bf16.mxu0 %v21866_v43  ;;  %21233 = vmatprep.subr.bf16.mxu1 %v21867_v63 }
0x1826   : > { %v16885_v40 = vrot.slane %v20761_v46, %v22227_v3 }
0x1828   : > { %21212 = vmatpush3.bf16.msra.mxu0 %v21868_v10  ;;  %21234 = vmatpush3.bf16.msra.mxu1 %v21869_v9  ;;  %v15418_v9 = vcombine.high %v15416_v28, %v15416_v28  ;;  %v16888_v31 = vcombine.low %v16885_v40, %v16885_v40  ;;  %v16889_v34 = vcombine.high %v16885_v40, %v16885_v40 }
0x1829   : > { %21213 = vmatprep.subr.bf16.mxu0 %v21870_v52  ;;  %21235 = vmatprep.subr.bf16.mxu1 %v21871_v54  ;;  %v15433_v52 = vrot.slane %v15419_v59, %v22227_v3 }
0x182c   : > { %21214 = vmatpush3.bf16.msra.mxu0 %v21872_v16  ;;  %21236 = vmatpush3.bf16.msra.mxu1 %v21873_v8 }
0x182d   : > { %21215 = vmatprep.subr.bf16.mxu0 %v21874_v57  ;;  %21237 = vmatprep.subr.bf16.mxu1 %v21875_v48  ;;  %v15434_v48 = vcombine.high %v15426_v49, %v15426_v49 }
0x1830   : > { %21216 = vmatpush3.bf16.msra.mxu0 %v21876_v56  ;;  %21238 = vmatpush3.bf16.msra.mxu1 %v21877_v44  ;;  %v16878_v56 = vrot.slane %v20760_v21, %v22227_v3 }
0x1831   : > { %21217 = vmatprep.subr.bf16.mxu0 %v21878_v23  ;;  %21239 = vmatprep.subr.bf16.mxu1 %v21879_v50 }
0x1832   : > { %v16887_v62 = vcombine.high %v16878_v56, %v16878_v56 }
0x1834   : > { %21218 = vmatpush3.bf16.msra.mxu0 %v21880_v19  ;;  %21240 = vmatpush3.bf16.msra.mxu1 %v21881_v24 }
0x1835   : > { %21219 = vmatprep.subr.bf16.mxu0 %v21882_v42  ;;  %21241 = vmatprep.subr.bf16.mxu1 %v21883_v58  ;;  %v15435_v42 = vcombine.high %v15433_v52, %v15433_v52 }
0x1838   : > { %21220 = vmatpush3.bf16.msra.mxu0 %v21884_v26  ;;  %21242 = vmatpush3.bf16.msra.mxu1 %v21885_v45 }
0x1839   : > { %21221 = vmatprep.subr.bf16.mxu0 %v21886_v60  ;;  %21243 = vmatprep.subr.bf16.mxu1 %v21887_v32 }
0x183c   : > { %21222 = vmatpush3.bf16.msra.mxu0 %v21888_v27  ;;  %21244 = vmatpush3.bf16.msra.mxu1 %v21889_v39  ;;  %v16886_v39 = vcombine.low %v16878_v56, %v16878_v56 }
0x18e2   : > { %v21179_v5 = vpop.f32.mrb[20].mxu0  ;;  %v21201_v33 = vpop.f32.mrb[20].mxu1 }
0x18e3   : > { %v21180_v20 = vpop.f32.mrb[21].mxu0  ;;  %v21202_v12 = vpop.f32.mrb[21].mxu1 }
0x18e4   : > { %v21181_v4 = vadd.f32 %v21180_v20, %v21179_v5  ;;  %v21203_v14 = vadd.f32 %v21202_v12, %v21201_v33  ;;  %v21182_v35 = vpop.f32.mrb[22].mxu0  ;;  %v21204_v51 = vpop.f32.mrb[22].mxu1 }
0x18e5   : > { %v21183_v53 = vpop.f32.mrb[23].mxu0  ;;  %v21205_v55 = vpop.f32.mrb[23].mxu1 }
0x18e6   : > { %v16617_v47 = vadd.f32 %v21203_v14, %v21181_v4  ;;  %v21184_v29 = vadd.f32 %v21183_v53, %v21182_v35  ;;  %v21206_v6 = vadd.f32 %v21205_v55, %v21204_v51 }
0x18e8   : > { %v16625_v43 = vcombine.high %v16617_v47, %v16617_v47  ;;  %v16632_v63 = vrot.slane %v16617_v47, %v22227_v3  ;;  %v16620_v10 = vadd.f32 %v21206_v6, %v21184_v29 }
0x18ea   : > { %v16639_v54 = vrot.slane %v16625_v43, %v22227_v3  ;;  %v16640_v16 = vcombine.high %v16632_v63, %v16632_v63  ;;  %v16642_v8 = vcombine.high %v16620_v10, %v16620_v10  ;;  %v16649_v57 = vrot.slane %v16620_v10, %v22227_v3 }
0x18eb   : > { %v24474_v44 = vadd.f32 %v16632_v63, %v15409_v37 }
0x18ec   : > { %v16641_v23 = vcombine.high %v16639_v54, %v16639_v54  ;;  %v16656_v50 = vrot.slane %v16642_v8, %v22227_v3  ;;  %v16657_v19 = vcombine.high %v16649_v57, %v16649_v57  ;;  %v24477_v24 = vadd.f32 %v16649_v57, %v15426_v49 }
0x18ed   : > { %v24479_v58 = vadd.f32 %v16639_v54, %v15416_v28  ;;  %v24481_v26 = vadd.f32 %v16640_v16, %v15417_v1 }
0x18ee   : > { %v16658_v45 = vcombine.high %v16656_v50, %v16656_v50  ;;  %v24483_v60 = vadd.f32 %v16641_v23, %v15418_v9  ;;  %v24485_v32 = vadd.f32 %v16657_v19, %v15434_v48  ;;  %v24487_v27 = vadd.f32 %v16656_v50, %v15433_v52 }
0x18f0   : > { %v24489_v17 = vadd.f32 %v16658_v45, %v15435_v42 }
0x18f2   : > { %v16928_v38 = vpop.f32.mrb[24].mxu0  ;;  %v16971_v36 = vpop.f32.mrb[24].mxu1 }
0x18f3   : > { %v16929_v61 = vadd.f32 %v16928_v38, %v16886_v39  ;;  %v16972_v15 = vadd.f32 %v16971_v36, %v16888_v31  ;;  %v16930_v5 = vpop.f32.mrb[25].mxu0  ;;  %v16973_v33 = vpop.f32.mrb[25].mxu1 }
0x18f4   : > { %v16931_v20 = vadd.f32 %v16930_v5, %v16887_v62  ;;  %v16974_v12 = vadd.f32 %v16973_v33, %v16889_v34  ;;  %v16932_v0 = vpop.f32.mrb[26].mxu0  ;;  %v16975_v13 = vpop.f32.mrb[26].mxu1 }
0x18f5   : > { %v16933_v4 = vadd.f32 %v16932_v0, %v16886_v39  ;;  %v16976_v14 = vadd.f32 %v16975_v13, %v16888_v31  ;;  %v16934_v35 = vpop.f32.mrb[27].mxu0  ;;  %v16977_v51 = vpop.f32.mrb[27].mxu1 }
0x18f6   : > { %v16988_v37 = vcombine.low %v16929_v61, %v16931_v20  ;;  %v16989_v28 = vcombine.high %v16929_v61, %v16931_v20  ;;  %v16990_v59 = vcombine.low %v16972_v15, %v16974_v12  ;;  %v16991_v53 = vcombine.high %v16972_v15, %v16974_v12 }
0x18f7   : > { %v16935_v55 = vadd.f32 %v16934_v35, %v16887_v62  ;;  %v16978_v47 = vadd.f32 %v16977_v51, %v16889_v34 }
0x18f8   : > { %v16998_v29 = vrot.slane %v16988_v37, %v22227_v3  ;;  %v17005_v6 = vrot.slane %v16989_v28, %v22227_v3  ;;  %v17012_v49 = vrot.slane %v16990_v59, %v22227_v3  ;;  %v17019_v21 = vrot.slane %v16991_v53, %v22227_v3 }
0x18f9   : > { %v17024_v46 = vcombine.low %v16933_v4, %v16935_v55  ;;  %v17025_v43 = vcombine.high %v16933_v4, %v16935_v55  ;;  %v17026_v63 = vcombine.low %v16976_v14, %v16978_v47  ;;  %v17027_v10 = vcombine.high %v16976_v14, %v16978_v47 }
0x18fa   : > { %v17020_v1 = vcombine.low %v16998_v29, %v17012_v49  ;;  %v17021_v9 = vcombine.high %v16998_v29, %v17012_v49  ;;  %v17022_v52 = vcombine.low %v17005_v6, %v17019_v21  ;;  %v17023_v54 = vcombine.high %v17005_v6, %v17019_v21 }
0x18fb   : > { %v17034_v16 = vrot.slane %v17024_v46, %v22227_v3  ;;  %v17041_v8 = vrot.slane %v17025_v43, %v22227_v3  ;;  %v17048_v57 = vrot.slane %v17026_v63, %v22227_v3  ;;  %v17055_v48 = vrot.slane %v17027_v10, %v22227_v3 }
0x18fc   : > { %v17068_v56 = vmax.f32 %v17020_v1, 0.0  ;;  %v17069_v40 = vmax.f32 %v17021_v9, 0.0  ;;  %v17070_v23 = vmax.f32 %v17022_v52, 0.0  ;;  %v17071_v50 = vmax.f32 %v17023_v54, 0.0 }
0x18fd   : > { %v17056_v19 = vcombine.low %v17034_v16, %v17048_v57  ;;  %v17057_v42 = vcombine.high %v17034_v16, %v17048_v57  ;;  %v17058_v45 = vcombine.low %v17041_v8, %v17055_v48  ;;  %v17059_v39 = vcombine.high %v17041_v8, %v17055_v48 }
0x18fe   : > { %v17084_v31 = vcombine.high %v17068_v56, %v17068_v56  ;;  %v17091_v62 = vrot.slane %v17068_v56, %v22227_v3  ;;  %v17101_v34 = vcombine.high %v17069_v40, %v17069_v40  ;;  %v17108_v38 = vrot.slane %v17069_v40, %v22227_v3 }
0x18ff   : > { %v17118_v36 = vcombine.high %v17070_v23, %v17070_v23  ;;  %v17125_v61 = vrot.slane %v17070_v23, %v22227_v3  ;;  %v17135_v15 = vcombine.high %v17071_v50, %v17071_v50  ;;  %v17142_v5 = vrot.slane %v17071_v50, %v22227_v3 }
0x1900   : > { %v17098_v33 = vrot.slane %v17084_v31, %v22227_v3  ;;  %v17099_v20 = vcombine.high %v17091_v62, %v17091_v62  ;;  %v17115_v12 = vrot.slane %v17101_v34, %v22227_v3  ;;  %v17116_v0 = vcombine.high %v17108_v38, %v17108_v38 }
0x1901   : > { %v17132_v13 = vrot.slane %v17118_v36, %v22227_v3  ;;  %v17133_v4 = vcombine.high %v17125_v61, %v17125_v61  ;;  %v17149_v14 = vrot.slane %v17135_v15, %v22227_v3  ;;  %v17150_v35 = vcombine.high %v17142_v5, %v17142_v5 }
0x1902   : > { %v17100_v51 = vcombine.high %v17098_v33, %v17098_v33  ;;  %v17117_v37 = vcombine.high %v17115_v12, %v17115_v12  ;;  %v20764_v28 = vpack.c.bf16 %v17099_v20, %v17091_v62  ;;  %v20766_v59 = vpack.c.bf16 %v17116_v0, %v17108_v38 }
0x1903   : > { %v17134_v53 = vcombine.high %v17132_v13, %v17132_v13  ;;  %v17151_v55 = vcombine.high %v17149_v14, %v17149_v14  ;;  %v20768_v47 = vpack.c.bf16 %v17133_v4, %v17125_v61  ;;  %v20770_v29 = vpack.c.bf16 %v17150_v35, %v17142_v5 }
0x1904   : > { %v20765_v6 = vpack.c.bf16 %v17100_v51, %v17098_v33  ;;  %v17324_v49 = vrot.slane %v20764_v28, %v25124_v22  ;;  %v20767_v21 = vpack.c.bf16 %v17117_v37, %v17115_v12  ;;  %v17348_v46 = vrot.slane %v20766_v59, %v25124_v22 }
0x1905   : > { %v20769_v43 = vpack.c.bf16 %v17134_v53, %v17132_v13  ;;  %v17372_v63 = vrot.slane %v20768_v47, %v25124_v22  ;;  %v20771_v10 = vpack.c.bf16 %v17151_v55, %v17149_v14  ;;  %v17396_v1 = vrot.slane %v20770_v29, %v25124_v22 }
0x1906   : > { %v17331_v9 = vrot.slane %v20765_v6, %v25124_v22  ;;  %v17355_v52 = vrot.slane %v20767_v21, %v25124_v22  ;;  %v17072_v54 = vmax.f32 %v17056_v19, 0.0  ;;  %v17073_v16 = vmax.f32 %v17057_v42, 0.0 }
0x1907   : > { %v17379_v8 = vrot.slane %v20769_v43, %v25124_v22  ;;  %v17403_v57 = vrot.slane %v20771_v10, %v25124_v22  ;;  %v17074_v48 = vmax.f32 %v17058_v45, 0.0  ;;  %v17075_v56 = vmax.f32 %v17059_v39, 0.0 }
0x1908   : > { %v17152_v40 = vcombine.high %v17072_v54, %v17072_v54  ;;  %v17159_v23 = vrot.slane %v17072_v54, %v22227_v3  ;;  %v17169_v50 = vcombine.high %v17073_v16, %v17073_v16  ;;  %v17176_v31 = vrot.slane %v17073_v16, %v22227_v3 }
0x1909   : > { %v17186_v62 = vcombine.high %v17074_v48, %v17074_v48  ;;  %v17193_v34 = vrot.slane %v17074_v48, %v22227_v3  ;;  %v17203_v38 = vcombine.high %v17075_v56, %v17075_v56  ;;  %v17210_v36 = vrot.slane %v17075_v56, %v22227_v3 }
0x190a   : > { %v17166_v19 = vrot.slane %v17152_v40, %v22227_v3  ;;  %v17167_v42 = vcombine.high %v17159_v23, %v17159_v23  ;;  %v17183_v61 = vrot.slane %v17169_v50, %v22227_v3  ;;  %v17184_v15 = vcombine.high %v17176_v31, %v17176_v31 }
0x190b   : > { %v17200_v45 = vrot.slane %v17186_v62, %v22227_v3  ;;  %v17201_v39 = vcombine.high %v17193_v34, %v17193_v34  ;;  %v17217_v5 = vrot.slane %v17203_v38, %v22227_v3  ;;  %v17218_v33 = vcombine.high %v17210_v36, %v17210_v36 }
0x190c   : > { %v17168_v20 = vcombine.high %v17166_v19, %v17166_v19  ;;  %v17185_v12 = vcombine.high %v17183_v61, %v17183_v61  ;;  %v20772_v0 = vpack.c.bf16 %v17167_v42, %v17159_v23  ;;  %v20774_v13 = vpack.c.bf16 %v17184_v15, %v17176_v31 }
0x190d   : > { %v17202_v4 = vcombine.high %v17200_v45, %v17200_v45  ;;  %v17219_v14 = vcombine.high %v17217_v5, %v17217_v5  ;;  %v20776_v35 = vpack.c.bf16 %v17201_v39, %v17193_v34  ;;  %v20778_v51 = vpack.c.bf16 %v17218_v33, %v17210_v36 }
0x190e   : > { %v20773_v37 = vpack.c.bf16 %v17168_v20, %v17166_v19  ;;  %v17420_v28 = vrot.slane %v20772_v0, %v25124_v22  ;;  %v20775_v59 = vpack.c.bf16 %v17185_v12, %v17183_v61  ;;  %v17444_v53 = vrot.slane %v20774_v13, %v25124_v22 }
0x190f   : > { %v20777_v55 = vpack.c.bf16 %v17202_v4, %v17200_v45  ;;  %v17468_v47 = vrot.slane %v20776_v35, %v25124_v22  ;;  %v20779_v29 = vpack.c.bf16 %v17219_v14, %v17217_v5  ;;  %v17492_v6 = vrot.slane %v20778_v51, %v25124_v22 }
0x1910   : > { %v17427_v21 = vrot.slane %v20773_v37, %v25124_v22  ;;  %v17451_v43 = vrot.slane %v20775_v59, %v25124_v22  ;;  %v17332_v10 = vcombine.low %v17324_v49, %v17331_v9  ;;  %v17356_v54 = vcombine.low %v17348_v46, %v17355_v52 }
0x1911   : > { %v17475_v16 = vrot.slane %v20777_v55, %v25124_v22  ;;  %v17499_v48 = vrot.slane %v20779_v29, %v25124_v22  ;;  %v17380_v56 = vcombine.low %v17372_v63, %v17379_v8  ;;  %v17404_v40 = vcombine.low %v17396_v1, %v17403_v57 }
0x1912   : > { %v17339_v23 = vrot.slane %v17332_v10, %v25124_v22  ;;  %v17363_v50 = vrot.slane %v17356_v54, %v25124_v22  ;;  %v17428_v31 = vcombine.low %v17420_v28, %v17427_v21  ;;  %v17452_v62 = vcombine.low %v17444_v53, %v17451_v43  ;;  %v25145_v54 = vld [vmem:[#allocation5_spill] sm:$0xff] }
0x1913   : > { %v17387_v34 = vrot.slane %v17380_v56, %v25124_v22  ;;  %v17411_v38 = vrot.slane %v17404_v40, %v25124_v22  ;;  %v17476_v36 = vcombine.low %v17468_v47, %v17475_v16  ;;  %v17500_v19 = vcombine.low %v17492_v6, %v17499_v48 }
0x1914   : > { %v17435_v49 = vrot.slane %v17428_v31, %v25124_v22  ;;  %v17459_v46 = vrot.slane %v17452_v62, %v25124_v22  ;;  %v17508_v9 = vcombine.low %v17339_v23, %v17363_v50  ;;  %v25146_v31 = vld [vmem:[#allocation7_spill] sm:$0xff] }
0x1915   : > { %v17483_v63 = vrot.slane %v17476_v36, %v25124_v22  ;;  %v17507_v1 = vrot.slane %v17500_v19, %v25124_v22  ;;  %v17509_v52 = vcombine.low %v17387_v34, %v17411_v38 }
0x1916   : > { %v17510_v8 = vcombine.low %v17435_v49, %v17459_v46  ;;  %v17518_v57 = vrot.slane %v17508_v9, %v25124_v22 }
0x1917   : > { %v17511_v42 = vcombine.low %v17483_v63, %v17507_v1  ;;  %v17525_v61 = vrot.slane %v17509_v52, %v25124_v22 }
0x1918   : > { %v17532_v15 = vrot.slane %v17510_v8, %v25124_v22 }
0x1919   : > { %v17539_v45 = vrot.slane %v17511_v42, %v25124_v22  ;;  %v17541_v39 = vcombine.high %v17518_v57, %v17525_v61  ;;  %v17540_v5 = vcombine.low %v17518_v57, %v17525_v61 }
0x191b   : > { %v17543_v33 = vcombine.high %v17532_v15, %v17539_v45  ;;  %v17542_v20 = vcombine.low %v17532_v15, %v17539_v45  ;;  %v17557_v12 = vrot.slane %v17541_v39, %v25124_v22  ;;  %v17550_v13 = vrot.slane %v17540_v5, %v25124_v22 }
0x191d   : > { %v17571_v0 = vrot.slane %v17543_v33, %v25124_v22  ;;  %v17564_v4 = vrot.slane %v17542_v20, %v25124_v22  ;;  %v17908_v22 = vsub.s32 6, %v25145_v54 }
0x191f   : > { %v17574_v14 = vcombine.low %v17557_v12, %v17571_v0  ;;  %v17575_v35 = vcombine.high %v17557_v12, %v17571_v0  ;;  %v17572_v51 = vcombine.low %v17550_v13, %v17564_v4  ;;  %v17573_v37 = vcombine.high %v17550_v13, %v17564_v4  ;;  %v25147_v13 = vld [vmem:[#allocation10_spill] sm:$0xff] }
0x1920   : > { %v17909_v62 = vrot.slane %v25146_v31, %v17908_v22 }
0x1921   : > { %17804 = vmatprep.mubr.bf16.mxu0 %v17574_v14  ;;  %17845 = vmatprep.mubr.bf16.mxu1 %v17575_v35  ;;  %v25148_v14 = vld [vmem:[#allocation14_spill] sm:$0xff] }
0x1922   : > { %17805 = vmatmul.mubr.bf16.vlgmr.msra.gmra.mrb[28].mxu0 %v17572_v51  ;;  %17846 = vmatmul.mubr.bf16.vlgmr.msra.gmra.mrb[28].mxu1 %v17573_v37 }
0x19f5   : > { %v21223_v28 = vpop.f32.mrb[28].mxu0  ;;  %v21245_v59 = vpop.f32.mrb[28].mxu1 }
0x19f6   : > { %v21224_v53 = vpop.f32.mrb[29].mxu0  ;;  %v21246_v55 = vpop.f32.mrb[29].mxu1 }
0x19f7   : > { %v21225_v47 = vadd.f32 %v21224_v53, %v21223_v28  ;;  %v21247_v29 = vadd.f32 %v21246_v55, %v21245_v59  ;;  %v21226_v6 = vpop.f32.mrb[30].mxu0  ;;  %v21248_v21 = vpop.f32.mrb[30].mxu1 }
0x19f8   : > { %v21227_v43 = vpop.f32.mrb[31].mxu0  ;;  %v21249_v10 = vpop.f32.mrb[31].mxu1 }
0x19f9   : > { %v17848_v16 = vadd.f32 %v21247_v29, %v21225_v47  ;;  %v21228_v48 = vadd.f32 %v21227_v43, %v21226_v6  ;;  %v21250_v56 = vadd.f32 %v21249_v10, %v21248_v21 }
0x19fb   : > { %v17856_v40 = vcombine.high %v17848_v16, %v17848_v16  ;;  %v17863_v23 = vrot.slane %v17848_v16, %v22227_v3  ;;  %v17851_v50 = vadd.f32 %v21250_v56, %v21228_v48 }
0x19fd   : > { %v17870_v34 = vrot.slane %v17856_v40, %v22227_v3  ;;  %v17871_v38 = vcombine.high %v17863_v23, %v17863_v23  ;;  %v17873_v36 = vcombine.high %v17851_v50, %v17851_v50  ;;  %v17880_v19 = vrot.slane %v17851_v50, %v22227_v3 }
0x19fe   : > { %v17898_v49 = vadd.f32 %v17863_v23, %v24474_v44 }
0x19ff   : > { %v17887_v46 = vrot.slane %v17873_v36, %v22227_v3  ;;  %v17888_v9 = vcombine.high %v17880_v19, %v17880_v19  ;;  %v17900_v63 = vadd.f32 %v17870_v34, %v24479_v58  ;;  %v17899_v1 = vadd.f32 %v17871_v38, %v24481_v26 }
0x1a00   : > { %v17910_v52 = vadd.f32 %v17909_v62, %v17898_v49  ;;  %v17872_v8 = vcombine.high %v17870_v34, %v17870_v34  ;;  %v17902_v57 = vadd.f32 %v17880_v19, %v24477_v24 }
0x1a01   : > { %v17912_v42 = vadd.f32 %v17909_v62, %v17900_v63  ;;  %v17911_v61 = vadd.f32 %v17909_v62, %v17899_v1  ;;  %v17903_v15 = vadd.f32 %v17888_v9, %v24485_v32  ;;  %v17904_v45 = vadd.f32 %v17887_v46, %v24487_v27 }
0x1a02   : > { %v17918_v39 = vadd.f32 %v17910_v52, %v23836_v7  ;;  %v17901_v44 = vadd.f32 %v17872_v8, %v24483_v60  ;;  %v17889_v3 = vcombine.high %v17887_v46, %v17887_v46  ;;  %v17914_v58 = vadd.f32 %v17909_v62, %v17902_v57 }
0x1a03   : > { %v17920_v5 = vadd.f32 %v17912_v42, %v23841_v30  ;;  %v17919_v33 = vadd.f32 %v17911_v61, %v23839_v11  ;;  %v17915_v12 = vadd.f32 %v17909_v62, %v17903_v15  ;;  %v17916_v30 = vadd.f32 %v17909_v62, %v17904_v45 }
0x1a04   : > { %v17926_v26 = vsel %vm12840_vm7, %v17918_v39, 0.0  ;;  %v17913_v20 = vadd.f32 %v17909_v62, %v17901_v44  ;;  %v17905_v24 = vadd.f32 %v17889_v3, %v24489_v17  ;;  %v17922_v27 = vadd.f32 %v17914_v58, %v23845_v18 }
0x1a05   : > { %17927 = vadd.xlane.f32.xlu0 %v17926_v26  ;;  %v17932_v32 = vsel %vm12840_vm7, %v17920_v5, 0.0  ;;  %v17929_v60 = vsel %vm12840_vm7, %v17919_v33, 0.0  ;;  %v17923_v11 = vadd.f32 %v17915_v12, %v25147_v13  ;;  %v17924_v35 = vadd.f32 %v17916_v30, %v25148_v14 }
0x1a06   : > { %17933 = vadd.xlane.f32.xlu1 %v17932_v32  ;;  %v17921_v7 = vadd.f32 %v17913_v20, %v23848_v41  ;;  %v17917_v4 = vadd.f32 %v17909_v62, %v17905_v24  ;;  %v17938_v17 = vsel %vm12840_vm7, %v17922_v27, 0.0  ;;  %v25149_v41 = vld [vmem:[#allocation9_spill] sm:$0xff]  ;;  %v18032_v14 = vsub.s32 7, %v25145_v54 }
0x1a07   : > { %v17941_v51 = vsel %vm12840_vm7, %v17923_v11, 0.0  ;;  %v17944_v18 = vsel %vm12840_vm7, %v17924_v35, 0.0 }
0x1a08   : > { %v17935_v0 = vsel %vm12840_vm7, %v17921_v7, 0.0  ;;  %v17925_v37 = vadd.f32 %v17917_v4, %v25149_v41 }
0x1a09   : > { %17930 = vadd.xlane.f32.xlu0 %v17929_v60 }
0x1a0a   : > { %17936 = vadd.xlane.f32.xlu1 %v17935_v0  ;;  %v17947_v28 = vsel %vm12840_vm7, %v17925_v37, 0.0 }
0x1a0d   : > { %17939 = vadd.xlane.f32.xlu0 %v17938_v17 }
0x1a0e   : > { %17942 = vadd.xlane.f32.xlu1 %v17941_v51 }
0x1a11   : > { %17945 = vadd.xlane.f32.xlu0 %v17944_v18 }
0x1a12   : > { %17948 = vadd.xlane.f32.xlu1 %v17947_v28 }
0x1a92   : > { %v17928_v59 = vpop.xlane.xlu0 %17927 }
0x1a93   : > { %v17950_v53 = vmul.f32 0.015625, %v17928_v59  ;;  %v17934_v55 = vpop.xlane.xlu1 %17933  ;;  %v18033_v59 = vrot.slane %v25146_v31, %v18032_v14 }
0x1a94   : > { %v17952_v47 = vmul.f32 0.015625, %v17934_v55 }
0x1a95   : > { %v24577_v29 = vsub.f32 %v17918_v39, %v17950_v53 }
0x1a96   : > { %v24579_v6 = vsub.f32 %v17920_v5, %v17952_v47  ;;  %v17931_v21 = vpop.xlane.xlu0 %17930 }
0x1a97   : > { %v17951_v43 = vmul.f32 0.015625, %v17931_v21  ;;  %v17937_v10 = vpop.xlane.xlu1 %17936  ;;  %v17966_v22 = vmul.f32 %v24577_v29, %v24577_v29  ;;  %v25150_v21 = vld [vmem:[#allocation4_spill] sm:$0xff] }
0x1a98   : > { %v17953_v16 = vmul.f32 0.015625, %v17937_v10  ;;  %v17968_v40 = vmul.f32 %v24579_v6, %v24579_v6 }
0x1a99   : > { %v24583_v48 = vsub.f32 %v17919_v33, %v17951_v43  ;;  %v17974_v56 = vsel %vm12840_vm7, %v17966_v22, 0.0  ;;  %v18045_v43 = vrot.slane %v25150_v21, %v25125_v25 }
0x1a9a   : > { %v24588_v23 = vsub.f32 %v17921_v7, %v17953_v16  ;;  %17975 = vadd.xlane.f32.xlu0 %v17974_v56  ;;  %v17940_v50 = vpop.xlane.xlu0 %17939  ;;  %v17980_v49 = vsel %vm12840_vm7, %v17968_v40, 0.0 }
0x1a9b   : > { %v17954_v62 = vmul.f32 0.015625, %v17940_v50  ;;  %v17943_v34 = vpop.xlane.xlu1 %17942  ;;  %v17967_v38 = vmul.f32 %v24583_v48, %v24583_v48 }
0x1a9c   : > { %v17955_v36 = vmul.f32 0.015625, %v17943_v34  ;;  %v17969_v9 = vmul.f32 %v24588_v23, %v24588_v23 }
0x1a9d   : > { %v24592_v19 = vsub.f32 %v17922_v27, %v17954_v62  ;;  %v17977_v46 = vsel %vm12840_vm7, %v17967_v38, 0.0 }
0x1a9e   : > { %v24598_v63 = vsub.f32 %v17923_v11, %v17955_v36  ;;  %v17946_v1 = vpop.xlane.xlu0 %17945  ;;  %17981 = vadd.xlane.f32.xlu0 %v17980_v49  ;;  %17978 = vadd.xlane.f32.xlu1 %v17977_v46  ;;  %v17983_v45 = vsel %vm12840_vm7, %v17969_v9, 0.0 }
0x1a9f   : > { %v17956_v52 = vmul.f32 0.015625, %v17946_v1  ;;  %v17949_v8 = vpop.xlane.xlu1 %17948  ;;  %v17970_v57 = vmul.f32 %v24592_v19, %v24592_v19 }
0x1aa0   : > { %v17957_v42 = vmul.f32 0.015625, %v17949_v8  ;;  %v17971_v39 = vmul.f32 %v24598_v63, %v24598_v63 }
0x1aa1   : > { %v24602_v61 = vsub.f32 %v17924_v35, %v17956_v52  ;;  %v17986_v15 = vsel %vm12840_vm7, %v17970_v57, 0.0 }
0x1aa2   : > { %v24608_v44 = vsub.f32 %v17925_v37, %v17957_v42  ;;  %17987 = vadd.xlane.f32.xlu0 %v17986_v15  ;;  %17984 = vadd.xlane.f32.xlu1 %v17983_v45  ;;  %v17989_v58 = vsel %vm12840_vm7, %v17971_v39, 0.0 }
0x1aa3   : > { %v17972_v3 = vmul.f32 %v24602_v61, %v24602_v61 }
0x1aa4   : > { %v17973_v26 = vmul.f32 %v24608_v44, %v24608_v44 }
0x1aa5   : > { %v17992_v5 = vsel %vm12840_vm7, %v17972_v3, 0.0 }
0x1aa6   : > { %17993 = vadd.xlane.f32.xlu0 %v17992_v5  ;;  %17990 = vadd.xlane.f32.xlu1 %v17989_v58  ;;  %v17995_v33 = vsel %vm12840_vm7, %v17973_v26, 0.0 }
0x1aaa   : > { %17996 = vadd.xlane.f32.xlu1 %v17995_v33 }
0x1b27   : > { %v17976_v20 = vpop.xlane.xlu0 %17975 }
0x1b28   : > { %v17998_v24 = vmul.f32 0.015625, %v17976_v20 }
0x1b2a   : > { %v18006_v32 = vadd.f32 1e-05, %v17998_v24 }
0x1b2b   : > { %v17982_v12 = vpop.xlane.xlu0 %17981  ;;  %v17979_v7 = vpop.xlane.xlu1 %17978 }
0x1b2c   : > { %21890 = vrsqrt.f32 %v18006_v32  ;;  %v18000_v60 = vmul.f32 0.015625, %v17982_v12  ;;  %v17999_v27 = vmul.f32 0.015625, %v17979_v7 }
0x1b2e   : > { %v18008_v30 = vadd.f32 1e-05, %v18000_v60  ;;  %v18007_v0 = vadd.f32 1e-05, %v17999_v27 }
0x1b2f   : > { %v17988_v13 = vpop.xlane.xlu0 %17987  ;;  %v17985_v11 = vpop.xlane.xlu1 %17984 }
0x1b30   : > { %21892 = vrsqrt.f32 %v18008_v30  ;;  %v18002_v4 = vmul.f32 0.015625, %v17988_v13  ;;  %v18001_v17 = vmul.f32 0.015625, %v17985_v11 }
0x1b31   : > { %21894 = vrsqrt.f32 %v18007_v0 }
0x1b32   : > { %v18010_v35 = vadd.f32 1e-05, %v18002_v4  ;;  %v18009_v51 = vadd.f32 1e-05, %v18001_v17 }
0x1b33   : > { %v17994_v41 = vpop.xlane.xlu0 %17993  ;;  %v17991_v37 = vpop.xlane.xlu1 %17990 }
0x1b34   : > { %21896 = vrsqrt.f32 %v18010_v35  ;;  %v18004_v18 = vmul.f32 0.015625, %v17994_v41  ;;  %v18003_v28 = vmul.f32 0.015625, %v17991_v37 }
0x1b35   : > { %21898 = vrsqrt.f32 %v18009_v51 }
0x1b36   : > { %v21891_v53 = vpop.eup %21890  ;;  %v18012_v55 = vadd.f32 1e-05, %v18004_v18  ;;  %v18011_v47 = vadd.f32 1e-05, %v18003_v28 }
0x1b37   : > { %v18022_v10 = vmul.f32 %v21891_v53, %v24577_v29  ;;  %v17997_v54 = vpop.xlane.xlu1 %17996 }
0x1b38   : > { %21900 = vrsqrt.f32 %v18012_v55  ;;  %v18005_v22 = vmul.f32 0.015625, %v17997_v54 }
0x1b39   : > { %v18034_v16 = vmul.f32 %v18033_v59, %v18022_v10  ;;  %21902 = vrsqrt.f32 %v18011_v47 }
0x1b3a   : > { %v21893_v56 = vpop.eup %21892  ;;  %v18013_v40 = vadd.f32 1e-05, %v18005_v22 }
0x1b3b   : > { %v21895_v50 = vpop.eup %21894  ;;  %v18046_v62 = vadd.f32 %v18045_v43, %v18034_v16  ;;  %v18024_v31 = vmul.f32 %v21893_v56, %v24579_v6 }
0x1b3c   : > { %v18023_v34 = vmul.f32 %v21895_v50, %v24583_v48  ;;  %21904 = vrsqrt.f32 %v18013_v40 }
0x1b3d   : > { %18054 = vst.msk [vmem:[#allocation2] sm:$0x3] %vm12840_vm7, %v18046_v62  ;;  %v18036_v38 = vmul.f32 %v18033_v59, %v18024_v31 }
0x1b3e   : > { %v21897_v25 = vpop.eup %21896  ;;  %v18035_v36 = vmul.f32 %v18033_v59, %v18023_v34 }
0x1b3f   : > { %v21899_v29 = vpop.eup %21898  ;;  %v18048_v49 = vadd.f32 %v18045_v43, %v18036_v38  ;;  %v18026_v46 = vmul.f32 %v21897_v25, %v24592_v19 }
0x1b40   : > { %v18047_v9 = vadd.f32 %v18045_v43, %v18035_v36  ;;  %v18025_v1 = vmul.f32 %v21899_v29, %v24588_v23 }
0x1b41   : > { %18056 = vst.msk [vmem:[#allocation2 + $0x4] sm:$0x3] %vm12840_vm7, %v18048_v49  ;;  %v18038_v52 = vmul.f32 %v18033_v59, %v18026_v46 }
0x1b42   : > { %v21901_v8 = vpop.eup %21900  ;;  %18055 = vst.msk [vmem:[#allocation2 + $0x2] sm:$0x3] %vm12840_vm7, %v18047_v9  ;;  %v18037_v6 = vmul.f32 %v18033_v59, %v18025_v1 }
0x1b43   : > { %v21903_v48 = vpop.eup %21902  ;;  %v18050_v57 = vadd.f32 %v18045_v43, %v18038_v52  ;;  %v18028_v42 = vmul.f32 %v21901_v8, %v24602_v61 }
0x1b44   : > { %v18049_v15 = vadd.f32 %v18045_v43, %v18037_v6  ;;  %v18027_v45 = vmul.f32 %v21903_v48, %v24598_v63 }
0x1b45   : > { %18058 = vst.msk [vmem:[#allocation2 + $0x8] sm:$0x3] %vm12840_vm7, %v18050_v57  ;;  %v18040_v19 = vmul.f32 %v18033_v59, %v18028_v42 }
0x1b46   : > { %v21905_v39 = vpop.eup %21904  ;;  %18057 = vst.msk [vmem:[#allocation2 + $0x6] sm:$0x3] %vm12840_vm7, %v18049_v15  ;;  %v18039_v23 = vmul.f32 %v18033_v59, %v18027_v45 }
0x1b47   : > { %v18052_v3 = vadd.f32 %v18045_v43, %v18040_v19  ;;  %v18029_v5 = vmul.f32 %v21905_v39, %v24608_v44 }
0x1b48   : > { %v18051_v58 = vadd.f32 %v18045_v43, %v18039_v23 }
0x1b49   : > { %18060 = vst.msk [vmem:[#allocation2 + $0xc] sm:$0x3] %vm12840_vm7, %v18052_v3  ;;  %v18041_v26 = vmul.f32 %v18033_v59, %v18029_v5 }
0x1b4a   : > { %18059 = vst.msk [vmem:[#allocation2 + $0xa] sm:$0x3] %vm12840_vm7, %v18051_v58 }
0x1b4b   : > { %v18053_v61 = vadd.f32 %v18045_v43, %v18041_v26 }
0x1b4d   : > { %18061 = vst.msk [vmem:[#allocation2 + $0xe] sm:$0x3] %vm12840_vm7, %v18053_v61 }
0x1b4e PF: > { %p20812_p6 = scmp.ne.s32.totalorder %s22133_s20, 1 }
0x1b4f   : > { %v18067_v63 = vld [vmem:[%s22157_s17] sm:$0xff] (!%p20812_p6)  ;;  %v18068_v33 = vld [vmem:[%s22157_s17 + $0x8] sm:$0xff] (!%p20812_p6)  ;;  %v22060_v60 = vmov (!%p20812_p6), 0   ;;  %v18342_v54 = vld [vmem:[%s22157_s17 + $0x10] sm:$0xff] (!%p20812_p6)  ;;  %vm22062_vm8 = vmmov (!%p20812_p6), 0   ;;  %vm20365_vm9 = vcmask (!%p20812_p6), 1024  }
0x1b50   : > { %18065 = sbr.rel (%p20812_p6) target bundleno = 8502 (0x2136), region = 76  ;;  %v18069_v44 = vld [vmem:[%s22157_s17 + $0x40] sm:$0xff] (!%p20812_p6)  ;;  %v18070_v24 = vld [vmem:[%s22157_s17 + $0x48] sm:$0xff] (!%p20812_p6)  ;;  %18284 = vmatprep.mubr.bf16.mxu0 (!%p20812_p6), %v22060_v60  ;;  %18325 = vmatprep.mubr.bf16.mxu1 (!%p20812_p6), %v22060_v60  ;;  %v18344_v16 = vld [vmem:[%s22157_s17 + $0x50] sm:$0xff] (!%p20812_p6) }
0x1b51   : > { %v20814_v20 = vcombine.high (!%p20812_p6), %v18067_v63, %v18069_v44  ;;  %v20813_v32 = vcombine.low (!%p20812_p6), %v18067_v63, %v18069_v44  ;;  %v18071_v12 = vld [vmem:[%s22157_s17 + $0x80] sm:$0xff] (!%p20812_p6)  ;;  %v20816_v27 = vcombine.high (!%p20812_p6), %v18068_v33, %v18070_v24  ;;  %v20815_v30 = vcombine.low (!%p20812_p6), %v18068_v33, %v18070_v24  ;;  %v18072_v13 = vld [vmem:[%s22157_s17 + $0x88] sm:$0xff] (!%p20812_p6)  ;;  %v18343_v56 = vld [vmem:[%s22157_s17 + $0x18] sm:$0xff] (!%p20812_p6) }
0x1b52   : > { %v18073_v7 = vld [vmem:[%s22157_s17 + $0xc0] sm:$0xff] (!%p20812_p6)  ;;  %v18074_v11 = vld [vmem:[%s22157_s17 + $0xc8] sm:$0xff] (!%p20812_p6)  ;;  %v18345_v40 = vld [vmem:[%s22157_s17 + $0x58] sm:$0xff] (!%p20812_p6)  ;;  %v20832_v34 = vcombine.high (!%p20812_p6), %v18342_v54, %v18344_v16  ;;  %v20831_v9 = vcombine.low (!%p20812_p6), %v18342_v54, %v18344_v16 }
0x1b53   : > { %v20818_v0 = vcombine.high (!%p20812_p6), %v18071_v12, %v18073_v7  ;;  %v18075_v4 = vld [vmem:[%s22157_s17 + $0x100] sm:$0xff] (!%p20812_p6)  ;;  %18252 = vmatprep.subr.bf16.mxu0 (!%p20812_p6), %v20814_v20  ;;  %v20820_v17 = vcombine.high (!%p20812_p6), %v18072_v13, %v18074_v11  ;;  %v18076_v35 = vld [vmem:[%s22157_s17 + $0x108] sm:$0xff] (!%p20812_p6)  ;;  %18293 = vmatprep.subr.bf16.mxu1 (!%p20812_p6), %v20816_v27  ;;  %v20817_v41 = vcombine.low (!%p20812_p6), %v18071_v12, %v18073_v7  ;;  %v18346_v62 = vld [vmem:[%s22157_s17 + $0x90] sm:$0xff] (!%p20812_p6) }
0x1b54   : > { %v18077_v14 = vld [vmem:[%s22157_s17 + $0x140] sm:$0xff] (!%p20812_p6)  ;;  %v18078_v51 = vld [vmem:[%s22157_s17 + $0x148] sm:$0xff] (!%p20812_p6)  ;;  %18253 = vmatpush1.bf16.msra.mxu0 (!%p20812_p6), %v20813_v32  ;;  %18294 = vmatpush1.bf16.msra.mxu1 (!%p20812_p6), %v20815_v30  ;;  %v20819_v37 = vcombine.low (!%p20812_p6), %v18072_v13, %v18074_v11  ;;  %v18348_v38 = vld [vmem:[%s22157_s17 + $0xd0] sm:$0xff] (!%p20812_p6)  ;;  %v20834_v25 = vcombine.high (!%p20812_p6), %v18343_v56, %v18345_v40  ;;  %v20833_v52 = vcombine.low (!%p20812_p6), %v18343_v56, %v18345_v40 }
0x1b55   : > { %18254 = vmatprep.subr.bf16.mxu0 (!%p20812_p6), %v20818_v0  ;;  %v20822_v18 = vcombine.high (!%p20812_p6), %v18075_v4, %v18077_v14  ;;  %18295 = vmatprep.subr.bf16.mxu1 (!%p20812_p6), %v20820_v17  ;;  %v20824_v28 = vcombine.high (!%p20812_p6), %v18076_v35, %v18078_v51  ;;  %v18079_v59 = vld [vmem:[%s22157_s17 + $0x180] sm:$0xff] (!%p20812_p6)  ;;  %v18080_v55 = vld [vmem:[%s22157_s17 + $0x188] sm:$0xff] (!%p20812_p6)  ;;  %v20821_v21 = vcombine.low (!%p20812_p6), %v18075_v4, %v18077_v14  ;;  %v18347_v36 = vld [vmem:[%s22157_s17 + $0x98] sm:$0xff] (!%p20812_p6) }
0x1b56   : > { %v18081_v53 = vld [vmem:[%s22157_s17 + $0x1c0] sm:$0xff] (!%p20812_p6)  ;;  %v18082_v47 = vld [vmem:[%s22157_s17 + $0x1c8] sm:$0xff] (!%p20812_p6)  ;;  %v20823_v43 = vcombine.low (!%p20812_p6), %v18076_v35, %v18078_v51  ;;  %v18349_v46 = vld [vmem:[%s22157_s17 + $0xd8] sm:$0xff] (!%p20812_p6)  ;;  %v20836_v8 = vcombine.high (!%p20812_p6), %v18346_v62, %v18348_v38  ;;  %v20835_v15 = vcombine.low (!%p20812_p6), %v18346_v62, %v18348_v38 }
0x1b57   : > { %v20826_v10 = vcombine.high %v18079_v59, %v18081_v53  ;;  %v20828_v22 = vcombine.high %v18080_v55, %v18082_v47  ;;  %v20825_v50 = vcombine.low %v18079_v59, %v18081_v53  ;;  %v20827_v31 = vcombine.low %v18080_v55, %v18082_v47  ;;  %v25151_v29 = vld [vmem:[#allocation9_spill] sm:$0xff]  ;;  %v18350_v1 = vld [vmem:[%s22157_s17 + $0x110] sm:$0xff]  ;;  %v21910_v27 = vld [vmem:[%s22167_s27 + $0x148] sm:$0xff]  }
0x1b58   : > { %18255 = vmatpush1.bf16.msra.mxu0 %v20817_v41  ;;  %18296 = vmatpush1.bf16.msra.mxu1 %v20819_v37  ;;  %v24665_v49 = vpack.c.bf16 %v25151_v29, %v25151_v29  ;;  %v18352_v6 = vld [vmem:[%s22157_s17 + $0x150] sm:$0xff]  ;;  %v20838_v48 = vcombine.high %v18347_v36, %v18349_v46  ;;  %v18351_v57 = vld [vmem:[%s22157_s17 + $0x118] sm:$0xff]  ;;  %v20837_v39 = vcombine.low %v18347_v36, %v18349_v46  ;;  %v21906_v33 = vld [vmem:[%s22167_s27 + $0x140] sm:$0xff]  }
0x1b59   : > { %18256 = vmatprep.subr.bf16.mxu0 %v20822_v18  ;;  %18297 = vmatprep.subr.bf16.mxu1 %v20824_v28  ;;  %v18353_v42 = vld [vmem:[%s22157_s17 + $0x158] sm:$0xff]  ;;  %v18354_v45 = vld [vmem:[%s22157_s17 + $0x190] sm:$0xff]  ;;  %v20840_v23 = vcombine.high %v18350_v1, %v18352_v6  ;;  %v20839_v26 = vcombine.low %v18350_v1, %v18352_v6  ;;  %v21907_v24 = vld [vmem:[%s22167_s27 + $0x1c0] sm:$0xff]  }
0x1b5a   : > { %v18356_v19 = vld [vmem:[%s22157_s17 + $0x1d0] sm:$0xff]  ;;  %v18355_v3 = vld [vmem:[%s22157_s17 + $0x198] sm:$0xff]  ;;  %v20842_v58 = vcombine.high %v18351_v57, %v18353_v42  ;;  %v20841_v61 = vcombine.low %v18351_v57, %v18353_v42  ;;  %v21908_v12 = vld [vmem:[%s22167_s27 + $0x100] sm:$0xff]  }
0x1b5b   : > { %v18357_v5 = vld [vmem:[%s22157_s17 + $0x1d8] sm:$0xff]  ;;  %v20844_v63 = vcombine.high %v18354_v45, %v18356_v19  ;;  %v20843_v20 = vcombine.low %v18354_v45, %v18356_v19  ;;  %v21909_v7 = vld [vmem:[%s22167_s27 + $0x180] sm:$0xff]   ;;  %v21911_v30 = vld [vmem:[%s22167_s27 + $0x1c8] sm:$0xff]  }
0x1b5c   : > { %18257 = vmatpush1.bf16.msra.mxu0 %v20821_v21  ;;  %18298 = vmatpush1.bf16.msra.mxu1 %v20823_v43  ;;  %v20846_v44 = vcombine.high %v18355_v3, %v18357_v5  ;;  %v20845_v32 = vcombine.low %v18355_v3, %v18357_v5  ;;  %v21912_v0 = vld [vmem:[%s22167_s27 + $0x108] sm:$0xff]   ;;  %v21914_v11 = vld [vmem:[%s22167_s27 + $0x150] sm:$0xff]   ;;  %v21918_v35 = vld [vmem:[%s22167_s27 + $0x158] sm:$0xff]  }
0x1b5d   : > { %18258 = vmatprep.subr.bf16.mxu0 %v20826_v10  ;;  %18299 = vmatprep.subr.bf16.mxu1 %v20828_v22  ;;  %v21913_v13 = vld [vmem:[%s22167_s27 + $0x188] sm:$0xff]   ;;  %v21915_v4 = vld [vmem:[%s22167_s27 + $0x1d0] sm:$0xff]   ;;  %v21919_v51 = vld [vmem:[%s22167_s27 + $0x1d8] sm:$0xff]  }
0x1b5e   : > { %v21916_v17 = vld [vmem:[%s22167_s27 + $0x110] sm:$0xff]   ;;  %v21920_v41 = vld [vmem:[%s22167_s27 + $0x118] sm:$0xff]   ;;  %v21922_v18 = vld [vmem:[%s22167_s27 + $0x160] sm:$0xff]  }
0x1b5f   : > { %v21917_v14 = vld [vmem:[%s22167_s27 + $0x190] sm:$0xff]   ;;  %v21921_v37 = vld [vmem:[%s22167_s27 + $0x198] sm:$0xff]   ;;  %v21923_v28 = vld [vmem:[%s22167_s27 + $0x1e0] sm:$0xff]  }
0x1b60   : > { %18259 = vmatpush1.bf16.msra.mxu0 %v20825_v50  ;;  %18300 = vmatpush1.bf16.msra.mxu1 %v20827_v31  ;;  %v21924_v59 = vld [vmem:[%s22167_s27 + $0x120] sm:$0xff]   ;;  %v21926_v55 = vld [vmem:[%s22167_s27 + $0x168] sm:$0xff]   ;;  %v21930_v10 = vld [vmem:[%s22167_s27 + $0x170] sm:$0xff]  }
0x1b61   : > { %18524 = vmatprep.subr.bf16.mxu0 %v20832_v34  ;;  %18565 = vmatprep.subr.bf16.mxu1 %v20834_v25  ;;  %v21925_v53 = vld [vmem:[%s22167_s27 + $0x1a0] sm:$0xff]   ;;  %v21927_v47 = vld [vmem:[%s22167_s27 + $0x1e8] sm:$0xff]   ;;  %v21931_v54 = vld [vmem:[%s22167_s27 + $0x1f0] sm:$0xff]  }
0x1b62   : > { %v21928_v21 = vld [vmem:[%s22167_s27 + $0x128] sm:$0xff]   ;;  %v21932_v22 = vld [vmem:[%s22167_s27 + $0x130] sm:$0xff]   ;;  %v21934_v56 = vld [vmem:[%s22167_s27 + $0x178] sm:$0xff]  }
0x1b63   : > { %20829 = vmatmul.mubr.msk.bf16.vlgmr.msra.gmra.mrb[0].mxu0 %vm686_vm1, %v24665_v49  ;;  %20830 = vmatmul.mubr.msk.bf16.vlgmr.msra.gmra.mrb[0].mxu1 %vm686_vm1, %v24665_v49  ;;  %v21929_v43 = vld [vmem:[%s22167_s27 + $0x1a8] sm:$0xff]   ;;  %v21933_v16 = vld [vmem:[%s22167_s27 + $0x1b0] sm:$0xff]   ;;  %v21935_v40 = vld [vmem:[%s22167_s27 + $0x1f8] sm:$0xff]  }
0x1b64   : > { %18525 = vmatpush1.bf16.msra.mxu0 %v20831_v9  ;;  %18566 = vmatpush1.bf16.msra.mxu1 %v20833_v52  ;;  %v21936_v50 = vld [vmem:[%s22167_s27 + $0x138] sm:$0xff]   ;;  %v21938_v31 = vld [vmem:[%s22167_s27 + $0x40] sm:$0xff]  }
0x1b65   : > { %18526 = vmatprep.subr.bf16.mxu0 %v20836_v8  ;;  %18567 = vmatprep.subr.bf16.mxu1 %v20838_v48  ;;  %v21937_v62 = vld [vmem:[%s22167_s27 + $0x1b8] sm:$0xff]   ;;  %v21939_v34 = vld [vmem:[%s22167_s27 + $0xc0] sm:$0xff]  }
0x1b66   : > { %18556 = vmatprep.mubr.bf16.mxu0 %v22060_v60  ;;  %18597 = vmatprep.mubr.bf16.mxu1 %v22060_v60  ;;  %v24725_v6 = vld [vmem:[%s22162_s23] sm:$0xf]  ;;  %v18358_v48 = vld [vmem:[%s22162_s23 + $0x4] sm:$0xf]  ;;  %v25152_v57 = vld [vmem:[#allocation8_spill] sm:$0xff] }
0x1b67   : > { %v18156_v42 = vrot.slane %v24725_v6, %v25152_v57  ;;  %v18164_v19 = vrot.slane %v24725_v6, %v23770_v2  ;;  %v18431_v3 = vrot.slane %v18358_v48, %v25152_v57  ;;  %v18439_v5 = vrot.slane %v18358_v48, %v23770_v2 }
0x1b68   : > { %18527 = vmatpush1.bf16.msra.mxu0 %v20835_v15  ;;  %18568 = vmatpush1.bf16.msra.mxu1 %v20837_v39  ;;  %v25153_v15 = vld [vmem:[#allocation18_spill] sm:$0xff]  ;;  %v25154_v39 = vld [vmem:[#allocation17_spill] sm:$0xff] }
0x1b69   : > { %18528 = vmatprep.subr.bf16.mxu0 %v20840_v23  ;;  %18569 = vmatprep.subr.bf16.mxu1 %v20842_v58  ;;  %v18427_v45 = vrot.slane %v18358_v48, %v25153_v15  ;;  %v18435_v23 = vrot.slane %v18358_v48, %v25154_v39  ;;  %v18152_v48 = vrot.slane %v24725_v6, %v25153_v15 }
0x1b6c   : > { %18529 = vmatpush1.bf16.msra.mxu0 %v20839_v26  ;;  %18570 = vmatpush1.bf16.msra.mxu1 %v20841_v61 }
0x1b6d   : > { %18530 = vmatprep.subr.bf16.mxu0 %v20844_v63  ;;  %18571 = vmatprep.subr.bf16.mxu1 %v20846_v44 }
0x1b70   : > { %18531 = vmatpush1.bf16.msra.mxu0 %v20843_v20  ;;  %18572 = vmatpush1.bf16.msra.mxu1 %v20845_v32 }
0x1b71   : > { %21251 = vmatprep.subr.bf16.mxu0 %v21906_v33  ;;  %21273 = vmatprep.subr.bf16.mxu1 %v21907_v24 }
0x1b73   : > { %20847 = vmatmul.mubr.msk.bf16.vlgmr.msra.gmra.mrb[4].mxu0 %vm686_vm1, %v24665_v49  ;;  %20848 = vmatmul.mubr.msk.bf16.vlgmr.msra.gmra.mrb[4].mxu1 %vm686_vm1, %v24665_v49 }
0x1b74   : > { %21252 = vmatpush3.bf16.msra.mxu0 %v21908_v12  ;;  %21274 = vmatpush3.bf16.msra.mxu1 %v21909_v7 }
0x1b75   : > { %21253 = vmatprep.subr.bf16.mxu0 %v21910_v27  ;;  %21275 = vmatprep.subr.bf16.mxu1 %v21911_v30 }
0x1b78   : > { %21254 = vmatpush3.bf16.msra.mxu0 %v21912_v0  ;;  %21276 = vmatpush3.bf16.msra.mxu1 %v21913_v13 }
0x1b79   : > { %21255 = vmatprep.subr.bf16.mxu0 %v21914_v11  ;;  %21277 = vmatprep.subr.bf16.mxu1 %v21915_v4 }
0x1b7c   : > { %21256 = vmatpush3.bf16.msra.mxu0 %v21916_v17  ;;  %21278 = vmatpush3.bf16.msra.mxu1 %v21917_v14 }
0x1b7d   : > { %21257 = vmatprep.subr.bf16.mxu0 %v21918_v35  ;;  %21279 = vmatprep.subr.bf16.mxu1 %v21919_v51 }
0x1b80   : > { %21258 = vmatpush3.bf16.msra.mxu0 %v21920_v41  ;;  %21280 = vmatpush3.bf16.msra.mxu1 %v21921_v37  ;;  %v21940_v41 = vld [vmem:[%s22167_s27] sm:$0xff]  }
0x1b81   : > { %21259 = vmatprep.subr.bf16.mxu0 %v21922_v18  ;;  %21281 = vmatprep.subr.bf16.mxu1 %v21923_v28  ;;  %v21941_v28 = vld [vmem:[%s22167_s27 + $0x80] sm:$0xff]  }
0x1b84   : > { %21260 = vmatpush3.bf16.msra.mxu0 %v21924_v59  ;;  %21282 = vmatpush3.bf16.msra.mxu1 %v21925_v53  ;;  %v21942_v53 = vld [vmem:[%s22167_s27 + $0x48] sm:$0xff]  }
0x1b85   : > { %21261 = vmatprep.subr.bf16.mxu0 %v21926_v55  ;;  %21283 = vmatprep.subr.bf16.mxu1 %v21927_v47  ;;  %v21943_v47 = vld [vmem:[%s22167_s27 + $0xc8] sm:$0xff]  }
0x1b88   : > { %21262 = vmatpush3.bf16.msra.mxu0 %v21928_v21  ;;  %21284 = vmatpush3.bf16.msra.mxu1 %v21929_v43  ;;  %v21944_v43 = vld [vmem:[%s22167_s27 + $0x8] sm:$0xff]  }
0x1b89   : > { %21263 = vmatprep.subr.bf16.mxu0 %v21930_v10  ;;  %21285 = vmatprep.subr.bf16.mxu1 %v21931_v54  ;;  %v21945_v10 = vld [vmem:[%s22167_s27 + $0x88] sm:$0xff]   ;;  %v21946_v54 = vld [vmem:[%s22167_s27 + $0x50] sm:$0xff]  }
0x1b8c   : > { %21264 = vmatpush3.bf16.msra.mxu0 %v21932_v22  ;;  %21286 = vmatpush3.bf16.msra.mxu1 %v21933_v16  ;;  %v21947_v22 = vld [vmem:[%s22167_s27 + $0xd0] sm:$0xff]  }
0x1b8d   : > { %21265 = vmatprep.subr.bf16.mxu0 %v21934_v56  ;;  %21287 = vmatprep.subr.bf16.mxu1 %v21935_v40  ;;  %v21948_v16 = vld [vmem:[%s22167_s27 + $0x10] sm:$0xff]   ;;  %v21950_v40 = vld [vmem:[%s22167_s27 + $0x58] sm:$0xff]  }
0x1b8e   : > { %v21949_v56 = vld [vmem:[%s22167_s27 + $0x90] sm:$0xff]  }
0x1b90   : > { %21266 = vmatpush3.bf16.msra.mxu0 %v21936_v50  ;;  %21288 = vmatpush3.bf16.msra.mxu1 %v21937_v62  ;;  %v21951_v50 = vld [vmem:[%s22167_s27 + $0xd8] sm:$0xff]  }
0x1b91   : > { %21295 = vmatprep.subr.bf16.mxu0 %v21938_v31  ;;  %21317 = vmatprep.subr.bf16.mxu1 %v21939_v34  ;;  %v21952_v62 = vld [vmem:[%s22167_s27 + $0x18] sm:$0xff]   ;;  %v21954_v34 = vld [vmem:[%s22167_s27 + $0x60] sm:$0xff]  }
0x1b92   : > { %v21953_v31 = vld [vmem:[%s22167_s27 + $0x98] sm:$0xff]  }
0x1c36   : > { %v24720_v38 = vpop.f32.mrb[0].mxu0  ;;  %v24722_v25 = vpop.f32.mrb[0].mxu1 }
0x1c37   : > { %v18288_v36 = vpop.f32.mrb[1].mxu0  ;;  %v18329_v46 = vpop.f32.mrb[1].mxu1 }
0x1c38   : > { %v18290_v9 = vpop.f32.mrb[2].mxu0  ;;  %v18331_v1 = vpop.f32.mrb[2].mxu1  ;;  %v18289_v26 = vadd.f32 %v18288_v36, %v18156_v42  ;;  %v18330_v33 = vadd.f32 %v18329_v46, %v18164_v19  ;;  %v21955_v36 = vld [vmem:[%s22167_s27 + $0xe0] sm:$0xff]   ;;  %v21961_v42 = vld [vmem:[%s22167_s27 + $0xa8] sm:$0xff]   ;;  %v18160_v19 = vrot.slane %v24725_v6, %v25154_v39 }
0x1c39   : > { %v18291_v52 = vpop.f32.mrb[3].mxu0  ;;  %v18332_v8 = vpop.f32.mrb[3].mxu1  ;;  %v21956_v46 = vld [vmem:[%s22167_s27 + $0x20] sm:$0xff]   ;;  %v21958_v1 = vld [vmem:[%s22167_s27 + $0x68] sm:$0xff]  }
0x1c3a   : > { %v18335_v17 = vmax.f32 %v18289_v26, 0.0  ;;  %v18337_v35 = vmax.f32 %v18330_v33, 0.0  ;;  %v21957_v9 = vld [vmem:[%s22167_s27 + $0xa0] sm:$0xff]   ;;  %v21959_v52 = vld [vmem:[%s22167_s27 + $0xe8] sm:$0xff]   ;;  %v21966_v26 = vld [vmem:[%s22167_s27 + $0x78] sm:$0xff]  }
0x1c3b   : > { %v21960_v8 = vld [vmem:[%s22167_s27 + $0x28] sm:$0xff]   ;;  %v19158_v6 = vld [vmem:[%s22157_s17 + $0x20] sm:$0xff] }
0x1c3c   : > { %v18339_v55 = vpack.c.bf16 %v18335_v17, %v18335_v17  ;;  %v18341_v21 = vpack.c.bf16 %v18337_v35, %v18337_v35  ;;  %v19159_v33 = vld [vmem:[%s22157_s17 + $0x28] sm:$0xff] }
0x1c46   : > { %v18558_v58 = vpop.f32.mrb[4].mxu0  ;;  %v18599_v63 = vpop.f32.mrb[4].mxu1 }
0x1c47   : > { %v18559_v61 = vadd.f32 %v18558_v58, %v18427_v45  ;;  %v18560_v44 = vpop.f32.mrb[5].mxu0  ;;  %v18600_v20 = vadd.f32 %v18599_v63, %v18435_v23  ;;  %v18601_v32 = vpop.f32.mrb[5].mxu1  ;;  %v21962_v45 = vld [vmem:[%s22167_s27 + $0x70] sm:$0xff]   ;;  %v21967_v63 = vld [vmem:[%s22167_s27 + $0xf8] sm:$0xff]  }
0x1c48   : > { %v18561_v24 = vadd.f32 %v18560_v44, %v18431_v3  ;;  %v18562_v12 = vpop.f32.mrb[6].mxu0  ;;  %v18602_v27 = vadd.f32 %v18601_v32, %v18439_v5  ;;  %v18603_v30 = vpop.f32.mrb[6].mxu1  ;;  %v21963_v23 = vld [vmem:[%s22167_s27 + $0xf0] sm:$0xff]   ;;  %v18287_v5 = vadd.f32 %v24720_v38, %v18152_v48  ;;  %v19160_v44 = vld [vmem:[%s22157_s17 + $0x60] sm:$0xff]  ;;  %v21969_v32 = vld [vmem:[%s22167_s27 + $0xb8] sm:$0xff]  }
0x1c49   : > { %v18606_v7 = vmax.f32 %v18559_v61, 0.0  ;;  %v18563_v0 = vpop.f32.mrb[7].mxu0  ;;  %v18608_v13 = vmax.f32 %v18600_v20, 0.0  ;;  %v18604_v4 = vpop.f32.mrb[7].mxu1  ;;  %v21964_v3 = vld [vmem:[%s22167_s27 + $0x30] sm:$0xff]   ;;  %v18328_v61 = vadd.f32 %v24722_v25, %v18160_v19  ;;  %v19161_v20 = vld [vmem:[%s22157_s17 + $0x68] sm:$0xff]  ;;  %v20914_v12 = vcombine.high %v19158_v6, %v19160_v44 }
0x1c4a   : > { %v18607_v11 = vmax.f32 %v18561_v24, 0.0  ;;  %v18609_v14 = vmax.f32 %v18602_v27, 0.0  ;;  %v21965_v58 = vld [vmem:[%s22167_s27 + $0xb0] sm:$0xff]   ;;  %v21968_v24 = vld [vmem:[%s22167_s27 + $0x38] sm:$0xff]   ;;  %v18334_v38 = vmax.f32 %v18287_v5, 0.0  ;;  %v20916_v25 = vcombine.high %v19159_v33, %v19161_v20  ;;  %v19162_v27 = vld [vmem:[%s22157_s17 + $0xa0] sm:$0xff] }
0x1c4b   : > { %v18610_v37 = vpack.c.bf16 %v18606_v7, %v18606_v7  ;;  %v18612_v59 = vpack.c.bf16 %v18608_v13, %v18608_v13  ;;  %v18336_v7 = vmax.f32 %v18328_v61, 0.0  ;;  %v19164_v30 = vld [vmem:[%s22157_s17 + $0xe0] sm:$0xff]  ;;  %v19163_v0 = vld [vmem:[%s22157_s17 + $0xa8] sm:$0xff]  ;;  %v20915_v17 = vcombine.low %v19159_v33, %v19161_v20  ;;  %v21978_v48 = vld [vmem:[%s22167_s27 + $0x250] sm:$0xff]  }
0x1c4c   : > { %v18611_v51 = vpack.c.bf16 %v18607_v11, %v18607_v11  ;;  %v18613_v18 = vpack.c.bf16 %v18609_v14, %v18609_v14  ;;  %v19165_v13 = vld [vmem:[%s22157_s17 + $0xe8] sm:$0xff]  ;;  %v20913_v11 = vcombine.low %v19158_v6, %v19160_v44  ;;  %v18338_v4 = vpack.c.bf16 %v18334_v38, %v18334_v38  ;;  %v21981_v19 = vld [vmem:[%s22167_s27 + $0x290] sm:$0xff]   ;;  %v21984_v5 = vld [vmem:[%s22167_s27 + $0x218] sm:$0xff]  }
0x1c4d   : > { %v20918_v14 = vcombine.high %v19162_v27, %v19164_v30  ;;  %v18340_v35 = vpack.c.bf16 %v18336_v7, %v18336_v7  ;;  %v21987_v61 = vld [vmem:[%s22167_s27 + $0x2e0] sm:$0xff]   ;;  %v21990_v44 = vld [vmem:[%s22167_s27 + $0x268] sm:$0xff]   ;;  %v21994_v38 = vld [vmem:[%s22167_s27 + $0x270] sm:$0xff]  }
0x1c4e   : > { %18838 = vmatprep.mubr.bf16.mxu0 %v18611_v51  ;;  %18878 = vmatprep.mubr.bf16.mxu1 %v18613_v18  ;;  %v20920_v51 = vcombine.high %v19163_v0, %v19165_v13  ;;  %v19167_v18 = vld [vmem:[%s22157_s17 + $0x128] sm:$0xff]  ;;  %v21989_v6 = vld [vmem:[%s22167_s27 + $0x2a0] sm:$0xff]   ;;  %v21997_v7 = vld [vmem:[%s22167_s27 + $0x2b0] sm:$0xff]  }
0x1c4f   : > { %18839 = vmatmul.mubr.bf16.vlgmr.msra.gmra.mrb[8].mxu0 %v18610_v37  ;;  %18879 = vmatmul.mubr.bf16.vlgmr.msra.gmra.mrb[8].mxu1 %v18612_v59  ;;  %v19168_v37 = vld [vmem:[%s22157_s17 + $0x160] sm:$0xff]  ;;  %v20917_v59 = vcombine.low %v19162_v27, %v19164_v30  ;;  %v21991_v33 = vld [vmem:[%s22167_s27 + $0x2e8] sm:$0xff]   ;;  %v21999_v27 = vld [vmem:[%s22167_s27 + $0x2f8] sm:$0xff]  }
0x1c50   : > { %21296 = vmatpush3.bf16.msra.mxu0 %v21940_v41  ;;  %21318 = vmatpush3.bf16.msra.mxu1 %v21941_v28  ;;  %v19166_v41 = vld [vmem:[%s22157_s17 + $0x120] sm:$0xff]  ;;  %v19169_v28 = vld [vmem:[%s22157_s17 + $0x168] sm:$0xff]  ;;  %v22000_v30 = vld [vmem:[%s22167_s27 + $0x238] sm:$0xff]  }
0x1c51   : > { %19110 = vmatprep.mubr.bf16.mxu0 %v18339_v55  ;;  %19150 = vmatprep.mubr.bf16.mxu1 %v18341_v21  ;;  %v20922_v55 = vcombine.high %v19166_v41, %v19168_v37  ;;  %v19170_v21 = vld [vmem:[%s22157_s17 + $0x1a0] sm:$0xff]  ;;  %v21992_v20 = vld [vmem:[%s22167_s27 + $0x228] sm:$0xff]  }
0x1c52   : > { %21297 = vmatprep.subr.bf16.mxu0 %v21942_v53  ;;  %21319 = vmatprep.subr.bf16.mxu1 %v21943_v47  ;;  %v20919_v53 = vcombine.low %v19163_v0, %v19165_v13  ;;  %v20924_v47 = vcombine.high %v19167_v18, %v19169_v28  ;;  %v22001_v0 = vld [vmem:[%s22167_s27 + $0x2b8] sm:$0xff]   ;;  %v24827_v13 = vld [vmem:[%s22157_s17 + $0x30] sm:$0xff] }
0x1c54   : > { %21298 = vmatpush3.bf16.msra.mxu0 %v21944_v43  ;;  %21320 = vmatpush3.bf16.msra.mxu1 %v21945_v10  ;;  %v19172_v43 = vld [vmem:[%s22157_s17 + $0x1e0] sm:$0xff]  ;;  %v19171_v10 = vld [vmem:[%s22157_s17 + $0x1a8] sm:$0xff] }
0x1c55   : > { %21299 = vmatprep.subr.bf16.mxu0 %v21946_v54  ;;  %21321 = vmatprep.subr.bf16.mxu1 %v21947_v22  ;;  %v19173_v54 = vld [vmem:[%s22157_s17 + $0x1e8] sm:$0xff]  ;;  %v20921_v22 = vcombine.low %v19166_v41, %v19168_v37 }
0x1c58   : > { %21300 = vmatpush3.bf16.msra.mxu0 %v21948_v16  ;;  %21322 = vmatpush3.bf16.msra.mxu1 %v21949_v56  ;;  %v20923_v16 = vcombine.low %v19167_v18, %v19169_v28  ;;  %v20926_v56 = vcombine.high %v19170_v21, %v19172_v43 }
0x1c59   : > { %21301 = vmatprep.subr.bf16.mxu0 %v21950_v40  ;;  %21323 = vmatprep.subr.bf16.mxu1 %v21951_v50  ;;  %v20928_v40 = vcombine.high %v19171_v10, %v19173_v54  ;;  %v20925_v50 = vcombine.low %v19170_v21, %v19172_v43 }
0x1c5c   : > { %21302 = vmatpush3.bf16.msra.mxu0 %v21952_v62  ;;  %21324 = vmatpush3.bf16.msra.mxu1 %v21953_v31  ;;  %v20927_v62 = vcombine.low %v19171_v10, %v19173_v54  ;;  %v21970_v31 = vld [vmem:[%s22167_s27 + $0x240] sm:$0xff]  }
0x1c5d   : > { %21303 = vmatprep.subr.bf16.mxu0 %v21954_v34  ;;  %21325 = vmatprep.subr.bf16.mxu1 %v21955_v36  ;;  %v21971_v34 = vld [vmem:[%s22167_s27 + $0x2c0] sm:$0xff]  }
0x1c5e   : > { %v21972_v36 = vld [vmem:[%s22167_s27 + $0x200] sm:$0xff]  }
0x1c60   : > { %21304 = vmatpush3.bf16.msra.mxu0 %v21956_v46  ;;  %21326 = vmatpush3.bf16.msra.mxu1 %v21957_v9  ;;  %v21973_v46 = vld [vmem:[%s22167_s27 + $0x280] sm:$0xff]   ;;  %v21974_v9 = vld [vmem:[%s22167_s27 + $0x248] sm:$0xff]  }
0x1c61   : > { %21305 = vmatprep.subr.bf16.mxu0 %v21958_v1  ;;  %21327 = vmatprep.subr.bf16.mxu1 %v21959_v52  ;;  %v21975_v1 = vld [vmem:[%s22167_s27 + $0x2c8] sm:$0xff]  }
0x1c62   : > { %v21976_v52 = vld [vmem:[%s22167_s27 + $0x208] sm:$0xff]  }
0x1c64   : > { %21306 = vmatpush3.bf16.msra.mxu0 %v21960_v8  ;;  %21328 = vmatpush3.bf16.msra.mxu1 %v21961_v42  ;;  %v21977_v8 = vld [vmem:[%s22167_s27 + $0x288] sm:$0xff]   ;;  %v21979_v42 = vld [vmem:[%s22167_s27 + $0x2d0] sm:$0xff]  }
0x1c65   : > { %21307 = vmatprep.subr.bf16.mxu0 %v21962_v45  ;;  %21329 = vmatprep.subr.bf16.mxu1 %v21963_v23  ;;  %v21980_v45 = vld [vmem:[%s22167_s27 + $0x210] sm:$0xff]   ;;  %v21982_v23 = vld [vmem:[%s22167_s27 + $0x258] sm:$0xff]  }
0x1c68   : > { %21308 = vmatpush3.bf16.msra.mxu0 %v21964_v3  ;;  %21330 = vmatpush3.bf16.msra.mxu1 %v21965_v58  ;;  %v21983_v3 = vld [vmem:[%s22167_s27 + $0x2d8] sm:$0xff]  }
0x1c69   : > { %21309 = vmatprep.subr.bf16.mxu0 %v21966_v26  ;;  %21331 = vmatprep.subr.bf16.mxu1 %v21967_v63  ;;  %v21985_v58 = vld [vmem:[%s22167_s27 + $0x298] sm:$0xff]   ;;  %v21986_v26 = vld [vmem:[%s22167_s27 + $0x260] sm:$0xff]  }
0x1c6a   : > { %v21988_v63 = vld [vmem:[%s22167_s27 + $0x220] sm:$0xff]  }
0x1c6c   : > { %21310 = vmatpush3.bf16.msra.mxu0 %v21968_v24  ;;  %21332 = vmatpush3.bf16.msra.mxu1 %v21969_v32  ;;  %v21993_v24 = vld [vmem:[%s22167_s27 + $0x2a8] sm:$0xff]   ;;  %v21995_v32 = vld [vmem:[%s22167_s27 + $0x2f0] sm:$0xff]  }
0x1c6d   : > { %19340 = vmatprep.subr.bf16.mxu0 %v20914_v12  ;;  %19381 = vmatprep.subr.bf16.mxu1 %v20916_v25  ;;  %v21996_v12 = vld [vmem:[%s22167_s27 + $0x230] sm:$0xff]   ;;  %v21998_v25 = vld [vmem:[%s22167_s27 + $0x278] sm:$0xff]  }
0x1c6f   : > { %19111 = vmatmul.mubr.bf16.vlgmr.msra.gmra.mrb[12].mxu0 %v18338_v4  ;;  %19151 = vmatmul.mubr.bf16.vlgmr.msra.gmra.mrb[12].mxu1 %v18340_v35  ;;  %v24833_v4 = vld [vmem:[%s22157_s17 + $0x38] sm:$0xff] }
0x1c70   : > { %19341 = vmatpush1.bf16.msra.mxu0 %v20913_v11  ;;  %19382 = vmatpush1.bf16.msra.mxu1 %v20915_v17  ;;  %v24830_v11 = vld [vmem:[%s22157_s17 + $0x70] sm:$0xff] }
0x1c71   : > { %19342 = vmatprep.subr.bf16.mxu0 %v20918_v14  ;;  %19383 = vmatprep.subr.bf16.mxu1 %v20920_v51  ;;  %v20964_v17 = vcombine.high %v24827_v13, %v24830_v11  ;;  %v24838_v14 = vld [vmem:[%s22157_s17 + $0x78] sm:$0xff]  ;;  %v20963_v35 = vcombine.low %v24827_v13, %v24830_v11 }
0x1c72   : > { %19372 = vmatprep.mubr.bf16.mxu0 %v22060_v60  ;;  %19413 = vmatprep.mubr.bf16.mxu1 %v22060_v60  ;;  %v20965_v51 = vcombine.low %v24833_v4, %v24838_v14  ;;  %v20966_v41 = vcombine.high %v24833_v4, %v24838_v14 }
0x1c74   : > { %19343 = vmatpush1.bf16.msra.mxu0 %v20917_v59  ;;  %19384 = vmatpush1.bf16.msra.mxu1 %v20919_v53 }
0x1c75   : > { %19344 = vmatprep.subr.bf16.mxu0 %v20922_v55  ;;  %19385 = vmatprep.subr.bf16.mxu1 %v20924_v47 }
0x1c78   : > { %19345 = vmatpush1.bf16.msra.mxu0 %v20921_v22  ;;  %19386 = vmatpush1.bf16.msra.mxu1 %v20923_v16 }
0x1c79   : > { %19346 = vmatprep.subr.bf16.mxu0 %v20926_v56  ;;  %19387 = vmatprep.subr.bf16.mxu1 %v20928_v40 }
0x1c7c   : > { %19347 = vmatpush1.bf16.msra.mxu0 %v20925_v50  ;;  %19388 = vmatpush1.bf16.msra.mxu1 %v20927_v62 }
0x1c7d   : > { %21339 = vmatprep.subr.bf16.mxu0 %v21970_v31  ;;  %21361 = vmatprep.subr.bf16.mxu1 %v21971_v34 }
0x1c7f   : > { %20929 = vmatmul.mubr.msk.bf16.vlgmr.msra.gmra.mrb[16].mxu0 %vm686_vm1, %v24665_v49  ;;  %20930 = vmatmul.mubr.msk.bf16.vlgmr.msra.gmra.mrb[16].mxu1 %vm686_vm1, %v24665_v49 }
0x1c80   : > { %21340 = vmatpush3.bf16.msra.mxu0 %v21972_v36  ;;  %21362 = vmatpush3.bf16.msra.mxu1 %v21973_v46 }
0x1c81   : > { %21341 = vmatprep.subr.bf16.mxu0 %v21974_v9  ;;  %21363 = vmatprep.subr.bf16.mxu1 %v21975_v1 }
0x1c84   : > { %21342 = vmatpush3.bf16.msra.mxu0 %v21976_v52  ;;  %21364 = vmatpush3.bf16.msra.mxu1 %v21977_v8  ;;  %v19174_v52 = vld [vmem:[%s22162_s23 + $0x8] sm:$0xf] }
0x1c85   : > { %21343 = vmatprep.subr.bf16.mxu0 %v21978_v48  ;;  %21365 = vmatprep.subr.bf16.mxu1 %v21979_v42  ;;  %v19243_v8 = vrot.slane %v19174_v52, %v25153_v15  ;;  %v19251_v48 = vrot.slane %v19174_v52, %v25154_v39  ;;  %v19247_v42 = vrot.slane %v19174_v52, %v25152_v57 }
0x1c88   : > { %21344 = vmatpush3.bf16.msra.mxu0 %v21980_v45  ;;  %21366 = vmatpush3.bf16.msra.mxu1 %v21981_v19  ;;  %v19255_v45 = vrot.slane %v19174_v52, %v23770_v2  ;;  %v22010_v52 = vld [vmem:[%s22167_s27 + $0x350] sm:$0xff]  }
0x1c89   : > { %21345 = vmatprep.subr.bf16.mxu0 %v21982_v23  ;;  %21367 = vmatprep.subr.bf16.mxu1 %v21983_v3 }
0x1c8c   : > { %21346 = vmatpush3.bf16.msra.mxu0 %v21984_v5  ;;  %21368 = vmatpush3.bf16.msra.mxu1 %v21985_v58 }
0x1c8d   : > { %21347 = vmatprep.subr.bf16.mxu0 %v21986_v26  ;;  %21369 = vmatprep.subr.bf16.mxu1 %v21987_v61 }
0x1c90   : > { %21348 = vmatpush3.bf16.msra.mxu0 %v21988_v63  ;;  %21370 = vmatpush3.bf16.msra.mxu1 %v21989_v6 }
0x1c91   : > { %21349 = vmatprep.subr.bf16.mxu0 %v21990_v44  ;;  %21371 = vmatprep.subr.bf16.mxu1 %v21991_v33 }
0x1c94   : > { %21350 = vmatpush3.bf16.msra.mxu0 %v21992_v20  ;;  %21372 = vmatpush3.bf16.msra.mxu1 %v21993_v24 }
0x1c95   : > { %21351 = vmatprep.subr.bf16.mxu0 %v21994_v38  ;;  %21373 = vmatprep.subr.bf16.mxu1 %v21995_v32 }
0x1c98   : > { %21352 = vmatpush3.bf16.msra.mxu0 %v21996_v12  ;;  %21374 = vmatpush3.bf16.msra.mxu1 %v21997_v7  ;;  %v19707_v12 = vld [vmem:[%s22157_s17 + $0xb0] sm:$0xff] }
0x1c99   : > { %21353 = vmatprep.subr.bf16.mxu0 %v21998_v25  ;;  %21375 = vmatprep.subr.bf16.mxu1 %v21999_v27  ;;  %v19709_v7 = vld [vmem:[%s22157_s17 + $0xf0] sm:$0xff]  ;;  %v19708_v27 = vld [vmem:[%s22157_s17 + $0xb8] sm:$0xff] }
0x1c9c   : > { %21354 = vmatpush3.bf16.msra.mxu0 %v22000_v30  ;;  %21376 = vmatpush3.bf16.msra.mxu1 %v22001_v0  ;;  %v19710_v30 = vld [vmem:[%s22157_s17 + $0xf8] sm:$0xff] }
0x1c9d   : > { %19885 = vmatprep.subr.bf16.mxu0 %v20964_v17  ;;  %19926 = vmatprep.subr.bf16.mxu1 %v20966_v41 }
0x1d22   : > { %v21267_v37 = vpop.f32.mrb[8].mxu0  ;;  %v21289_v18 = vpop.f32.mrb[8].mxu1 }
0x1d23   : > { %v21268_v28 = vpop.f32.mrb[9].mxu0  ;;  %v21290_v53 = vpop.f32.mrb[9].mxu1 }
0x1d24   : > { %v21269_v59 = vadd.f32 %v21268_v28, %v21267_v37  ;;  %v21270_v55 = vpop.f32.mrb[10].mxu0  ;;  %v21291_v47 = vadd.f32 %v21290_v53, %v21289_v18  ;;  %v21292_v21 = vpop.f32.mrb[10].mxu1  ;;  %v20968_v37 = vcombine.high %v19707_v12, %v19709_v7  ;;  %v20970_v28 = vcombine.high %v19708_v27, %v19710_v30  ;;  %v19713_v53 = vld [vmem:[%s22157_s17 + $0x170] sm:$0xff] }
0x1d25   : > { %v21271_v43 = vpop.f32.mrb[11].mxu0  ;;  %v21293_v10 = vpop.f32.mrb[11].mxu1  ;;  %v19712_v55 = vld [vmem:[%s22157_s17 + $0x138] sm:$0xff]  ;;  %v20967_v21 = vcombine.low %v19707_v12, %v19709_v7 }
0x1d26   : > { %v18881_v54 = vadd.f32 %v21291_v47, %v21269_v59  ;;  %v19711_v59 = vld [vmem:[%s22157_s17 + $0x130] sm:$0xff]  ;;  %v19714_v47 = vld [vmem:[%s22157_s17 + $0x178] sm:$0xff]  ;;  %v20969_v43 = vcombine.low %v19708_v27, %v19710_v30 }
0x1d27   : > { %v20972_v10 = vcombine.high %v19711_v59, %v19713_v53  ;;  %v20971_v13 = vcombine.low %v19711_v59, %v19713_v53  ;;  %v20973_v11 = vcombine.low %v19712_v55, %v19714_v47  ;;  %v22031_v12 = vld [vmem:[%s22167_s27 + $0x3f8] sm:$0xff]  }
0x1d28   : > { %v22032_v7 = vld [vmem:[%s22167_s27 + $0x338] sm:$0xff]  }
0x1d42   : > { %v21311_v22 = vpop.f32.mrb[12].mxu0  ;;  %v21333_v16 = vpop.f32.mrb[12].mxu1 }
0x1d43   : > { %v21312_v56 = vpop.f32.mrb[13].mxu0  ;;  %v21334_v50 = vpop.f32.mrb[13].mxu1 }
0x1d44   : > { %v21313_v40 = vadd.f32 %v21312_v56, %v21311_v22  ;;  %v21314_v62 = vpop.f32.mrb[14].mxu0  ;;  %v21335_v31 = vadd.f32 %v21334_v50, %v21333_v16  ;;  %v21336_v34 = vpop.f32.mrb[14].mxu1  ;;  %v19715_v22 = vld [vmem:[%s22157_s17 + $0x1b0] sm:$0xff]  ;;  %v19716_v56 = vld [vmem:[%s22157_s17 + $0x1b8] sm:$0xff]  ;;  %v22003_v50 = vld [vmem:[%s22167_s27 + $0x3c0] sm:$0xff]  }
0x1d45   : > { %v21315_v36 = vpop.f32.mrb[15].mxu0  ;;  %v21337_v9 = vpop.f32.mrb[15].mxu1  ;;  %v19717_v16 = vld [vmem:[%s22157_s17 + $0x1f0] sm:$0xff]  ;;  %v22004_v62 = vld [vmem:[%s22167_s27 + $0x300] sm:$0xff]   ;;  %v22006_v34 = vld [vmem:[%s22167_s27 + $0x348] sm:$0xff]  }
0x1d46   : > { %v19113_v46 = vadd.f32 %v21313_v40, %v18881_v54  ;;  %v20974_v54 = vcombine.high %v19712_v55, %v19714_v47  ;;  %v19718_v40 = vld [vmem:[%s22157_s17 + $0x1f8] sm:$0xff]  ;;  %v20976_v4 = vcombine.high %v19715_v22, %v19717_v16  ;;  %v22007_v36 = vld [vmem:[%s22167_s27 + $0x3c8] sm:$0xff]  }
0x1d47   : > { %v20978_v14 = vcombine.high %v19716_v56, %v19718_v40  ;;  %v22009_v9 = vld [vmem:[%s22167_s27 + $0x388] sm:$0xff]  }
0x1d48   : > { %v24846_v1 = vadd.f32 %v21335_v31, %v19113_v46  ;;  %v22005_v31 = vld [vmem:[%s22167_s27 + $0x380] sm:$0xff]   ;;  %v22008_v46 = vld [vmem:[%s22167_s27 + $0x308] sm:$0xff]  }
0x1d52   : > { %v19374_v19 = vpop.f32.mrb[16].mxu0  ;;  %v19415_v3 = vpop.f32.mrb[16].mxu1 }
0x1d53   : > { %v19375_v23 = vadd.f32 %v19374_v19, %v19243_v8  ;;  %v19376_v5 = vpop.f32.mrb[17].mxu0  ;;  %v19416_v58 = vadd.f32 %v19415_v3, %v19251_v48  ;;  %v19417_v61 = vpop.f32.mrb[17].mxu1  ;;  %v22011_v8 = vld [vmem:[%s22167_s27 + $0x3d0] sm:$0xff]   ;;  %v22016_v19 = vld [vmem:[%s22167_s27 + $0x318] sm:$0xff]   ;;  %v22018_v3 = vld [vmem:[%s22167_s27 + $0x360] sm:$0xff]  }
0x1d54   : > { %v19377_v26 = vadd.f32 %v19376_v5, %v19247_v42  ;;  %v19378_v63 = vpop.f32.mrb[18].mxu0  ;;  %v19418_v44 = vadd.f32 %v19417_v61, %v19255_v45  ;;  %v19419_v33 = vpop.f32.mrb[18].mxu1  ;;  %v22012_v48 = vld [vmem:[%s22167_s27 + $0x310] sm:$0xff]   ;;  %v22015_v45 = vld [vmem:[%s22167_s27 + $0x3d8] sm:$0xff]   ;;  %v22019_v5 = vld [vmem:[%s22167_s27 + $0x3e0] sm:$0xff]  }
0x1d55   : > { %v19422_v6 = vmax.f32 %v19375_v23, 0.0  ;;  %v19379_v20 = vpop.f32.mrb[19].mxu0  ;;  %v19424_v24 = vmax.f32 %v19416_v58, 0.0  ;;  %v19420_v32 = vpop.f32.mrb[19].mxu1  ;;  %v22013_v42 = vld [vmem:[%s22167_s27 + $0x390] sm:$0xff]   ;;  %v22017_v23 = vld [vmem:[%s22167_s27 + $0x398] sm:$0xff]  }
0x1d56   : > { %v19423_v38 = vmax.f32 %v19377_v26, 0.0  ;;  %v19425_v25 = vmax.f32 %v19418_v44, 0.0  ;;  %v22020_v58 = vld [vmem:[%s22167_s27 + $0x320] sm:$0xff]   ;;  %v22022_v61 = vld [vmem:[%s22167_s27 + $0x368] sm:$0xff]   ;;  %v22026_v33 = vld [vmem:[%s22167_s27 + $0x370] sm:$0xff]  }
0x1d57   : > { %v19426_v17 = vpack.c.bf16 %v19422_v6, %v19422_v6  ;;  %v19428_v18 = vpack.c.bf16 %v19424_v24, %v19424_v24  ;;  %v22021_v26 = vld [vmem:[%s22167_s27 + $0x3a0] sm:$0xff]   ;;  %v22023_v63 = vld [vmem:[%s22167_s27 + $0x3e8] sm:$0xff]   ;;  %v22027_v20 = vld [vmem:[%s22167_s27 + $0x3f0] sm:$0xff]  }
0x1d58   : > { %v19427_v0 = vpack.c.bf16 %v19423_v38, %v19423_v38  ;;  %v19429_v41 = vpack.c.bf16 %v19425_v25, %v19425_v25  ;;  %v22024_v6 = vld [vmem:[%s22167_s27 + $0x328] sm:$0xff]   ;;  %v22028_v24 = vld [vmem:[%s22167_s27 + $0x330] sm:$0xff]   ;;  %v22030_v32 = vld [vmem:[%s22167_s27 + $0x378] sm:$0xff]  }
0x1d59   : > { %v22025_v44 = vld [vmem:[%s22167_s27 + $0x3a8] sm:$0xff]   ;;  %v22029_v38 = vld [vmem:[%s22167_s27 + $0x3b0] sm:$0xff]   ;;  %v22033_v25 = vld [vmem:[%s22167_s27 + $0x3b8] sm:$0xff]  }
0x1d5a   : > { %19654 = vmatprep.mubr.bf16.mxu0 %v19427_v0  ;;  %19694 = vmatprep.mubr.bf16.mxu1 %v19429_v41 }
0x1d5b   : > { %19655 = vmatmul.mubr.bf16.vlgmr.msra.gmra.mrb[20].mxu0 %v19426_v17  ;;  %19695 = vmatmul.mubr.bf16.vlgmr.msra.gmra.mrb[20].mxu1 %v19428_v18 }
0x1d5c   : > { %19886 = vmatpush1.bf16.msra.mxu0 %v20963_v35  ;;  %19927 = vmatpush1.bf16.msra.mxu1 %v20965_v51  ;;  %v20975_v35 = vcombine.low %v19715_v22, %v19717_v16  ;;  %v20977_v51 = vcombine.low %v19716_v56, %v19718_v40 }
0x1d5d   : > { %19887 = vmatprep.subr.bf16.mxu0 %v20968_v37  ;;  %19928 = vmatprep.subr.bf16.mxu1 %v20970_v28 }
0x1d5e   : > { %19917 = vmatprep.mubr.bf16.mxu0 %v22060_v60  ;;  %19958 = vmatprep.mubr.bf16.mxu1 %v22060_v60  ;;  %v22002_v60 = vld [vmem:[%s22167_s27 + $0x340] sm:$0xff]  }
0x1d60   : > { %19888 = vmatpush1.bf16.msra.mxu0 %v20967_v21  ;;  %19929 = vmatpush1.bf16.msra.mxu1 %v20969_v43  ;;  %v19719_v21 = vld [vmem:[%s22162_s23 + $0xc] sm:$0xf] }
0x1d61   : > { %19889 = vmatprep.subr.bf16.mxu0 %v20972_v10  ;;  %19930 = vmatprep.subr.bf16.mxu1 %v20974_v54  ;;  %v19788_v43 = vrot.slane %v19719_v21, %v25153_v15  ;;  %v19796_v10 = vrot.slane %v19719_v21, %v25154_v39  ;;  %v19792_v54 = vrot.slane %v19719_v21, %v25152_v57 }
0x1d62   : > { %v19800_v22 = vrot.slane %v19719_v21, %v23770_v2 }
0x1d64   : > { %19890 = vmatpush1.bf16.msra.mxu0 %v20971_v13  ;;  %19931 = vmatpush1.bf16.msra.mxu1 %v20973_v11 }
0x1d65   : > { %19891 = vmatprep.subr.bf16.mxu0 %v20976_v4  ;;  %19932 = vmatprep.subr.bf16.mxu1 %v20978_v14 }
0x1d68   : > { %19892 = vmatpush1.bf16.msra.mxu0 %v20975_v35  ;;  %19933 = vmatpush1.bf16.msra.mxu1 %v20977_v51 }
0x1d69   : > { %21383 = vmatprep.subr.bf16.mxu0 %v22002_v60  ;;  %21405 = vmatprep.subr.bf16.mxu1 %v22003_v50 }
0x1d6b   : > { %20979 = vmatmul.mubr.msk.bf16.vlgmr.msra.gmra.mrb[24].mxu0 %vm686_vm1, %v24665_v49  ;;  %20980 = vmatmul.mubr.msk.bf16.vlgmr.msra.gmra.mrb[24].mxu1 %vm686_vm1, %v24665_v49  ;;  %v22014_v49 = vld [vmem:[%s22167_s27 + $0x358] sm:$0xff]  }
0x1d6c   : > { %21384 = vmatpush3.bf16.msra.mxu0 %v22004_v62  ;;  %21406 = vmatpush3.bf16.msra.mxu1 %v22005_v31 }
0x1d6d   : > { %21385 = vmatprep.subr.bf16.mxu0 %v22006_v34  ;;  %21407 = vmatprep.subr.bf16.mxu1 %v22007_v36 }
0x1d70   : > { %21386 = vmatpush3.bf16.msra.mxu0 %v22008_v46  ;;  %21408 = vmatpush3.bf16.msra.mxu1 %v22009_v9 }
0x1d71   : > { %21387 = vmatprep.subr.bf16.mxu0 %v22010_v52  ;;  %21409 = vmatprep.subr.bf16.mxu1 %v22011_v8 }
0x1d74   : > { %21388 = vmatpush3.bf16.msra.mxu0 %v22012_v48  ;;  %21410 = vmatpush3.bf16.msra.mxu1 %v22013_v42  ;;  %v25155_v48 = vld [vmem:[#allocation5_spill] sm:$0xff] }
0x1d75   : > { %21389 = vmatprep.subr.bf16.mxu0 %v22014_v49  ;;  %21411 = vmatprep.subr.bf16.mxu1 %v22015_v45  ;;  %v20250_v42 = vsub.s32 6, %v25155_v48 }
0x1d78   : > { %21390 = vmatpush3.bf16.msra.mxu0 %v22016_v19  ;;  %21412 = vmatpush3.bf16.msra.mxu1 %v22017_v23 }
0x1d79   : > { %21391 = vmatprep.subr.bf16.mxu0 %v22018_v3  ;;  %21413 = vmatprep.subr.bf16.mxu1 %v22019_v5 }
0x1d7c   : > { %21392 = vmatpush3.bf16.msra.mxu0 %v22020_v58  ;;  %21414 = vmatpush3.bf16.msra.mxu1 %v22021_v26 }
0x1d7d   : > { %21393 = vmatprep.subr.bf16.mxu0 %v22022_v61  ;;  %21415 = vmatprep.subr.bf16.mxu1 %v22023_v63  ;;  %v25156_v61 = vld [vmem:[#allocation7_spill] sm:$0xff] }
0x1d7e   : > { %v20251_v63 = vrot.slane %v25156_v61, %v20250_v42 }
0x1d80   : > { %21394 = vmatpush3.bf16.msra.mxu0 %v22024_v6  ;;  %21416 = vmatpush3.bf16.msra.mxu1 %v22025_v44 }
0x1d81   : > { %21395 = vmatprep.subr.bf16.mxu0 %v22026_v33  ;;  %21417 = vmatprep.subr.bf16.mxu1 %v22027_v20 }
0x1d84   : > { %21396 = vmatpush3.bf16.msra.mxu0 %v22028_v24  ;;  %21418 = vmatpush3.bf16.msra.mxu1 %v22029_v38 }
0x1d85   : > { %21397 = vmatprep.subr.bf16.mxu0 %v22030_v32  ;;  %21419 = vmatprep.subr.bf16.mxu1 %v22031_v12 }
0x1d88   : > { %21398 = vmatpush3.bf16.msra.mxu0 %v22032_v7  ;;  %21420 = vmatpush3.bf16.msra.mxu1 %v22033_v25  ;;  %v20277_v25 = vld [vmem:[%s24964_s9] sm:$0xff] }
0x1e2e   : > { %v21355_v27 = vpop.f32.mrb[20].mxu0  ;;  %v21377_v30 = vpop.f32.mrb[20].mxu1 }
0x1e2f   : > { %v21356_v0 = vpop.f32.mrb[21].mxu0  ;;  %v21378_v41 = vpop.f32.mrb[21].mxu1 }
0x1e30   : > { %v21357_v17 = vadd.f32 %v21356_v0, %v21355_v27  ;;  %v21358_v37 = vpop.f32.mrb[22].mxu0  ;;  %v21379_v18 = vadd.f32 %v21378_v41, %v21377_v30  ;;  %v21380_v28 = vpop.f32.mrb[22].mxu1  ;;  %v20278_v27 = vld [vmem:[%s24964_s9 + $0x8] sm:$0xff]  ;;  %v20280_v0 = vld [vmem:[%s24964_s9 + $0x18] sm:$0xff]  ;;  %v22063_v41 = vmov 0.0  }
0x1e31   : > { %v21359_v59 = vpop.f32.mrb[23].mxu0  ;;  %v21381_v53 = vpop.f32.mrb[23].mxu1  ;;  %v21588_v30 = vpack.c.bf16 %v20278_v27, %v20277_v25  ;;  %v20282_v28 = vld [vmem:[%s24964_s9 + $0x28] sm:$0xff] }
0x1e32   : > { %v19697_v55 = vadd.f32 %v21379_v18, %v21357_v17  ;;  %v22061_v17 = vmov 0.0|0.0   ;;  %v20281_v18 = vld [vmem:[%s24964_s9 + $0x20] sm:$0xff]  ;;  %v20283_v53 = vld [vmem:[%s24964_s9 + $0x30] sm:$0xff] }
0x1e33   : > { %21587 = vmatprep.subr.bf16.mxu0 %v22061_v17  ;;  %v21594_v59 = vpack.c.bf16 %v20282_v28, %v20281_v18 }
0x1e34   : > { %v19702_v47 = vadd.f32 %v19697_v55, %v24846_v1  ;;  %v20284_v55 = vld [vmem:[%s24964_s9 + $0x38] sm:$0xff] }
0x1e3e   : > { %v19919_v16 = vpop.f32.mrb[24].mxu0  ;;  %v19960_v40 = vpop.f32.mrb[24].mxu1 }
0x1e3f   : > { %v19920_v56 = vadd.f32 %v19919_v16, %v19788_v43  ;;  %v19921_v13 = vpop.f32.mrb[25].mxu0  ;;  %v19961_v11 = vadd.f32 %v19960_v40, %v19796_v10  ;;  %v19962_v14 = vpop.f32.mrb[25].mxu1  ;;  %v25157_v40 = vld [vmem:[#allocation4_spill] sm:$0xff] }
0x1e40   : > { %v19922_v4 = vadd.f32 %v19921_v13, %v19792_v54  ;;  %v19923_v35 = vpop.f32.mrb[26].mxu0  ;;  %v19963_v60 = vadd.f32 %v19962_v14, %v19800_v22  ;;  %v19964_v1 = vpop.f32.mrb[26].mxu1  ;;  %v20269_v54 = vsub.s32 7, %v25155_v48  ;;  %v20275_v13 = vrot.slane %v25157_v40, %v25153_v15  ;;  %v21013_v14 = vld [vmem:[#allocation3] ss:$0 sm:$0xff] }
0x1e41   : > { %v19967_v51 = vmax.f32 %v19920_v56, 0.0  ;;  %v19924_v50 = vpop.f32.mrb[27].mxu0  ;;  %v19969_v62 = vmax.f32 %v19961_v11, 0.0  ;;  %v19965_v34 = vpop.f32.mrb[27].mxu1 }
0x1e42   : > { %v19968_v31 = vmax.f32 %v19922_v4, 0.0  ;;  %v19970_v39 = vmax.f32 %v19963_v60, 0.0  ;;  %v20270_v22 = vrot.slane %v25156_v61, %v20269_v54 }
0x1e43   : > { %v19971_v57 = vpack.c.bf16 %v19967_v51, %v19967_v51  ;;  %v19973_v2 = vpack.c.bf16 %v19969_v62, %v19969_v62 }
0x1e44   : > { %v19972_v36 = vpack.c.bf16 %v19968_v31, %v19968_v31  ;;  %v19974_v46 = vpack.c.bf16 %v19970_v39, %v19970_v39 }
0x1e46   : > { %20199 = vmatprep.mubr.bf16.mxu0 %v19972_v36  ;;  %20239 = vmatprep.mubr.bf16.mxu1 %v19974_v46 }
0x1e47   : > { %20200 = vmatmul.mubr.bf16.vlgmr.msra.gmra.mrb[28].mxu0 %v19971_v57  ;;  %20240 = vmatmul.mubr.bf16.vlgmr.msra.gmra.mrb[28].mxu1 %v19973_v2 }
0x1e48   : > { %21560 = vmatprep.mubr.msk.f32.mxu0 %vm22062_vm8, %v22063_v41  ;;  %21589 = vmatpush3.bf16.msra.mxu0 %v21588_v30 }
0x1e49   : > { %21590 = vmatprep.subr.bf16.mxu0 %v22061_v17 }
0x1f1a   : > { %v21399_v9 = vpop.f32.mrb[28].mxu0  ;;  %v21421_v52 = vpop.f32.mrb[28].mxu1 }
0x1f1b   : > { %v21400_v8 = vpop.f32.mrb[29].mxu0  ;;  %v21422_v45 = vpop.f32.mrb[29].mxu1 }
0x1f1c   : > { %v21401_v49 = vadd.f32 %v21400_v8, %v21399_v9  ;;  %v21402_v19 = vpop.f32.mrb[30].mxu0  ;;  %v21423_v23 = vadd.f32 %v21422_v45, %v21421_v52  ;;  %v21424_v3 = vpop.f32.mrb[30].mxu1 }
0x1f1d   : > { %v21403_v5 = vpop.f32.mrb[31].mxu0  ;;  %v21425_v58 = vpop.f32.mrb[31].mxu1 }
0x1f1e   : > { %v20242_v26 = vadd.f32 %v21423_v23, %v21401_v49 }
0x1f20   : > { %v20247_v6 = vadd.f32 %v20242_v26, %v19702_v47  ;;  %v21597_v47 = vpack.c.bf16 %v20284_v55, %v20283_v53 }
0x1f22   : > { %v20252_v44 = vadd.f32 %v20251_v63, %v20247_v6 }
0x1f24   : > { %v20253_v33 = vadd.f32 %v20252_v44, %v25151_v29  ;;  %v20279_v29 = vld [vmem:[%s24964_s9 + $0x10] sm:$0xff] }
0x1f25   : > { %v21591_v37 = vpack.c.bf16 %v20280_v0, %v20279_v29 }
0x1f26   : > { %v20254_v20 = vsel %vm12840_vm7, %v20253_v33, 0.0 }
0x1f27   : > { %20255 = vadd.xlane.f32.xlu0 %v20254_v20  ;;  %21592 = vmatpush3.bf16.msra.mxu0 %v21591_v37 }
0x1f28   : > { %21593 = vmatprep.subr.bf16.mxu0 %v22061_v17 }
0x1f2b   : > { %21595 = vmatpush3.bf16.msra.mxu0 %v21594_v59 }
0x1f2c   : > { %21596 = vmatprep.subr.bf16.mxu0 %v22061_v17 }
0x1f2f   : > { %21598 = vmatpush3.bf16.msra.mxu0 %v21597_v47 }
0x1fb4   : > { %v20256_v24 = vpop.xlane.xlu0 %20255 }
0x1fb5   : > { %v20257_v38 = vmul.f32 0.015625, %v20256_v24 }
0x1fb7   : > { %v20258_v32 = vsub.f32 %v20253_v33, %v20257_v38 }
0x1fb9   : > { %v20259_v12 = vmul.f32 %v20258_v32, %v20258_v32 }
0x1fbb   : > { %v20260_v7 = vsel %vm12840_vm7, %v20259_v12, 0.0 }
0x1fbc   : > { %20261 = vadd.xlane.f32.xlu0 %v20260_v7 }
0x2049   : > { %v20262_v21 = vpop.xlane.xlu0 %20261 }
0x204a   : > { %v20263_v43 = vmul.f32 0.015625, %v20262_v21 }
0x204c   : > { %v20264_v10 = vadd.f32 1e-05, %v20263_v43 }
0x204e   : > { %22034 = vrsqrt.f32 %v20264_v10 }
0x2058   : > { %v22035_v16 = vpop.eup %22034 }
0x2059   : > { %v20266_v56 = vmul.f32 %v22035_v16, %v20258_v32 }
0x205b   : > { %v20271_v11 = vmul.f32 %v20270_v22, %v20266_v56 }
0x205d   : > { %v20276_v4 = vadd.f32 %v20275_v13, %v20271_v11 }
0x205f   : > { %21561 = vmatmul.mubr.msk.f32.vlgmr.msra.gmra.mrb[32].mxu0 %vm686_vm1, %v20276_v4 }
0x2132   : > { %v20361_v35 = vpop.f32.mrb[32].mxu0 }
0x2133   : > { %v20362_v51 = vadd.f32 %v21013_v14, %v20361_v35  ;;  %v21562_v60 = vpop.f32.mrb[33].mxu0 }
0x2135   : > { %20366 = vst.msk [vmem:[%s24966_s11] sm:$0x3] %vm20365_vm9, %v20362_v51 }
0x2136 PF: > { %s23_s19 = sadd.s32 1, %s22042_s19  }
0x2137   : > { %p20_p7 = scmp.ge.s32.totalorder %s23_s19, 4  }
0x2139   :  { %22 = sbr.rel (!%p20_p7) target bundleno = 3 (0x3), region = 117 }

</bundles_post_ra>
